<compile_context>
chip_gen: v7x
topology: tpu7x:2x2x1
jax: 0.10.0
libtpu: 0.0.40
codegen_flags: <defaults>
</compile_context>

<pallas_src>
import functools

import jax
import jax.numpy as jnp
import numpy as np
from jax import lax
from jax.experimental import pallas as pl
from jax.experimental.pallas import tpu as pltpu

EPS = 1e-5
LANE = 128


def _round_up(x, m):
    return (x + m - 1) // m * m


def _mosaic_params(step_bytes):
    # Scoped-VMEM budget from the per-grid-step working set; cap at 64 MiB
    # (v7x physical per TensorCore), floor at 32 MiB.
    limit = int(min(64 * 1024 * 1024, max(32 * 1024 * 1024, 3 * step_bytes)))
    return pltpu.CompilerParams(dimension_semantics=("parallel",),
                                vmem_limit_bytes=limit)


# ----------------------------------------------------------------------------
# 3x3 stride-1 conv kernel, per-sample, no HBM im2col.
# Optionally fuses the PREVIOUS layer's BN + ReLU onto its input tile
# (halo re-zeroed in-kernel).  Emits BN partial stats for the CURRENT conv.
# ----------------------------------------------------------------------------
def _make_conv3x3_kernel(Ho, Wo, pre_bn_relu):
    def kernel(*refs):
        if pre_bn_relu:
            x_ref, s_ref, b_ref, w_ref, conv_ref, stats_ref, act_ref = refs
        else:
            x_ref, w_ref, conv_ref, stats_ref = refs
        Hp, Wp, Cin = x_ref.shape
        Cpad = conv_ref.shape[-1]

        if pre_bn_relu:
            # act = relu(raw_prev_conv * scale + shift), halo forced back to 0.
            xin = x_ref[...].astype(jnp.float32)
            act = (xin * s_ref[...].reshape(1, 1, Cin)
                   + b_ref[...].reshape(1, 1, Cin))
            act = jnp.maximum(act, 0.0)
            hh = lax.broadcasted_iota(jnp.int32, (Hp, Wp, Cin), 0)
            ww = lax.broadcasted_iota(jnp.int32, (Hp, Wp, Cin), 1)
            interior = (hh >= 1) & (hh <= Ho) & (ww >= 1) & (ww <= Wo)
            act_ref[...] = jnp.where(interior, act, 0.0).astype(act_ref.dtype)
            src = act_ref
        else:
            src = x_ref

        acc = jnp.zeros((Ho * Wo, Cpad), jnp.float32)
        for kh in range(3):
            for kw in range(3):
                win = src[pl.ds(kh, Ho), pl.ds(kw, Wo), :]       # (Ho, Wo, Cin)
                acc = acc + jnp.dot(win.reshape(Ho * Wo, Cin),
                                    w_ref[kh * 3 + kw],
                                    preferred_element_type=jnp.float32)
        conv_ref[...] = acc.astype(conv_ref.dtype)
        psum = jnp.sum(acc, axis=0, keepdims=True)               # (1, Cpad)
        psq = jnp.sum(acc * acc, axis=0, keepdims=True)          # (1, Cpad)
        stats_ref[...] = jnp.concatenate(
            [psum, psq, jnp.zeros((6, Cpad), jnp.float32)], axis=0)
    return kernel


def _conv3x3_s1(x_bf16, w_taps, scale=None, shift=None):
    """x: (N,H,W,Cin) bf16, w_taps: (9,Cin,Cpad) bf16.
    If scale/shift are given, applies relu(x*scale+shift) in-kernel before the
    taps (fusing the previous BN+ReLU epilogue).
    Returns (N*H*W, Cpad) bf16 raw conv rows + (N, 8, Cpad) f32 partial stats."""
    N, H, W, Cin = x_bf16.shape
    Cpad = w_taps.shape[-1]
    Ho, Wo = H, W
    Hp, Wp = H + 2, W + 2
    xp = jnp.pad(x_bf16, ((0, 0), (1, 1), (1, 1), (0, 0)))
    fused = scale is not None

    in_specs = [pl.BlockSpec((None, Hp, Wp, Cin), lambda n: (n, 0, 0, 0))]
    args = [xp]
    if fused:
        in_specs += [pl.BlockSpec((1, Cin), lambda n: (0, 0)),
                     pl.BlockSpec((1, Cin), lambda n: (0, 0))]
        args += [scale.reshape(1, Cin).astype(jnp.float32),
                 shift.reshape(1, Cin).astype(jnp.float32)]
    in_specs.append(pl.BlockSpec((9, Cin, Cpad), lambda n: (0, 0, 0)))
    args.append(w_taps)

    scratch = [pltpu.VMEM((Hp, Wp, Cin), jnp.bfloat16)] if fused else []

    step_bytes = (Hp * Wp * Cin * 2 * (2 if fused else 1)
                  + 9 * Cin * Cpad * 2
                  + Ho * Wo * Cpad * (2 + 4) + 8 * Cpad * 4 + 2 * Cin * 4)
    conv, stats = pl.pallas_call(
        _make_conv3x3_kernel(Ho, Wo, fused),
        out_shape=(jax.ShapeDtypeStruct((N * Ho * Wo, Cpad), jnp.bfloat16),
                   jax.ShapeDtypeStruct((N, 8, Cpad), jnp.float32)),
        grid=(N,),
        in_specs=in_specs,
        out_specs=(pl.BlockSpec((Ho * Wo, Cpad), lambda n: (n, 0)),
                   pl.BlockSpec((None, 8, Cpad), lambda n: (n, 0, 0))),
        scratch_shapes=scratch,
        compiler_params=_mosaic_params(step_bytes),
    )(*args)
    return conv, stats, (N, Ho, Wo)


# ----------------------------------------------------------------------------
# Generic row-tiled (patches @ W) kernel (1x1 shortcut, stride-2 3x3 fallback)
# ----------------------------------------------------------------------------
def _matmul_stats_kernel(p_ref, w_ref, conv_ref, stats_ref):
    acc = jnp.dot(p_ref[...], w_ref[...], preferred_element_type=jnp.float32)
    conv_ref[...] = acc.astype(conv_ref.dtype)
    Cpad = acc.shape[-1]
    psum = jnp.sum(acc, axis=0, keepdims=True)
    psq = jnp.sum(acc * acc, axis=0, keepdims=True)
    stats_ref[...] = jnp.concatenate(
        [psum, psq, jnp.zeros((6, Cpad), jnp.float32)], axis=0)


def _conv_as_matmul(patches_bf16, w_mat_bf16, tile_m):
    M, K = patches_bf16.shape
    Cpad = w_mat_bf16.shape[-1]
    tile_m = max(8, min(tile_m, _round_up(M, 8)) // 8 * 8)
    Mp = _round_up(M, tile_m)
    if Mp != M:
        patches_bf16 = jnp.pad(patches_bf16, ((0, Mp - M), (0, 0)))
    n_tiles = Mp // tile_m

    step_bytes = (tile_m * K * 2 + K * Cpad * 2
                  + tile_m * Cpad * (2 + 4) + 8 * Cpad * 4)
    conv, stats = pl.pallas_call(
        _matmul_stats_kernel,
        out_shape=(jax.ShapeDtypeStruct((Mp, Cpad), jnp.bfloat16),
                   jax.ShapeDtypeStruct((n_tiles, 8, Cpad), jnp.float32)),
        grid=(n_tiles,),
        in_specs=[pl.BlockSpec((tile_m, K), lambda i: (i, 0)),
                  pl.BlockSpec((K, Cpad), lambda i: (0, 0))],
        out_specs=(pl.BlockSpec((tile_m, Cpad), lambda i: (i, 0)),
                   pl.BlockSpec((None, 8, Cpad), lambda i: (i, 0, 0))),
        compiler_params=_mosaic_params(step_bytes),
    )(patches_bf16, w_mat_bf16)
    return conv[:M], stats


# ----------------------------------------------------------------------------
# Final fused epilogue:  y = relu(conv2*s2 + b2 + residual)
# where residual is either raw x (identity) or conv_sc*ssc + bsc (projection,
# shortcut BN folded in here instead of a separate pass).
# ----------------------------------------------------------------------------
def _make_final_kernel(proj_bn):
    def kernel(*refs):
        if proj_bn:
            x_ref, s_ref, b_ref, r_ref, rs_ref, rb_ref, o_ref = refs
        else:
            x_ref, s_ref, b_ref, r_ref, o_ref = refs
        y = x_ref[...].astype(jnp.float32) * s_ref[...] + b_ref[...]
        if proj_bn:
            y = y + (r_ref[...].astype(jnp.float32) * rs_ref[...] + rb_ref[...])
        else:
            y = y + r_ref[...].astype(jnp.float32)
        o_ref[...] = jnp.maximum(y, 0.0).astype(o_ref.dtype)
    return kernel


def _final_epilogue(conv2_flat, s2, b2, res_flat,
                    res_scale=None, res_shift=None, tile_m=512):
    M, Cpad = conv2_flat.shape
    tile_m = max(8, min(tile_m, _round_up(M, 8)) // 8 * 8)
    Mp = _round_up(M, tile_m)
    if Mp != M:
        conv2_flat = jnp.pad(conv2_flat, ((0, Mp - M), (0, 0)))
        res_flat = jnp.pad(res_flat, ((0, Mp - M), (0, 0)))
    n_tiles = Mp // tile_m
    proj = res_scale is not None

    in_specs = [pl.BlockSpec((tile_m, Cpad), lambda i: (i, 0)),
                pl.BlockSpec((1, Cpad), lambda i: (0, 0)),
                pl.BlockSpec((1, Cpad), lambda i: (0, 0)),
                pl.BlockSpec((tile_m, Cpad), lambda i: (i, 0))]
    args = [conv2_flat, s2.reshape(1, Cpad), b2.reshape(1, Cpad), res_flat]
    if proj:
        in_specs += [pl.BlockSpec((1, Cpad), lambda i: (0, 0)),
                     pl.BlockSpec((1, Cpad), lambda i: (0, 0))]
        args += [res_scale.reshape(1, Cpad), res_shift.reshape(1, Cpad)]

    step_bytes = tile_m * Cpad * (2 + 2 + 2 + 4) + 4 * Cpad * 4
    out = pl.pallas_call(
        _make_final_kernel(proj),
        out_shape=jax.ShapeDtypeStruct((Mp, Cpad), jnp.bfloat16),
        grid=(n_tiles,),
        in_specs=in_specs,
        out_specs=pl.BlockSpec((tile_m, Cpad), lambda i: (i, 0)),
        compiler_params=_mosaic_params(step_bytes),
    )(*args)
    return out[:M]


# ----------------------------------------------------------------------------
# XLA-side helpers (patch extraction only for 1x1 / stride>1 fallback paths)
# ----------------------------------------------------------------------------
def _im2col(x, ksize, stride):
    N, H, W, C = x.shape
    if ksize == 1:                       # plain strided subsample, no blowup
        xs = x[:, ::stride, ::stride, :]
        _, Ho, Wo, _ = xs.shape
        return xs.reshape(N * Ho * Wo, C), (N, Ho, Wo)
    assert ksize == 3
    # TODO(synk): the stride>1 3x3 conv still materializes a 9x im2col in HBM;
    # replace with a halo-window manual-DMA kernel if that path becomes hot.
    xp = jnp.pad(x, ((0, 0), (1, 1), (1, 1), (0, 0)))
    Ho = (H + 2 - 3) // stride + 1
    Wo = (W + 2 - 3) // stride + 1
    taps = []
    for kh in range(3):
        for kw in range(3):
            taps.append(
                xp[:, kh:kh + (Ho - 1) * stride + 1:stride,
                      kw:kw + (Wo - 1) * stride + 1:stride, :])
    patches = jnp.concatenate(taps, axis=-1)
    return patches.reshape(N * Ho * Wo, 9 * C), (N, Ho, Wo)


def _taps(w_oihw, cpad):
    cout, cin, kh, kw = w_oihw.shape
    w = jnp.transpose(w_oihw, (2, 3, 1, 0)).reshape(kh * kw, cin, cout)
    return jnp.pad(w, ((0, 0), (0, 0), (0, cpad - cout))).astype(jnp.bfloat16)


def _bn_scale_shift(stats, gamma, beta, m_rows, cout, cpad):
    """Finalize training-mode BN from per-tile partial (sum, sum_sq) stats."""
    g = jnp.pad(gamma.astype(jnp.float32), (0, cpad - cout))
    b = jnp.pad(beta.astype(jnp.float32), (0, cpad - cout))
    total = jnp.sum(stats[:, 0, :], axis=0)
    total_sq = jnp.sum(stats[:, 1, :], axis=0)
    mean = total / m_rows
    var = jnp.maximum(total_sq / m_rows - mean * mean, 0.0)
    scale = g * lax.rsqrt(var + EPS)
    shift = b - mean * scale
    return scale, shift                   # each (cpad,) f32


# ----------------------------------------------------------------------------
# BasicBlock forward (NCHW f32 in/out, bf16 NHWC inside)
# ----------------------------------------------------------------------------
def basic_block_forward(x_nchw, params, *, stride, tile_m=512):
    x = jnp.transpose(x_nchw, (0, 2, 3, 1)).astype(jnp.bfloat16)
    N, H, W, in_planes = x.shape
    planes = params["conv1_w"].shape[0]
    Cpad = _round_up(planes, LANE)

    # ---- conv1 (3x3, stride) : raw conv rows + BN1 partial stats ----
    w1 = _taps(params["conv1_w"], Cpad)                    # (9, in_planes, Cpad)
    if stride == 1 and W % 8 == 0:
        conv1_raw, stats1, (_, H1, W1) = _conv3x3_s1(x, w1)
    else:
        patches, (_, H1, W1) = _im2col(x, 3, stride)
        conv1_raw, stats1 = _conv_as_matmul(
            patches, w1.reshape(9 * in_planes, Cpad), tile_m)
    M1 = N * H1 * W1
    s1, b1 = _bn_scale_shift(stats1, params["bn1_g"], params["bn1_b"],
                             M1, planes, Cpad)

    # ---- conv2 (3x3, stride 1) with BN1+ReLU fused onto its input tile ----
    w2 = _taps(params["conv2_w"], Cpad)                    # (9, planes, Cpad)
    act1_raw = conv1_raw.reshape(N, H1, W1, Cpad)[..., :planes]
    if W1 % 8 == 0:
        conv2_raw, stats2, (_, H2, W2) = _conv3x3_s1(
            act1_raw, w2, scale=s1[:planes], shift=b1[:planes])
    else:
        # TODO(synk): fallback applies BN1+ReLU in XLA and im2cols; replace
        # with a halo-window manual-DMA kernel if this path becomes hot.
        act1 = jnp.maximum(
            act1_raw.astype(jnp.float32) * s1[:planes] + b1[:planes], 0.0)
        patches, (_, H2, W2) = _im2col(act1.astype(jnp.bfloat16), 3, 1)
        conv2_raw, stats2 = _conv_as_matmul(
            patches, w2.reshape(9 * planes, Cpad), tile_m)
    M2 = N * H2 * W2
    s2, b2 = _bn_scale_shift(stats2, params["bn2_g"], params["bn2_b"],
                             M2, planes, Cpad)

    # ---- shortcut + final fused epilogue (BN2 [+BN_sc] + add + ReLU) ----
    if stride != 1 or in_planes != planes:
        wsc = jnp.transpose(params["sc_w"], (2, 3, 1, 0)).reshape(in_planes,
                                                                  planes)
        wsc = jnp.pad(wsc, ((0, 0), (0, Cpad - planes))).astype(jnp.bfloat16)
        patches_sc, (_, Hs, Ws) = _im2col(x, 1, stride)
        convsc_raw, stats_sc = _conv_as_matmul(patches_sc, wsc, tile_m)
        ssc, bsc = _bn_scale_shift(stats_sc, params["sc_g"], params["sc_b"],
                                   N * Hs * Ws, planes, Cpad)
        out_flat = _final_epilogue(conv2_raw, s2, b2, convsc_raw[:M2],
                                   res_scale=ssc, res_shift=bsc, tile_m=tile_m)
    else:
        res_flat = jnp.pad(x.reshape(M2, in_planes),
                           ((0, 0), (0, Cpad - in_planes)))
        out_flat = _final_epilogue(conv2_raw, s2, b2, res_flat, tile_m=tile_m)

    out = out_flat[:, :planes].reshape(N, H2, W2, planes)
    return jnp.transpose(out.astype(jnp.float32), (0, 3, 1, 2))


# ----------------------------------------------------------------------------
# Pure-JAX f32 reference (mirrors the PyTorch forward, training-mode BN)
# ----------------------------------------------------------------------------
def _ref_conv(x, w, stride, pad):
    return lax.conv_general_dilated(
        x, w, (stride, stride), [(pad, pad), (pad, pad)],
        dimension_numbers=("NCHW", "OIHW", "NCHW"))


def _ref_bn(x, g, b):
    mean = x.mean(axis=(0, 2, 3), keepdims=True)
    var = ((x - mean) ** 2).mean(axis=(0, 2, 3), keepdims=True)
    return (x - mean) * lax.rsqrt(var + EPS) * g.reshape(1, -1, 1, 1) \
        + b.reshape(1, -1, 1, 1)


def _ref_forward(x, p, stride):
    out = jax.nn.relu(_ref_bn(_ref_conv(x, p["conv1_w"], stride, 1),
                              p["bn1_g"], p["bn1_b"]))
    out = _ref_bn(_ref_conv(out, p["conv2_w"], 1, 1), p["bn2_g"], p["bn2_b"])
    if stride != 1 or x.shape[1] != p["conv1_w"].shape[0]:
        sc = _ref_bn(_ref_conv(x, p["sc_w"], stride, 0), p["sc_g"], p["sc_b"])
    else:
        sc = x
    return jax.nn.relu(out + sc)


def init_params(key, in_planes, planes, stride):
    ks = jax.random.split(key, 8)
    p = {
        "conv1_w": 0.2 * jax.random.normal(ks[0], (planes, in_planes, 3, 3),
                                           jnp.float32),
        "bn1_g": 1.0 + 0.1 * jax.random.normal(ks[1], (planes,), jnp.float32),
        "bn1_b": 0.1 * jax.random.normal(ks[2], (planes,), jnp.float32),
        "conv2_w": 0.2 * jax.random.normal(ks[3], (planes, planes, 3, 3),
                                           jnp.float32),
        "bn2_g": 1.0 + 0.1 * jax.random.normal(ks[4], (planes,), jnp.float32),
        "bn2_b": 0.1 * jax.random.normal(ks[5], (planes,), jnp.float32),
    }
    if stride != 1 or in_planes != planes:
        p["sc_w"] = 0.2 * jax.random.normal(ks[6], (planes, in_planes, 1, 1),
                                            jnp.float32)
        p["sc_g"] = 1.0 + 0.1 * jax.random.normal(ks[7], (planes,),
                                                  jnp.float32)
        p["sc_b"] = jnp.zeros((planes,), jnp.float32)
    return p


if __name__ == "__main__":
    N, in_planes, planes, H, W, stride = 2, 4, 8, 16, 16, 1

    key = jax.random.PRNGKey(0)
    kx, kp = jax.random.split(key)
    x = jax.random.normal(kx, (N, in_planes, H, W), jnp.float32)
    params = init_params(kp, in_planes, planes, stride)

    # tile_m=256 so the 512-row M axis exercises the multi-tile two-phase BN
    # path here; sweep 512-1024 (and re-derive the VMEM budget, esp. on v7x's
    # 64 MiB) for real ResNet shapes.
    fwd = jax.jit(functools.partial(basic_block_forward, stride=stride,
                                    tile_m=256))
    out = jax.block_until_ready(fwd(x, params))

    ref = jax.block_until_ready(_ref_forward(x, params, stride))
    # bf16 MXU operands / bf16 intermediates => looser tolerance than f32.
    np.testing.assert_allclose(np.asarray(out, dtype=np.float32),
                               np.asarray(ref), rtol=5e-2, atol=5e-2)
    assert out.shape == (N, planes, H, W)

    print("KERNEL_OK")
</pallas_src>

<mosaic_0001>
module attributes {stable_mosaic.version = 11 : i64} {
  func.func @kernel(%arg0: i32, %arg1: memref<1x18x18x4xbf16, #tpu.memory_space<vmem>>, %arg2: memref<9x4x128xbf16, #tpu.memory_space<vmem>>, %arg3: memref<256x128xbf16, #tpu.memory_space<vmem>>, %arg4: memref<1x8x128xf32, #tpu.memory_space<vmem>>) attributes {dimension_semantics = [#tpu.dimension_semantics<parallel>], iteration_bounds = array<i64: 2>, scalar_prefetch = 0 : i64, scratch_operands = 0 : i64, tpu.core_type = #tpu.core_type<tc>, window_params = [{transform_indices = @transform_0, window_bounds = array<i64: 1, 18, 18, 4>}, {pipeline_mode = #tpu.pipeline_mode<synchronous>, transform_indices = @transform_1, window_bounds = array<i64: 9, 4, 128>}, {transform_indices = @transform_2, window_bounds = array<i64: 256, 128>}, {transform_indices = @transform_3, window_bounds = array<i64: 1, 8, 128>}]} {
    %cst = arith.constant 0.000000e+00 : f32
    %0 = vector.broadcast %cst : f32 to vector<256x128xf32>
    %c0 = arith.constant 0 : index
    %c0_0 = arith.constant 0 : index
    %c0_1 = arith.constant 0 : index
    %c0_2 = arith.constant 0 : index
    %1 = vector.load %arg1[%c0, %c0_0, %c0_1, %c0_2] : memref<1x18x18x4xbf16, #tpu.memory_space<vmem>>, vector<1x16x16x4xbf16>
    %2 = vector.shape_cast %1 : vector<1x16x16x4xbf16> to vector<16x16x4xbf16>
    %3 = vector.shape_cast %2 : vector<16x16x4xbf16> to vector<256x4xbf16>
    %c0_3 = arith.constant 0 : index
    %c0_4 = arith.constant 0 : index
    %c0_5 = arith.constant 0 : index
    %4 = vector.load %arg2[%c0_3, %c0_4, %c0_5] : memref<9x4x128xbf16, #tpu.memory_space<vmem>>, vector<1x4x128xbf16>
    %5 = vector.shape_cast %4 : vector<1x4x128xbf16> to vector<4x128xbf16>
    %cst_6 = arith.constant dense<0.000000e+00> : vector<256x128xf32>
    %6 = tpu.matmul %3, %5, %cst_6 {dimension_numbers = #tpu.dot_dimension_numbers<[1], [0], [0], [1], [0, 0, 1, 1], [], []>} : vector<256x4xbf16>, vector<4x128xbf16>, vector<256x128xf32> -> vector<256x128xf32>
    %7 = arith.addf %0, %6 : vector<256x128xf32>
    %c0_7 = arith.constant 0 : index
    %c0_8 = arith.constant 0 : index
    %c1 = arith.constant 1 : index
    %c0_9 = arith.constant 0 : index
    %8 = vector.load %arg1[%c0_7, %c0_8, %c1, %c0_9] : memref<1x18x18x4xbf16, #tpu.memory_space<vmem>>, vector<1x16x16x4xbf16>
    %9 = vector.shape_cast %8 : vector<1x16x16x4xbf16> to vector<16x16x4xbf16>
    %10 = vector.shape_cast %9 : vector<16x16x4xbf16> to vector<256x4xbf16>
    %c1_10 = arith.constant 1 : index
    %c0_11 = arith.constant 0 : index
    %c0_12 = arith.constant 0 : index
    %11 = vector.load %arg2[%c1_10, %c0_11, %c0_12] : memref<9x4x128xbf16, #tpu.memory_space<vmem>>, vector<1x4x128xbf16>
    %12 = vector.shape_cast %11 : vector<1x4x128xbf16> to vector<4x128xbf16>
    %cst_13 = arith.constant dense<0.000000e+00> : vector<256x128xf32>
    %13 = tpu.matmul %10, %12, %cst_13 {dimension_numbers = #tpu.dot_dimension_numbers<[1], [0], [0], [1], [0, 0, 1, 1], [], []>} : vector<256x4xbf16>, vector<4x128xbf16>, vector<256x128xf32> -> vector<256x128xf32>
    %14 = arith.addf %7, %13 : vector<256x128xf32>
    %c0_14 = arith.constant 0 : index
    %c0_15 = arith.constant 0 : index
    %c2 = arith.constant 2 : index
    %c0_16 = arith.constant 0 : index
    %15 = vector.load %arg1[%c0_14, %c0_15, %c2, %c0_16] : memref<1x18x18x4xbf16, #tpu.memory_space<vmem>>, vector<1x16x16x4xbf16>
    %16 = vector.shape_cast %15 : vector<1x16x16x4xbf16> to vector<16x16x4xbf16>
    %17 = vector.shape_cast %16 : vector<16x16x4xbf16> to vector<256x4xbf16>
    %c2_17 = arith.constant 2 : index
    %c0_18 = arith.constant 0 : index
    %c0_19 = arith.constant 0 : index
    %18 = vector.load %arg2[%c2_17, %c0_18, %c0_19] : memref<9x4x128xbf16, #tpu.memory_space<vmem>>, vector<1x4x128xbf16>
    %19 = vector.shape_cast %18 : vector<1x4x128xbf16> to vector<4x128xbf16>
    %cst_20 = arith.constant dense<0.000000e+00> : vector<256x128xf32>
    %20 = tpu.matmul %17, %19, %cst_20 {dimension_numbers = #tpu.dot_dimension_numbers<[1], [0], [0], [1], [0, 0, 1, 1], [], []>} : vector<256x4xbf16>, vector<4x128xbf16>, vector<256x128xf32> -> vector<256x128xf32>
    %21 = arith.addf %14, %20 : vector<256x128xf32>
    %c0_21 = arith.constant 0 : index
    %c1_22 = arith.constant 1 : index
    %c0_23 = arith.constant 0 : index
    %c0_24 = arith.constant 0 : index
    %22 = vector.load %arg1[%c0_21, %c1_22, %c0_23, %c0_24] : memref<1x18x18x4xbf16, #tpu.memory_space<vmem>>, vector<1x16x16x4xbf16>
    %23 = vector.shape_cast %22 : vector<1x16x16x4xbf16> to vector<16x16x4xbf16>
    %24 = vector.shape_cast %23 : vector<16x16x4xbf16> to vector<256x4xbf16>
    %c3 = arith.constant 3 : index
    %c0_25 = arith.constant 0 : index
    %c0_26 = arith.constant 0 : index
    %25 = vector.load %arg2[%c3, %c0_25, %c0_26] : memref<9x4x128xbf16, #tpu.memory_space<vmem>>, vector<1x4x128xbf16>
    %26 = vector.shape_cast %25 : vector<1x4x128xbf16> to vector<4x128xbf16>
    %cst_27 = arith.constant dense<0.000000e+00> : vector<256x128xf32>
    %27 = tpu.matmul %24, %26, %cst_27 {dimension_numbers = #tpu.dot_dimension_numbers<[1], [0], [0], [1], [0, 0, 1, 1], [], []>} : vector<256x4xbf16>, vector<4x128xbf16>, vector<256x128xf32> -> vector<256x128xf32>
    %28 = arith.addf %21, %27 : vector<256x128xf32>
    %c0_28 = arith.constant 0 : index
    %c1_29 = arith.constant 1 : index
    %c1_30 = arith.constant 1 : index
    %c0_31 = arith.constant 0 : index
    %29 = vector.load %arg1[%c0_28, %c1_29, %c1_30, %c0_31] : memref<1x18x18x4xbf16, #tpu.memory_space<vmem>>, vector<1x16x16x4xbf16>
    %30 = vector.shape_cast %29 : vector<1x16x16x4xbf16> to vector<16x16x4xbf16>
    %31 = vector.shape_cast %30 : vector<16x16x4xbf16> to vector<256x4xbf16>
    %c4 = arith.constant 4 : index
    %c0_32 = arith.constant 0 : index
    %c0_33 = arith.constant 0 : index
    %32 = vector.load %arg2[%c4, %c0_32, %c0_33] : memref<9x4x128xbf16, #tpu.memory_space<vmem>>, vector<1x4x128xbf16>
    %33 = vector.shape_cast %32 : vector<1x4x128xbf16> to vector<4x128xbf16>
    %cst_34 = arith.constant dense<0.000000e+00> : vector<256x128xf32>
    %34 = tpu.matmul %31, %33, %cst_34 {dimension_numbers = #tpu.dot_dimension_numbers<[1], [0], [0], [1], [0, 0, 1, 1], [], []>} : vector<256x4xbf16>, vector<4x128xbf16>, vector<256x128xf32> -> vector<256x128xf32>
    %35 = arith.addf %28, %34 : vector<256x128xf32>
    %c0_35 = arith.constant 0 : index
    %c1_36 = arith.constant 1 : index
    %c2_37 = arith.constant 2 : index
    %c0_38 = arith.constant 0 : index
    %36 = vector.load %arg1[%c0_35, %c1_36, %c2_37, %c0_38] : memref<1x18x18x4xbf16, #tpu.memory_space<vmem>>, vector<1x16x16x4xbf16>
    %37 = vector.shape_cast %36 : vector<1x16x16x4xbf16> to vector<16x16x4xbf16>
    %38 = vector.shape_cast %37 : vector<16x16x4xbf16> to vector<256x4xbf16>
    %c5 = arith.constant 5 : index
    %c0_39 = arith.constant 0 : index
    %c0_40 = arith.constant 0 : index
    %39 = vector.load %arg2[%c5, %c0_39, %c0_40] : memref<9x4x128xbf16, #tpu.memory_space<vmem>>, vector<1x4x128xbf16>
    %40 = vector.shape_cast %39 : vector<1x4x128xbf16> to vector<4x128xbf16>
    %cst_41 = arith.constant dense<0.000000e+00> : vector<256x128xf32>
    %41 = tpu.matmul %38, %40, %cst_41 {dimension_numbers = #tpu.dot_dimension_numbers<[1], [0], [0], [1], [0, 0, 1, 1], [], []>} : vector<256x4xbf16>, vector<4x128xbf16>, vector<256x128xf32> -> vector<256x128xf32>
    %42 = arith.addf %35, %41 : vector<256x128xf32>
    %c0_42 = arith.constant 0 : index
    %c2_43 = arith.constant 2 : index
    %c0_44 = arith.constant 0 : index
    %c0_45 = arith.constant 0 : index
    %43 = vector.load %arg1[%c0_42, %c2_43, %c0_44, %c0_45] : memref<1x18x18x4xbf16, #tpu.memory_space<vmem>>, vector<1x16x16x4xbf16>
    %44 = vector.shape_cast %43 : vector<1x16x16x4xbf16> to vector<16x16x4xbf16>
    %45 = vector.shape_cast %44 : vector<16x16x4xbf16> to vector<256x4xbf16>
    %c6 = arith.constant 6 : index
    %c0_46 = arith.constant 0 : index
    %c0_47 = arith.constant 0 : index
    %46 = vector.load %arg2[%c6, %c0_46, %c0_47] : memref<9x4x128xbf16, #tpu.memory_space<vmem>>, vector<1x4x128xbf16>
    %47 = vector.shape_cast %46 : vector<1x4x128xbf16> to vector<4x128xbf16>
    %cst_48 = arith.constant dense<0.000000e+00> : vector<256x128xf32>
    %48 = tpu.matmul %45, %47, %cst_48 {dimension_numbers = #tpu.dot_dimension_numbers<[1], [0], [0], [1], [0, 0, 1, 1], [], []>} : vector<256x4xbf16>, vector<4x128xbf16>, vector<256x128xf32> -> vector<256x128xf32>
    %49 = arith.addf %42, %48 : vector<256x128xf32>
    %c0_49 = arith.constant 0 : index
    %c2_50 = arith.constant 2 : index
    %c1_51 = arith.constant 1 : index
    %c0_52 = arith.constant 0 : index
    %50 = vector.load %arg1[%c0_49, %c2_50, %c1_51, %c0_52] : memref<1x18x18x4xbf16, #tpu.memory_space<vmem>>, vector<1x16x16x4xbf16>
    %51 = vector.shape_cast %50 : vector<1x16x16x4xbf16> to vector<16x16x4xbf16>
    %52 = vector.shape_cast %51 : vector<16x16x4xbf16> to vector<256x4xbf16>
    %c7 = arith.constant 7 : index
    %c0_53 = arith.constant 0 : index
    %c0_54 = arith.constant 0 : index
    %53 = vector.load %arg2[%c7, %c0_53, %c0_54] : memref<9x4x128xbf16, #tpu.memory_space<vmem>>, vector<1x4x128xbf16>
    %54 = vector.shape_cast %53 : vector<1x4x128xbf16> to vector<4x128xbf16>
    %cst_55 = arith.constant dense<0.000000e+00> : vector<256x128xf32>
    %55 = tpu.matmul %52, %54, %cst_55 {dimension_numbers = #tpu.dot_dimension_numbers<[1], [0], [0], [1], [0, 0, 1, 1], [], []>} : vector<256x4xbf16>, vector<4x128xbf16>, vector<256x128xf32> -> vector<256x128xf32>
    %56 = arith.addf %49, %55 : vector<256x128xf32>
    %c0_56 = arith.constant 0 : index
    %c2_57 = arith.constant 2 : index
    %c2_58 = arith.constant 2 : index
    %c0_59 = arith.constant 0 : index
    %57 = vector.load %arg1[%c0_56, %c2_57, %c2_58, %c0_59] : memref<1x18x18x4xbf16, #tpu.memory_space<vmem>>, vector<1x16x16x4xbf16>
    %58 = vector.shape_cast %57 : vector<1x16x16x4xbf16> to vector<16x16x4xbf16>
    %59 = vector.shape_cast %58 : vector<16x16x4xbf16> to vector<256x4xbf16>
    %c8 = arith.constant 8 : index
    %c0_60 = arith.constant 0 : index
    %c0_61 = arith.constant 0 : index
    %60 = vector.load %arg2[%c8, %c0_60, %c0_61] : memref<9x4x128xbf16, #tpu.memory_space<vmem>>, vector<1x4x128xbf16>
    %61 = vector.shape_cast %60 : vector<1x4x128xbf16> to vector<4x128xbf16>
    %cst_62 = arith.constant dense<0.000000e+00> : vector<256x128xf32>
    %62 = tpu.matmul %59, %61, %cst_62 {dimension_numbers = #tpu.dot_dimension_numbers<[1], [0], [0], [1], [0, 0, 1, 1], [], []>} : vector<256x4xbf16>, vector<4x128xbf16>, vector<256x128xf32> -> vector<256x128xf32>
    %63 = arith.addf %56, %62 : vector<256x128xf32>
    %64 = arith.truncf %63 : vector<256x128xf32> to vector<256x128xbf16>
    %c0_63 = arith.constant 0 : index
    %c0_64 = arith.constant 0 : index
    %65 = vector.load %arg3[%c0_63, %c0_64] : memref<256x128xbf16, #tpu.memory_space<vmem>>, vector<256x128xbf16>
    tpu.vector_store %arg3[%c0_63, %c0_64], %64 {strides = array<i32>} : memref<256x128xbf16, #tpu.memory_space<vmem>>, vector<256x128xbf16>,
    %cst_65 = arith.constant dense<0.000000e+00> : vector<128xf32>
    %66 = vector.multi_reduction <add>, %63, %cst_65 [0] : vector<256x128xf32> to vector<128xf32>
    %67 = vector.shape_cast %66 : vector<128xf32> to vector<1x128xf32>
    %68 = arith.mulf %63, %63 : vector<256x128xf32>
    %cst_66 = arith.constant dense<0.000000e+00> : vector<128xf32>
    %69 = vector.multi_reduction <add>, %68, %cst_66 [0] : vector<256x128xf32> to vector<128xf32>
    %70 = vector.shape_cast %69 : vector<128xf32> to vector<1x128xf32>
    %cst_67 = arith.constant 0.000000e+00 : f32
    %71 = vector.broadcast %cst_67 : f32 to vector<6x128xf32>
    %72 = tpu.concatenate %67, %70, %71 in 0 : vector<1x128xf32>, vector<1x128xf32>, vector<6x128xf32> -> vector<8x128xf32>
    %c0_68 = arith.constant 0 : index
    %c0_69 = arith.constant 0 : index
    %c0_70 = arith.constant 0 : index
    %73 = vector.load %arg4[%c0_68, %c0_69, %c0_70] : memref<1x8x128xf32, #tpu.memory_space<vmem>>, vector<1x8x128xf32>
    %74 = vector.shape_cast %73 : vector<1x8x128xf32> to vector<8x128xf32>
    %75 = vector.shape_cast %72 : vector<8x128xf32> to vector<1x8x128xf32>
    tpu.vector_store %arg4[%c0_68, %c0_69, %c0_70], %75 {strides = array<i32>} : memref<1x8x128xf32, #tpu.memory_space<vmem>>, vector<1x8x128xf32>,
    return
  }
  func.func @transform_0(%arg0: i32) -> (i32, i32, i32, i32) {
    %c0_i32 = arith.constant 0 : i32
    %c0_i32_0 = arith.constant 0 : i32
    %c0_i32_1 = arith.constant 0 : i32
    %c0_i32_2 = arith.constant 0 : i32
    return %arg0, %c0_i32, %c0_i32_0, %c0_i32_1 : i32, i32, i32, i32
  }
  func.func @transform_1(%arg0: i32) -> (i32, i32, i32) {
    %c0_i32 = arith.constant 0 : i32
    %c0_i32_0 = arith.constant 0 : i32
    %c0_i32_1 = arith.constant 0 : i32
    %c0_i32_2 = arith.constant 0 : i32
    return %c0_i32, %c0_i32_0, %c0_i32_1 : i32, i32, i32
  }
  func.func @transform_2(%arg0: i32) -> (i32, i32) {
    %c0_i32 = arith.constant 0 : i32
    %c0_i32_0 = arith.constant 0 : i32
    return %arg0, %c0_i32 : i32, i32
  }
  func.func @transform_3(%arg0: i32) -> (i32, i32, i32) {
    %c0_i32 = arith.constant 0 : i32
    %c0_i32_0 = arith.constant 0 : i32
    %c0_i32_1 = arith.constant 0 : i32
    return %arg0, %c0_i32, %c0_i32_0 : i32, i32, i32
  }
}

module attributes {stable_mosaic.version = 11 : i64} {
  func.func @kernel(%arg0: i32, %arg1: memref<1x18x18x8xbf16, #tpu.memory_space<vmem>>, %arg2: memref<1x8xf32, #tpu.memory_space<vmem>>, %arg3: memref<1x8xf32, #tpu.memory_space<vmem>>, %arg4: memref<9x8x128xbf16, #tpu.memory_space<vmem>>, %arg5: memref<256x128xbf16, #tpu.memory_space<vmem>>, %arg6: memref<1x8x128xf32, #tpu.memory_space<vmem>>, %arg7: memref<18x18x8xbf16, #tpu.memory_space<vmem>>) attributes {dimension_semantics = [#tpu.dimension_semantics<parallel>], iteration_bounds = array<i64: 2>, scalar_prefetch = 0 : i64, scratch_operands = 1 : i64, tpu.core_type = #tpu.core_type<tc>, window_params = [{transform_indices = @transform_0, window_bounds = array<i64: 1, 18, 18, 8>}, {pipeline_mode = #tpu.pipeline_mode<synchronous>, transform_indices = @transform_1, window_bounds = array<i64: 1, 8>}, {pipeline_mode = #tpu.pipeline_mode<synchronous>, transform_indices = @transform_2, window_bounds = array<i64: 1, 8>}, {pipeline_mode = #tpu.pipeline_mode<synchronous>, transform_indices = @transform_3, window_bounds = array<i64: 9, 8, 128>}, {transform_indices = @transform_4, window_bounds = array<i64: 256, 128>}, {transform_indices = @transform_5, window_bounds = array<i64: 1, 8, 128>}]} {
    %c0 = arith.constant 0 : index
    %c0_0 = arith.constant 0 : index
    %c0_1 = arith.constant 0 : index
    %c0_2 = arith.constant 0 : index
    %0 = vector.load %arg1[%c0, %c0_0, %c0_1, %c0_2] : memref<1x18x18x8xbf16, #tpu.memory_space<vmem>>, vector<1x18x18x8xbf16>
    %1 = vector.shape_cast %0 : vector<1x18x18x8xbf16> to vector<18x18x8xbf16>
    %2 = arith.extf %1 : vector<18x18x8xbf16> to vector<18x18x8xf32>
    %c0_3 = arith.constant 0 : index
    %c0_4 = arith.constant 0 : index
    %3 = vector.load %arg2[%c0_3, %c0_4] : memref<1x8xf32, #tpu.memory_space<vmem>>, vector<1x8xf32>
    %4 = vector.shape_cast %3 : vector<1x8xf32> to vector<1x1x8xf32>
    %5 = vector.broadcast %4 : vector<1x1x8xf32> to vector<18x18x8xf32>
    %6 = arith.mulf %2, %5 : vector<18x18x8xf32>
    %c0_5 = arith.constant 0 : index
    %c0_6 = arith.constant 0 : index
    %7 = vector.load %arg3[%c0_5, %c0_6] : memref<1x8xf32, #tpu.memory_space<vmem>>, vector<1x8xf32>
    %8 = vector.shape_cast %7 : vector<1x8xf32> to vector<1x1x8xf32>
    %9 = vector.broadcast %8 : vector<1x1x8xf32> to vector<18x18x8xf32>
    %10 = arith.addf %6, %9 : vector<18x18x8xf32>
    %cst = arith.constant 0.000000e+00 : f32
    %11 = vector.broadcast %cst : f32 to vector<18x18x8xf32>
    %12 = arith.maximumf %10, %11 : vector<18x18x8xf32>
    %13 = tpu.iota {dimensions = array<i32: 0>} : vector<18x18x8xi32>
    %14 = tpu.iota {dimensions = array<i32: 1>} : vector<18x18x8xi32>
    %c1_i32 = arith.constant 1 : i32
    %15 = vector.broadcast %c1_i32 : i32 to vector<18x18x8xi32>
    %16 = arith.cmpi sge, %13, %15 : vector<18x18x8xi32>
    %c16_i32 = arith.constant 16 : i32
    %17 = vector.broadcast %c16_i32 : i32 to vector<18x18x8xi32>
    %18 = arith.cmpi sle, %13, %17 : vector<18x18x8xi32>
    %19 = arith.andi %16, %18 : vector<18x18x8xi1>
    %c1_i32_7 = arith.constant 1 : i32
    %20 = vector.broadcast %c1_i32_7 : i32 to vector<18x18x8xi32>
    %21 = arith.cmpi sge, %14, %20 : vector<18x18x8xi32>
    %22 = arith.andi %19, %21 : vector<18x18x8xi1>
    %c16_i32_8 = arith.constant 16 : i32
    %23 = vector.broadcast %c16_i32_8 : i32 to vector<18x18x8xi32>
    %24 = arith.cmpi sle, %14, %23 : vector<18x18x8xi32>
    %25 = arith.andi %22, %24 : vector<18x18x8xi1>
    %cst_9 = arith.constant 0.000000e+00 : f32
    %26 = vector.broadcast %cst_9 : f32 to vector<18x18x8xf32>
    %27 = arith.select %25, %12, %26 : vector<18x18x8xi1>, vector<18x18x8xf32>
    %28 = arith.truncf %27 : vector<18x18x8xf32> to vector<18x18x8xbf16>
    %c0_10 = arith.constant 0 : index
    %c0_11 = arith.constant 0 : index
    %c0_12 = arith.constant 0 : index
    %29 = vector.load %arg7[%c0_10, %c0_11, %c0_12] : memref<18x18x8xbf16, #tpu.memory_space<vmem>>, vector<18x18x8xbf16>
    tpu.vector_store %arg7[%c0_10, %c0_11, %c0_12], %28 {strides = array<i32>} : memref<18x18x8xbf16, #tpu.memory_space<vmem>>, vector<18x18x8xbf16>,
    %cst_13 = arith.constant 0.000000e+00 : f32
    %30 = vector.broadcast %cst_13 : f32 to vector<256x128xf32>
    %c0_14 = arith.constant 0 : index
    %c0_15 = arith.constant 0 : index
    %c0_16 = arith.constant 0 : index
    %31 = vector.load %arg7[%c0_14, %c0_15, %c0_16] : memref<18x18x8xbf16, #tpu.memory_space<vmem>>, vector<16x16x8xbf16>
    %32 = vector.shape_cast %31 : vector<16x16x8xbf16> to vector<256x8xbf16>
    %c0_17 = arith.constant 0 : index
    %c0_18 = arith.constant 0 : index
    %c0_19 = arith.constant 0 : index
    %33 = vector.load %arg4[%c0_17, %c0_18, %c0_19] : memref<9x8x128xbf16, #tpu.memory_space<vmem>>, vector<1x8x128xbf16>
    %34 = vector.shape_cast %33 : vector<1x8x128xbf16> to vector<8x128xbf16>
    %cst_20 = arith.constant dense<0.000000e+00> : vector<256x128xf32>
    %35 = tpu.matmul %32, %34, %cst_20 {dimension_numbers = #tpu.dot_dimension_numbers<[1], [0], [0], [1], [0, 0, 1, 1], [], []>} : vector<256x8xbf16>, vector<8x128xbf16>, vector<256x128xf32> -> vector<256x128xf32>
    %36 = arith.addf %30, %35 : vector<256x128xf32>
    %c0_21 = arith.constant 0 : index
    %c1 = arith.constant 1 : index
    %c0_22 = arith.constant 0 : index
    %37 = vector.load %arg7[%c0_21, %c1, %c0_22] : memref<18x18x8xbf16, #tpu.memory_space<vmem>>, vector<16x16x8xbf16>
    %38 = vector.shape_cast %37 : vector<16x16x8xbf16> to vector<256x8xbf16>
    %c1_23 = arith.constant 1 : index
    %c0_24 = arith.constant 0 : index
    %c0_25 = arith.constant 0 : index
    %39 = vector.load %arg4[%c1_23, %c0_24, %c0_25] : memref<9x8x128xbf16, #tpu.memory_space<vmem>>, vector<1x8x128xbf16>
    %40 = vector.shape_cast %39 : vector<1x8x128xbf16> to vector<8x128xbf16>
    %cst_26 = arith.constant dense<0.000000e+00> : vector<256x128xf32>
    %41 = tpu.matmul %38, %40, %cst_26 {dimension_numbers = #tpu.dot_dimension_numbers<[1], [0], [0], [1], [0, 0, 1, 1], [], []>} : vector<256x8xbf16>, vector<8x128xbf16>, vector<256x128xf32> -> vector<256x128xf32>
    %42 = arith.addf %36, %41 : vector<256x128xf32>
    %c0_27 = arith.constant 0 : index
    %c2 = arith.constant 2 : index
    %c0_28 = arith.constant 0 : index
    %43 = vector.load %arg7[%c0_27, %c2, %c0_28] : memref<18x18x8xbf16, #tpu.memory_space<vmem>>, vector<16x16x8xbf16>
    %44 = vector.shape_cast %43 : vector<16x16x8xbf16> to vector<256x8xbf16>
    %c2_29 = arith.constant 2 : index
    %c0_30 = arith.constant 0 : index
    %c0_31 = arith.constant 0 : index
    %45 = vector.load %arg4[%c2_29, %c0_30, %c0_31] : memref<9x8x128xbf16, #tpu.memory_space<vmem>>, vector<1x8x128xbf16>
    %46 = vector.shape_cast %45 : vector<1x8x128xbf16> to vector<8x128xbf16>
    %cst_32 = arith.constant dense<0.000000e+00> : vector<256x128xf32>
    %47 = tpu.matmul %44, %46, %cst_32 {dimension_numbers = #tpu.dot_dimension_numbers<[1], [0], [0], [1], [0, 0, 1, 1], [], []>} : vector<256x8xbf16>, vector<8x128xbf16>, vector<256x128xf32> -> vector<256x128xf32>
    %48 = arith.addf %42, %47 : vector<256x128xf32>
    %c1_33 = arith.constant 1 : index
    %c0_34 = arith.constant 0 : index
    %c0_35 = arith.constant 0 : index
    %49 = vector.load %arg7[%c1_33, %c0_34, %c0_35] : memref<18x18x8xbf16, #tpu.memory_space<vmem>>, vector<16x16x8xbf16>
    %50 = vector.shape_cast %49 : vector<16x16x8xbf16> to vector<256x8xbf16>
    %c3 = arith.constant 3 : index
    %c0_36 = arith.constant 0 : index
    %c0_37 = arith.constant 0 : index
    %51 = vector.load %arg4[%c3, %c0_36, %c0_37] : memref<9x8x128xbf16, #tpu.memory_space<vmem>>, vector<1x8x128xbf16>
    %52 = vector.shape_cast %51 : vector<1x8x128xbf16> to vector<8x128xbf16>
    %cst_38 = arith.constant dense<0.000000e+00> : vector<256x128xf32>
    %53 = tpu.matmul %50, %52, %cst_38 {dimension_numbers = #tpu.dot_dimension_numbers<[1], [0], [0], [1], [0, 0, 1, 1], [], []>} : vector<256x8xbf16>, vector<8x128xbf16>, vector<256x128xf32> -> vector<256x128xf32>
    %54 = arith.addf %48, %53 : vector<256x128xf32>
    %c1_39 = arith.constant 1 : index
    %c1_40 = arith.constant 1 : index
    %c0_41 = arith.constant 0 : index
    %55 = vector.load %arg7[%c1_39, %c1_40, %c0_41] : memref<18x18x8xbf16, #tpu.memory_space<vmem>>, vector<16x16x8xbf16>
    %56 = vector.shape_cast %55 : vector<16x16x8xbf16> to vector<256x8xbf16>
    %c4 = arith.constant 4 : index
    %c0_42 = arith.constant 0 : index
    %c0_43 = arith.constant 0 : index
    %57 = vector.load %arg4[%c4, %c0_42, %c0_43] : memref<9x8x128xbf16, #tpu.memory_space<vmem>>, vector<1x8x128xbf16>
    %58 = vector.shape_cast %57 : vector<1x8x128xbf16> to vector<8x128xbf16>
    %cst_44 = arith.constant dense<0.000000e+00> : vector<256x128xf32>
    %59 = tpu.matmul %56, %58, %cst_44 {dimension_numbers = #tpu.dot_dimension_numbers<[1], [0], [0], [1], [0, 0, 1, 1], [], []>} : vector<256x8xbf16>, vector<8x128xbf16>, vector<256x128xf32> -> vector<256x128xf32>
    %60 = arith.addf %54, %59 : vector<256x128xf32>
    %c1_45 = arith.constant 1 : index
    %c2_46 = arith.constant 2 : index
    %c0_47 = arith.constant 0 : index
    %61 = vector.load %arg7[%c1_45, %c2_46, %c0_47] : memref<18x18x8xbf16, #tpu.memory_space<vmem>>, vector<16x16x8xbf16>
    %62 = vector.shape_cast %61 : vector<16x16x8xbf16> to vector<256x8xbf16>
    %c5 = arith.constant 5 : index
    %c0_48 = arith.constant 0 : index
    %c0_49 = arith.constant 0 : index
    %63 = vector.load %arg4[%c5, %c0_48, %c0_49] : memref<9x8x128xbf16, #tpu.memory_space<vmem>>, vector<1x8x128xbf16>
    %64 = vector.shape_cast %63 : vector<1x8x128xbf16> to vector<8x128xbf16>
    %cst_50 = arith.constant dense<0.000000e+00> : vector<256x128xf32>
    %65 = tpu.matmul %62, %64, %cst_50 {dimension_numbers = #tpu.dot_dimension_numbers<[1], [0], [0], [1], [0, 0, 1, 1], [], []>} : vector<256x8xbf16>, vector<8x128xbf16>, vector<256x128xf32> -> vector<256x128xf32>
    %66 = arith.addf %60, %65 : vector<256x128xf32>
    %c2_51 = arith.constant 2 : index
    %c0_52 = arith.constant 0 : index
    %c0_53 = arith.constant 0 : index
    %67 = vector.load %arg7[%c2_51, %c0_52, %c0_53] : memref<18x18x8xbf16, #tpu.memory_space<vmem>>, vector<16x16x8xbf16>
    %68 = vector.shape_cast %67 : vector<16x16x8xbf16> to vector<256x8xbf16>
    %c6 = arith.constant 6 : index
    %c0_54 = arith.constant 0 : index
    %c0_55 = arith.constant 0 : index
    %69 = vector.load %arg4[%c6, %c0_54, %c0_55] : memref<9x8x128xbf16, #tpu.memory_space<vmem>>, vector<1x8x128xbf16>
    %70 = vector.shape_cast %69 : vector<1x8x128xbf16> to vector<8x128xbf16>
    %cst_56 = arith.constant dense<0.000000e+00> : vector<256x128xf32>
    %71 = tpu.matmul %68, %70, %cst_56 {dimension_numbers = #tpu.dot_dimension_numbers<[1], [0], [0], [1], [0, 0, 1, 1], [], []>} : vector<256x8xbf16>, vector<8x128xbf16>, vector<256x128xf32> -> vector<256x128xf32>
    %72 = arith.addf %66, %71 : vector<256x128xf32>
    %c2_57 = arith.constant 2 : index
    %c1_58 = arith.constant 1 : index
    %c0_59 = arith.constant 0 : index
    %73 = vector.load %arg7[%c2_57, %c1_58, %c0_59] : memref<18x18x8xbf16, #tpu.memory_space<vmem>>, vector<16x16x8xbf16>
    %74 = vector.shape_cast %73 : vector<16x16x8xbf16> to vector<256x8xbf16>
    %c7 = arith.constant 7 : index
    %c0_60 = arith.constant 0 : index
    %c0_61 = arith.constant 0 : index
    %75 = vector.load %arg4[%c7, %c0_60, %c0_61] : memref<9x8x128xbf16, #tpu.memory_space<vmem>>, vector<1x8x128xbf16>
    %76 = vector.shape_cast %75 : vector<1x8x128xbf16> to vector<8x128xbf16>
    %cst_62 = arith.constant dense<0.000000e+00> : vector<256x128xf32>
    %77 = tpu.matmul %74, %76, %cst_62 {dimension_numbers = #tpu.dot_dimension_numbers<[1], [0], [0], [1], [0, 0, 1, 1], [], []>} : vector<256x8xbf16>, vector<8x128xbf16>, vector<256x128xf32> -> vector<256x128xf32>
    %78 = arith.addf %72, %77 : vector<256x128xf32>
    %c2_63 = arith.constant 2 : index
    %c2_64 = arith.constant 2 : index
    %c0_65 = arith.constant 0 : index
    %79 = vector.load %arg7[%c2_63, %c2_64, %c0_65] : memref<18x18x8xbf16, #tpu.memory_space<vmem>>, vector<16x16x8xbf16>
    %80 = vector.shape_cast %79 : vector<16x16x8xbf16> to vector<256x8xbf16>
    %c8 = arith.constant 8 : index
    %c0_66 = arith.constant 0 : index
    %c0_67 = arith.constant 0 : index
    %81 = vector.load %arg4[%c8, %c0_66, %c0_67] : memref<9x8x128xbf16, #tpu.memory_space<vmem>>, vector<1x8x128xbf16>
    %82 = vector.shape_cast %81 : vector<1x8x128xbf16> to vector<8x128xbf16>
    %cst_68 = arith.constant dense<0.000000e+00> : vector<256x128xf32>
    %83 = tpu.matmul %80, %82, %cst_68 {dimension_numbers = #tpu.dot_dimension_numbers<[1], [0], [0], [1], [0, 0, 1, 1], [], []>} : vector<256x8xbf16>, vector<8x128xbf16>, vector<256x128xf32> -> vector<256x128xf32>
    %84 = arith.addf %78, %83 : vector<256x128xf32>
    %85 = arith.truncf %84 : vector<256x128xf32> to vector<256x128xbf16>
    %c0_69 = arith.constant 0 : index
    %c0_70 = arith.constant 0 : index
    %86 = vector.load %arg5[%c0_69, %c0_70] : memref<256x128xbf16, #tpu.memory_space<vmem>>, vector<256x128xbf16>
    tpu.vector_store %arg5[%c0_69, %c0_70], %85 {strides = array<i32>} : memref<256x128xbf16, #tpu.memory_space<vmem>>, vector<256x128xbf16>,
    %cst_71 = arith.constant dense<0.000000e+00> : vector<128xf32>
    %87 = vector.multi_reduction <add>, %84, %cst_71 [0] : vector<256x128xf32> to vector<128xf32>
    %88 = vector.shape_cast %87 : vector<128xf32> to vector<1x128xf32>
    %89 = arith.mulf %84, %84 : vector<256x128xf32>
    %cst_72 = arith.constant dense<0.000000e+00> : vector<128xf32>
    %90 = vector.multi_reduction <add>, %89, %cst_72 [0] : vector<256x128xf32> to vector<128xf32>
    %91 = vector.shape_cast %90 : vector<128xf32> to vector<1x128xf32>
    %cst_73 = arith.constant 0.000000e+00 : f32
    %92 = vector.broadcast %cst_73 : f32 to vector<6x128xf32>
    %93 = tpu.concatenate %88, %91, %92 in 0 : vector<1x128xf32>, vector<1x128xf32>, vector<6x128xf32> -> vector<8x128xf32>
    %c0_74 = arith.constant 0 : index
    %c0_75 = arith.constant 0 : index
    %c0_76 = arith.constant 0 : index
    %94 = vector.load %arg6[%c0_74, %c0_75, %c0_76] : memref<1x8x128xf32, #tpu.memory_space<vmem>>, vector<1x8x128xf32>
    %95 = vector.shape_cast %94 : vector<1x8x128xf32> to vector<8x128xf32>
    %96 = vector.shape_cast %93 : vector<8x128xf32> to vector<1x8x128xf32>
    tpu.vector_store %arg6[%c0_74, %c0_75, %c0_76], %96 {strides = array<i32>} : memref<1x8x128xf32, #tpu.memory_space<vmem>>, vector<1x8x128xf32>,
    return
  }
  func.func @transform_0(%arg0: i32) -> (i32, i32, i32, i32) {
    %c0_i32 = arith.constant 0 : i32
    %c0_i32_0 = arith.constant 0 : i32
    %c0_i32_1 = arith.constant 0 : i32
    %c0_i32_2 = arith.constant 0 : i32
    return %arg0, %c0_i32, %c0_i32_0, %c0_i32_1 : i32, i32, i32, i32
  }
  func.func @transform_1(%arg0: i32) -> (i32, i32) {
    %c0_i32 = arith.constant 0 : i32
    %c0_i32_0 = arith.constant 0 : i32
    %c0_i32_1 = arith.constant 0 : i32
    return %c0_i32, %c0_i32_0 : i32, i32
  }
  func.func @transform_2(%arg0: i32) -> (i32, i32) {
    %c0_i32 = arith.constant 0 : i32
    %c0_i32_0 = arith.constant 0 : i32
    %c0_i32_1 = arith.constant 0 : i32
    return %c0_i32, %c0_i32_0 : i32, i32
  }
  func.func @transform_3(%arg0: i32) -> (i32, i32, i32) {
    %c0_i32 = arith.constant 0 : i32
    %c0_i32_0 = arith.constant 0 : i32
    %c0_i32_1 = arith.constant 0 : i32
    %c0_i32_2 = arith.constant 0 : i32
    return %c0_i32, %c0_i32_0, %c0_i32_1 : i32, i32, i32
  }
  func.func @transform_4(%arg0: i32) -> (i32, i32) {
    %c0_i32 = arith.constant 0 : i32
    %c0_i32_0 = arith.constant 0 : i32
    return %arg0, %c0_i32 : i32, i32
  }
  func.func @transform_5(%arg0: i32) -> (i32, i32, i32) {
    %c0_i32 = arith.constant 0 : i32
    %c0_i32_0 = arith.constant 0 : i32
    %c0_i32_1 = arith.constant 0 : i32
    return %arg0, %c0_i32, %c0_i32_0 : i32, i32, i32
  }
}

module attributes {stable_mosaic.version = 11 : i64} {
  func.func @_matmul_stats_kernel(%arg0: i32, %arg1: memref<256x4xbf16, #tpu.memory_space<vmem>>, %arg2: memref<4x128xbf16, #tpu.memory_space<vmem>>, %arg3: memref<256x128xbf16, #tpu.memory_space<vmem>>, %arg4: memref<1x8x128xf32, #tpu.memory_space<vmem>>) attributes {dimension_semantics = [#tpu.dimension_semantics<parallel>], iteration_bounds = array<i64: 2>, scalar_prefetch = 0 : i64, scratch_operands = 0 : i64, tpu.core_type = #tpu.core_type<tc>, window_params = [{transform_indices = @transform_0, window_bounds = array<i64: 256, 4>}, {pipeline_mode = #tpu.pipeline_mode<synchronous>, transform_indices = @transform_1, window_bounds = array<i64: 4, 128>}, {transform_indices = @transform_2, window_bounds = array<i64: 256, 128>}, {transform_indices = @transform_3, window_bounds = array<i64: 1, 8, 128>}]} {
    %c0 = arith.constant 0 : index
    %c0_0 = arith.constant 0 : index
    %0 = vector.load %arg1[%c0, %c0_0] : memref<256x4xbf16, #tpu.memory_space<vmem>>, vector<256x4xbf16>
    %c0_1 = arith.constant 0 : index
    %c0_2 = arith.constant 0 : index
    %1 = vector.load %arg2[%c0_1, %c0_2] : memref<4x128xbf16, #tpu.memory_space<vmem>>, vector<4x128xbf16>
    %cst = arith.constant dense<0.000000e+00> : vector<256x128xf32>
    %2 = tpu.matmul %0, %1, %cst {dimension_numbers = #tpu.dot_dimension_numbers<[1], [0], [0], [1], [0, 0, 1, 1], [], []>} : vector<256x4xbf16>, vector<4x128xbf16>, vector<256x128xf32> -> vector<256x128xf32>
    %3 = arith.truncf %2 : vector<256x128xf32> to vector<256x128xbf16>
    %c0_3 = arith.constant 0 : index
    %c0_4 = arith.constant 0 : index
    %4 = vector.load %arg3[%c0_3, %c0_4] : memref<256x128xbf16, #tpu.memory_space<vmem>>, vector<256x128xbf16>
    tpu.vector_store %arg3[%c0_3, %c0_4], %3 {strides = array<i32>} : memref<256x128xbf16, #tpu.memory_space<vmem>>, vector<256x128xbf16>,
    %cst_5 = arith.constant dense<0.000000e+00> : vector<128xf32>
    %5 = vector.multi_reduction <add>, %2, %cst_5 [0] : vector<256x128xf32> to vector<128xf32>
    %6 = vector.shape_cast %5 : vector<128xf32> to vector<1x128xf32>
    %7 = arith.mulf %2, %2 : vector<256x128xf32>
    %cst_6 = arith.constant dense<0.000000e+00> : vector<128xf32>
    %8 = vector.multi_reduction <add>, %7, %cst_6 [0] : vector<256x128xf32> to vector<128xf32>
    %9 = vector.shape_cast %8 : vector<128xf32> to vector<1x128xf32>
    %cst_7 = arith.constant 0.000000e+00 : f32
    %10 = vector.broadcast %cst_7 : f32 to vector<6x128xf32>
    %11 = tpu.concatenate %6, %9, %10 in 0 : vector<1x128xf32>, vector<1x128xf32>, vector<6x128xf32> -> vector<8x128xf32>
    %c0_8 = arith.constant 0 : index
    %c0_9 = arith.constant 0 : index
    %c0_10 = arith.constant 0 : index
    %12 = vector.load %arg4[%c0_8, %c0_9, %c0_10] : memref<1x8x128xf32, #tpu.memory_space<vmem>>, vector<1x8x128xf32>
    %13 = vector.shape_cast %12 : vector<1x8x128xf32> to vector<8x128xf32>
    %14 = vector.shape_cast %11 : vector<8x128xf32> to vector<1x8x128xf32>
    tpu.vector_store %arg4[%c0_8, %c0_9, %c0_10], %14 {strides = array<i32>} : memref<1x8x128xf32, #tpu.memory_space<vmem>>, vector<1x8x128xf32>,
    return
  }
  func.func @transform_0(%arg0: i32) -> (i32, i32) {
    %c0_i32 = arith.constant 0 : i32
    %c0_i32_0 = arith.constant 0 : i32
    return %arg0, %c0_i32 : i32, i32
  }
  func.func @transform_1(%arg0: i32) -> (i32, i32) {
    %c0_i32 = arith.constant 0 : i32
    %c0_i32_0 = arith.constant 0 : i32
    %c0_i32_1 = arith.constant 0 : i32
    return %c0_i32, %c0_i32_0 : i32, i32
  }
  func.func @transform_2(%arg0: i32) -> (i32, i32) {
    %c0_i32 = arith.constant 0 : i32
    %c0_i32_0 = arith.constant 0 : i32
    return %arg0, %c0_i32 : i32, i32
  }
  func.func @transform_3(%arg0: i32) -> (i32, i32, i32) {
    %c0_i32 = arith.constant 0 : i32
    %c0_i32_0 = arith.constant 0 : i32
    %c0_i32_1 = arith.constant 0 : i32
    return %arg0, %c0_i32, %c0_i32_0 : i32, i32, i32
  }
}

module attributes {stable_mosaic.version = 11 : i64} {
  func.func @kernel(%arg0: i32, %arg1: memref<256x128xbf16, #tpu.memory_space<vmem>>, %arg2: memref<1x128xf32, #tpu.memory_space<vmem>>, %arg3: memref<1x128xf32, #tpu.memory_space<vmem>>, %arg4: memref<256x128xbf16, #tpu.memory_space<vmem>>, %arg5: memref<1x128xf32, #tpu.memory_space<vmem>>, %arg6: memref<1x128xf32, #tpu.memory_space<vmem>>, %arg7: memref<256x128xbf16, #tpu.memory_space<vmem>>) attributes {dimension_semantics = [#tpu.dimension_semantics<parallel>], iteration_bounds = array<i64: 2>, scalar_prefetch = 0 : i64, scratch_operands = 0 : i64, tpu.core_type = #tpu.core_type<tc>, window_params = [{transform_indices = @transform_0, window_bounds = array<i64: 256, 128>}, {pipeline_mode = #tpu.pipeline_mode<synchronous>, transform_indices = @transform_1, window_bounds = array<i64: 1, 128>}, {pipeline_mode = #tpu.pipeline_mode<synchronous>, transform_indices = @transform_2, window_bounds = array<i64: 1, 128>}, {transform_indices = @transform_3, window_bounds = array<i64: 256, 128>}, {pipeline_mode = #tpu.pipeline_mode<synchronous>, transform_indices = @transform_4, window_bounds = array<i64: 1, 128>}, {pipeline_mode = #tpu.pipeline_mode<synchronous>, transform_indices = @transform_5, window_bounds = array<i64: 1, 128>}, {transform_indices = @transform_6, window_bounds = array<i64: 256, 128>}]} {
    %c0 = arith.constant 0 : index
    %c0_0 = arith.constant 0 : index
    %0 = vector.load %arg1[%c0, %c0_0] : memref<256x128xbf16, #tpu.memory_space<vmem>>, vector<256x128xbf16>
    %1 = arith.extf %0 : vector<256x128xbf16> to vector<256x128xf32>
    %c0_1 = arith.constant 0 : index
    %c0_2 = arith.constant 0 : index
    %2 = vector.load %arg2[%c0_1, %c0_2] : memref<1x128xf32, #tpu.memory_space<vmem>>, vector<1x128xf32>
    %3 = vector.broadcast %2 : vector<1x128xf32> to vector<256x128xf32>
    %4 = arith.mulf %1, %3 : vector<256x128xf32>
    %c0_3 = arith.constant 0 : index
    %c0_4 = arith.constant 0 : index
    %5 = vector.load %arg3[%c0_3, %c0_4] : memref<1x128xf32, #tpu.memory_space<vmem>>, vector<1x128xf32>
    %6 = vector.broadcast %5 : vector<1x128xf32> to vector<256x128xf32>
    %7 = arith.addf %4, %6 : vector<256x128xf32>
    %c0_5 = arith.constant 0 : index
    %c0_6 = arith.constant 0 : index
    %8 = vector.load %arg4[%c0_5, %c0_6] : memref<256x128xbf16, #tpu.memory_space<vmem>>, vector<256x128xbf16>
    %9 = arith.extf %8 : vector<256x128xbf16> to vector<256x128xf32>
    %c0_7 = arith.constant 0 : index
    %c0_8 = arith.constant 0 : index
    %10 = vector.load %arg5[%c0_7, %c0_8] : memref<1x128xf32, #tpu.memory_space<vmem>>, vector<1x128xf32>
    %11 = vector.broadcast %10 : vector<1x128xf32> to vector<256x128xf32>
    %12 = arith.mulf %9, %11 : vector<256x128xf32>
    %c0_9 = arith.constant 0 : index
    %c0_10 = arith.constant 0 : index
    %13 = vector.load %arg6[%c0_9, %c0_10] : memref<1x128xf32, #tpu.memory_space<vmem>>, vector<1x128xf32>
    %14 = vector.broadcast %13 : vector<1x128xf32> to vector<256x128xf32>
    %15 = arith.addf %12, %14 : vector<256x128xf32>
    %16 = arith.addf %7, %15 : vector<256x128xf32>
    %cst = arith.constant 0.000000e+00 : f32
    %17 = vector.broadcast %cst : f32 to vector<256x128xf32>
    %18 = arith.maximumf %16, %17 : vector<256x128xf32>
    %19 = arith.truncf %18 : vector<256x128xf32> to vector<256x128xbf16>
    %c0_11 = arith.constant 0 : index
    %c0_12 = arith.constant 0 : index
    %20 = vector.load %arg7[%c0_11, %c0_12] : memref<256x128xbf16, #tpu.memory_space<vmem>>, vector<256x128xbf16>
    tpu.vector_store %arg7[%c0_11, %c0_12], %19 {strides = array<i32>} : memref<256x128xbf16, #tpu.memory_space<vmem>>, vector<256x128xbf16>,
    return
  }
  func.func @transform_0(%arg0: i32) -> (i32, i32) {
    %c0_i32 = arith.constant 0 : i32
    %c0_i32_0 = arith.constant 0 : i32
    return %arg0, %c0_i32 : i32, i32
  }
  func.func @transform_1(%arg0: i32) -> (i32, i32) {
    %c0_i32 = arith.constant 0 : i32
    %c0_i32_0 = arith.constant 0 : i32
    %c0_i32_1 = arith.constant 0 : i32
    return %c0_i32, %c0_i32_0 : i32, i32
  }
  func.func @transform_2(%arg0: i32) -> (i32, i32) {
    %c0_i32 = arith.constant 0 : i32
    %c0_i32_0 = arith.constant 0 : i32
    %c0_i32_1 = arith.constant 0 : i32
    return %c0_i32, %c0_i32_0 : i32, i32
  }
  func.func @transform_3(%arg0: i32) -> (i32, i32) {
    %c0_i32 = arith.constant 0 : i32
    %c0_i32_0 = arith.constant 0 : i32
    return %arg0, %c0_i32 : i32, i32
  }
  func.func @transform_4(%arg0: i32) -> (i32, i32) {
    %c0_i32 = arith.constant 0 : i32
    %c0_i32_0 = arith.constant 0 : i32
    %c0_i32_1 = arith.constant 0 : i32
    return %c0_i32, %c0_i32_0 : i32, i32
  }
  func.func @transform_5(%arg0: i32) -> (i32, i32) {
    %c0_i32 = arith.constant 0 : i32
    %c0_i32_0 = arith.constant 0 : i32
    %c0_i32_1 = arith.constant 0 : i32
    return %c0_i32, %c0_i32_0 : i32, i32
  }
  func.func @transform_6(%arg0: i32) -> (i32, i32) {
    %c0_i32 = arith.constant 0 : i32
    %c0_i32_0 = arith.constant 0 : i32
    return %arg0, %c0_i32 : i32, i32
  }
}

</mosaic_0001>

<bundles_post_ra>
// kernel: basic_block_forward.6
= control target key start
LH: loop header
LB: loop body
LE: loop exit
PB: predicated region body
PF: predicated region fallthrough
CT: control target
= control target key end

     0   :  { %s1180_s12 = smov 0   ;;  %s1331_s0 = inlined_call_operand.vmem [shape: bf16[512,4], index: 0, kind: input, shape index: {}]   ;;  %s1332_s1 = inlined_call_operand.vmem [shape: bf16[4,128], index: 1, kind: input, shape index: {}]   ;;  %s1333_s2 = inlined_call_operand.vmem [shape: bf16[512,128], index: 2, kind: output, shape index: {0}]   ;;  %s1334_s3 = inlined_call_operand.vmem [shape: f32[2,8,128], index: 3, kind: output, shape index: {1}]  }
   0x1 LB: > { %s1186_s13 = sadd.s32 4294967295, %s1158_s12   ;;  %p874_p0 = scmp.ge.s32.totalorder %s1158_s12, 1  ;;  %s1158_s12 = sphi %s1180_s12, %s14_s12  }
   0x2   : > { %p141_p1 = scmp.lt.s32.totalorder %s1158_s12, 3 }
   0x4   : > { %p142_p2 = pnand %p874_p0, %p141_p1 }
   0x5   : > { %v218_v0 = vld [vmem:[%s1332_s1] sm:$0x3] (!%p142_p2)  ;;  %vm348_vm0 = vcmask (!%p142_p2), 1041408   ;;  %s875_s16 = sshll.u32 (!%p142_p2), %s1186_s13, 5  ;;  %vm299_vm1 = vcmask (!%p142_p2), 31744   ;;  %p181_p4 = scmp.lt.s32.totalorder (!%p142_p2), %s1186_s13, 1 }
   0x6   : > { %145 = sbr.rel (%p142_p2) target bundleno = 312 (0x138), region = 28  ;;  %1126 = vmatprep.subr.msk.bf16.mxu0 (!%p142_p2), %vm348_vm0, %v218_v0  ;;  %v350_v1 = vsel (!%p142_p2), %vm348_vm0, %v218_v0, 0  ;;  %p170_p3 = scmp.lt.s32.totalorder (!%p142_p2), %s875_s16, 63  ;;  %1127 = vmatprep.subr.msk.bf16.mxu1 (!%p142_p2), %vm348_vm0, %v218_v0  ;;  %vm779_vm2 = vcmask (!%p142_p2), 1040384  }
   0x7   : > { %1091 = vmatpush3.bf16.msra.mxu0 (!%p142_p2), %v350_v1  ;;  %1125 = vmatpush3.bf16.msra.mxu1 (!%p142_p2), %v350_v1 }
   0xd   : > { %s1336_s16 = smov (!%p170_p3, %s875_s16), 63  ;;  %s1338_s13 = smov (!%p181_p4, %s1186_s13), 1 }
   0xe   : > { %s876_s17 = sshll.u32 %s1336_s16, 2  ;;  %s879_s24 = sshll.u32 %s1338_s13, 3 }
   0xf   : > { %s1205_s20 = scalar_lea.vmem %s1331_s0, %s876_s17  ;;  %s1244_s23 = scalar_lea.vmem %s1333_s2, %s876_s17 }
  0x10   : > { %v1136_v2 = vld [vmem:[%s1205_s20] sm:$0xff]   ;;  %v1137_v3 = vld [vmem:[%s1205_s20 + $0x8] sm:$0xff]   ;;  %v1138_v4 = vld [vmem:[%s1205_s20 + $0x10] sm:$0xff]   ;;  %s184_s27 = scalar_lea.vmem %s1334_s3, %s879_s24 }
  0x11   : > { %1092 = vmatprep.mubr.msk.bf16.mxu0 %vm299_vm1, %v1136_v2  ;;  %v1139_v5 = vld [vmem:[%s1205_s20 + $0x18] sm:$0xff]   ;;  %v1140_v6 = vld [vmem:[%s1205_s20 + $0x20] sm:$0xff]   ;;  %v1145_v8 = vld [vmem:[%s1205_s20 + $0x48] sm:$0xff]  }
  0x12   : > { %1093 = vmatmul.mubr.msk.bf16.vlgmr.msra.gmra.mrb[0].mxu0 %vm299_vm1, %v1137_v3  ;;  %v1144_v7 = vld [vmem:[%s1205_s20 + $0x40] sm:$0xff]   ;;  %v1146_v9 = vld [vmem:[%s1205_s20 + $0x50] sm:$0xff]   ;;  %v1141_v10 = vld [vmem:[%s1205_s20 + $0x28] sm:$0xff]  }
  0x13   : > { %1096 = vmatprep.mubr.msk.bf16.mxu0 %vm299_vm1, %v1138_v4  ;;  %1108 = vmatprep.mubr.msk.bf16.mxu1 %vm299_vm1, %v1144_v7  ;;  %v1147_v11 = vld [vmem:[%s1205_s20 + $0x58] sm:$0xff]   ;;  %v1142_v12 = vld [vmem:[%s1205_s20 + $0x30] sm:$0xff]   ;;  %v1148_v13 = vld [vmem:[%s1205_s20 + $0x60] sm:$0xff]  }
  0x14   : > { %1109 = vmatmul.mubr.msk.bf16.vlgmr.msra.gmra.mrb[0].mxu1 %vm299_vm1, %v1145_v8  ;;  %v1143_v14 = vld [vmem:[%s1205_s20 + $0x38] sm:$0xff]   ;;  %v1149_v15 = vld [vmem:[%s1205_s20 + $0x68] sm:$0xff]   ;;  %v1150_v16 = vld [vmem:[%s1205_s20 + $0x70] sm:$0xff]  }
  0x15   : > { %1112 = vmatprep.mubr.msk.bf16.mxu1 %vm299_vm1, %v1146_v9  ;;  %v1151_v17 = vld [vmem:[%s1205_s20 + $0x78] sm:$0xff]  }
  0x1a   : > { %1097 = vmatmul.mubr.msk.bf16.gmra.mrb[4].mxu0 %vm299_vm1, %v1139_v5 }
  0x1b   : > { %1100 = vmatprep.mubr.msk.bf16.mxu0 %vm299_vm1, %v1140_v6 }
  0x1c   : > { %1113 = vmatmul.mubr.msk.bf16.gmra.mrb[4].mxu1 %vm299_vm1, %v1147_v11 }
  0x1d   : > { %1116 = vmatprep.mubr.msk.bf16.mxu1 %vm299_vm1, %v1148_v13 }
  0x22   : > { %1101 = vmatmul.mubr.msk.bf16.gmra.mrb[8].mxu0 %vm299_vm1, %v1141_v10 }
  0x23   : > { %1104 = vmatprep.mubr.msk.bf16.mxu0 %vm299_vm1, %v1142_v12 }
  0x24   : > { %1117 = vmatmul.mubr.msk.bf16.gmra.mrb[8].mxu1 %vm299_vm1, %v1149_v15 }
  0x25   : > { %1120 = vmatprep.mubr.msk.bf16.mxu1 %vm299_vm1, %v1150_v16 }
  0x2a   : > { %1105 = vmatmul.mubr.msk.bf16.gmra.mrb[12].mxu0 %vm299_vm1, %v1143_v14 }
  0x2c   : > { %1121 = vmatmul.mubr.msk.bf16.gmra.mrb[12].mxu1 %vm299_vm1, %v1151_v17 }
  0xe5   : > { %v1094_v18 = vpop.f32.mrb[0].mxu0 }
  0xe6   : > { %v386_v19 = vpop.f32.mrb[1].mxu0  ;;  %v712_v27 = vmul.f32 %v1094_v18, %v1094_v18 }
  0xe7   : > { %v1095_v20 = vpop.f32.mrb[2].mxu0  ;;  %v710_v23 = vmul.f32 %v386_v19, %v386_v19  ;;  %v1248_v34 = vpop.f32.mrb[0].mxu1 }
  0xe8   : > { %v986_v21 = vpack.c.bf16 %v1095_v20, %v1094_v18  ;;  %v389_v22 = vpop.f32.mrb[3].mxu0  ;;  %v713_v30 = vmul.f32 %v1095_v20, %v1095_v20  ;;  %v1250_v36 = vpop.f32.mrb[1].mxu1 }
  0xe9   : > { %v981_v24 = vpack.c.bf16 %v389_v22, %v386_v19  ;;  %v673_v25 = vadd.f32 %v389_v22, %v386_v19  ;;  %v711_v26 = vmul.f32 %v389_v22, %v389_v22  ;;  %v1252_v41 = vpop.f32.mrb[2].mxu1 }
  0xea   : > { %1058 = vst [vmem:[%s1244_s23 + $0x8] sm:$0xff] %v986_v21   ;;  %v1026_v44 = vpack.c.bf16 %v1252_v41, %v1248_v34  ;;  %v1256_v45 = vpop.f32.mrb[3].mxu1 }
  0xeb   : > { %982 = vst [vmem:[%s1244_s23] sm:$0xff] %v981_v24   ;;  %v674_v28 = vadd.f32 %v1094_v18, %v673_v25  ;;  %v742_v29 = vadd.f32 %v711_v26, %v710_v23  ;;  %v1021_v50 = vpack.c.bf16 %v1256_v45, %v1250_v36 }
  0xec   : > { %1066 = vst [vmem:[%s1244_s23 + $0x48] sm:$0xff] %v1026_v44   ;;  %v726_v44 = vmul.f32 %v1250_v36, %v1250_v36 }
  0xed   : > { %v743_v31 = vadd.f32 %v742_v29, %v712_v27  ;;  %v1098_v32 = vpop.f32.mrb[4].mxu0  ;;  %v675_v33 = vadd.f32 %v1095_v20, %v674_v28  ;;  %1065 = vst [vmem:[%s1244_s23 + $0x40] sm:$0xff] %v1021_v50  }
  0xee   : > { %v402_v35 = vpop.f32.mrb[5].mxu0  ;;  %v716_v51 = vmul.f32 %v1098_v32, %v1098_v32 }
  0xef   : > { %v676_v37 = vadd.f32 %v675_v33, %v402_v35  ;;  %v714_v38 = vmul.f32 %v402_v35, %v402_v35  ;;  %v744_v39 = vadd.f32 %v743_v31, %v713_v30  ;;  %v1099_v40 = vpop.f32.mrb[6].mxu0  ;;  %v1264_v58 = vpop.f32.mrb[4].mxu1 }
  0xf0   : > { %v996_v42 = vpack.c.bf16 %v1099_v40, %v1098_v32  ;;  %v405_v43 = vpop.f32.mrb[7].mxu0  ;;  %v717_v54 = vmul.f32 %v1099_v40, %v1099_v40  ;;  %v1266_v60 = vpop.f32.mrb[5].mxu1 }
  0xf1   : > { %v745_v46 = vadd.f32 %v744_v39, %v714_v38  ;;  %v991_v47 = vpack.c.bf16 %v405_v43, %v402_v35  ;;  %v677_v48 = vadd.f32 %v676_v37, %v405_v43  ;;  %v715_v49 = vmul.f32 %v405_v43, %v405_v43  ;;  %v1268_v1 = vpop.f32.mrb[6].mxu1 }
  0xf2   : > { %1060 = vst [vmem:[%s1244_s23 + $0x18] sm:$0xff] %v996_v42   ;;  %v1036_v4 = vpack.c.bf16 %v1268_v1, %v1264_v58  ;;  %v1272_v5 = vpop.f32.mrb[7].mxu1 }
  0xf3   : > { %1059 = vst [vmem:[%s1244_s23 + $0x10] sm:$0xff] %v991_v47   ;;  %v678_v52 = vadd.f32 %v1098_v32, %v677_v48  ;;  %v746_v53 = vadd.f32 %v745_v46, %v715_v49  ;;  %v1031_v10 = vpack.c.bf16 %v1272_v5, %v1266_v60 }
  0xf4   : > { %1068 = vst [vmem:[%s1244_s23 + $0x58] sm:$0xff] %v1036_v4  }
  0xf5   : > { %v747_v55 = vadd.f32 %v746_v53, %v716_v51  ;;  %v1102_v56 = vpop.f32.mrb[8].mxu0  ;;  %v679_v57 = vadd.f32 %v1099_v40, %v678_v52  ;;  %1067 = vst [vmem:[%s1244_s23 + $0x50] sm:$0xff] %v1031_v10  }
  0xf6   : > { %v418_v59 = vpop.f32.mrb[9].mxu0  ;;  %v720_v11 = vmul.f32 %v1102_v56, %v1102_v56 }
  0xf7   : > { %v680_v61 = vadd.f32 %v679_v57, %v418_v59  ;;  %v718_v62 = vmul.f32 %v418_v59, %v418_v59  ;;  %v748_v63 = vadd.f32 %v747_v55, %v717_v54  ;;  %v1103_v0 = vpop.f32.mrb[10].mxu0  ;;  %v1280_v18 = vpop.f32.mrb[8].mxu1  ;;  %v727_v55 = vmul.f32 %v1256_v45, %v1256_v45 }
  0xf8   : > { %v1006_v2 = vpack.c.bf16 %v1103_v0, %v1102_v56  ;;  %v421_v3 = vpop.f32.mrb[11].mxu0  ;;  %v721_v14 = vmul.f32 %v1103_v0, %v1103_v0  ;;  %v482_v20 = vpop.f32.mrb[9].mxu1  ;;  %v728_v57 = vmul.f32 %v1248_v34, %v1248_v34 }
  0xf9   : > { %v749_v6 = vadd.f32 %v748_v63, %v718_v62  ;;  %v1001_v7 = vpack.c.bf16 %v421_v3, %v418_v59  ;;  %v681_v8 = vadd.f32 %v680_v61, %v421_v3  ;;  %v719_v9 = vmul.f32 %v421_v3, %v421_v3  ;;  %v1282_v25 = vpop.f32.mrb[10].mxu1 }
  0xfa   : > { %1062 = vst [vmem:[%s1244_s23 + $0x28] sm:$0xff] %v1006_v2   ;;  %v1046_v28 = vpack.c.bf16 %v1282_v25, %v1280_v18  ;;  %v485_v29 = vpop.f32.mrb[11].mxu1 }
  0xfb   : > { %1061 = vst [vmem:[%s1244_s23 + $0x20] sm:$0xff] %v1001_v7   ;;  %v682_v12 = vadd.f32 %v1102_v56, %v681_v8  ;;  %v750_v13 = vadd.f32 %v749_v6, %v719_v9  ;;  %v1041_v35 = vpack.c.bf16 %v485_v29, %v482_v20  ;;  %v732_v6 = vmul.f32 %v1264_v58, %v1264_v58 }
  0xfc   : > { %1070 = vst [vmem:[%s1244_s23 + $0x68] sm:$0xff] %v1046_v28  }
  0xfd   : > { %v751_v15 = vadd.f32 %v750_v13, %v720_v11  ;;  %v1106_v16 = vpop.f32.mrb[12].mxu0  ;;  %v683_v17 = vadd.f32 %v1103_v0, %v682_v12  ;;  %1069 = vst [vmem:[%s1244_s23 + $0x60] sm:$0xff] %v1041_v35   ;;  %v730_v0 = vmul.f32 %v1266_v60, %v1266_v60 }
  0xfe   : > { %v434_v19 = vpop.f32.mrb[13].mxu0  ;;  %v724_v37 = vmul.f32 %v1106_v16, %v1106_v16 }
  0xff   : > { %v684_v21 = vadd.f32 %v683_v17, %v434_v19  ;;  %v722_v22 = vmul.f32 %v434_v19, %v434_v19  ;;  %v752_v23 = vadd.f32 %v751_v15, %v721_v14  ;;  %v1107_v24 = vpop.f32.mrb[14].mxu0  ;;  %v1122_v46 = vpop.f32.mrb[12].mxu1  ;;  %v735_v15 = vmul.f32 %v485_v29, %v485_v29 }
 0x100   : > { %v1016_v26 = vpack.c.bf16 %v1107_v24, %v1106_v16  ;;  %v437_v27 = vpop.f32.mrb[15].mxu0  ;;  %v725_v40 = vmul.f32 %v1107_v24, %v1107_v24  ;;  %v498_v47 = vpop.f32.mrb[13].mxu1 }
 0x101   : > { %v753_v30 = vadd.f32 %v752_v23, %v722_v22  ;;  %v1011_v31 = vpack.c.bf16 %v437_v27, %v434_v19  ;;  %v685_v32 = vadd.f32 %v684_v21, %v437_v27  ;;  %v723_v33 = vmul.f32 %v437_v27, %v437_v27  ;;  %v1123_v50 = vpop.f32.mrb[14].mxu1 }
 0x102   : > { %1064 = vst [vmem:[%s1244_s23 + $0x38] sm:$0xff] %v1016_v26   ;;  %v1056_v51 = vpack.c.bf16 %v1123_v50, %v1122_v46  ;;  %v501_v52 = vpop.f32.mrb[15].mxu1  ;;  %v740_v27 = vmul.f32 %v1122_v46, %v1122_v46 }
 0x103   : > { %1063 = vst [vmem:[%s1244_s23 + $0x30] sm:$0xff] %v1011_v31   ;;  %v686_v38 = vadd.f32 %v1106_v16, %v685_v32  ;;  %v754_v39 = vadd.f32 %v753_v30, %v723_v33  ;;  %v1051_v56 = vpack.c.bf16 %v501_v52, %v498_v47  ;;  %v739_v26 = vmul.f32 %v501_v52, %v501_v52 }
 0x104   : > { %1072 = vst [vmem:[%s1244_s23 + $0x78] sm:$0xff] %v1056_v51   ;;  %v741_v30 = vmul.f32 %v1123_v50, %v1123_v50 }
 0x105   : > { %v755_v42 = vadd.f32 %v754_v39, %v724_v37  ;;  %v687_v43 = vadd.f32 %v1107_v24, %v686_v38  ;;  %1071 = vst [vmem:[%s1244_s23 + $0x70] sm:$0xff] %v1051_v56  }
 0x107   : > { %v688_v48 = vadd.f32 %v687_v43, %v1250_v36  ;;  %v756_v49 = vadd.f32 %v755_v42, %v725_v40  ;;  %v729_v36 = vmul.f32 %v1252_v41, %v1252_v41 }
 0x109   : > { %v757_v53 = vadd.f32 %v756_v49, %v726_v44  ;;  %v689_v54 = vadd.f32 %v688_v48, %v1256_v45 }
 0x10b   : > { %v690_v59 = vadd.f32 %v1248_v34, %v689_v54  ;;  %v758_v61 = vadd.f32 %v757_v53, %v727_v55  ;;  %v731_v34 = vmul.f32 %v1272_v5, %v1272_v5 }
 0x10d   : > { %v759_v62 = vadd.f32 %v758_v61, %v728_v57  ;;  %v691_v63 = vadd.f32 %v1252_v41, %v690_v59  ;;  %v733_v41 = vmul.f32 %v1268_v1, %v1268_v1 }
 0x10f   : > { %v692_v45 = vadd.f32 %v691_v63, %v1266_v60  ;;  %v760_v2 = vadd.f32 %v759_v62, %v729_v36  ;;  %v734_v60 = vmul.f32 %v482_v20, %v482_v20 }
 0x111   : > { %v761_v3 = vadd.f32 %v760_v2, %v730_v0  ;;  %v693_v4 = vadd.f32 %v692_v45, %v1272_v5  ;;  %v736_v5 = vmul.f32 %v1280_v18, %v1280_v18 }
 0x113   : > { %v694_v7 = vadd.f32 %v1264_v58, %v693_v4  ;;  %v762_v8 = vadd.f32 %v761_v3, %v731_v34  ;;  %v737_v58 = vmul.f32 %v1282_v25, %v1282_v25 }
 0x115   : > { %v763_v9 = vadd.f32 %v762_v8, %v732_v6  ;;  %v695_v10 = vadd.f32 %v1268_v1, %v694_v7  ;;  %v738_v1 = vmul.f32 %v498_v47, %v498_v47 }
 0x117   : > { %v696_v11 = vadd.f32 %v695_v10, %v482_v20  ;;  %v764_v12 = vadd.f32 %v763_v9, %v733_v41 }
 0x119   : > { %v765_v13 = vadd.f32 %v764_v12, %v734_v60  ;;  %v697_v14 = vadd.f32 %v696_v11, %v485_v29 }
 0x11b   : > { %v698_v16 = vadd.f32 %v1280_v18, %v697_v14  ;;  %v766_v17 = vadd.f32 %v765_v13, %v735_v15 }
 0x11d   : > { %v767_v19 = vadd.f32 %v766_v17, %v736_v5  ;;  %v699_v21 = vadd.f32 %v1282_v25, %v698_v16 }
 0x11f   : > { %v700_v22 = vadd.f32 %v699_v21, %v498_v47  ;;  %v768_v20 = vadd.f32 %v767_v19, %v737_v58 }
 0x121   : > { %v769_v23 = vadd.f32 %v768_v20, %v738_v1  ;;  %v701_v24 = vadd.f32 %v700_v22, %v501_v52 }
 0x123   : > { %v702_v28 = vadd.f32 %v1122_v46, %v701_v24  ;;  %v770_v29 = vadd.f32 %v769_v23, %v739_v26 }
 0x125   : > { %v703_v18 = vadd.f32 %v1123_v50, %v702_v28  ;;  %v771_v31 = vadd.f32 %v770_v29, %v740_v27 }
 0x127   : > { %v704_v32 = vrot.slane %v703_v18, 4  ;;  %v772_v33 = vadd.f32 %v771_v31, %v741_v30 }
 0x129   : > { %v705_v35 = vadd.f32 %v704_v32, %v703_v18  ;;  %v773_v37 = vrot.slane %v772_v33, 4 }
 0x12b   : > { %v706_v38 = vrot.slane %v705_v35, 2  ;;  %v774_v25 = vadd.f32 %v773_v37, %v772_v33 }
 0x12d   : > { %v707_v39 = vadd.f32 %v706_v38, %v705_v35  ;;  %v775_v40 = vrot.slane %v774_v25, 2 }
 0x12f   : > { %v708_v42 = vrot.slane %v707_v39, 1  ;;  %v776_v43 = vadd.f32 %v775_v40, %v774_v25 }
 0x131   : > { %v777_v44 = vrot.slane %v776_v43, 1  ;;  %v709_v46 = vadd.f32 %v708_v42, %v707_v39 }
 0x133   : > { %v778_v47 = vadd.f32 %v777_v44, %v776_v43 }
 0x135   : > { %v780_v48 = vsel %vm779_vm2, %v709_v46, %v778_v47 }
 0x136   : > { %v781_v49 = vsel %vm348_vm0, %v780_v48, 0.0 }
 0x137   : > { %782 = vst [vmem:[%s184_s27] sm:$0xff] %v781_v49 }
 0x138 PF: > { %s14_s12 = sadd.s32 1, %s1158_s12  }
 0x139   : > { %p11_p5 = scmp.ge.s32.totalorder %s14_s12, 4  }
 0x13b   :  { %13 = sbr.rel (!%p11_p5) target bundleno = 1 (0x1), region = 70 }

// kernel: basic_block_forward.7
= control target key start
LH: loop header
LB: loop body
LE: loop exit
PB: predicated region body
PF: predicated region fallthrough
CT: control target
= control target key end

     0   :  { %s1238_s21 = smov 0   ;;  %s1465_s0 = inlined_call_operand.vmem [shape: bf16[512,128], index: 0, kind: input, shape index: {}]   ;;  %s1466_s1 = inlined_call_operand.vmem [shape: f32[1,128], index: 1, kind: input, shape index: {}]   ;;  %s1467_s2 = inlined_call_operand.vmem [shape: f32[1,128], index: 2, kind: input, shape index: {}]   ;;  %s1468_s3 = inlined_call_operand.vmem [shape: bf16[512,128], index: 3, kind: input, shape index: {}]   ;;  %s1469_s4 = inlined_call_operand.vmem [shape: f32[1,128], index: 4, kind: input, shape index: {}]   ;;  %s1470_s5 = inlined_call_operand.vmem [shape: f32[1,128], index: 5, kind: input, shape index: {}]   ;;  %s1471_s6 = inlined_call_operand.vmem [shape: bf16[512,128], index: 6, kind: output, shape index: {}]  }
   0x1 LB: > { %s853_s22 = sadd.s32 4294967295, %s1201_s21   ;;  %p857_p0 = scmp.ge.s32.totalorder %s1201_s21, 1  ;;  %s1201_s21 = sphi %s1238_s21, %s16_s21  }
   0x2   : > { %p224_p1 = scmp.lt.s32.totalorder %s1201_s21, 3 }
   0x4   : > { %p225_p2 = pnand %p857_p0, %p224_p1 }
   0x5   : > { %s858_s23 = sshll.u32 (!%p225_p2), %s853_s22, 5  ;;  %v1263_v0 = vld [vmem:[%s1466_s1] ss:$0 sm:$0xff] (!%p225_p2) }
   0x6   : > { %228 = sbr.rel (%p225_p2) target bundleno = 93 (0x5d), region = 44  ;;  %p260_p3 = scmp.lt.s32.totalorder (!%p225_p2), %s858_s23, 63  ;;  %v1268_v1 = vld [vmem:[%s1469_s4] ss:$0 sm:$0xff] (!%p225_p2) }
   0x7   : > { %v1277_v10 = vld [vmem:[%s1467_s2] ss:$0 sm:$0xff] (!%p225_p2) }
   0x8   : > { %v1282_v11 = vld [vmem:[%s1470_s5] ss:$0 sm:$0xff] (!%p225_p2) }
   0xd   : > { %s1473_s23 = smov (!%p260_p3, %s858_s23), 63 }
   0xe   : > { %s1246_s24 = sshll.u32 %s1473_s23, 2 }
   0xf   : > { %s1252_s27 = scalar_lea.vmem %s1465_s0, %s1246_s24  ;;  %s1258_s30 = scalar_lea.vmem %s1468_s3, %s1246_s24 }
  0x10   : > { %v935_v2 = vld [vmem:[%s1252_s27] sm:$0xff]   ;;  %v1142_v4 = vld [vmem:[%s1252_s27 + $0x8] sm:$0xff]   ;;  %v1143_v24 = vld [vmem:[%s1252_s27 + $0x10] sm:$0xff]   ;;  %s1309_s17 = scalar_lea.vmem %s1471_s6, %s1246_s24 }
  0x11   : > { %v999_v3 = vld [vmem:[%s1258_s30] sm:$0xff]   ;;  %v936_v5 = vunpack.c.l.bf16 %v935_v2  ;;  %v937_v6 = vunpack.c.h.bf16 %v935_v2  ;;  %v1157_v9 = vld [vmem:[%s1258_s30 + $0x8] sm:$0xff]   ;;  %v940_v12 = vunpack.c.l.bf16 %v1142_v4  ;;  %v941_v13 = vunpack.c.h.bf16 %v1142_v4  ;;  %v1158_v29 = vld [vmem:[%s1258_s30 + $0x10] sm:$0xff]  }
  0x12   : > { %v1000_v7 = vunpack.c.l.bf16 %v999_v3  ;;  %v1001_v8 = vunpack.c.h.bf16 %v999_v3  ;;  %v1004_v14 = vunpack.c.l.bf16 %v1157_v9  ;;  %v1005_v15 = vunpack.c.h.bf16 %v1157_v9  ;;  %v1144_v42 = vld [vmem:[%s1252_s27 + $0x18] sm:$0xff]   ;;  %v1145_v52 = vld [vmem:[%s1252_s27 + $0x20] sm:$0xff]  }
  0x13   : > { %v348_v16 = vmul.f32 %v936_v5, %v1263_v0  ;;  %v349_v17 = vmul.f32 %v937_v6, %v1263_v0  ;;  %v350_v20 = vmul.f32 %v940_v12, %v1263_v0  ;;  %v351_v21 = vmul.f32 %v941_v13, %v1263_v0  ;;  %v1159_v51 = vld [vmem:[%s1258_s30 + $0x18] sm:$0xff]  }
  0x14   : > { %v490_v18 = vmul.f32 %v1000_v7, %v1268_v1  ;;  %v491_v19 = vmul.f32 %v1001_v8, %v1268_v1  ;;  %v492_v22 = vmul.f32 %v1004_v14, %v1268_v1  ;;  %v493_v23 = vmul.f32 %v1005_v15, %v1268_v1  ;;  %v1160_v7 = vld [vmem:[%s1258_s30 + $0x20] sm:$0xff]   ;;  %v1146_v14 = vld [vmem:[%s1252_s27 + $0x28] sm:$0xff]  }
  0x15   : > { %v387_v25 = vadd.f32 %v1277_v10, %v348_v16  ;;  %v388_v26 = vadd.f32 %v1277_v10, %v349_v17  ;;  %v389_v30 = vadd.f32 %v1277_v10, %v350_v20  ;;  %v390_v31 = vadd.f32 %v1277_v10, %v351_v21 }
  0x16   : > { %v529_v27 = vadd.f32 %v1282_v11, %v490_v18  ;;  %v530_v28 = vadd.f32 %v1282_v11, %v491_v19  ;;  %v531_v32 = vadd.f32 %v1282_v11, %v492_v22  ;;  %v532_v33 = vadd.f32 %v1282_v11, %v493_v23  ;;  %v1161_v23 = vld [vmem:[%s1258_s30 + $0x28] sm:$0xff]  }
  0x17   : > { %v944_v36 = vunpack.c.l.bf16 %v1143_v24  ;;  %v945_v37 = vunpack.c.h.bf16 %v1143_v24  ;;  %v1008_v40 = vunpack.c.l.bf16 %v1158_v29  ;;  %v1009_v41 = vunpack.c.h.bf16 %v1158_v29 }
  0x18   : > { %v561_v34 = vadd.f32 %v529_v27, %v387_v25  ;;  %v562_v35 = vadd.f32 %v530_v28, %v388_v26  ;;  %v563_v38 = vadd.f32 %v531_v32, %v389_v30  ;;  %v564_v39 = vadd.f32 %v532_v33, %v390_v31 }
  0x19   : > { %v352_v45 = vmul.f32 %v944_v36, %v1263_v0  ;;  %v353_v46 = vmul.f32 %v945_v37, %v1263_v0  ;;  %v494_v49 = vmul.f32 %v1008_v40, %v1268_v1  ;;  %v495_v50 = vmul.f32 %v1009_v41, %v1268_v1  ;;  %v1147_v36 = vld [vmem:[%s1252_s27 + $0x30] sm:$0xff]  }
  0x1a   : > { %v593_v43 = vmax.f32 %v561_v34, 0.0  ;;  %v594_v44 = vmax.f32 %v562_v35, 0.0  ;;  %v595_v47 = vmax.f32 %v563_v38, 0.0  ;;  %v596_v48 = vmax.f32 %v564_v39, 0.0 }
  0x1b   : > { %v391_v54 = vadd.f32 %v1277_v10, %v352_v45  ;;  %v392_v55 = vadd.f32 %v1277_v10, %v353_v46  ;;  %v948_v56 = vunpack.c.l.bf16 %v1144_v42  ;;  %v533_v58 = vadd.f32 %v1282_v11, %v494_v49  ;;  %v1162_v45 = vld [vmem:[%s1258_s30 + $0x30] sm:$0xff]  }
  0x1c   : > { %v1065_v53 = vpack.c.bf16 %v594_v44, %v593_v43  ;;  %v1070_v57 = vpack.c.bf16 %v596_v48, %v595_v47  ;;  %v534_v59 = vadd.f32 %v1282_v11, %v495_v50  ;;  %v949_v60 = vunpack.c.h.bf16 %v1144_v42 }
  0x1d   : > { %v354_v61 = vmul.f32 %v948_v56, %v1263_v0  ;;  %v1012_v62 = vunpack.c.l.bf16 %v1159_v51  ;;  %v1013_v63 = vunpack.c.h.bf16 %v1159_v51  ;;  %v952_v2 = vunpack.c.l.bf16 %v1145_v52 }
  0x1e   : > { %1066 = vst [vmem:[%s1309_s17] sm:$0xff] %v1065_v53   ;;  %1172 = vst [vmem:[%s1309_s17 + $0x8] sm:$0xff] %v1070_v57   ;;  %v565_v3 = vadd.f32 %v533_v58, %v391_v54  ;;  %v566_v4 = vadd.f32 %v534_v59, %v392_v55  ;;  %v355_v5 = vmul.f32 %v949_v60, %v1263_v0  ;;  %v953_v6 = vunpack.c.h.bf16 %v1145_v52  ;;  %v1148_v54 = vld [vmem:[%s1252_s27 + $0x38] sm:$0xff]  }
  0x1f   : > { %v393_v8 = vadd.f32 %v1277_v10, %v354_v61  ;;  %v496_v9 = vmul.f32 %v1012_v62, %v1268_v1  ;;  %v497_v12 = vmul.f32 %v1013_v63, %v1268_v1  ;;  %v356_v13 = vmul.f32 %v952_v2, %v1263_v0 }
  0x20   : > { %v597_v15 = vmax.f32 %v565_v3, 0.0  ;;  %v598_v16 = vmax.f32 %v566_v4, 0.0  ;;  %v394_v17 = vadd.f32 %v1277_v10, %v355_v5  ;;  %v357_v18 = vmul.f32 %v953_v6, %v1263_v0  ;;  %v1163_v5 = vld [vmem:[%s1258_s30 + $0x38] sm:$0xff]   ;;  %v1149_v6 = vld [vmem:[%s1252_s27 + $0x40] sm:$0xff]  }
  0x21   : > { %v535_v19 = vadd.f32 %v1282_v11, %v496_v9  ;;  %v536_v20 = vadd.f32 %v1282_v11, %v497_v12  ;;  %v395_v21 = vadd.f32 %v1277_v10, %v356_v13  ;;  %v1016_v22 = vunpack.c.l.bf16 %v1160_v7 }
  0x22   : > { %v1075_v24 = vpack.c.bf16 %v598_v16, %v597_v15  ;;  %v396_v25 = vadd.f32 %v1277_v10, %v357_v18  ;;  %v1017_v26 = vunpack.c.h.bf16 %v1160_v7  ;;  %v956_v27 = vunpack.c.l.bf16 %v1146_v14 }
  0x23   : > { %v567_v28 = vadd.f32 %v535_v19, %v393_v8  ;;  %v568_v29 = vadd.f32 %v536_v20, %v394_v17  ;;  %v498_v30 = vmul.f32 %v1016_v22, %v1268_v1  ;;  %v957_v31 = vunpack.c.h.bf16 %v1146_v14 }
  0x24   : > { %1173 = vst [vmem:[%s1309_s17 + $0x10] sm:$0xff] %v1075_v24   ;;  %v499_v32 = vmul.f32 %v1017_v26, %v1268_v1  ;;  %v358_v33 = vmul.f32 %v956_v27, %v1263_v0  ;;  %v1020_v34 = vunpack.c.l.bf16 %v1161_v23  ;;  %v1021_v35 = vunpack.c.h.bf16 %v1161_v23 }
  0x25   : > { %v599_v37 = vmax.f32 %v567_v28, 0.0  ;;  %v600_v38 = vmax.f32 %v568_v29, 0.0  ;;  %v537_v39 = vadd.f32 %v1282_v11, %v498_v30  ;;  %v359_v40 = vmul.f32 %v957_v31, %v1263_v0  ;;  %v1150_v30 = vld [vmem:[%s1252_s27 + $0x48] sm:$0xff]  }
  0x26   : > { %v538_v41 = vadd.f32 %v1282_v11, %v499_v32  ;;  %v397_v42 = vadd.f32 %v1277_v10, %v358_v33  ;;  %v500_v43 = vmul.f32 %v1020_v34, %v1268_v1  ;;  %v501_v44 = vmul.f32 %v1021_v35, %v1268_v1 }
  0x27   : > { %v1080_v46 = vpack.c.bf16 %v600_v38, %v599_v37  ;;  %v569_v47 = vadd.f32 %v537_v39, %v395_v21  ;;  %v398_v48 = vadd.f32 %v1277_v10, %v359_v40  ;;  %v960_v49 = vunpack.c.l.bf16 %v1147_v36  ;;  %v1164_v21 = vld [vmem:[%s1258_s30 + $0x40] sm:$0xff]   ;;  %v1165_v39 = vld [vmem:[%s1258_s30 + $0x48] sm:$0xff]  }
  0x28   : > { %v570_v50 = vadd.f32 %v538_v41, %v396_v25  ;;  %v539_v51 = vadd.f32 %v1282_v11, %v500_v43  ;;  %v540_v52 = vadd.f32 %v1282_v11, %v501_v44  ;;  %v961_v53 = vunpack.c.h.bf16 %v1147_v36 }
  0x29   : > { %1174 = vst [vmem:[%s1309_s17 + $0x18] sm:$0xff] %v1080_v46   ;;  %v601_v55 = vmax.f32 %v569_v47, 0.0  ;;  %v360_v56 = vmul.f32 %v960_v49, %v1263_v0  ;;  %v1024_v57 = vunpack.c.l.bf16 %v1162_v45  ;;  %v1025_v58 = vunpack.c.h.bf16 %v1162_v45 }
  0x2a   : > { %v602_v59 = vmax.f32 %v570_v50, 0.0  ;;  %v571_v60 = vadd.f32 %v539_v51, %v397_v42  ;;  %v572_v61 = vadd.f32 %v540_v52, %v398_v48  ;;  %v361_v62 = vmul.f32 %v961_v53, %v1263_v0  ;;  %v1151_v52 = vld [vmem:[%s1252_s27 + $0x50] sm:$0xff]  }
  0x2b   : > { %v399_v63 = vadd.f32 %v1277_v10, %v360_v56  ;;  %v502_v2 = vmul.f32 %v1024_v57, %v1268_v1  ;;  %v503_v3 = vmul.f32 %v1025_v58, %v1268_v1  ;;  %v964_v4 = vunpack.c.l.bf16 %v1148_v54 }
  0x2c   : > { %v1085_v7 = vpack.c.bf16 %v602_v59, %v601_v55  ;;  %v603_v8 = vmax.f32 %v571_v60, 0.0  ;;  %v604_v9 = vmax.f32 %v572_v61, 0.0  ;;  %v400_v12 = vadd.f32 %v1277_v10, %v361_v62  ;;  %v1166_v61 = vld [vmem:[%s1258_s30 + $0x50] sm:$0xff]  }
  0x2d   : > { %v541_v13 = vadd.f32 %v1282_v11, %v502_v2  ;;  %v542_v14 = vadd.f32 %v1282_v11, %v503_v3  ;;  %v965_v15 = vunpack.c.h.bf16 %v1148_v54  ;;  %v362_v16 = vmul.f32 %v964_v4, %v1263_v0  ;;  %v1152_v4 = vld [vmem:[%s1252_s27 + $0x58] sm:$0xff]  }
  0x2e   : > { %1175 = vst [vmem:[%s1309_s17 + $0x20] sm:$0xff] %v1085_v7   ;;  %v1090_v17 = vpack.c.bf16 %v604_v9, %v603_v8  ;;  %v1028_v18 = vunpack.c.l.bf16 %v1163_v5  ;;  %v1029_v19 = vunpack.c.h.bf16 %v1163_v5  ;;  %v968_v20 = vunpack.c.l.bf16 %v1149_v6 }
  0x2f   : > { %v573_v22 = vadd.f32 %v541_v13, %v399_v63  ;;  %v574_v23 = vadd.f32 %v542_v14, %v400_v12  ;;  %v363_v24 = vmul.f32 %v965_v15, %v1263_v0  ;;  %v401_v25 = vadd.f32 %v1277_v10, %v362_v16 }
  0x30   : > { %1176 = vst [vmem:[%s1309_s17 + $0x28] sm:$0xff] %v1090_v17   ;;  %v504_v26 = vmul.f32 %v1028_v18, %v1268_v1  ;;  %v505_v27 = vmul.f32 %v1029_v19, %v1268_v1  ;;  %v969_v28 = vunpack.c.h.bf16 %v1149_v6  ;;  %v364_v29 = vmul.f32 %v968_v20, %v1263_v0 }
  0x31   : > { %v605_v31 = vmax.f32 %v573_v22, 0.0  ;;  %v606_v32 = vmax.f32 %v574_v23, 0.0  ;;  %v402_v33 = vadd.f32 %v1277_v10, %v363_v24  ;;  %v1032_v34 = vunpack.c.l.bf16 %v1164_v21  ;;  %v1167_v23 = vld [vmem:[%s1258_s30 + $0x58] sm:$0xff]   ;;  %v1153_v24 = vld [vmem:[%s1252_s27 + $0x60] sm:$0xff]  }
  0x32   : > { %v543_v35 = vadd.f32 %v1282_v11, %v504_v26  ;;  %v544_v36 = vadd.f32 %v1282_v11, %v505_v27  ;;  %v365_v37 = vmul.f32 %v969_v28, %v1263_v0  ;;  %v403_v38 = vadd.f32 %v1277_v10, %v364_v29 }
  0x33   : > { %v1095_v40 = vpack.c.bf16 %v606_v32, %v605_v31  ;;  %v1033_v41 = vunpack.c.h.bf16 %v1164_v21  ;;  %v506_v42 = vmul.f32 %v1032_v34, %v1268_v1  ;;  %v972_v43 = vunpack.c.l.bf16 %v1150_v30 }
  0x34   : > { %v575_v44 = vadd.f32 %v543_v35, %v401_v25  ;;  %v576_v45 = vadd.f32 %v544_v36, %v402_v33  ;;  %v404_v46 = vadd.f32 %v1277_v10, %v365_v37  ;;  %v973_v47 = vunpack.c.h.bf16 %v1150_v30  ;;  %v1168_v37 = vld [vmem:[%s1258_s30 + $0x60] sm:$0xff]  }
  0x35   : > { %1177 = vst [vmem:[%s1309_s17 + $0x30] sm:$0xff] %v1095_v40   ;;  %v507_v48 = vmul.f32 %v1033_v41, %v1268_v1  ;;  %v545_v49 = vadd.f32 %v1282_v11, %v506_v42  ;;  %v366_v50 = vmul.f32 %v972_v43, %v1263_v0  ;;  %v1036_v51 = vunpack.c.l.bf16 %v1165_v39 }
  0x36   : > { %v607_v53 = vmax.f32 %v575_v44, 0.0  ;;  %v608_v54 = vmax.f32 %v576_v45, 0.0  ;;  %v367_v55 = vmul.f32 %v973_v47, %v1263_v0  ;;  %v1037_v56 = vunpack.c.h.bf16 %v1165_v39 }
  0x37   : > { %v546_v57 = vadd.f32 %v1282_v11, %v507_v48  ;;  %v577_v58 = vadd.f32 %v545_v49, %v403_v38  ;;  %v405_v59 = vadd.f32 %v1277_v10, %v366_v50  ;;  %v508_v60 = vmul.f32 %v1036_v51, %v1268_v1 }
  0x38   : > { %v1100_v62 = vpack.c.bf16 %v608_v54, %v607_v53  ;;  %v406_v63 = vadd.f32 %v1277_v10, %v367_v55  ;;  %v509_v2 = vmul.f32 %v1037_v56, %v1268_v1  ;;  %v976_v3 = vunpack.c.l.bf16 %v1151_v52  ;;  %v1169_v55 = vld [vmem:[%s1258_s30 + $0x68] sm:$0xff]  }
  0x39   : > { %v578_v5 = vadd.f32 %v546_v57, %v404_v46  ;;  %v609_v6 = vmax.f32 %v577_v58, 0.0  ;;  %v547_v7 = vadd.f32 %v1282_v11, %v508_v60  ;;  %v977_v8 = vunpack.c.h.bf16 %v1151_v52  ;;  %v1154_v46 = vld [vmem:[%s1252_s27 + $0x68] sm:$0xff]  }
  0x3a   : > { %1178 = vst [vmem:[%s1309_s17 + $0x38] sm:$0xff] %v1100_v62   ;;  %v548_v9 = vadd.f32 %v1282_v11, %v509_v2  ;;  %v368_v12 = vmul.f32 %v976_v3, %v1263_v0  ;;  %v1040_v13 = vunpack.c.l.bf16 %v1166_v61  ;;  %v1041_v14 = vunpack.c.h.bf16 %v1166_v61 }
  0x3b   : > { %v610_v15 = vmax.f32 %v578_v5, 0.0  ;;  %v579_v16 = vadd.f32 %v547_v7, %v405_v59  ;;  %v369_v17 = vmul.f32 %v977_v8, %v1263_v0  ;;  %v980_v18 = vunpack.c.l.bf16 %v1152_v4 }
  0x3c   : > { %v580_v19 = vadd.f32 %v548_v9, %v406_v63  ;;  %v407_v20 = vadd.f32 %v1277_v10, %v368_v12  ;;  %v510_v21 = vmul.f32 %v1040_v13, %v1268_v1  ;;  %v511_v22 = vmul.f32 %v1041_v14, %v1268_v1 }
  0x3d   : > { %v1105_v25 = vpack.c.bf16 %v610_v15, %v609_v6  ;;  %v611_v26 = vmax.f32 %v579_v16, 0.0  ;;  %v408_v27 = vadd.f32 %v1277_v10, %v369_v17  ;;  %v981_v28 = vunpack.c.h.bf16 %v1152_v4  ;;  %v1155_v6 = vld [vmem:[%s1252_s27 + $0x70] sm:$0xff]  }
  0x3e   : > { %v612_v29 = vmax.f32 %v580_v19, 0.0  ;;  %v549_v30 = vadd.f32 %v1282_v11, %v510_v21  ;;  %v550_v31 = vadd.f32 %v1282_v11, %v511_v22  ;;  %v370_v32 = vmul.f32 %v980_v18, %v1263_v0  ;;  %v1170_v17 = vld [vmem:[%s1258_s30 + $0x70] sm:$0xff]   ;;  %v1156_v22 = vld [vmem:[%s1252_s27 + $0x78] sm:$0xff]  }
  0x3f   : > { %1179 = vst [vmem:[%s1309_s17 + $0x40] sm:$0xff] %v1105_v25   ;;  %v371_v33 = vmul.f32 %v981_v28, %v1263_v0  ;;  %v1044_v34 = vunpack.c.l.bf16 %v1167_v23  ;;  %v1045_v35 = vunpack.c.h.bf16 %v1167_v23  ;;  %v984_v36 = vunpack.c.l.bf16 %v1153_v24 }
  0x40   : > { %v1110_v38 = vpack.c.bf16 %v612_v29, %v611_v26  ;;  %v581_v39 = vadd.f32 %v549_v30, %v407_v20  ;;  %v582_v40 = vadd.f32 %v550_v31, %v408_v27  ;;  %v409_v41 = vadd.f32 %v1277_v10, %v370_v32 }
  0x41   : > { %v410_v42 = vadd.f32 %v1277_v10, %v371_v33  ;;  %v512_v43 = vmul.f32 %v1044_v34, %v1268_v1  ;;  %v513_v44 = vmul.f32 %v1045_v35, %v1268_v1  ;;  %v985_v45 = vunpack.c.h.bf16 %v1153_v24  ;;  %v1171_v35 = vld [vmem:[%s1258_s30 + $0x78] sm:$0xff]  }
  0x42   : > { %1180 = vst [vmem:[%s1309_s17 + $0x48] sm:$0xff] %v1110_v38   ;;  %v613_v47 = vmax.f32 %v581_v39, 0.0  ;;  %v614_v48 = vmax.f32 %v582_v40, 0.0  ;;  %v372_v49 = vmul.f32 %v984_v36, %v1263_v0  ;;  %v1048_v50 = vunpack.c.l.bf16 %v1168_v37 }
  0x43   : > { %v551_v51 = vadd.f32 %v1282_v11, %v512_v43  ;;  %v552_v52 = vadd.f32 %v1282_v11, %v513_v44  ;;  %v373_v53 = vmul.f32 %v985_v45, %v1263_v0  ;;  %v1049_v54 = vunpack.c.h.bf16 %v1168_v37 }
  0x44   : > { %v1115_v56 = vpack.c.bf16 %v614_v48, %v613_v47  ;;  %v411_v57 = vadd.f32 %v1277_v10, %v372_v49  ;;  %v514_v58 = vmul.f32 %v1048_v50, %v1268_v1  ;;  %v988_v59 = vunpack.c.l.bf16 %v1154_v46 }
  0x45   : > { %v583_v60 = vadd.f32 %v551_v51, %v409_v41  ;;  %v584_v61 = vadd.f32 %v552_v52, %v410_v42  ;;  %v412_v62 = vadd.f32 %v1277_v10, %v373_v53  ;;  %v515_v63 = vmul.f32 %v1049_v54, %v1268_v1 }
  0x46   : > { %1181 = vst [vmem:[%s1309_s17 + $0x50] sm:$0xff] %v1115_v56   ;;  %v553_v2 = vadd.f32 %v1282_v11, %v514_v58  ;;  %v989_v3 = vunpack.c.h.bf16 %v1154_v46  ;;  %v374_v4 = vmul.f32 %v988_v59, %v1263_v0  ;;  %v1052_v5 = vunpack.c.l.bf16 %v1169_v55 }
  0x47   : > { %v615_v7 = vmax.f32 %v583_v60, 0.0  ;;  %v616_v8 = vmax.f32 %v584_v61, 0.0  ;;  %v554_v9 = vadd.f32 %v1282_v11, %v515_v63  ;;  %v1053_v12 = vunpack.c.h.bf16 %v1169_v55 }
  0x48   : > { %v585_v13 = vadd.f32 %v553_v2, %v411_v57  ;;  %v375_v14 = vmul.f32 %v989_v3, %v1263_v0  ;;  %v413_v15 = vadd.f32 %v1277_v10, %v374_v4  ;;  %v516_v16 = vmul.f32 %v1052_v5, %v1268_v1 }
  0x49   : > { %v1120_v18 = vpack.c.bf16 %v616_v8, %v615_v7  ;;  %v586_v19 = vadd.f32 %v554_v9, %v412_v62  ;;  %v517_v20 = vmul.f32 %v1053_v12, %v1268_v1  ;;  %v992_v21 = vunpack.c.l.bf16 %v1155_v6 }
  0x4a   : > { %v617_v23 = vmax.f32 %v585_v13, 0.0  ;;  %v414_v24 = vadd.f32 %v1277_v10, %v375_v14  ;;  %v555_v25 = vadd.f32 %v1282_v11, %v516_v16  ;;  %v993_v26 = vunpack.c.h.bf16 %v1155_v6 }
  0x4b   : > { %1182 = vst [vmem:[%s1309_s17 + $0x58] sm:$0xff] %v1120_v18   ;;  %v618_v27 = vmax.f32 %v586_v19, 0.0  ;;  %v556_v28 = vadd.f32 %v1282_v11, %v517_v20  ;;  %v376_v29 = vmul.f32 %v992_v21, %v1263_v0  ;;  %v1056_v30 = vunpack.c.l.bf16 %v1170_v17 }
  0x4c   : > { %v587_v31 = vadd.f32 %v555_v25, %v413_v15  ;;  %v377_v32 = vmul.f32 %v993_v26, %v1263_v0  ;;  %v1057_v33 = vunpack.c.h.bf16 %v1170_v17  ;;  %v996_v34 = vunpack.c.l.bf16 %v1156_v22 }
  0x4d   : > { %v1125_v36 = vpack.c.bf16 %v618_v27, %v617_v23  ;;  %v588_v37 = vadd.f32 %v556_v28, %v414_v24  ;;  %v415_v38 = vadd.f32 %v1277_v10, %v376_v29  ;;  %v518_v39 = vmul.f32 %v1056_v30, %v1268_v1 }
  0x4e   : > { %v619_v40 = vmax.f32 %v587_v31, 0.0  ;;  %v416_v41 = vadd.f32 %v1277_v10, %v377_v32  ;;  %v519_v42 = vmul.f32 %v1057_v33, %v1268_v1  ;;  %v997_v43 = vunpack.c.h.bf16 %v1156_v22 }
  0x4f   : > { %1183 = vst [vmem:[%s1309_s17 + $0x60] sm:$0xff] %v1125_v36   ;;  %v620_v44 = vmax.f32 %v588_v37, 0.0  ;;  %v557_v45 = vadd.f32 %v1282_v11, %v518_v39  ;;  %v378_v46 = vmul.f32 %v996_v34, %v1263_v0  ;;  %v1060_v47 = vunpack.c.l.bf16 %v1171_v35 }
  0x50   : > { %v558_v48 = vadd.f32 %v1282_v11, %v519_v42  ;;  %v379_v49 = vmul.f32 %v997_v43, %v1263_v0  ;;  %v1061_v50 = vunpack.c.h.bf16 %v1171_v35 }
  0x51   : > { %v1130_v51 = vpack.c.bf16 %v620_v44, %v619_v40  ;;  %v589_v52 = vadd.f32 %v557_v45, %v415_v38  ;;  %v417_v53 = vadd.f32 %v1277_v10, %v378_v46  ;;  %v520_v54 = vmul.f32 %v1060_v47, %v1268_v1 }
  0x52   : > { %v590_v55 = vadd.f32 %v558_v48, %v416_v41  ;;  %v418_v56 = vadd.f32 %v1277_v10, %v379_v49  ;;  %v521_v57 = vmul.f32 %v1061_v50, %v1268_v1 }
  0x53   : > { %1184 = vst [vmem:[%s1309_s17 + $0x68] sm:$0xff] %v1130_v51   ;;  %v621_v58 = vmax.f32 %v589_v52, 0.0  ;;  %v559_v59 = vadd.f32 %v1282_v11, %v520_v54 }
  0x54   : > { %v622_v60 = vmax.f32 %v590_v55, 0.0  ;;  %v560_v0 = vadd.f32 %v1282_v11, %v521_v57 }
  0x55   : > { %v591_v61 = vadd.f32 %v559_v59, %v417_v53 }
  0x56   : > { %v1135_v62 = vpack.c.bf16 %v622_v60, %v621_v58  ;;  %v592_v63 = vadd.f32 %v560_v0, %v418_v56 }
  0x57   : > { %v623_v2 = vmax.f32 %v591_v61, 0.0 }
  0x58   : > { %1185 = vst [vmem:[%s1309_s17 + $0x70] sm:$0xff] %v1135_v62   ;;  %v624_v3 = vmax.f32 %v592_v63, 0.0 }
  0x5a   : > { %v1140_v4 = vpack.c.bf16 %v624_v3, %v623_v2 }
  0x5c   : > { %1186 = vst [vmem:[%s1309_s17 + $0x78] sm:$0xff] %v1140_v4  }
  0x5d PF: > { %s16_s21 = sadd.s32 1, %s1201_s21  }
  0x5e   : > { %p13_p4 = scmp.ge.s32.totalorder %s16_s21, 4  }
  0x60   :  { %15 = sbr.rel (!%p13_p4) target bundleno = 1 (0x1), region = 77 }

// kernel: basic_block_forward.4
= control target key start
LH: loop header
LB: loop body
LE: loop exit
PB: predicated region body
PF: predicated region fallthrough
CT: control target
= control target key end

     0   :  { %s6675_s12 = smov 0   ;;  %s8435_s0 = inlined_call_operand.vmem [shape: bf16[2,18,18,4], index: 0, kind: input, shape index: {}]   ;;  %s8436_s1 = inlined_call_operand.vmem [shape: bf16[9,4,128], index: 1, kind: input, shape index: {}]   ;;  %s8437_s2 = inlined_call_operand.vmem [shape: bf16[512,128], index: 2, kind: output, shape index: {0}]   ;;  %s8438_s3 = inlined_call_operand.vmem [shape: f32[2,8,128], index: 3, kind: output, shape index: {1}]  }
   0x1 LB: > { %s6681_s13 = sadd.s32 4294967295, %s6653_s12   ;;  %p5104_p0 = scmp.ge.s32.totalorder %s6653_s12, 1  ;;  %s6653_s12 = sphi %s6675_s12, %s14_s12  }
   0x2   : > { %p140_p1 = scmp.lt.s32.totalorder %s6653_s12, 3 }
   0x4   : > { %p141_p2 = pnand %p5104_p0, %p140_p1 }
   0x6   : > { %144 = sbr.rel (%p141_p2) target bundleno = 606 (0x25e), region = 28 }
   0xd   : > { %v5109_v0 = vld [vmem:[%s8436_s1 + $0x2] sm:$0x3]  ;;  %vm719_vm0 = vcmask 1041408   ;;  %v5336_v1 = vld [vmem:[%s8436_s1 + $0x8] sm:$0x3]  ;;  %p168_p3 = scmp.lt.s32.totalorder %s6681_s13, 1 }
   0xe   : > { %6523 = vmatprep.subr.msk.bf16.mxu1 %vm719_vm0, %v5109_v0  ;;  %6527 = vmatprep.subr.msk.bf16.mxu0 %vm719_vm0, %v5336_v1  ;;  %v721_v2 = vsel %vm719_vm0, %v5109_v0, 0  ;;  %v6696_v3 = vsel %vm719_vm0, %v5336_v1, 0  ;;  %v216_v4 = vld [vmem:[%s8436_s1] sm:$0x3]  ;;  %v5401_v5 = vld [vmem:[%s8436_s1 + $0xa] sm:$0x3] }
   0xf   : > { %8452 = vst [vmem:[#allocation2_spill] sm:$0xff] %v6696_v3  ;;  %5960 = vmatpush3.bf16.msra.mxu1 %v721_v2  ;;  %6096 = vmatpush3.bf16.msra.mxu0 %v6696_v3  ;;  %s6700_s18 = scalar_select %p168_p3, %s6681_s13, 1  ;;  %vm233_vm1 = vsmask.f32 3328  ;;  %vm234_vm2 = vsmask.f32 7440 }
  0x10   : > { %6524 = vmatprep.subr.msk.bf16.mxu1 %vm719_vm0, %v216_v4  ;;  %6529 = vmatprep.subr.msk.bf16.mxu0 %vm719_vm0, %v5401_v5  ;;  %vm670_vm3 = vcmask 31744   ;;  %v6727_v17 = vsel %vm719_vm0, %v216_v4, 0  ;;  %v6733_v26 = vld [vmem:[%s8436_s1 + $0xc] sm:$0x3]  ;;  %vm6740_vm4 = vmor %vm233_vm1, %vm234_vm2  ;;  %v6746_v37 = vsel %vm719_vm0, %v5401_v5, 0  ;;  %vm1224_vm5 = vcmask 1042432  }
  0x11   : > { %s6533_s23 = smul.u32 216, %s6700_s18  ;;  %v6750_v41 = vsel %vm719_vm0, %v6733_v26, 0  ;;  %vm1225_vm6 = vcmask 1046532   ;;  %s5106_s16 = sshll.u32 %s6681_s13, 5  ;;  %vm5009_vm8 = vcmask 1040384  }
  0x12   : > { %vm6966_vm7 = vmor %vm1224_vm5, %vm1225_vm6  ;;  %p174_p4 = scmp.lt.s32.totalorder %s5106_s16, 63  ;;  %s5108_s21 = sshll.u32 %s6700_s18, 3 }
  0x13   : > { %s6714_s26 = scalar_lea.vmem %s8435_s0, %s6533_s23  ;;  %s182_s24 = scalar_lea.vmem %s8438_s3, %s5108_s21 }
  0x14   : > { %v184_v6 = vld [vmem:[%s6714_s26] sm:$0xf]  ;;  %v185_v7 = vld [vmem:[%s6714_s26 + $0x4] sm:$0xf]  ;;  %v217_v8 = vld [vmem:[%s6714_s26 + $0x8] sm:$0x1] }
  0x15   : > { %v237_v9 = vshrl.u32 %v184_v6, 16  ;;  %v240_v10 = vshll.u32 %v184_v6, 16  ;;  %v246_v11 = vshll.u32 %v185_v7, 16  ;;  %v250_v12 = vshrl.u32 %v185_v7, 16  ;;  %v5288_v13 = vld [vmem:[%s6714_s26 + $0xc] sm:$0xf] }
  0x16   : > { %v256_v14 = vshll.u32 %v217_v8, 16  ;;  %v6721_v15 = vld [vmem:[%s6714_s26 + $0x10] sm:$0xf]  ;;  %v6724_v16 = vld [vmem:[%s6714_s26 + $0x14] sm:$0x1]  ;;  %v2041_v23 = vshrl.u32 %v5288_v13, 16 }
  0x17   : > { %v239_v18 = vrot.slane %v237_v9, 4  ;;  %v242_v19 = vrot.slane %v240_v10, 5  ;;  %v248_v20 = vrot.slane %v246_v11, 5  ;;  %v252_v21 = vrot.slane %v250_v12, 4  ;;  %v186_v31 = vld [vmem:[%s6714_s26 + $0xc] sm:$0xf] }
  0x18   : > { %v258_v22 = vrot.slane %v256_v14, 5  ;;  %v2044_v24 = vshll.u32 %v5288_v13, 16  ;;  %v2050_v25 = vshll.u32 %v6721_v15, 16  ;;  %v2054_v29 = vshrl.u32 %v6721_v15, 16  ;;  %v187_v36 = vld [vmem:[%s6714_s26 + $0x10] sm:$0xf] }
  0x19   : > { %v243_v27 = vor.u32 %v242_v19, %v239_v18  ;;  %v253_v28 = vor.u32 %v252_v21, %v248_v20  ;;  %v2060_v30 = vshll.u32 %v6724_v16, 16  ;;  %v2043_v33 = vrot.slane %v2041_v23, 4  ;;  %v218_v44 = vld [vmem:[%s6714_s26 + $0x14] sm:$0x1]  ;;  %v5291_v55 = vld [vmem:[%s6714_s26 + $0x18] sm:$0xf] }
  0x1a   : > { %v2046_v34 = vrot.slane %v2044_v24, 5  ;;  %v2052_v35 = vrot.slane %v2050_v25, 5  ;;  %v2056_v40 = vrot.slane %v2054_v29, 4  ;;  %v261_v45 = vshrl.u32 %v186_v31, 16  ;;  %v6759_v60 = vld [vmem:[%s6714_s26 + $0x1c] sm:$0xf] }
  0x1b   : > { %v244_v38 = vrot.slane %v243_v27, 4  ;;  %v254_v39 = vrot.slane %v253_v28, 4  ;;  %v2062_v43 = vrot.slane %v2060_v30, 5  ;;  %v264_v46 = vshll.u32 %v186_v31, 16  ;;  %v6767_v1 = vld [vmem:[%s6714_s26 + $0x20] sm:$0x1] }
  0x1c   : > { %v2047_v42 = vor.u32 %v2046_v34, %v2043_v33  ;;  %v2057_v49 = vor.u32 %v2056_v40, %v2052_v35  ;;  %v270_v50 = vshll.u32 %v187_v36, 16  ;;  %v263_v53 = vrot.slane %v261_v45, 4  ;;  %v188_v18 = vld [vmem:[%s6714_s26 + $0x18] sm:$0xf]  ;;  %v189_v23 = vld [vmem:[%s6714_s26 + $0x1c] sm:$0xf] }
  0x1d   : > { %v249_v47 = vsel %vm6740_vm4, %v244_v38, %v248_v20  ;;  %v259_v48 = vsel %vm6740_vm4, %v254_v39, %v258_v22  ;;  %v266_v54 = vrot.slane %v264_v46, 5  ;;  %v274_v58 = vshrl.u32 %v187_v36, 16  ;;  %v219_v31 = vld [vmem:[%s6714_s26 + $0x20] sm:$0x1]  ;;  %v5294_v40 = vld [vmem:[%s6714_s26 + $0x24] sm:$0xf] }
  0x1e   : > { %v5110_v51 = vcombine.low %v249_v47, %v259_v48  ;;  %v2048_v52 = vrot.slane %v2047_v42, 4  ;;  %v2058_v56 = vrot.slane %v2057_v49, 4  ;;  %v272_v57 = vrot.slane %v270_v50, 5  ;;  %v6790_v46 = vld [vmem:[%s6714_s26 + $0x28] sm:$0xf]  ;;  %s8507_s16 = smov (!%p174_p4, %s5106_s16), 63 }
  0x1f   : > { %v280_v59 = vshll.u32 %v218_v44, 16  ;;  %v2784_v62 = vrot.slane %v6721_v15, 5  ;;  %v2787_v63 = vrot.slane %v6724_v16, 5  ;;  %v267_v0 = vor.u32 %v266_v54, %v263_v53  ;;  %v6799_v54 = vld [vmem:[%s6714_s26 + $0x2c] sm:$0x1]  ;;  %s5107_s17 = sshll.u32 %s8507_s16, 2 }
  0x20   : > { %5961 = vmatprep.mubr.msk.bf16.mxu1 %vm670_vm3, %v5110_v51  ;;  %v2053_v61 = vsel %vm6740_vm4, %v2048_v52, %v2052_v35  ;;  %v2063_v2 = vsel %vm6740_vm4, %v2058_v56, %v2062_v43  ;;  %v276_v4 = vrot.slane %v274_v58, 4  ;;  %v2065_v6 = vshrl.u32 %v5291_v55, 16  ;;  %v5190_v51 = vld [vmem:[%s8436_s1 + $0x4] sm:$0x3]  ;;  %v6999_v16 = vld [vmem:[%s6714_s26 + $0x7c] sm:$0xf]  ;;  %s8404_s20 = scalar_lea.vmem %s8437_s2, %s5107_s17 }
  0x21   : > { %v282_v5 = vrot.slane %v280_v59, 5  ;;  %v5337_v7 = vcombine.low %v2053_v61, %v2063_v2  ;;  %v268_v8 = vrot.slane %v267_v0, 4  ;;  %v2068_v9 = vshll.u32 %v5291_v55, 16  ;;  %v190_v0 = vld [vmem:[%s6714_s26 + $0x24] sm:$0xf] }
  0x22   : > { %v2074_v10 = vshll.u32 %v6759_v60, 16  ;;  %v277_v11 = vor.u32 %v276_v4, %v272_v57  ;;  %v2067_v12 = vrot.slane %v2065_v6, 4  ;;  %v2078_v13 = vshrl.u32 %v6759_v60, 16 }
  0x23   : > { %v2084_v14 = vshll.u32 %v6767_v1, 16  ;;  %6097 = vmatprep.mubr.msk.bf16.mxu0 %vm670_vm3, %v5337_v7  ;;  %v273_v19 = vsel %vm6740_vm4, %v268_v8, %v272_v57  ;;  %v2070_v20 = vrot.slane %v2068_v9, 5  ;;  %v2791_v22 = vrot.slane %v6759_v60, 5  ;;  %v191_v7 = vld [vmem:[%s6714_s26 + $0x28] sm:$0xf] }
  0x24   : > { %v2076_v21 = vrot.slane %v2074_v10, 5  ;;  %v278_v24 = vrot.slane %v277_v11, 4  ;;  %v2080_v25 = vrot.slane %v2078_v13, 4  ;;  %v2794_v28 = vrot.slane %v6767_v1, 5  ;;  %v220_v13 = vld [vmem:[%s6714_s26 + $0x2c] sm:$0x1] }
  0x25   : > { %v2086_v27 = vrot.slane %v2084_v14, 5  ;;  %v2071_v29 = vor.u32 %v2070_v20, %v2067_v12  ;;  %v6783_v30 = vrot.slane %v2791_v22, 4  ;;  %v285_v33 = vshrl.u32 %v188_v18, 16 }
  0x26   : > { %v288_v34 = vshll.u32 %v188_v18, 16  ;;  %v283_v35 = vsel %vm6740_vm4, %v278_v24, %v282_v5  ;;  %v2081_v36 = vor.u32 %v2080_v25, %v2076_v21  ;;  %v294_v38 = vshll.u32 %v189_v23, 16  ;;  %v5297_v24 = vld [vmem:[%s6714_s26 + $0x30] sm:$0xf] }
  0x27   : > { %v298_v39 = vshrl.u32 %v189_v23, 16  ;;  %v5111_v42 = vcombine.low %v273_v19, %v283_v35  ;;  %v2072_v43 = vrot.slane %v2071_v29, 4  ;;  %v287_v44 = vrot.slane %v285_v33, 4  ;;  %v6819_v33 = vld [vmem:[%s6714_s26 + $0x34] sm:$0xf] }
  0x28   : > { %v290_v45 = vrot.slane %v288_v34, 5  ;;  %v2082_v47 = vrot.slane %v2081_v36, 4  ;;  %v296_v48 = vrot.slane %v294_v38, 5  ;;  %v304_v50 = vshll.u32 %v219_v31, 16 }
  0x29   : > { %v300_v49 = vrot.slane %v298_v39, 4  ;;  %5962 = vmatmul.mubr.msk.bf16.vlgmr.msra.gmra.mrb[0].mxu1 %vm670_vm3, %v5111_v42  ;;  %v2077_v52 = vsel %vm6740_vm4, %v2072_v43, %v2076_v21  ;;  %v2089_v55 = vshrl.u32 %v5294_v40, 16  ;;  %v2092_v56 = vshll.u32 %v5294_v40, 16  ;;  %v6827_v40 = vld [vmem:[%s6714_s26 + $0x38] sm:$0x1] }
  0x2a   : > { %v291_v53 = vor.u32 %v290_v45, %v287_v44  ;;  %5994 = vmatpush3.bf16.msra.mxu1 %v6727_v17  ;;  %v2087_v57 = vsel %vm6740_vm4, %v2082_v47, %v2086_v27  ;;  %v306_v59 = vrot.slane %v304_v50, 5  ;;  %v2098_v61 = vshll.u32 %v6790_v46, 16 }
  0x2b   : > { %v301_v58 = vor.u32 %v300_v49, %v296_v48  ;;  %v5338_v2 = vcombine.low %v2077_v52, %v2087_v57  ;;  %v2091_v5 = vrot.slane %v2089_v55, 4  ;;  %v2094_v6 = vrot.slane %v2092_v56, 5  ;;  %6525 = vmatprep.subr.msk.bf16.mxu1 %vm719_vm0, %v5190_v51  ;;  %v192_v52 = vld [vmem:[%s6714_s26 + $0x30] sm:$0xf] }
  0x2c   : > { %v292_v4 = vrot.slane %v291_v53, 4  ;;  %v2100_v9 = vrot.slane %v2098_v61, 5  ;;  %v2102_v17 = vshrl.u32 %v6790_v46, 16  ;;  %v2108_v10 = vshll.u32 %v6799_v54, 16 }
  0x2d   : > { %v302_v8 = vrot.slane %v301_v58, 4  ;;  %6098 = vmatmul.mubr.msk.bf16.vlgmr.msra.gmra.mrb[0].mxu0 %vm670_vm3, %v5338_v2  ;;  %v2095_v12 = vor.u32 %v2094_v6, %v2091_v5  ;;  %v309_v14 = vshrl.u32 %v190_v0, 16  ;;  %v312_v18 = vshll.u32 %v190_v0, 16  ;;  %v193_v58 = vld [vmem:[%s6714_s26 + $0x34] sm:$0xf] }
  0x2e   : > { %v297_v11 = vsel %vm6740_vm4, %v292_v4, %v296_v48  ;;  %6130 = vmatpush3.bf16.msra.mxu0 %v6746_v37  ;;  %v2104_v20 = vrot.slane %v2102_v17, 4  ;;  %v2110_v21 = vrot.slane %v2108_v10, 5  ;;  %v318_v23 = vshll.u32 %v191_v7, 16  ;;  %v221_v4 = vld [vmem:[%s6714_s26 + $0x38] sm:$0x1] }
  0x2f   : > { %v307_v19 = vsel %vm6740_vm4, %v302_v8, %v306_v59  ;;  %v2096_v27 = vrot.slane %v2095_v12, 4  ;;  %v311_v29 = vrot.slane %v309_v14, 4  ;;  %v314_v31 = vrot.slane %v312_v18, 5  ;;  %6530 = vmatprep.subr.msk.bf16.mxu0 %vm719_vm0, %v6733_v26  ;;  %v5300_v12 = vld [vmem:[%s6714_s26 + $0x3c] sm:$0xf] }
  0x30   : > { %v5112_v25 = vcombine.low %v297_v11, %v307_v19  ;;  %v2105_v34 = vor.u32 %v2104_v20, %v2100_v9  ;;  %v320_v35 = vrot.slane %v318_v23, 5  ;;  %v322_v37 = vshrl.u32 %v191_v7, 16  ;;  %v6844_v20 = vld [vmem:[%s6714_s26 + $0x40] sm:$0xf] }
  0x31   : > { %v328_v36 = vshll.u32 %v220_v13, 16  ;;  %v2101_v38 = vsel %vm6740_vm4, %v2096_v27, %v2100_v9  ;;  %v315_v39 = vor.u32 %v314_v31, %v311_v29  ;;  %v2113_v42 = vshrl.u32 %v5297_v24, 16 }
  0x32   : > { %5965 = vmatprep.mubr.msk.bf16.mxu1 %vm670_vm3, %v5112_v25  ;;  %v2116_v43 = vshll.u32 %v5297_v24, 16  ;;  %v2106_v44 = vrot.slane %v2105_v34, 4  ;;  %v324_v45 = vrot.slane %v322_v37, 4  ;;  %v2122_v26 = vshll.u32 %v6819_v33, 16  ;;  %v6849_v34 = vld [vmem:[%s6714_s26 + $0x44] sm:$0x1] }
  0x33   : > { %v330_v47 = vrot.slane %v328_v36, 5  ;;  %v316_v48 = vrot.slane %v315_v39, 4  ;;  %v2115_v49 = vrot.slane %v2113_v42, 4  ;;  %v2126_v51 = vshrl.u32 %v6819_v33, 16  ;;  %v194_v42 = vld [vmem:[%s6714_s26 + $0x3c] sm:$0xf] }
  0x34   : > { %v2118_v50 = vrot.slane %v2116_v43, 5  ;;  %v2111_v53 = vsel %vm6740_vm4, %v2106_v44, %v2110_v21  ;;  %v325_v55 = vor.u32 %v324_v45, %v320_v35  ;;  %v2124_v56 = vrot.slane %v2122_v26, 5  ;;  %v195_v26 = vld [vmem:[%s6714_s26 + $0x40] sm:$0xf] }
  0x35   : > { %v2132_v57 = vshll.u32 %v6827_v40, 16  ;;  %v5339_v59 = vcombine.low %v2101_v38, %v2111_v53  ;;  %v321_v61 = vsel %vm6740_vm4, %v316_v48, %v320_v35  ;;  %v2128_v2 = vrot.slane %v2126_v51, 4 }
  0x36   : > { %v2119_v0 = vor.u32 %v2118_v50, %v2115_v49  ;;  %v326_v5 = vrot.slane %v325_v55, 4  ;;  %v333_v7 = vshrl.u32 %v192_v52, 16  ;;  %v336_v8 = vshll.u32 %v192_v52, 16 }
  0x37   : > { %v2134_v6 = vrot.slane %v2132_v57, 5  ;;  %6101 = vmatprep.mubr.msk.bf16.mxu0 %vm670_vm3, %v5339_v59  ;;  %v2129_v17 = vor.u32 %v2128_v2, %v2124_v56  ;;  %v342_v10 = vshll.u32 %v193_v58, 16  ;;  %v346_v11 = vshrl.u32 %v193_v58, 16  ;;  %v5303_v2 = vld [vmem:[%s6714_s26 + $0x48] sm:$0xf] }
  0x38   : > { %v2120_v9 = vrot.slane %v2119_v0, 4  ;;  %v331_v13 = vsel %vm6740_vm4, %v326_v5, %v330_v47  ;;  %v335_v14 = vrot.slane %v333_v7, 4  ;;  %v338_v18 = vrot.slane %v336_v8, 5  ;;  %v6867_v8 = vld [vmem:[%s6714_s26 + $0x4c] sm:$0xf] }
  0x39   : > { %v352_v19 = vshll.u32 %v221_v4, 16  ;;  %v5113_v21 = vcombine.low %v321_v61, %v331_v13  ;;  %v2130_v24 = vrot.slane %v2129_v17, 4  ;;  %v344_v25 = vrot.slane %v342_v10, 5  ;;  %v222_v61 = vld [vmem:[%s6714_s26 + $0x44] sm:$0x1] }
  0x3a   : > { %v2125_v23 = vsel %vm6740_vm4, %v2120_v9, %v2124_v56  ;;  %v339_v27 = vor.u32 %v338_v18, %v335_v14  ;;  %v348_v29 = vrot.slane %v346_v11, 4  ;;  %v2137_v35 = vshrl.u32 %v5300_v12, 16 }
  0x3b   : > { %v354_v31 = vrot.slane %v352_v19, 5  ;;  %5966 = vmatmul.mubr.msk.bf16.gmra.mrb[4].mxu1 %vm670_vm3, %v5113_v21  ;;  %v2135_v37 = vsel %vm6740_vm4, %v2130_v24, %v2134_v6  ;;  %v2140_v36 = vshll.u32 %v5300_v12, 16  ;;  %v2146_v38 = vshll.u32 %v6844_v20, 16 }
  0x3c   : > { %v2150_v39 = vshrl.u32 %v6844_v20, 16  ;;  %v5340_v43 = vcombine.low %v2125_v23, %v2135_v37  ;;  %v340_v44 = vrot.slane %v339_v27, 4  ;;  %v349_v45 = vor.u32 %v348_v29, %v344_v25  ;;  %v6875_v23 = vld [vmem:[%s6714_s26 + $0x50] sm:$0x1]  ;;  %v6879_v27 = vld [vmem:[%s6714_s26 + $0x48] sm:$0xf] }
  0x3d   : > { %v2139_v47 = vrot.slane %v2137_v35, 4  ;;  %v2142_v48 = vrot.slane %v2140_v36, 5  ;;  %v2148_v49 = vrot.slane %v2146_v38, 5  ;;  %v2156_v51 = vshll.u32 %v6849_v34, 16  ;;  %v6882_v36 = vld [vmem:[%s6714_s26 + $0x4c] sm:$0xf] }
  0x3e   : > { %v2152_v50 = vrot.slane %v2150_v39, 4  ;;  %6102 = vmatmul.mubr.msk.bf16.gmra.mrb[4].mxu0 %vm670_vm3, %v5340_v43  ;;  %v345_v52 = vsel %vm6740_vm4, %v340_v44, %v344_v25  ;;  %v350_v53 = vrot.slane %v349_v45, 4  ;;  %v357_v55 = vshrl.u32 %v194_v42, 16 }
  0x3f   : > { %v360_v56 = vshll.u32 %v194_v42, 16  ;;  %v2143_v57 = vor.u32 %v2142_v48, %v2139_v47  ;;  %v2158_v59 = vrot.slane %v2156_v51, 5  ;;  %v366_v0 = vshll.u32 %v195_v26, 16 }
  0x40   : > { %v2153_v58 = vor.u32 %v2152_v50, %v2148_v49  ;;  %v355_v4 = vsel %vm6740_vm4, %v350_v53, %v354_v31  ;;  %v359_v5 = vrot.slane %v357_v55, 4  ;;  %v370_v7 = vshrl.u32 %v195_v26, 16  ;;  %v223_v26 = vld [vmem:[%s6714_s26 + $0x50] sm:$0x1]  ;;  %v5306_v53 = vld [vmem:[%s6714_s26 + $0x54] sm:$0xf] }
  0x41   : > { %v362_v6 = vrot.slane %v360_v56, 5  ;;  %v5114_v9 = vcombine.low %v345_v52, %v355_v4  ;;  %v2144_v17 = vrot.slane %v2143_v57, 4  ;;  %v368_v11 = vrot.slane %v366_v0, 5  ;;  %v6898_v4 = vld [vmem:[%s6714_s26 + $0x58] sm:$0xf] }
  0x42   : > { %v2154_v10 = vrot.slane %v2153_v58, 4  ;;  %v372_v13 = vrot.slane %v370_v7, 4  ;;  %v376_v14 = vshll.u32 %v222_v61, 16  ;;  %v2161_v18 = vshrl.u32 %v5303_v2, 16 }
  0x43   : > { %v363_v12 = vor.u32 %v362_v6, %v359_v5  ;;  %5969 = vmatprep.mubr.msk.bf16.mxu1 %vm670_vm3, %v5114_v9  ;;  %v2149_v19 = vsel %vm6740_vm4, %v2144_v17, %v2148_v49  ;;  %v2164_v24 = vshll.u32 %v5303_v2, 16  ;;  %v2170_v25 = vshll.u32 %v6867_v8, 16 }
  0x44   : > { %v2159_v21 = vsel %vm6740_vm4, %v2154_v10, %v2158_v59  ;;  %v373_v35 = vor.u32 %v372_v13, %v368_v11  ;;  %v378_v37 = vrot.slane %v376_v14, 5  ;;  %v2163_v38 = vrot.slane %v2161_v18, 4 }
  0x45   : > { %v5341_v29 = vcombine.low %v2149_v19, %v2159_v21  ;;  %v364_v31 = vrot.slane %v363_v12, 4  ;;  %v2166_v39 = vrot.slane %v2164_v24, 5  ;;  %v2172_v42 = vrot.slane %v2170_v25, 5  ;;  %v6904_v12 = vld [vmem:[%s6714_s26 + $0x5c] sm:$0x1] }
  0x46   : > { %v2174_v43 = vshrl.u32 %v6867_v8, 16  ;;  %v374_v45 = vrot.slane %v373_v35, 4  ;;  %v2180_v47 = vshll.u32 %v6875_v23, 16  ;;  %v381_v48 = vshrl.u32 %v6879_v27, 16  ;;  %v6908_v24 = vld [vmem:[%s6714_s26 + $0x54] sm:$0xf] }
  0x47   : > { %6105 = vmatprep.mubr.msk.bf16.mxu0 %vm670_vm3, %v5341_v29  ;;  %v369_v44 = vsel %vm6740_vm4, %v364_v31, %v368_v11  ;;  %v2167_v49 = vor.u32 %v2166_v39, %v2163_v38  ;;  %v384_v51 = vshll.u32 %v6879_v27, 16  ;;  %v390_v52 = vshll.u32 %v6882_v36, 16 }
  0x48   : > { %v2176_v50 = vrot.slane %v2174_v43, 4  ;;  %v379_v55 = vsel %vm6740_vm4, %v374_v45, %v378_v37  ;;  %v2182_v56 = vrot.slane %v2180_v47, 5  ;;  %v383_v57 = vrot.slane %v381_v48, 4  ;;  %v6914_v37 = vld [vmem:[%s6714_s26 + $0x58] sm:$0xf] }
  0x49   : > { %v394_v58 = vshrl.u32 %v6882_v36, 16  ;;  %v5115_v59 = vcombine.low %v369_v44, %v379_v55  ;;  %v2168_v61 = vrot.slane %v2167_v49, 4  ;;  %v386_v2 = vrot.slane %v384_v51, 5 }
  0x4a   : > { %v2177_v0 = vor.u32 %v2176_v50, %v2172_v42  ;;  %v392_v5 = vrot.slane %v390_v52, 5  ;;  %v400_v7 = vshll.u32 %v223_v26, 16  ;;  %v2185_v9 = vshrl.u32 %v5306_v53, 16  ;;  %v224_v26 = vld [vmem:[%s6714_s26 + $0x5c] sm:$0x1] }
  0x4b   : > { %v396_v6 = vrot.slane %v394_v58, 4  ;;  %5970 = vmatmul.mubr.msk.bf16.gmra.mrb[8].mxu1 %vm670_vm3, %v5115_v59  ;;  %v2173_v17 = vsel %vm6740_vm4, %v2168_v61, %v2172_v42  ;;  %v387_v11 = vor.u32 %v386_v2, %v383_v57  ;;  %v2188_v13 = vshll.u32 %v5306_v53, 16  ;;  %v5309_v53 = vld [vmem:[%s6714_s26 + $0x60] sm:$0xf]  ;;  %v6928_v59 = vld [vmem:[%s6714_s26 + $0x64] sm:$0xf] }
  0x4c   : > { %v2178_v10 = vrot.slane %v2177_v0, 4  ;;  %v402_v18 = vrot.slane %v400_v7, 5  ;;  %v2187_v19 = vrot.slane %v2185_v9, 4  ;;  %v2194_v21 = vshll.u32 %v6898_v4, 16  ;;  %v6935_v9 = vld [vmem:[%s6714_s26 + $0x68] sm:$0x1] }
  0x4d   : > { %v397_v14 = vor.u32 %v396_v6, %v392_v5  ;;  %v388_v29 = vrot.slane %v387_v11, 4  ;;  %v2190_v31 = vrot.slane %v2188_v13, 5  ;;  %v2198_v35 = vshrl.u32 %v6898_v4, 16 }
  0x4e   : > { %v2183_v25 = vsel %vm6740_vm4, %v2178_v10, %v2182_v56  ;;  %v2196_v42 = vrot.slane %v2194_v21, 5  ;;  %v2204_v43 = vshll.u32 %v6904_v12, 16  ;;  %v405_v48 = vshrl.u32 %v6908_v24, 16 }
  0x4f   : > { %v5342_v38 = vcombine.low %v2173_v17, %v2183_v25  ;;  %v398_v39 = vrot.slane %v397_v14, 4  ;;  %v393_v44 = vsel %vm6740_vm4, %v388_v29, %v392_v5  ;;  %v2191_v45 = vor.u32 %v2190_v31, %v2187_v19  ;;  %v6939_v19 = vld [vmem:[%s6714_s26 + $0x60] sm:$0xf] }
  0x50   : > { %v2200_v47 = vrot.slane %v2198_v35, 4  ;;  %v2206_v50 = vrot.slane %v2204_v43, 5  ;;  %v408_v51 = vshll.u32 %v6908_v24, 16  ;;  %v414_v52 = vshll.u32 %v6914_v37, 16  ;;  %v6945_v35 = vld [vmem:[%s6714_s26 + $0x64] sm:$0xf] }
  0x51   : > { %6106 = vmatmul.mubr.msk.bf16.gmra.mrb[8].mxu0 %vm670_vm3, %v5342_v38  ;;  %v403_v49 = vsel %vm6740_vm4, %v398_v39, %v402_v18  ;;  %v2192_v56 = vrot.slane %v2191_v45, 4  ;;  %v407_v58 = vrot.slane %v405_v48, 4  ;;  %v418_v2 = vshrl.u32 %v6914_v37, 16 }
  0x52   : > { %v5116_v55 = vcombine.low %v393_v44, %v403_v49  ;;  %v2201_v57 = vor.u32 %v2200_v47, %v2196_v42  ;;  %v410_v61 = vrot.slane %v408_v51, 5  ;;  %v416_v0 = vrot.slane %v414_v52, 5 }
  0x53   : > { %v424_v5 = vshll.u32 %v224_v26, 16  ;;  %v2197_v6 = vsel %vm6740_vm4, %v2192_v56, %v2196_v42  ;;  %v2209_v17 = vshrl.u32 %v5309_v53, 16  ;;  %v2212_v10 = vshll.u32 %v5309_v53, 16 }
  0x54   : > { %5973 = vmatprep.mubr.msk.bf16.mxu1 %vm670_vm3, %v5116_v55  ;;  %v2202_v7 = vrot.slane %v2201_v57, 4  ;;  %v411_v11 = vor.u32 %v410_v61, %v407_v58  ;;  %v420_v13 = vrot.slane %v418_v2, 4  ;;  %v2218_v18 = vshll.u32 %v6928_v59, 16  ;;  %v5369_v58 = vld [vmem:[%s6714_s26 + $0xc] sm:$0xe] }
  0x55   : > { %v426_v14 = vrot.slane %v424_v5, 5  ;;  %v2211_v25 = vrot.slane %v2209_v17, 4  ;;  %v2214_v29 = vrot.slane %v2212_v10, 5  ;;  %v2222_v31 = vshrl.u32 %v6928_v59, 16 }
  0x56   : > { %v2207_v21 = vsel %vm6740_vm4, %v2202_v7, %v2206_v50  ;;  %v412_v39 = vrot.slane %v411_v11, 4  ;;  %v421_v42 = vor.u32 %v420_v13, %v416_v0  ;;  %v2220_v43 = vrot.slane %v2218_v18, 5  ;;  %v225_v50 = vld [vmem:[%s6714_s26 + $0x68] sm:$0x1] }
  0x57   : > { %v5343_v38 = vcombine.low %v2197_v6, %v2207_v21  ;;  %v2215_v44 = vor.u32 %v2214_v29, %v2211_v25  ;;  %v2224_v45 = vrot.slane %v2222_v31, 4  ;;  %v2228_v47 = vshll.u32 %v6935_v9, 16  ;;  %v6973_v29 = vld [vmem:[%s6714_s26 + $0x70] sm:$0xf] }
  0x58   : > { %v429_v26 = vshrl.u32 %v6939_v19, 16  ;;  %v417_v48 = vsel %vm6740_vm4, %v412_v39, %v416_v0  ;;  %v422_v49 = vrot.slane %v421_v42, 4  ;;  %v432_v51 = vshll.u32 %v6939_v19, 16  ;;  %v6960_v0 = vld [vmem:[%s6714_s26 + $0x6c] sm:$0xf] }
  0x59   : > { %6109 = vmatprep.mubr.msk.bf16.mxu0 %vm670_vm3, %v5343_v38  ;;  %v438_v52 = vshll.u32 %v6945_v35, 16  ;;  %v2216_v53 = vrot.slane %v2215_v44, 4  ;;  %v2225_v55 = vor.u32 %v2224_v45, %v2220_v43  ;;  %v2230_v56 = vrot.slane %v2228_v47, 5 }
  0x5a   : > { %v431_v57 = vrot.slane %v429_v26, 4  ;;  %v427_v61 = vsel %vm6740_vm4, %v422_v49, %v426_v14  ;;  %v434_v2 = vrot.slane %v432_v51, 5  ;;  %v442_v6 = vshrl.u32 %v6945_v35, 16  ;;  %v226_v26 = vld [vmem:[%s6714_s26 + $0x74] sm:$0x1] }
  0x5b   : > { %v440_v5 = vrot.slane %v438_v52, 5  ;;  %v5117_v7 = vcombine.low %v417_v48, %v427_v61  ;;  %v2221_v17 = vsel %vm6740_vm4, %v2216_v53, %v2220_v43  ;;  %v2226_v10 = vrot.slane %v2225_v55, 4  ;;  %v5370_v48 = vld [vmem:[%s6714_s26 + $0x18] sm:$0xe] }
  0x5c   : > { %v448_v11 = vshll.u32 %v225_v50, 16  ;;  %v435_v14 = vor.u32 %v434_v2, %v431_v57  ;;  %v444_v18 = vrot.slane %v442_v6, 4  ;;  %v5385_v21 = vrot.slane %v5369_v58, 9  ;;  %v6992_v53 = vld [vmem:[%s6714_s26 + $0x78] sm:$0xf] }
  0x5d   : > { %v2786_v25 = vrot.slane %v2784_v62, 4  ;;  %5974 = vmatmul.mubr.msk.bf16.gmra.mrb[12].mxu1 %vm670_vm3, %v5117_v7  ;;  %v2231_v31 = vsel %vm6740_vm4, %v2226_v10, %v2230_v56  ;;  %v453_v39 = vshrl.u32 %v6960_v0, 16  ;;  %v456_v42 = vshll.u32 %v6960_v0, 16  ;;  %v227_v57 = vld [vmem:[%s6714_s26 + $0x80] sm:$0x1] }
  0x5e   : > { %v450_v38 = vrot.slane %v448_v11, 5  ;;  %v5344_v43 = vcombine.low %v2221_v17, %v2231_v31  ;;  %v436_v44 = vrot.slane %v435_v14, 4  ;;  %v445_v45 = vor.u32 %v444_v18, %v440_v5  ;;  %v5371_v10 = vld [vmem:[%s6714_s26 + $0x24] sm:$0xe] }
  0x5f   : > { %v2785_v47 = vsel %vm6966_vm7, %v5385_v21, %v2784_v62  ;;  %v2788_v49 = vsel %vm6966_vm7, %v2786_v25, %v2787_v63  ;;  %v455_v50 = vrot.slane %v453_v39, 4  ;;  %v458_v51 = vrot.slane %v456_v42, 5  ;;  %v7018_v39 = vld [vmem:[%s6714_s26 + $0x84] sm:$0xf] }
  0x60   : > { %v462_v52 = vshll.u32 %v6973_v29, 16  ;;  %6110 = vmatmul.mubr.msk.bf16.gmra.mrb[12].mxu0 %vm670_vm3, %v5344_v43  ;;  %v441_v15 = vsel %vm6740_vm4, %v436_v44, %v440_v5  ;;  %v446_v62 = vrot.slane %v445_v45, 4  ;;  %v5402_v55 = vcombine.low %v2785_v47, %v2788_v49  ;;  %v7026_v43 = vld [vmem:[%s6714_s26 + $0x88] sm:$0xf] }
  0x61   : > { %v466_v56 = vshrl.u32 %v6973_v29, 16  ;;  %v459_v63 = vor.u32 %v458_v51, %v455_v50  ;;  %v472_v61 = vshll.u32 %v226_v26, 16  ;;  %v5386_v2 = vrot.slane %v5370_v48, 9 }
  0x62   : > { %v464_v58 = vrot.slane %v462_v52, 5  ;;  %v451_v6 = vsel %vm6740_vm4, %v446_v62, %v450_v38  ;;  %6131 = vmatprep.mubr.msk.bf16.mxu0 %vm670_vm3, %v5402_v55  ;;  %v2795_v5 = vsel %vm6966_vm7, %v6783_v30, %v2794_v28  ;;  %v477_v17 = vshrl.u32 %v6992_v53, 16  ;;  %v228_v52 = vld [vmem:[%s6714_s26 + $0x8c] sm:$0x1] }
  0x63   : > { %v468_v7 = vrot.slane %v466_v56, 4  ;;  %v5118_v11 = vcombine.low %v441_v15, %v451_v6  ;;  %v460_v14 = vrot.slane %v459_v63, 4  ;;  %v474_v18 = vrot.slane %v472_v61, 5 }
  0x64   : > { %v2792_v21 = vsel %vm6966_vm7, %v5386_v2, %v2791_v22  ;;  %v479_v38 = vrot.slane %v477_v17, 4  ;;  %v480_v1 = vshll.u32 %v6992_v53, 16  ;;  %v486_v30 = vshll.u32 %v6999_v16, 16  ;;  %v7031_v22 = vld [vmem:[%s8436_s1 + $0xe] sm:$0x3] }
  0x65   : > { %v469_v25 = vor.u32 %v468_v7, %v464_v58  ;;  %v5403_v31 = vcombine.low %v2792_v21, %v2795_v5  ;;  %5977 = vmatprep.mubr.msk.bf16.mxu1 %vm670_vm3, %v5118_v11  ;;  %v465_v28 = vsel %vm6740_vm4, %v460_v14, %v464_v58  ;;  %v490_v60 = vshrl.u32 %v6999_v16, 16  ;;  %v7050_v5 = vld [vmem:[%s6714_s26 + $0x90] sm:$0xf] }
  0x66   : > { %v496_v42 = vshll.u32 %v227_v57, 16  ;;  %v482_v45 = vrot.slane %v480_v1, 5  ;;  %v5387_v47 = vrot.slane %v5371_v10, 9  ;;  %v2798_v26 = vrot.slane %v6790_v46, 5  ;;  %v5372_v57 = vld [vmem:[%s6714_s26 + $0x30] sm:$0xe] }
  0x67   : > { %v470_v44 = vrot.slane %v469_v25, 4  ;;  %v488_v48 = vrot.slane %v486_v30, 5  ;;  %v492_v49 = vrot.slane %v490_v60, 4  ;;  %v2801_v51 = vrot.slane %v6799_v54, 5  ;;  %v7062_v30 = vld [vmem:[%s6714_s26 + $0x94] sm:$0xf] }
  0x68   : > { %v498_v50 = vrot.slane %v496_v42, 5  ;;  %6132 = vmatmul.mubr.msk.bf16.vlgmr.msra.gmra.mrb[0].mxu0 %vm670_vm3, %v5403_v31  ;;  %v483_v62 = vor.u32 %v482_v45, %v479_v38  ;;  %v2799_v55 = vsel %vm6966_vm7, %v5387_v47, %v2798_v26  ;;  %v2800_v56 = vrot.slane %v2798_v26, 4  ;;  %v229_v60 = vld [vmem:[%s6714_s26 + $0x98] sm:$0x1]  ;;  %v5373_v26 = vld [vmem:[%s6714_s26 + $0x3c] sm:$0xe] }
  0x69   : > { %v475_v15 = vsel %vm6740_vm4, %v470_v44, %v474_v18  ;;  %6164 = vmatpush3.bf16.msra.mxu0 %v6750_v41  ;;  %v493_v46 = vor.u32 %v492_v49, %v488_v48  ;;  %v501_v58 = vshrl.u32 %v7018_v39, 16  ;;  %v504_v54 = vshll.u32 %v7018_v39, 16 }
  0x6a   : > { %v5119_v63 = vcombine.low %v465_v28, %v475_v15  ;;  %v484_v61 = vrot.slane %v483_v62, 4  ;;  %v2802_v2 = vsel %vm6966_vm7, %v2800_v56, %v2801_v51  ;;  %v510_v6 = vshll.u32 %v7026_v43, 16  ;;  %6531 = vmatprep.subr.msk.bf16.mxu0 %vm719_vm0, %v7031_v22 }
  0x6b   : > { %v514_v7 = vshrl.u32 %v7026_v43, 16  ;;  %v494_v41 = vrot.slane %v493_v46, 4  ;;  %v5404_v17 = vcombine.low %v2799_v55, %v2802_v2  ;;  %v503_v10 = vrot.slane %v501_v58, 4  ;;  %v7082_v46 = vld [vmem:[%s6714_s26 + $0xa0] sm:$0xf] }
  0x6c   : > { %5978 = vmatmul.mubr.msk.bf16.gmra.mrb[16].mxu1 %vm670_vm3, %v5119_v63  ;;  %v506_v11 = vrot.slane %v504_v54, 5  ;;  %v489_v14 = vsel %vm6740_vm4, %v484_v61, %v488_v48  ;;  %v512_v18 = vrot.slane %v510_v6, 5  ;;  %v520_v25 = vshll.u32 %v228_v52, 16  ;;  %v7071_v52 = vld [vmem:[%s6714_s26 + $0x9c] sm:$0xf] }
  0x6d   : > { %v516_v21 = vrot.slane %v514_v7, 4  ;;  %v499_v31 = vsel %vm6740_vm4, %v494_v41, %v498_v50  ;;  %6135 = vmatprep.mubr.msk.bf16.mxu0 %vm670_vm3, %v5404_v17  ;;  %v5388_v1 = vrot.slane %v5372_v57, 9  ;;  %v2805_v28 = vrot.slane %v6819_v33, 5 }
  0x6e   : > { %v507_v38 = vor.u32 %v506_v11, %v503_v10  ;;  %v5120_v42 = vcombine.low %v489_v14, %v499_v31  ;;  %v522_v45 = vrot.slane %v520_v25, 5  ;;  %v2808_v47 = vrot.slane %v6827_v40, 5  ;;  %v230_v10 = vld [vmem:[%s6714_s26 + $0xa4] sm:$0x1]  ;;  %v5374_v11 = vld [vmem:[%s6714_s26 + $0x48] sm:$0xe] }
  0x6f   : > { %v517_v44 = vor.u32 %v516_v21, %v512_v18  ;;  %v2806_v49 = vsel %vm6966_vm7, %v5388_v1, %v2805_v28  ;;  %v2807_v50 = vrot.slane %v2805_v28, 4  ;;  %v525_v51 = vshrl.u32 %v7050_v5, 16 }
  0x70   : > { %v508_v48 = vrot.slane %v507_v38, 4  ;;  %5981 = vmatprep.mubr.msk.bf16.mxu1 %vm670_vm3, %v5120_v42  ;;  %v528_v15 = vshll.u32 %v7050_v5, 16  ;;  %v534_v62 = vshll.u32 %v7062_v30, 16  ;;  %v538_v40 = vshrl.u32 %v7062_v30, 16 }
  0x71   : > { %v518_v33 = vrot.slane %v517_v44, 4  ;;  %v2809_v56 = vsel %vm6966_vm7, %v2807_v50, %v2808_v47  ;;  %v527_v57 = vrot.slane %v525_v51, 4  ;;  %v544_v63 = vshll.u32 %v229_v60, 16 }
  0x72   : > { %v513_v55 = vsel %vm6740_vm4, %v508_v48, %v512_v18  ;;  %v5405_v54 = vcombine.low %v2806_v49, %v2809_v56  ;;  %v530_v61 = vrot.slane %v528_v15, 5  ;;  %v536_v2 = vrot.slane %v534_v62, 5  ;;  %v7108_v56 = vld [vmem:[%s6714_s26 + $0xac] sm:$0xf] }
  0x73   : > { %v523_v58 = vsel %vm6740_vm4, %v518_v33, %v522_v45  ;;  %v540_v7 = vrot.slane %v538_v40, 4  ;;  %v546_v41 = vrot.slane %v544_v63, 5  ;;  %v5389_v17 = vrot.slane %v5373_v26, 9  ;;  %v7103_v33 = vld [vmem:[%s6714_s26 + $0xa8] sm:$0xf] }
  0x74   : > { %v5121_v6 = vcombine.low %v513_v55, %v523_v58  ;;  %6136 = vmatmul.mubr.msk.bf16.gmra.mrb[4].mxu0 %vm670_vm3, %v5405_v54  ;;  %v531_v14 = vor.u32 %v530_v61, %v527_v57  ;;  %v2812_v18 = vrot.slane %v6844_v20, 5  ;;  %v2815_v21 = vrot.slane %v6849_v34, 5  ;;  %v231_v61 = vld [vmem:[%s6714_s26 + $0xb0] sm:$0x1] }
  0x75   : > { %v549_v25 = vshrl.u32 %v7071_v52, 16  ;;  %v541_v31 = vor.u32 %v540_v7, %v536_v2  ;;  %v552_v38 = vshll.u32 %v7071_v52, 16  ;;  %v558_v1 = vshll.u32 %v7082_v46, 16 }
  0x76   : > { %5982 = vmatmul.mubr.msk.bf16.gmra.mrb[20].mxu1 %vm670_vm3, %v5121_v6  ;;  %v562_v28 = vshrl.u32 %v7082_v46, 16  ;;  %v532_v60 = vrot.slane %v531_v14, 4  ;;  %v2813_v42 = vsel %vm6966_vm7, %v5389_v17, %v2812_v18  ;;  %v2814_v20 = vrot.slane %v2812_v18, 4  ;;  %v7123_v14 = vld [vmem:[%s6714_s26 + $0xb4] sm:$0xf] }
  0x77   : > { %v551_v44 = vrot.slane %v549_v25, 4  ;;  %v542_v34 = vrot.slane %v541_v31, 4  ;;  %v554_v45 = vrot.slane %v552_v38, 5  ;;  %v560_v47 = vrot.slane %v558_v1, 5 }
  0x78   : > { %v564_v26 = vrot.slane %v562_v28, 4  ;;  %v537_v48 = vsel %vm6740_vm4, %v532_v60, %v536_v2  ;;  %v2816_v49 = vsel %vm6966_vm7, %v2814_v20, %v2815_v21  ;;  %v568_v50 = vshll.u32 %v230_v10, 16  ;;  %v5375_v2 = vld [vmem:[%s6714_s26 + $0x54] sm:$0xe] }
  0x79   : > { %v5390_v51 = vrot.slane %v5374_v11, 9  ;;  %v547_v15 = vsel %vm6740_vm4, %v542_v34, %v546_v41  ;;  %v5406_v62 = vcombine.low %v2813_v42, %v2816_v49  ;;  %v555_v40 = vor.u32 %v554_v45, %v551_v44  ;;  %v7132_v42 = vld [vmem:[%s6714_s26 + $0xb8] sm:$0xf]  ;;  %v232_v49 = vld [vmem:[%s6714_s26 + $0xbc] sm:$0x1] }
  0x7a   : > { %v565_v55 = vor.u32 %v564_v26, %v560_v47  ;;  %v5122_v57 = vcombine.low %v537_v48, %v547_v15  ;;  %v570_v63 = vrot.slane %v568_v50, 5  ;;  %v2819_v58 = vrot.slane %v6867_v8, 5 }
  0x7b   : > { %v2822_v54 = vrot.slane %v6875_v23, 5  ;;  %6139 = vmatprep.mubr.msk.bf16.mxu0 %vm670_vm3, %v5406_v62  ;;  %v556_v6 = vrot.slane %v555_v40, 4  ;;  %v573_v41 = vshrl.u32 %v7103_v33, 16  ;;  %v576_v17 = vshll.u32 %v7103_v33, 16 }
  0x7c   : > { %v566_v7 = vrot.slane %v565_v55, 4  ;;  %5985 = vmatprep.mubr.msk.bf16.mxu1 %vm670_vm3, %v5122_v57  ;;  %v2820_v10 = vsel %vm6966_vm7, %v5390_v51, %v2819_v58  ;;  %v2821_v11 = vrot.slane %v2819_v58, 4  ;;  %v582_v8 = vshll.u32 %v7108_v56, 16  ;;  %v5376_v55 = vld [vmem:[%s6714_s26 + $0x60] sm:$0xe] }
  0x7d   : > { %v586_v23 = vshrl.u32 %v7108_v56, 16  ;;  %v561_v18 = vsel %vm6740_vm4, %v556_v6, %v560_v47  ;;  %v575_v25 = vrot.slane %v573_v41, 4  ;;  %v578_v31 = vrot.slane %v576_v17, 5  ;;  %v5377_v6 = vld [vmem:[%s6714_s26 + $0x6c] sm:$0xe] }
  0x7e   : > { %v571_v21 = vsel %vm6740_vm4, %v566_v7, %v570_v63  ;;  %v2823_v1 = vsel %vm6966_vm7, %v2821_v11, %v2822_v54  ;;  %v584_v28 = vrot.slane %v582_v8, 5  ;;  %v592_v34 = vshll.u32 %v231_v61, 16  ;;  %v5313_v11 = vld [vmem:[%s6714_s26 + $0x70] sm:$0xf]  ;;  %v5314_v8 = vld [vmem:[%s6714_s26 + $0x74] sm:$0x1] }
  0x7f   : > { %v5123_v38 = vcombine.low %v561_v18, %v571_v21  ;;  %v588_v60 = vrot.slane %v586_v23, 4  ;;  %v5407_v20 = vcombine.low %v2820_v10, %v2823_v1  ;;  %v579_v44 = vor.u32 %v578_v31, %v575_v25 }
  0x80   : > { %v5391_v45 = vrot.slane %v5375_v2, 9  ;;  %v2826_v26 = vrot.slane %v6898_v4, 5  ;;  %v2829_v48 = vrot.slane %v6904_v12, 5  ;;  %v597_v50 = vshrl.u32 %v7123_v14, 16 }
  0x81   : > { %5986 = vmatmul.mubr.msk.bf16.gmra.mrb[24].mxu1 %vm670_vm3, %v5123_v38  ;;  %v589_v47 = vor.u32 %v588_v60, %v584_v28  ;;  %6140 = vmatmul.mubr.msk.bf16.gmra.mrb[8].mxu0 %vm670_vm3, %v5407_v20  ;;  %v580_v51 = vrot.slane %v579_v44, 4  ;;  %v594_v15 = vrot.slane %v592_v34, 5  ;;  %v600_v62 = vshll.u32 %v7123_v14, 16 }
  0x82   : > { %v606_v40 = vshll.u32 %v7132_v42, 16  ;;  %v2827_v4 = vsel %vm6966_vm7, %v5391_v45, %v2826_v26  ;;  %v2828_v12 = vrot.slane %v2826_v26, 4  ;;  %v599_v63 = vrot.slane %v597_v50, 4 }
  0x83   : > { %v590_v57 = vrot.slane %v589_v47, 4  ;;  %v585_v58 = vsel %vm6740_vm4, %v580_v51, %v584_v28  ;;  %v602_v54 = vrot.slane %v600_v62, 5  ;;  %v610_v2 = vshrl.u32 %v7132_v42, 16  ;;  %v5378_v47 = vld [vmem:[%s6714_s26 + $0x78] sm:$0xe] }
  0x84   : > { %v608_v61 = vrot.slane %v606_v40, 5  ;;  %v2830_v41 = vsel %vm6966_vm7, %v2828_v12, %v2829_v48  ;;  %v616_v17 = vshll.u32 %v232_v49, 16  ;;  %v5392_v10 = vrot.slane %v5376_v55, 9  ;;  %v6590_v51 = vld [vmem:[%s6714_s26] sm:$0xf] }
  0x85   : > { %v595_v7 = vsel %vm6740_vm4, %v590_v57, %v594_v15  ;;  %v5408_v18 = vcombine.low %v2827_v4, %v2830_v41  ;;  %v603_v21 = vor.u32 %v602_v54, %v599_v63  ;;  %v612_v25 = vrot.slane %v610_v2, 4  ;;  %v7170_v15 = vld [vmem:[%s6714_s26 + $0x4] sm:$0xf]  ;;  %v7174_v40 = vld [vmem:[%s6714_s26 + $0x7c] sm:$0xf] }
  0x86   : > { %v5124_v23 = vcombine.low %v585_v58, %v595_v7  ;;  %v618_v31 = vrot.slane %v616_v17, 5  ;;  %v2833_v38 = vrot.slane %v6928_v59, 5  ;;  %v2836_v1 = vrot.slane %v6935_v9, 5  ;;  %v7177_v55 = vld [vmem:[%s6714_s26 + $0x80] sm:$0x1] }
  0x87   : > { %v5393_v28 = vrot.slane %v5377_v6, 9  ;;  %6143 = vmatprep.mubr.msk.bf16.mxu0 %vm670_vm3, %v5408_v18  ;;  %v604_v60 = vrot.slane %v603_v21, 4  ;;  %v613_v20 = vor.u32 %v612_v25, %v608_v61  ;;  %v2840_v44 = vrot.slane %v5313_v11, 5  ;;  %v5319_v57 = vld [vmem:[%s6714_s26 + $0x88] sm:$0xf] }
  0x88   : > { %5989 = vmatprep.mubr.msk.bf16.mxu1 %vm670_vm3, %v5124_v23  ;;  %v2843_v34 = vrot.slane %v5314_v8, 5  ;;  %v2834_v45 = vsel %vm6966_vm7, %v5392_v10, %v2833_v38  ;;  %v2835_v59 = vrot.slane %v2833_v38, 4  ;;  %v5142_v62 = vcombine.low %v6590_v51, %v7170_v15  ;;  %v5320_v54 = vld [vmem:[%s6714_s26 + $0x8c] sm:$0x1]  ;;  %v5322_v17 = vld [vmem:[%s6714_s26 + $0x94] sm:$0xf] }
  0x89   : > { %v609_v9 = vsel %vm6740_vm4, %v604_v60, %v608_v61  ;;  %v614_v26 = vrot.slane %v613_v20, 4  ;;  %v2841_v48 = vsel %vm6966_vm7, %v5393_v28, %v2840_v44  ;;  %v2842_v49 = vrot.slane %v2840_v44, 4  ;;  %v5379_v61 = vld [vmem:[%s6714_s26 + $0x84] sm:$0xe]  ;;  %v5380_v23 = vld [vmem:[%s6714_s26 + $0x90] sm:$0xe] }
  0x8a   : > { %v2837_v50 = vsel %vm6966_vm7, %v2835_v59, %v2836_v1  ;;  %v5394_v58 = vrot.slane %v5378_v47, 9  ;;  %v2847_v7 = vrot.slane %v7174_v40, 5  ;;  %v2850_v41 = vrot.slane %v7177_v55, 5  ;;  %v5323_v25 = vld [vmem:[%s6714_s26 + $0x98] sm:$0x1] }
  0x8b   : > { %v619_v4 = vsel %vm6740_vm4, %v614_v26, %v618_v31  ;;  %v5409_v12 = vcombine.low %v2834_v45, %v2837_v50  ;;  %v2844_v63 = vsel %vm6966_vm7, %v2842_v49, %v2843_v34  ;;  %v5395_v10 = vrot.slane %v5379_v61, 9  ;;  %v5325_v31 = vld [vmem:[%s6714_s26 + $0xa0] sm:$0xf]  ;;  %v5326_v60 = vld [vmem:[%s6714_s26 + $0xa4] sm:$0x1] }
  0x8c   : > { %v5125_v2 = vcombine.low %v609_v9, %v619_v4  ;;  %v5410_v6 = vcombine.low %v2841_v48, %v2844_v63  ;;  %v2854_v11 = vrot.slane %v5319_v57, 5  ;;  %v2857_v8 = vrot.slane %v5320_v54, 5  ;;  %v5381_v20 = vld [vmem:[%s6714_s26 + $0x9c] sm:$0xe]  ;;  %v6592_v44 = vld [vmem:[%s6714_s26 + $0xc] sm:$0xf] }
  0x8d   : > { %6144 = vmatmul.mubr.msk.bf16.gmra.mrb[12].mxu0 %vm670_vm3, %v5409_v12  ;;  %v2848_v18 = vsel %vm6966_vm7, %v5394_v58, %v2847_v7  ;;  %v2849_v21 = vrot.slane %v2847_v7, 4  ;;  %v2861_v28 = vrot.slane %v5322_v17, 5  ;;  %v7204_v34 = vld [vmem:[%s6714_s26 + $0x10] sm:$0xf]  ;;  %v6594_v47 = vld [vmem:[%s6714_s26 + $0x18] sm:$0xf] }
  0x8e   : > { %5990 = vmatmul.mubr.msk.bf16.gmra.mrb[28].mxu1 %vm670_vm3, %v5125_v2  ;;  %6147 = vmatprep.mubr.msk.bf16.mxu0 %vm670_vm3, %v5410_v6  ;;  %v2855_v38 = vsel %vm6966_vm7, %v5395_v10, %v2854_v11  ;;  %v2856_v1 = vrot.slane %v2854_v11, 4  ;;  %v5143_v45 = vcombine.low %v6592_v44, %v7204_v34  ;;  %v7211_v9 = vld [vmem:[%s6714_s26 + $0x1c] sm:$0xf]  ;;  %v5396_v48 = vrot.slane %v5380_v23, 9  ;;  %v5328_v57 = vld [vmem:[%s6714_s26 + $0xac] sm:$0xf] }
  0x8f   : > { %5995 = vmatprep.mubr.msk.bf16.mxu1 %vm670_vm3, %v5142_v62  ;;  %v2851_v59 = vsel %vm6966_vm7, %v2849_v21, %v2850_v41  ;;  %v5144_v26 = vcombine.low %v6594_v47, %v7211_v9  ;;  %v2863_v51 = vrot.slane %v2861_v28, 4  ;;  %v2864_v62 = vrot.slane %v5323_v25, 5  ;;  %v6596_v54 = vld [vmem:[%s8436_s1 + $0x4] sm:$0x3]  ;;  %v5331_v2 = vld [vmem:[%s6714_s26 + $0xb8] sm:$0xf] }
  0x90   : > { %v5411_v49 = vcombine.low %v2848_v18, %v2851_v59  ;;  %v2858_v50 = vsel %vm6966_vm7, %v2856_v1, %v2857_v8  ;;  %v5397_v12 = vrot.slane %v5381_v20, 9  ;;  %v2868_v63 = vrot.slane %v5325_v31, 5  ;;  %v7226_v7 = vld [vmem:[%s8436_s1 + $0x6] sm:$0x3]  ;;  %v5329_v10 = vld [vmem:[%s6714_s26 + $0xb0] sm:$0x1] }
  0x91   : > { %v5412_v4 = vcombine.low %v2855_v38, %v2858_v50  ;;  %v2871_v58 = vrot.slane %v5326_v60, 5  ;;  %v1438_v61 = vsel %vm719_vm0, %v6596_v54, 0  ;;  %v2862_v41 = vsel %vm6966_vm7, %v5396_v48, %v2861_v28  ;;  %v5382_v11 = vld [vmem:[%s6714_s26 + $0xa8] sm:$0xe]  ;;  %v5332_v25 = vld [vmem:[%s6714_s26 + $0xbc] sm:$0x1] }
  0x92   : > { %v2870_v6 = vrot.slane %v2868_v63, 4  ;;  %v2865_v17 = vsel %vm6966_vm7, %v2863_v51, %v2864_v62  ;;  %v2875_v8 = vrot.slane %v5328_v57, 5  ;;  %v2869_v23 = vsel %vm6966_vm7, %v5397_v12, %v2868_v63  ;;  %v5383_v31 = vld [vmem:[%s6714_s26 + $0xb4] sm:$0xe]  ;;  %v6597_v38 = vld [vmem:[%s6714_s26 + $0x24] sm:$0xf] }
  0x93   : > { %v2882_v21 = vrot.slane %v5331_v2, 5  ;;  %v7247_v1 = vld [vmem:[%s6714_s26 + $0x28] sm:$0xf]  ;;  %v5413_v60 = vcombine.low %v2862_v41, %v2865_v17  ;;  %v5398_v44 = vrot.slane %v5382_v11, 9  ;;  %v2878_v59 = vrot.slane %v5329_v10, 5 }
  0x94   : > { %v2872_v18 = vsel %vm6966_vm7, %v2870_v6, %v2871_v58  ;;  %v5145_v28 = vcombine.low %v6597_v38, %v7247_v1  ;;  %v6599_v47 = vld [vmem:[%s6714_s26 + $0x30] sm:$0xf]  ;;  %v2885_v51 = vrot.slane %v5332_v25, 5  ;;  %v5334_v62 = vld [vmem:[%s6714_s26 + $0xc4] sm:$0xf]  ;;  %v2270_v25 = vshrl.u32 %v7174_v40, 16 }
  0x95   : > { %6148 = vmatmul.mubr.msk.bf16.gmra.mrb[16].mxu0 %vm670_vm3, %v5411_v49  ;;  %v5414_v20 = vcombine.low %v2869_v23, %v2872_v18  ;;  %v5399_v49 = vrot.slane %v5383_v31, 9  ;;  %v2884_v50 = vrot.slane %v2882_v21, 4  ;;  %v2876_v57 = vsel %vm6966_vm7, %v5398_v44, %v2875_v8  ;;  %v5384_v12 = vld [vmem:[%s6714_s26 + $0xc0] sm:$0xe]  ;;  %v6601_v41 = vld [vmem:[%s6714_s26 + $0x3c] sm:$0xf] }
  0x96   : > { %5996 = vmatmul.mubr.msk.bf16.vlgmr.msra.gmra.mrb[0].mxu1 %vm670_vm3, %v5143_v45  ;;  %6151 = vmatprep.mubr.msk.bf16.mxu0 %vm670_vm3, %v5412_v4  ;;  %v2877_v45 = vrot.slane %v2875_v8, 4  ;;  %v2889_v63 = vrot.slane %v5334_v62, 5  ;;  %v5400_v6 = vrot.slane %v5384_v12, 9  ;;  %v7272_v17 = vld [vmem:[%s6714_s26 + $0x40] sm:$0xf]  ;;  %v5148_v18 = vcombine.low %v6879_v27, %v6882_v36  ;;  %v6553_v62 = vld [vmem:[%s6714_s26 + $0x24] sm:$0xff]  }
  0x97   : > { %6028 = vmatpush3.bf16.msra.mxu1 %v1438_v61  ;;  %5999 = vmatprep.mubr.msk.bf16.mxu1 %vm670_vm3, %v5144_v26  ;;  %v7252_v26 = vld [vmem:[%s6714_s26 + $0x34] sm:$0xf]  ;;  %v2883_v58 = vsel %vm6966_vm7, %v5399_v49, %v2882_v21  ;;  %v2886_v54 = vsel %vm6966_vm7, %v2884_v50, %v2885_v51  ;;  %v5335_v61 = vld [vmem:[%s6714_s26 + $0xc8] sm:$0x1]  ;;  %v5147_v10 = vcombine.low %v6601_v41, %v7272_v17  ;;  %v2266_v21 = vshll.u32 %v7174_v40, 16 }
  0x98   : > { %6526 = vmatprep.subr.msk.bf16.mxu1 %vm719_vm0, %v7226_v7  ;;  %v5146_v48 = vcombine.low %v6599_v47, %v7252_v26  ;;  %v2879_v4 = vsel %vm6966_vm7, %v2877_v45, %v2878_v59  ;;  %v5416_v11 = vcombine.low %v2883_v58, %v2886_v54  ;;  %v2891_v8 = vrot.slane %v2889_v63, 4  ;;  %v1176_v45 = vld [vmem:[%s6714_s26] sm:$0xe]  ;;  %v1177_v59 = vld [vmem:[%s6714_s26 + $0xc] sm:$0xe] }
  0x99   : > { %v5415_v2 = vcombine.low %v2876_v57, %v2879_v4  ;;  %v2892_v23 = vrot.slane %v5335_v61, 5  ;;  %v2890_v31 = vsel %vm6966_vm7, %v5400_v6, %v2889_v63  ;;  %v7287_v27 = vrot.slane %v2266_v21, 5  ;;  %v1180_v41 = vld [vmem:[%s6714_s26 + $0x30] sm:$0xe] }
  0x9a   : > { %v2272_v36 = vrot.slane %v2270_v25, 4  ;;  %v5150_v44 = vcombine.low %v6939_v19, %v6945_v35  ;;  %v2276_v47 = vshll.u32 %v7177_v55, 16  ;;  %v5174_v19 = vrot.slane %v1176_v45, 9 }
  0x9b   : > { %v2893_v38 = vsel %vm6966_vm7, %v2891_v8, %v2892_v23  ;;  %8457 = vst [vmem:[#allocation3_spill] sm:$0xff] %v7287_v27  ;;  %v5175_v35 = vrot.slane %v1177_v59, 9  ;;  %v1243_v4 = vrot.slane %v7211_v9, 5  ;;  %v1250_v12 = vrot.slane %v7247_v1, 5  ;;  %v1181_v8 = vld [vmem:[%s6714_s26 + $0x3c] sm:$0xe] }
  0x9c   : > { %v5417_v40 = vcombine.low %v2890_v31, %v2893_v38  ;;  %v2273_v49 = vor.u32 %v2272_v36, %v7287_v27  ;;  %v7307_v51 = vrot.slane %v2276_v47, 5  ;;  %v5151_v58 = vcombine.low %v6960_v0, %v6973_v29  ;;  %v1182_v31 = vld [vmem:[%s6714_s26 + $0x48] sm:$0xe]  ;;  %v6607_v59 = vld [vmem:[%s6714_s26 + $0x38] sm:$0x1] }
  0x9d   : > { %6152 = vmatmul.mubr.msk.bf16.gmra.mrb[20].mxu0 %vm670_vm3, %v5413_v60  ;;  %v5149_v60 = vcombine.low %v6908_v24, %v6914_v37  ;;  %v6604_v24 = vld [vmem:[%s6714_s26 + $0x14] sm:$0x1]  ;;  %v4078_v54 = vsel %vm719_vm0, %v7031_v22, 0  ;;  %v5152_v61 = vcombine.low %v6992_v53, %v6999_v16  ;;  %v5153_v6 = vcombine.low %v7018_v39, %v7026_v43  ;;  %v6605_v16 = vld [vmem:[%s6714_s26 + $0x20] sm:$0x1] }
  0x9e   : > { %6000 = vmatmul.mubr.msk.bf16.gmra.mrb[4].mxu1 %vm670_vm3, %v5145_v28  ;;  %6155 = vmatprep.mubr.msk.bf16.mxu0 %vm670_vm3, %v5414_v20  ;;  %v1236_v28 = vrot.slane %v7204_v34, 5  ;;  %v6551_v20 = vld [vmem:[%s6714_s26 + $0x18] sm:$0xff]   ;;  %v6603_v34 = vld [vmem:[%s6714_s26 + $0x8] sm:$0x1]  ;;  %v1239_v37 = vrot.slane %v6604_v24, 5  ;;  %8458 = vst [vmem:[#allocation4_spill] sm:$0xff] %v7307_v51  ;;  %v5154_v9 = vcombine.low %v7050_v5, %v7062_v30 }
  0x9f   : > { %6003 = vmatprep.mubr.msk.bf16.mxu1 %vm670_vm3, %v5146_v48  ;;  %v1229_v48 = vrot.slane %v7170_v15, 5  ;;  %v1232_v50 = vrot.slane %v6603_v34, 5  ;;  %v1178_v15 = vld [vmem:[%s6714_s26 + $0x18] sm:$0xe]  ;;  %v7312_v63 = vrot.slane %v2273_v49, 4  ;;  %v1246_v22 = vrot.slane %v6605_v16, 5 }
  0xa0   : > { %v1238_v55 = vrot.slane %v1236_v28, 4  ;;  %v5176_v1 = vrot.slane %v1178_v15, 9  ;;  %v7334_v29 = vsel %vm6966_vm7, %v5175_v35, %v1236_v28  ;;  %v1252_v25 = vrot.slane %v1250_v12, 4  ;;  %v5499_v24 = vld [vmem:[%s6714_s26 + $0x18] sm:$0xf] }
  0xa1   : > { %v1231_v57 = vrot.slane %v1229_v48, 4  ;;  %8459 = vst [vmem:[#allocation5_spill] sm:$0xff] %v7312_v63  ;;  %v7330_v0 = vsel %vm6966_vm7, %v5174_v19, %v1229_v48  ;;  %v1260_v47 = vrot.slane %v6607_v59, 5  ;;  %v7371_v49 = vsel %vm719_vm0, %v7226_v7, 0  ;;  %v5500_v7 = vld [vmem:[%s6714_s26 + $0x1c] sm:$0xf] }
  0xa2   : > { %v7338_v53 = vsel %vm6966_vm7, %v1238_v55, %v1239_v37  ;;  %v7375_v34 = vsel %vm6966_vm7, %v5176_v1, %v1243_v4  ;;  %v6557_v37 = vld [vmem:[%s6714_s26 + $0x3c] sm:$0xff]   ;;  %v5179_v35 = vrot.slane %v1181_v8, 9  ;;  %v6608_v55 = vld [vmem:[%s6714_s26 + $0x44] sm:$0x1]  ;;  %v3599_v8 = vshll.u32 %v5499_v24, 16 }
  0xa3   : > { %v7349_v23 = vsel %vm6966_vm7, %v1231_v57, %v1232_v50  ;;  %v1183_v50 = vld [vmem:[%s6714_s26 + $0x54] sm:$0xe]  ;;  %v1267_v15 = vrot.slane %v6608_v55, 5  ;;  %v5503_v39 = vld [vmem:[%s6714_s26 + $0x28] sm:$0xf] }
  0xa4   : > { %v6615_v5 = vld [vmem:[%s6714_s26 + $0x70] sm:$0xf] }
  0xa5   : > { %6156 = vmatmul.mubr.msk.bf16.gmra.mrb[24].mxu0 %vm670_vm3, %v5415_v2  ;;  %v1179_v2 = vld [vmem:[%s6714_s26 + $0x24] sm:$0xe]  ;;  %v1292_v30 = vrot.slane %v6615_v5, 5 }
  0xa6   : > { %6004 = vmatmul.mubr.msk.bf16.gmra.mrb[8].mxu1 %vm670_vm3, %v5147_v10  ;;  %6159 = vmatprep.mubr.msk.bf16.mxu0 %vm670_vm3, %v5416_v11  ;;  %v1257_v10 = vrot.slane %v7252_v26, 5  ;;  %v6555_v11 = vld [vmem:[%s6714_s26 + $0x30] sm:$0xff]   ;;  %v5177_v21 = vrot.slane %v1179_v2, 9 }
  0xa7   : > { %6007 = vmatprep.mubr.msk.bf16.mxu1 %vm670_vm3, %v5148_v18  ;;  %v7345_v26 = vld [vmem:[%s8436_s1 + $0x10] sm:$0x3]  ;;  %v1245_v18 = vrot.slane %v1243_v4, 4  ;;  %v1294_v48 = vrot.slane %v1292_v30, 4 }
  0xa8   : > { %v1259_v45 = vrot.slane %v1257_v10, 4  ;;  %v7382_v19 = vsel %vm6966_vm7, %v5177_v21, %v1250_v12  ;;  %v3609_v21 = vshrl.u32 %v5500_v7, 16 }
  0xa9   : > { %v7391_v4 = vsel %vm6966_vm7, %v1245_v18, %v1246_v22  ;;  %v3596_v22 = vshrl.u32 %v5499_v24, 16  ;;  %v3605_v18 = vshll.u32 %v5500_v7, 16  ;;  %v5502_v24 = vld [vmem:[%s6714_s26 + $0x24] sm:$0xf] }
  0xaa   : > { %v7404_v1 = vsel %vm6966_vm7, %v1259_v45, %v1260_v47 }
  0xab   : > { %v3598_v43 = vrot.slane %v3596_v22, 4  ;;  %v7446_v7 = vrot.slane %v3605_v18, 5  ;;  %v3623_v22 = vshll.u32 %v5502_v24, 16  ;;  %v3633_v18 = vshrl.u32 %v5503_v39, 16 }
  0xad   : > { %6160 = vmatmul.mubr.msk.bf16.gmra.mrb[28].mxu0 %vm670_vm3, %v5417_v40  ;;  %v6606_v40 = vld [vmem:[%s6714_s26 + $0x2c] sm:$0x1]  ;;  %v3625_v27 = vrot.slane %v3623_v22, 5 }
  0xae   : > { %6008 = vmatmul.mubr.msk.bf16.gmra.mrb[12].mxu1 %vm670_vm3, %v5149_v60  ;;  %6165 = vmatprep.mubr.msk.bf16.mxu0 %vm670_vm3, %v6551_v20  ;;  %v1253_v28 = vrot.slane %v6606_v40, 5  ;;  %v1264_v60 = vrot.slane %v7272_v17, 5  ;;  %v6611_v40 = vld [vmem:[%s6714_s26 + $0x50] sm:$0x1]  ;;  %v6616_v17 = vld [vmem:[%s6714_s26 + $0x74] sm:$0x1] }
  0xaf   : > { %6011 = vmatprep.mubr.msk.bf16.mxu1 %vm670_vm3, %v5150_v44  ;;  %v5178_v44 = vrot.slane %v1180_v41, 9  ;;  %v5181_v41 = vrot.slane %v1183_v50, 9  ;;  %v1184_v50 = vld [vmem:[%s6714_s26 + $0x60] sm:$0xe]  ;;  %v5504_v20 = vld [vmem:[%s6714_s26 + $0x2c] sm:$0x1] }
  0xb0   : > { %v1266_v12 = vrot.slane %v1264_v60, 4  ;;  %v7417_v45 = vsel %vm6966_vm7, %v5179_v35, %v1264_v60  ;;  %v6612_v35 = vld [vmem:[%s6714_s26 + $0x5c] sm:$0x1] }
  0xb1   : > { %v7400_v2 = vsel %vm6966_vm7, %v5178_v44, %v1257_v10  ;;  %v1281_v55 = vrot.slane %v6612_v35, 5  ;;  %v1185_v35 = vld [vmem:[%s6714_s26 + $0x6c] sm:$0xe] }
  0xb2   : > { %v7421_v59 = vsel %vm6966_vm7, %v1266_v12, %v1267_v15  ;;  %v6613_v15 = vld [vmem:[%s6714_s26 + $0x64] sm:$0xf]  ;;  %v3611_v12 = vrot.slane %v3609_v21, 4  ;;  %v5183_v5 = vrot.slane %v1185_v35, 9 }
  0xb3   : > { %v6563_v21 = vld [vmem:[%s6714_s26 + $0x60] sm:$0xff]  }
  0xb5   : > { %6166 = vmatmul.mubr.msk.bf16.vlgmr.msra.gmra.mrb[0].mxu0 %vm670_vm3, %v6553_v62  ;;  %v6609_v62 = vld [vmem:[%s6714_s26 + $0x4c] sm:$0xf] }
  0xb6   : > { %6012 = vmatmul.mubr.msk.bf16.gmra.mrb[16].mxu1 %vm670_vm3, %v5151_v58  ;;  %6198 = vmatpush3.bf16.msra.mxu0 %v4078_v54  ;;  %v1271_v57 = vrot.slane %v6609_v62, 5  ;;  %v7395_v58 = vsel %vm6966_vm7, %v1252_v25, %v1253_v28  ;;  %v5180_v54 = vrot.slane %v1182_v31, 9  ;;  %v1274_v28 = vrot.slane %v6611_v40, 5 }
  0xb7   : > { %6015 = vmatprep.mubr.msk.bf16.mxu1 %vm670_vm3, %v5152_v61  ;;  %6169 = vmatprep.mubr.msk.bf16.mxu0 %vm670_vm3, %v6555_v11  ;;  %v6559_v61 = vld [vmem:[%s6714_s26 + $0x48] sm:$0xff]   ;;  %v6610_v11 = vld [vmem:[%s6714_s26 + $0x58] sm:$0xf]  ;;  %v1285_v62 = vrot.slane %v6613_v15, 5  ;;  %v5506_v15 = vld [vmem:[%s6714_s26 + $0x34] sm:$0xf] }
  0xb8   : > { %6532 = vmatprep.subr.msk.bf16.mxu0 %vm719_vm0, %v7345_v26  ;;  %v1278_v16 = vrot.slane %v6610_v11, 5  ;;  %v1273_v31 = vrot.slane %v1271_v57, 4  ;;  %v7425_v47 = vsel %vm6966_vm7, %v5180_v54, %v1271_v57  ;;  %v5501_v57 = vld [vmem:[%s6714_s26 + $0x20] sm:$0x1]  ;;  %v5505_v54 = vld [vmem:[%s6714_s26 + $0x30] sm:$0xf] }
  0xb9   : > { %v5182_v11 = vrot.slane %v1184_v50, 9  ;;  %v3647_v50 = vshll.u32 %v5505_v54, 16  ;;  %v3615_v25 = vshll.u32 %v5501_v57, 16  ;;  %v3653_v36 = vshll.u32 %v5506_v15, 16 }
  0xba   : > { %v7436_v60 = vsel %vm6966_vm7, %v5181_v41, %v1278_v16  ;;  %v7452_v41 = vsel %vm6966_vm7, %v1273_v31, %v1274_v28  ;;  %v1287_v31 = vrot.slane %v1285_v62, 4  ;;  %v3644_v28 = vshrl.u32 %v5505_v54, 16 }
  0xbb   : > { %v7494_v35 = vrot.slane %v3653_v36, 5 }
  0xbd   : > { %6170 = vmatmul.mubr.msk.bf16.gmra.mrb[4].mxu0 %vm670_vm3, %v6557_v37  ;;  %v1280_v37 = vrot.slane %v1278_v16, 4  ;;  %v6614_v16 = vld [vmem:[%s6714_s26 + $0x68] sm:$0x1] }
  0xbe   : > { %6016 = vmatmul.mubr.msk.bf16.gmra.mrb[20].mxu1 %vm670_vm3, %v5153_v6  ;;  %6173 = vmatprep.mubr.msk.bf16.mxu0 %vm670_vm3, %v6559_v61  ;;  %v3601_v6 = vrot.slane %v3599_v8, 5  ;;  %v6561_v61 = vld [vmem:[%s6714_s26 + $0x54] sm:$0xff]   ;;  %v1288_v40 = vrot.slane %v6614_v16, 5  ;;  %v3629_v8 = vshll.u32 %v5503_v39, 16  ;;  %v3612_v16 = vor.u32 %v3611_v12, %v7446_v7 }
  0xbf   : > { %6019 = vmatprep.mubr.msk.bf16.mxu1 %vm670_vm3, %v5154_v9  ;;  %v3620_v9 = vshrl.u32 %v5502_v24, 16  ;;  %v7461_v44 = vsel %vm6966_vm7, %v1280_v37, %v1281_v55  ;;  %v1295_v24 = vrot.slane %v6616_v17, 5  ;;  %v3657_v39 = vshrl.u32 %v5506_v15, 16 }
  0xc0   : > { %v3602_v10 = vor.u32 %v3601_v6, %v3598_v43  ;;  %v7467_v37 = vrot.slane %v3629_v8, 5  ;;  %v3635_v55 = vrot.slane %v3633_v18, 4  ;;  %v8460_v43 = vcombine.low %v7071_v52, %v7082_v46  ;;  %v6617_v8 = vld [vmem:[%s6714_s26 + $0x7c] sm:$0xf]  ;;  %v7503_v18 = vld [vmem:[%s6714_s26 + $0x38] sm:$0x1] }
  0xc1   : > { %v3622_v38 = vrot.slane %v3620_v9, 4  ;;  %v7476_v17 = vsel %vm6966_vm7, %v5182_v11, %v1285_v62  ;;  %v7480_v57 = vsel %vm6966_vm7, %v1287_v31, %v1288_v40  ;;  %v3646_v6 = vrot.slane %v3644_v28, 4  ;;  %8462 = vst [vmem:[#allocation6_spill] sm:$0xff] %v7503_v18 }
  0xc2   : > { %v3649_v12 = vrot.slane %v3647_v50, 5  ;;  %v8461_v52 = vcombine.low %v7103_v33, %v7108_v56  ;;  %v3603_v46 = vrot.slane %v3602_v10, 4  ;;  %v3613_v54 = vrot.slane %v3612_v16, 4  ;;  %v6565_v33 = vld [vmem:[%s6714_s26 + $0x6c] sm:$0xff]   ;;  %v1187_v16 = vld [vmem:[%s6714_s26 + $0x84] sm:$0xe] }
  0xc3   : > { %v3639_v62 = vshll.u32 %v5504_v20, 16  ;;  %v7488_v11 = vsel %vm6966_vm7, %v5183_v5, %v1292_v30  ;;  %v7492_v40 = vsel %vm6966_vm7, %v1294_v48, %v1295_v24  ;;  %v3659_v9 = vrot.slane %v3657_v39, 4  ;;  %v6566_v48 = vld [vmem:[%s6714_s26 + $0x78] sm:$0xff]  }
  0xc4   : > { %v3626_v10 = vor.u32 %v3625_v27, %v3622_v38  ;;  %v3636_v20 = vor.u32 %v3635_v55, %v7467_v37  ;;  %v1299_v30 = vrot.slane %v6617_v8, 5  ;;  %v3650_v38 = vor.u32 %v3649_v12, %v3646_v6  ;;  %v5508_v5 = vld [vmem:[%s6714_s26 + $0x3c] sm:$0xf] }
  0xc5   : > { %6174 = vmatmul.mubr.msk.bf16.gmra.mrb[8].mxu0 %vm670_vm3, %v6561_v61  ;;  %v3617_v61 = vrot.slane %v3615_v25, 5  ;;  %v1186_v25 = vld [vmem:[%s6714_s26 + $0x78] sm:$0xe]  ;;  %v7519_v50 = vrot.slane %v3639_v62, 5  ;;  %v3660_v39 = vor.u32 %v3659_v9, %v7494_v35  ;;  %v3663_v55 = vshll.u32 %v7503_v18, 16 }
  0xc6   : > { %6020 = vmatmul.mubr.msk.bf16.gmra.mrb[24].mxu1 %vm670_vm3, %v8460_v43  ;;  %6177 = vmatprep.mubr.msk.bf16.mxu0 %vm670_vm3, %v6563_v21  ;;  %v3608_v21 = vsel %vm6740_vm4, %v3603_v46, %v7446_v7  ;;  %v5184_v24 = vrot.slane %v1186_v25, 9  ;;  %v6618_v43 = vld [vmem:[%s6714_s26 + $0x88] sm:$0xf]  ;;  %v7527_v7 = vld [vmem:[%s6714_s26 + $0x40] sm:$0xf]  ;;  %v3627_v12 = vrot.slane %v3626_v10, 4  ;;  %v8464_v62 = vcombine.low %v7123_v14, %v7132_v42 }
  0xc7   : > { %6023 = vmatprep.mubr.msk.bf16.mxu1 %vm670_vm3, %v8461_v52  ;;  %v3618_v31 = vsel %vm6740_vm4, %v3613_v54, %v3617_v61  ;;  %v1306_v6 = vrot.slane %v6618_v43, 5  ;;  %8463 = vst [vmem:[#allocation7_spill] sm:$0xff] %v7527_v7  ;;  %v3637_v52 = vrot.slane %v3636_v20, 4  ;;  %v1301_v46 = vrot.slane %v1299_v30, 4  ;;  %v6619_v54 = vld [vmem:[%s6714_s26 + $0x80] sm:$0x1] }
  0xc8   : > { %v1302_v61 = vrot.slane %v6619_v54, 5  ;;  %v3651_v9 = vrot.slane %v3650_v38, 4  ;;  %v5185_v25 = vrot.slane %v1187_v16, 9  ;;  %v3668_v8 = vshrl.u32 %v5508_v5, 16  ;;  %v6567_v10 = vld [vmem:[%s6714_s26 + $0x84] sm:$0xff]  }
  0xc9   : > { %v3671_v43 = vshll.u32 %v5508_v5, 16  ;;  %v7541_v20 = vcombine.low %v3608_v21, %v3618_v31  ;;  %v7545_v14 = vsel %vm719_vm0, %v7345_v26, 0  ;;  %v3681_v38 = vshrl.u32 %v7527_v7, 16  ;;  %v6568_v21 = vld [vmem:[%s6714_s26 + $0x90] sm:$0xff]   ;;  %v6624_v18 = vld [vmem:[%s6714_s26 + $0xa0] sm:$0xf] }
  0xca   : > { %v3661_v16 = vrot.slane %v3660_v39, 4  ;;  %v3665_v5 = vrot.slane %v3663_v55, 5  ;;  %v1308_v54 = vrot.slane %v1306_v6, 4  ;;  %v3632_v31 = vsel %vm6740_vm4, %v3627_v12, %v7467_v37 }
  0xcb   : > { %v3642_v26 = vsel %vm6740_vm4, %v3637_v52, %v7519_v50  ;;  %v7560_v39 = vsel %vm6966_vm7, %v5184_v24, %v1299_v30  ;;  %v7564_v55 = vsel %vm6966_vm7, %v1301_v46, %v1302_v61  ;;  %v3656_v37 = vsel %vm6740_vm4, %v3651_v9, %v7494_v35  ;;  %v5514_v30 = vld [vmem:[%s6714_s26 + $0x54] sm:$0xf]  ;;  %v7581_v24 = vld [vmem:[%s6714_s26 + $0x58] sm:$0xf]  ;;  %v7586_v61 = vld [vmem:[%s6714_s26 + $0x90] sm:$0xe] }
  0xcc   : > { %v7577_v12 = vsel %vm6966_vm7, %v5185_v25, %v1306_v6  ;;  %v3670_v50 = vrot.slane %v3668_v8, 4  ;;  %v3673_v52 = vrot.slane %v3671_v43, 5  ;;  %v3683_v46 = vrot.slane %v3681_v38, 4 }
  0xcd   : > { %6178 = vmatmul.mubr.msk.bf16.gmra.mrb[12].mxu0 %vm670_vm3, %v6565_v33  ;;  %v8465_v33 = vcombine.low %v7330_v0, %v7349_v23  ;;  %v6620_v0 = vld [vmem:[%s6714_s26 + $0x8c] sm:$0x1]  ;;  %v3666_v36 = vsel %vm6740_vm4, %v3661_v16, %v3665_v5  ;;  %v3716_v25 = vshrl.u32 %v5514_v30, 16  ;;  %v3719_v8 = vshll.u32 %v5514_v30, 16 }
  0xce   : > { %6024 = vmatmul.mubr.msk.bf16.gmra.mrb[28].mxu1 %vm670_vm3, %v8464_v62  ;;  %6181 = vmatprep.mubr.msk.bf16.mxu0 %vm670_vm3, %v6566_v48  ;;  %v3677_v48 = vshll.u32 %v7527_v7, 16  ;;  %v1309_v23 = vrot.slane %v6620_v0, 5  ;;  %v5511_v62 = vld [vmem:[%s6714_s26 + $0x48] sm:$0xf]  ;;  %v7570_v0 = vld [vmem:[%s6714_s26 + $0x4c] sm:$0xf]  ;;  %v8467_v38 = vcombine.low %v7334_v29, %v7338_v53  ;;  %v7604_v16 = vcombine.low %v3632_v31, %v3642_v26 }
  0xcf   : > { %6029 = vmatprep.mubr.msk.bf16.mxu1 %vm670_vm3, %v8465_v33  ;;  %v7567_v33 = vld [vmem:[%s6714_s26 + $0x44] sm:$0x1]  ;;  %v3692_v27 = vshrl.u32 %v5511_v62, 16  ;;  %v3695_v15 = vshll.u32 %v5511_v62, 16  ;;  %v3701_v6 = vshll.u32 %v7570_v0, 16  ;;  %v3705_v9 = vshrl.u32 %v7570_v0, 16 }
  0xd0   : > { %8466 = vst [vmem:[#allocation8_spill] sm:$0xff] %v7567_v33  ;;  %v7583_v28 = vrot.slane %v3677_v48, 5  ;;  %v7592_v35 = vsel %vm6966_vm7, %v1308_v54, %v1309_v23  ;;  %v3725_v43 = vshll.u32 %v7581_v24, 16  ;;  %v3729_v48 = vshrl.u32 %v7581_v24, 16  ;;  %v5517_v31 = vld [vmem:[%s6714_s26 + $0x60] sm:$0xf] }
  0xd1   : > { %v3687_v5 = vshll.u32 %v7567_v33, 16  ;;  %v5186_v54 = vrot.slane %v7586_v61, 9  ;;  %v8468_v23 = vcombine.low %v7375_v34, %v7391_v4  ;;  %v7615_v29 = vcombine.low %v3656_v37, %v3666_v36  ;;  %v6569_v26 = vld [vmem:[%s6714_s26 + $0x9c] sm:$0xff]   ;;  %v6570_v30 = vld [vmem:[%s6714_s26 + $0xa8] sm:$0xff]  }
  0xd2   : > { %v3674_v53 = vor.u32 %v3673_v52, %v3670_v50  ;;  %v3694_v62 = vrot.slane %v3692_v27, 4  ;;  %v7626_v34 = vrot.slane %v3701_v6, 5  ;;  %v3707_v4 = vrot.slane %v3705_v9, 4  ;;  %v6621_v36 = vld [vmem:[%s8436_s1 + $0x8] sm:$0x3] }
  0xd3   : > { %v3718_v27 = vrot.slane %v3716_v25, 4  ;;  %v3721_v37 = vrot.slane %v3719_v8, 5  ;;  %v7635_v50 = vrot.slane %v3725_v43, 5  ;;  %v3731_v52 = vrot.slane %v3729_v48, 4  ;;  %v6622_v6 = vld [vmem:[%s6714_s26 + $0x94] sm:$0xf] }
  0xd4   : > { %v7641_v9 = vld [vmem:[%s6714_s26 + $0x64] sm:$0xf]  ;;  %v3740_v61 = vshrl.u32 %v5517_v31, 16  ;;  %v7643_v22 = vrot.slane %v3674_v53, 4  ;;  %v1320_v25 = vrot.slane %v6624_v18, 5  ;;  %v3708_v43 = vor.u32 %v3707_v4, %v7626_v34 }
  0xd5   : > { %6182 = vmatmul.mubr.msk.bf16.gmra.mrb[16].mxu0 %vm670_vm3, %v6567_v10  ;;  %8469 = vst [vmem:[#allocation9_spill] sm:$0xff] %v7641_v9  ;;  %v3743_v10 = vshll.u32 %v5517_v31, 16  ;;  %v3722_v31 = vor.u32 %v3721_v37, %v3718_v27  ;;  %v3732_v53 = vor.u32 %v3731_v52, %v7635_v50  ;;  %v8470_v18 = vcombine.low %v7382_v19, %v7395_v58  ;;  %v6571_v37 = vld [vmem:[%s6714_s26 + $0xb4] sm:$0xff]  }
  0xd6   : > { %6030 = vmatmul.mubr.msk.bf16.vlgmr.msra.gmra.mrb[0].mxu1 %vm670_vm3, %v8467_v38  ;;  %6185 = vmatprep.mubr.msk.bf16.mxu0 %vm670_vm3, %v6568_v21  ;;  %v3697_v21 = vrot.slane %v3695_v15, 5  ;;  %v7624_v38 = vld [vmem:[%s6714_s26 + $0x50] sm:$0x1]  ;;  %v7633_v15 = vld [vmem:[%s6714_s26 + $0x5c] sm:$0x1]  ;;  %v8471_v27 = vcombine.low %v7400_v2, %v7404_v1  ;;  %v1322_v52 = vrot.slane %v1320_v25, 4 }
  0xd7   : > { %6062 = vmatpush3.bf16.msra.mxu1 %v7371_v49  ;;  %6033 = vmatprep.mubr.msk.bf16.mxu1 %vm670_vm3, %v8468_v23  ;;  %v3684_v49 = vor.u32 %v3683_v46, %v7583_v28  ;;  %v7637_v46 = vrot.slane %v3687_v5, 5  ;;  %v1313_v23 = vrot.slane %v6622_v6, 5  ;;  %v3711_v48 = vshll.u32 %v7624_v38, 16  ;;  %v1189_v5 = vld [vmem:[%s6714_s26 + $0x9c] sm:$0xe] }
  0xd8   : > { %6528 = vmatprep.subr.msk.bf16.mxu1 %vm719_vm0, %v6621_v36  ;;  %v6623_v36 = vld [vmem:[%s6714_s26 + $0x98] sm:$0x1]  ;;  %v3698_v7 = vor.u32 %v3697_v21, %v3694_v62  ;;  %v3735_v6 = vshll.u32 %v7633_v15, 16  ;;  %v3753_v62 = vshrl.u32 %v7641_v9, 16  ;;  %v3745_v4 = vrot.slane %v3743_v10, 5 }
  0xd9   : > { %v1316_v33 = vrot.slane %v6623_v36, 5  ;;  %v3685_v8 = vrot.slane %v3684_v49, 4  ;;  %v3749_v36 = vshll.u32 %v7641_v9, 16  ;;  %v7662_v21 = vsel %vm6966_vm7, %v5186_v54, %v1313_v23  ;;  %v7673_v2 = vld [vmem:[%s6714_s26 + $0x68] sm:$0x1] }
  0xda   : > { %v3742_v49 = vrot.slane %v3740_v61, 4  ;;  %v3699_v19 = vrot.slane %v3698_v7, 4  ;;  %v5187_v58 = vrot.slane %v1189_v5, 9  ;;  %v3709_v3 = vrot.slane %v3708_v43, 4  ;;  %8472 = vst [vmem:[#allocation10_spill] sm:$0xff] %v7673_v2  ;;  %v6572_v5 = vld [vmem:[%s6714_s26 + $0xc0] sm:$0xff]  }
  0xdb   : > { %v3713_v54 = vrot.slane %v3711_v48, 5  ;;  %v3737_v63 = vrot.slane %v3735_v6, 5  ;;  %v1327_v61 = vrot.slane %v7108_v56, 5  ;;  %v3723_v10 = vrot.slane %v3722_v31, 4  ;;  %v1191_v31 = vld [vmem:[%s6714_s26 + $0xb4] sm:$0xe] }
  0xdc   : > { %v3733_v51 = vrot.slane %v3732_v53, 4  ;;  %v7675_v1 = vrot.slane %v3749_v36, 5  ;;  %v3755_v7 = vrot.slane %v3753_v62, 4  ;;  %v3680_v43 = vsel %vm6740_vm4, %v7643_v22, %v7583_v28  ;;  %v6626_v62 = vld [vmem:[%s6714_s26 + $0xb0] sm:$0x1] }
  0xdd   : > { %6186 = vmatmul.mubr.msk.bf16.gmra.mrb[20].mxu0 %vm670_vm3, %v6569_v26  ;;  %v1315_v26 = vrot.slane %v1313_v23, 4  ;;  %v1190_v23 = vld [vmem:[%s6714_s26 + $0xa8] sm:$0xe]  ;;  %v3690_v48 = vsel %vm6740_vm4, %v3685_v8, %v7637_v46  ;;  %v3746_v6 = vor.u32 %v3745_v4, %v3742_v49  ;;  %v3704_v53 = vsel %vm6740_vm4, %v3699_v19, %v7626_v34  ;;  %v5520_v46 = vld [vmem:[%s6714_s26 + $0x6c] sm:$0xf] }
  0xde   : > { %6034 = vmatmul.mubr.msk.bf16.gmra.mrb[4].mxu1 %vm670_vm3, %v8470_v18  ;;  %6189 = vmatprep.mubr.msk.bf16.mxu0 %vm670_vm3, %v6570_v30  ;;  %v6625_v18 = vld [vmem:[%s6714_s26 + $0xa4] sm:$0x1]  ;;  %v7695_v36 = vsel %vm6966_vm7, %v5187_v58, %v1320_v25  ;;  %v5188_v28 = vrot.slane %v1190_v23, 9  ;;  %v1329_v8 = vrot.slane %v1327_v61, 4  ;;  %v3759_v49 = vshll.u32 %v7673_v2, 16 }
  0xdf   : > { %6037 = vmatprep.mubr.msk.bf16.mxu1 %vm670_vm3, %v8471_v27  ;;  %v1323_v30 = vrot.slane %v6625_v18, 5  ;;  %v7687_v56 = vsel %vm6966_vm7, %v1315_v26, %v1316_v33  ;;  %v3714_v33 = vsel %vm6740_vm4, %v3709_v3, %v3713_v54  ;;  %v1330_v26 = vrot.slane %v6626_v62, 5  ;;  %v5523_v18 = vld [vmem:[%s6714_s26 + $0x78] sm:$0xf]  ;;  %v7750_v54 = vld [vmem:[%s6714_s26 + $0xbc] sm:$0x1] }
  0xe0   : > { %v3728_v34 = vsel %vm6740_vm4, %v3723_v10, %v7635_v50  ;;  %v3738_v25 = vsel %vm6740_vm4, %v3733_v51, %v3737_v63  ;;  %v3756_v4 = vor.u32 %v3755_v7, %v7675_v1  ;;  %v5189_v27 = vrot.slane %v1191_v31, 9  ;;  %v7724_v51 = vld [vmem:[%s6714_s26 + $0x70] sm:$0xf]  ;;  %v7754_v10 = vld [vmem:[%s6714_s26 + $0x7c] sm:$0xf] }
  0xe1   : > { %v7699_v22 = vsel %vm6966_vm7, %v1322_v52, %v1323_v30  ;;  %v8474_v3 = vcombine.low %v7417_v45, %v7421_v59  ;;  %v7720_v19 = vrot.slane %v3746_v6, 4  ;;  %v1334_v50 = vrot.slane %v7132_v42, 5  ;;  %8475 = vst [vmem:[#allocation12_spill] sm:$0xff] %v7724_v51  ;;  %8477 = vst [vmem:[#allocation13_spill] sm:$0xff] %v7754_v10  ;;  %v5526_v7 = vld [vmem:[%s6714_s26 + $0x84] sm:$0xf] }
  0xe2   : > { %8473 = vst [vmem:[#allocation11_spill] sm:$0xff] %v7699_v22  ;;  %v3764_v63 = vshrl.u32 %v5520_v46, 16  ;;  %v8476_v45 = vcombine.low %v7425_v47, %v7452_v41  ;;  %v7732_v58 = vcombine.low %v3704_v53, %v3714_v33  ;;  %v7738_v42 = vsel %vm6966_vm7, %v5188_v28, %v1327_v61  ;;  %v6573_v61 = vld [vmem:[%s6714_s26 + $0xcc] sm:$0xff]   ;;  %v7766_v31 = vld [vmem:[%s6714_s26 + $0x88] sm:$0xf] }
  0xe3   : > { %v7741_v30 = vcombine.low %v3728_v34, %v3738_v25  ;;  %v7745_v47 = vsel %vm6966_vm7, %v1329_v8, %v1330_v26  ;;  %v7747_v41 = vrot.slane %v3759_v49, 5  ;;  %v3773_v6 = vshll.u32 %v7724_v51, 16  ;;  %8478 = vst [vmem:[#allocation14_spill] sm:$0xff] %v7766_v31  ;;  %v5529_v62 = vld [vmem:[%s6714_s26 + $0x90] sm:$0xf] }
  0xe4   : > { %v7772_v28 = vrot.slane %v1334_v50, 4  ;;  %v7774_v33 = vrot.slane %v3764_v63, 4  ;;  %v3777_v8 = vshrl.u32 %v7724_v51, 16  ;;  %v3788_v26 = vshrl.u32 %v5523_v18, 16  ;;  %v7781_v25 = vld [vmem:[%s6714_s26 + $0x94] sm:$0xf] }
  0xe5   : > { %6190 = vmatmul.mubr.msk.bf16.gmra.mrb[24].mxu0 %vm670_vm3, %v6571_v37  ;;  %v7718_v37 = vcombine.low %v3680_v43, %v3690_v48  ;;  %v7762_v43 = vsel %vm6966_vm7, %v5189_v27, %v1334_v50  ;;  %v3767_v48 = vshll.u32 %v5520_v46, 16  ;;  %v3791_v49 = vshll.u32 %v5523_v18, 16  ;;  %8479 = vst [vmem:[#allocation15_spill] sm:$0xff] %v7781_v25  ;;  %v7819_v2 = vld [vmem:[%s6714_s26 + $0x8c] sm:$0x1] }
  0xe6   : > { %6038 = vmatmul.mubr.msk.bf16.gmra.mrb[8].mxu1 %vm670_vm3, %v8474_v3  ;;  %6193 = vmatprep.mubr.msk.bf16.mxu0 %vm670_vm3, %v6572_v5  ;;  %v7758_v5 = vrot.slane %v3756_v4, 4  ;;  %v3797_v46 = vshll.u32 %v7754_v10, 16  ;;  %v3801_v34 = vshrl.u32 %v7754_v10, 16  ;;  %v3812_v4 = vshrl.u32 %v5526_v7, 16 }
  0xe7   : > { %6041 = vmatprep.mubr.msk.bf16.mxu1 %vm670_vm3, %v8476_v45  ;;  %v3815_v27 = vshll.u32 %v5526_v7, 16  ;;  %v3821_v3 = vshll.u32 %v7766_v31, 16  ;;  %v3825_v50 = vshrl.u32 %v7766_v31, 16  ;;  %v7791_v45 = vld [vmem:[%s6714_s26 + $0x74] sm:$0x1]  ;;  %v3769_v18 = vrot.slane %v3767_v48, 5 }
  0xe8   : > { %v3836_v52 = vshrl.u32 %v5529_v62, 16  ;;  %v3839_v53 = vshll.u32 %v5529_v62, 16  ;;  %v8480_v7 = vcombine.low %v7436_v60, %v7461_v44  ;;  %v3779_v59 = vrot.slane %v3777_v8, 4  ;;  %v5532_v48 = vld [vmem:[%s6714_s26 + $0x9c] sm:$0xf] }
  0xe9   : > { %v3845_v63 = vshll.u32 %v7781_v25, 16  ;;  %v3849_v23 = vshrl.u32 %v7781_v25, 16  ;;  %v8481_v62 = vcombine.low %v7476_v17, %v7480_v57  ;;  %v7809_v44 = vld [vmem:[%s6714_s26 + $0x80] sm:$0x1]  ;;  %v3790_v60 = vrot.slane %v3788_v26, 4 }
  0xea   : > { %8482 = vst [vmem:[#allocation16_spill] sm:$0xff] %v7809_v44  ;;  %v3814_v31 = vrot.slane %v3812_v4, 4  ;;  %v3817_v8 = vrot.slane %v3815_v27, 5  ;;  %v7813_v10 = vrot.slane %v3821_v3, 5  ;;  %v3827_v51 = vrot.slane %v3825_v50, 4 }
  0xeb   : > { %v7816_v25 = vld [vmem:[%s6714_s26 + $0xa0] sm:$0xf]  ;;  %v3838_v17 = vrot.slane %v3836_v52, 4  ;;  %v3841_v57 = vrot.slane %v3839_v53, 5  ;;  %v3863_v9 = vshll.u32 %v5532_v48, 16  ;;  %v3770_v26 = vor.u32 %v3769_v18, %v7774_v33 }
  0xec   : > { %v3807_v27 = vshll.u32 %v7809_v44, 16  ;;  %v7828_v3 = vld [vmem:[%s6714_s26 + $0x98] sm:$0x1]  ;;  %v3869_v50 = vshll.u32 %v7816_v25, 16  ;;  %v3873_v52 = vshrl.u32 %v7816_v25, 16  ;;  %v3818_v22 = vor.u32 %v3817_v8, %v3814_v31 }
  0xed   : > { %6194 = vmatmul.mubr.msk.bf16.gmra.mrb[28].mxu0 %vm670_vm3, %v6573_v61  ;;  %v7799_v61 = vrot.slane %v3773_v6, 5  ;;  %v3803_v6 = vrot.slane %v3801_v34, 4  ;;  %v3851_v34 = vrot.slane %v3849_v23, 4  ;;  %v3831_v33 = vshll.u32 %v7819_v2, 16 }
  0xee   : > { %6042 = vmatmul.mubr.msk.bf16.gmra.mrb[12].mxu1 %vm670_vm3, %v8480_v7  ;;  %6199 = vmatprep.mubr.msk.bf16.mxu0 %vm670_vm3, %v7541_v20  ;;  %v3793_v7 = vrot.slane %v3791_v49, 5  ;;  %v7811_v20 = vrot.slane %v3797_v46, 5  ;;  %v3783_v49 = vshll.u32 %v7791_v45, 16  ;;  %v7823_v46 = vrot.slane %v3845_v63, 5 }
  0xef   : > { %6045 = vmatprep.mubr.msk.bf16.mxu1 %vm670_vm3, %v8481_v62  ;;  %v3860_v62 = vshrl.u32 %v5532_v48, 16  ;;  %v3780_v4 = vor.u32 %v3779_v59, %v7799_v61  ;;  %v3828_v23 = vor.u32 %v3827_v51, %v7813_v10  ;;  %v3842_v59 = vor.u32 %v3841_v57, %v3838_v17  ;;  %v7861_v57 = vld [vmem:[%s6714_s26 + $0xa4] sm:$0x1] }
  0xf0   : > { %v3794_v53 = vor.u32 %v3793_v7, %v3790_v60  ;;  %v3804_v48 = vor.u32 %v3803_v6, %v7811_v20  ;;  %v3865_v18 = vrot.slane %v3863_v9, 5  ;;  %v8483_v44 = vcombine.low %v7488_v11, %v7492_v40 }
  0xf1   : > { %v3862_v63 = vrot.slane %v3860_v62, 4  ;;  %v8484_v31 = vrot.slane %v7750_v54, 5  ;;  %v3785_v51 = vrot.slane %v3783_v49, 5  ;;  %v3852_v60 = vor.u32 %v3851_v34, %v7823_v46  ;;  %v7864_v34 = vld [vmem:[%s6714_s26 + $0xac] sm:$0xf] }
  0xf2   : > { %v3855_v9 = vshll.u32 %v7828_v3, 16  ;;  %v8485_v11 = vcombine.low %v7560_v39, %v7564_v55  ;;  %v3771_v40 = vrot.slane %v3770_v26, 4  ;;  %v7857_v54 = vrot.slane %v3869_v50, 5 }
  0xf3   : > { %v3795_v7 = vrot.slane %v3794_v53, 4  ;;  %v3805_v6 = vrot.slane %v3804_v48, 4  ;;  %v3809_v8 = vrot.slane %v3807_v27, 5  ;;  %v3833_v17 = vrot.slane %v3831_v33, 5  ;;  %v7874_v48 = vld [vmem:[%s6714_s26 + $0xb0] sm:$0x1] }
  0xf4   : > { %v3819_v39 = vrot.slane %v3818_v22, 4  ;;  %v3829_v55 = vrot.slane %v3828_v23, 4  ;;  %v3843_v62 = vrot.slane %v3842_v59, 4  ;;  %v3866_v49 = vor.u32 %v3865_v18, %v3862_v63 }
  0xf5   : > { %6200 = vmatmul.mubr.msk.bf16.vlgmr.msra.gmra.mrb[0].mxu0 %vm670_vm3, %v7604_v16  ;;  %v7847_v16 = vsel %vm6966_vm7, %v7772_v28, %v8484_v31  ;;  %v3875_v28 = vrot.slane %v3873_v52, 4  ;;  %v3857_v26 = vrot.slane %v3855_v9, 5  ;;  %v3776_v52 = vsel %vm6740_vm4, %v3771_v40, %v7799_v61 }
  0xf6   : > { %6046 = vmatmul.mubr.msk.bf16.gmra.mrb[16].mxu1 %vm670_vm3, %v8483_v44  ;;  %6232 = vmatpush3.bf16.msra.mxu0 %v7545_v14  ;;  %v3781_v14 = vrot.slane %v3780_v4, 4  ;;  %v5535_v44 = vld [vmem:[%s6714_s26 + $0xa8] sm:$0xf]  ;;  %v3879_v22 = vshll.u32 %v7861_v57, 16  ;;  %v3800_v33 = vsel %vm6740_vm4, %v3795_v7, %v7811_v20  ;;  %v3810_v23 = vsel %vm6740_vm4, %v3805_v6, %v3809_v8 }
  0xf7   : > { %6049 = vmatprep.mubr.msk.bf16.mxu1 %vm670_vm3, %v8485_v11  ;;  %6203 = vmatprep.mubr.msk.bf16.mxu0 %vm670_vm3, %v7615_v29  ;;  %v3853_v29 = vrot.slane %v3852_v60, 4  ;;  %v3884_v4 = vshrl.u32 %v5535_v44, 16  ;;  %v3887_v50 = vshll.u32 %v5535_v44, 16  ;;  %v3876_v53 = vor.u32 %v3875_v28, %v7857_v54  ;;  %v5584_v11 = vld [vmem:[%s6714_s26 + $0x48] sm:$0xe] }
  0xf8   : > { %v3786_v27 = vsel %vm6740_vm4, %v3781_v14, %v3785_v51  ;;  %v3893_v59 = vshll.u32 %v7864_v34, 16  ;;  %v3897_v61 = vshrl.u32 %v7864_v34, 16  ;;  %v3824_v63 = vsel %vm6740_vm4, %v3819_v39, %v7813_v10  ;;  %v7939_v39 = vld [vmem:[%s6714_s26 + $0xb8] sm:$0xf] }
  0xf9   : > { %v3834_v18 = vsel %vm6740_vm4, %v3829_v55, %v3833_v17  ;;  %v3848_v20 = vsel %vm6740_vm4, %v3843_v62, %v7823_v46  ;;  %v3867_v31 = vrot.slane %v3866_v49, 4  ;;  %v8486_v51 = vcombine.low %v7577_v12, %v7592_v35 }
  0xfa   : > { %v3886_v10 = vrot.slane %v3884_v4, 4  ;;  %v3889_v60 = vrot.slane %v3887_v50, 5  ;;  %v3903_v9 = vshll.u32 %v7874_v48, 16  ;;  %v8487_v46 = vcombine.low %v7662_v21, %v7687_v56  ;;  %v5538_v21 = vld [vmem:[%s6714_s26 + $0xb4] sm:$0xf] }
  0xfb   : > { %v5205_v12 = vcombine.low %v7738_v42, %v7745_v47  ;;  %v8488_v35 = vsel %vm6740_vm4, %v7758_v5, %v7747_v41  ;;  %v3877_v14 = vrot.slane %v3876_v53, 4  ;;  %v3881_v28 = vrot.slane %v3879_v22, 5  ;;  %v5586_v4 = vld [vmem:[%s6714_s26 + $0x60] sm:$0xe]  ;;  %v5587_v53 = vld [vmem:[%s6714_s26 + $0x6c] sm:$0xe] }
  0xfc   : > { %v5206_v56 = vcombine.low %v7762_v43, %v7847_v16  ;;  %v7922_v44 = vcombine.low %v3776_v52, %v3786_v27  ;;  %v7924_v42 = vrot.slane %v3893_v59, 5  ;;  %v3899_v47 = vrot.slane %v3897_v61, 4  ;;  %v8497_v16 = vld [vmem:[#allocation4_spill] sm:$0xff] }
  0xfd   : > { %6204 = vmatmul.mubr.msk.bf16.gmra.mrb[4].mxu0 %vm670_vm3, %v7718_v37  ;;  %v3858_v37 = vsel %vm6740_vm4, %v3853_v29, %v3857_v26  ;;  %v7926_v41 = vcombine.low %v3800_v33, %v3810_v23  ;;  %v7928_v5 = vcombine.low %v3824_v63, %v3834_v18  ;;  %v3872_v6 = vsel %vm6740_vm4, %v3867_v31, %v7857_v54  ;;  %v8490_v23 = vld [vmem:[#allocation11_spill] sm:$0xff]  ;;  %v5541_v63 = vld [vmem:[%s6714_s26 + $0xc0] sm:$0xf]  ;;  %v8492_v18 = vld [vmem:[#allocation9_spill] sm:$0xff] }
  0xfe   : > { %6050 = vmatmul.mubr.msk.bf16.gmra.mrb[20].mxu1 %vm670_vm3, %v8486_v51  ;;  %6207 = vmatprep.mubr.msk.bf16.mxu0 %vm670_vm3, %v7732_v58  ;;  %v8489_v58 = vsel %vm6740_vm4, %v7720_v19, %v7675_v1  ;;  %v7930_v7 = vcombine.low %v3848_v20, %v3858_v37  ;;  %v5600_v1 = vrot.slane %v5584_v11, 9  ;;  %v5585_v19 = vld [vmem:[%s6714_s26 + $0x54] sm:$0xe]  ;;  %v3890_v8 = vor.u32 %v3889_v60, %v3886_v10  ;;  %v8493_v31 = vld [vmem:[#allocation10_spill] sm:$0xff] }
  0xff   : > { %6053 = vmatprep.mubr.msk.bf16.mxu1 %vm670_vm3, %v8487_v46  ;;  %v5554_v40 = vcombine.low %v8489_v58, %v8488_v35  ;;  %v7936_v17 = vrot.slane %v3903_v9, 5  ;;  %v3908_v55 = vshrl.u32 %v5538_v21, 16  ;;  %v3882_v62 = vsel %vm6740_vm4, %v3877_v14, %v3881_v28  ;;  %v8494_v9 = vld [vmem:[#allocation12_spill] sm:$0xff]  ;;  %v7988_v35 = vld [vmem:[%s6714_s26 + $0xbc] sm:$0x1] }
 0x100   : > { %v3911_v49 = vshll.u32 %v5538_v21, 16  ;;  %v4367_v29 = vrot.slane %v7570_v0, 5  ;;  %v4370_v26 = vrot.slane %v7624_v38, 5  ;;  %v3900_v50 = vor.u32 %v3899_v47, %v7924_v42  ;;  %v7991_v58 = vld [vmem:[%s6714_s26 + $0xc4] sm:$0xf] }
 0x101   : > { %v5601_v52 = vrot.slane %v5585_v19, 9  ;;  %v4374_v54 = vrot.slane %v7581_v24, 5  ;;  %v4377_v27 = vrot.slane %v7633_v15, 5  ;;  %v3917_v22 = vshll.u32 %v7939_v39, 16  ;;  %v5588_v19 = vld [vmem:[%s6714_s26 + $0x78] sm:$0xe] }
 0x102   : > { %v3921_v33 = vshrl.u32 %v7939_v39, 16  ;;  %v7956_v0 = vsel %vm6966_vm7, %v5600_v1, %v4367_v29  ;;  %v4369_v38 = vrot.slane %v4367_v29, 4  ;;  %v8491_v59 = vcombine.low %v7695_v36, %v8490_v23  ;;  %v8495_v23 = vld [vmem:[#allocation13_spill] sm:$0xff] }
 0x103   : > { %v7963_v24 = vcombine.low %v3872_v6, %v3882_v62  ;;  %v7967_v15 = vsel %vm6966_vm7, %v5601_v52, %v4374_v54  ;;  %v5602_v61 = vrot.slane %v5586_v4, 9  ;;  %v4381_v20 = vrot.slane %v8492_v18, 5  ;;  %v6574_v6 = vld [vmem:[%s6714_s26 + $0xc] sm:$0xff]  }
 0x104   : > { %v7973_v36 = vsel %vm6966_vm7, %v4369_v38, %v4370_v26  ;;  %v4384_v51 = vrot.slane %v8493_v31, 5  ;;  %v5603_v37 = vrot.slane %v5587_v53, 9  ;;  %v4388_v11 = vrot.slane %v8494_v9, 5 }
 0x105   : > { %6208 = vmatmul.mubr.msk.bf16.gmra.mrb[8].mxu0 %vm670_vm3, %v7741_v30  ;;  %v4376_v30 = vrot.slane %v4374_v54, 4  ;;  %v5617_v10 = vcombine.low %v7956_v0, %v7973_v36  ;;  %v4391_v46 = vrot.slane %v7791_v45, 5  ;;  %v7997_v14 = vsel %vm6966_vm7, %v5602_v61, %v4381_v20 }
 0x106   : > { %6054 = vmatmul.mubr.msk.bf16.gmra.mrb[24].mxu1 %vm670_vm3, %v8491_v59  ;;  %6211 = vmatprep.mubr.msk.bf16.mxu0 %vm670_vm3, %v5554_v40  ;;  %v4383_v28 = vrot.slane %v4381_v20, 4  ;;  %v7999_v21 = vrot.slane %v3908_v55, 4  ;;  %v3932_v47 = vshrl.u32 %v5541_v63, 16  ;;  %v8003_v45 = vsel %vm6966_vm7, %v5603_v37, %v4388_v11  ;;  %v5315_v55 = vld [vmem:[%s6714_s26 + $0x78] sm:$0xf]  ;;  %v8496_v59 = vld [vmem:[#allocation16_spill] sm:$0xff] }
 0x107   : > { %6057 = vmatprep.mubr.msk.bf16.mxu1 %vm670_vm3, %v5205_v12  ;;  %v7981_v60 = vsel %vm6966_vm7, %v4376_v30, %v4377_v27  ;;  %v7985_v12 = vrot.slane %v3890_v8, 4  ;;  %v4390_v1 = vrot.slane %v4388_v11, 4  ;;  %v8007_v8 = vrot.slane %v3900_v50, 4 }
 0x108   : > { %v5618_v40 = vcombine.low %v7967_v15, %v7981_v60  ;;  %v8009_v62 = vrot.slane %v3911_v49, 5  ;;  %v3935_v29 = vshll.u32 %v5541_v63, 16  ;;  %v8013_v26 = vsel %vm6966_vm7, %v4383_v28, %v4384_v51  ;;  %v8499_v28 = vld [vmem:[#allocation14_spill] sm:$0xff] }
 0x109   : > { %v8016_v4 = vrot.slane %v3917_v22, 5  ;;  %v8018_v52 = vrot.slane %v3921_v33, 4  ;;  %v5619_v54 = vcombine.low %v7997_v14, %v8013_v26  ;;  %v8024_v27 = vsel %vm6966_vm7, %v4390_v1, %v4391_v46  ;;  %v5589_v33 = vld [vmem:[%s6714_s26 + $0x84] sm:$0xe]  ;;  %v6575_v1 = vld [vmem:[%s6714_s26 + $0x18] sm:$0xff]  }
 0x10a   : > { %v3927_v49 = vshll.u32 %v7988_v35, 16  ;;  %v3941_v50 = vshll.u32 %v7991_v58, 16  ;;  %v5620_v53 = vcombine.low %v8003_v45, %v8024_v27  ;;  %v5604_v22 = vrot.slane %v5588_v19, 9  ;;  %v6637_v60 = vld [vmem:[%s6714_s26 + $0xa0] sm:$0xf] }
 0x10b   : > { %v3934_v38 = vrot.slane %v3932_v47, 4  ;;  %v4398_v30 = vrot.slane %v8496_v59, 5  ;;  %v2257_v61 = vshrl.u32 %v5315_v55, 16  ;;  %v3937_v63 = vrot.slane %v3935_v29, 5  ;;  %v5544_v29 = vld [vmem:[%s6714_s26 + $0xcc] sm:$0xf] }
 0x10c   : > { %v3945_v18 = vshrl.u32 %v7991_v58, 16  ;;  %v2260_v43 = vshll.u32 %v5315_v55, 16  ;;  %v5605_v37 = vrot.slane %v5589_v33, 9  ;;  %v3896_v9 = vsel %vm6740_vm4, %v7985_v12, %v7924_v42  ;;  %v8067_v55 = vld [vmem:[%s6714_s26 + $0xd0] sm:$0xf] }
 0x10d   : > { %6212 = vmatmul.mubr.msk.bf16.gmra.mrb[12].mxu0 %vm670_vm3, %v7922_v44  ;;  %v4395_v44 = vrot.slane %v8495_v23, 5  ;;  %v2259_v51 = vrot.slane %v2257_v61, 4  ;;  %v3914_v11 = vor.u32 %v8009_v62, %v7999_v21  ;;  %v4402_v47 = vrot.slane %v8499_v28, 5  ;;  %v6576_v21 = vld [vmem:[%s6714_s26 + $0x24] sm:$0xff]   ;;  %v6641_v27 = vld [vmem:[%s6714_s26 + $0xac] sm:$0xf] }
 0x10e   : > { %6058 = vmatmul.mubr.msk.bf16.gmra.mrb[28].mxu1 %vm670_vm3, %v5206_v56  ;;  %6215 = vmatprep.mubr.msk.bf16.mxu0 %vm670_vm3, %v7926_v41  ;;  %v8498_v56 = vld [vmem:[#allocation5_spill] sm:$0xff]  ;;  %v2262_v46 = vrot.slane %v2260_v43, 5  ;;  %v3906_v19 = vsel %vm6740_vm4, %v8007_v8, %v7936_v17  ;;  %v4405_v12 = vrot.slane %v7819_v2, 5  ;;  %v8075_v62 = vrot.slane %v3941_v50, 5  ;;  %v5590_v8 = vld [vmem:[%s6714_s26 + $0x90] sm:$0xe] }
 0x10f   : > { %6063 = vmatprep.mubr.msk.bf16.mxu1 %vm670_vm3, %v6574_v6  ;;  %v2279_v41 = vsel %vm6740_vm4, %v8498_v56, %v8497_v16  ;;  %v8049_v20 = vsel %vm6966_vm7, %v5604_v22, %v4395_v44  ;;  %v4397_v31 = vrot.slane %v4395_v44, 4  ;;  %v3924_v6 = vor.u32 %v8018_v52, %v8016_v4  ;;  %v8081_v52 = vld [vmem:[%s6714_s26 + $0xc8] sm:$0x1]  ;;  %v8501_v16 = vld [vmem:[#allocation2_spill] sm:$0xff] }
 0x110   : > { %v3947_v22 = vrot.slane %v3945_v18, 4  ;;  %v2263_v17 = vor.u32 %v2262_v46, %v2259_v51  ;;  %v3929_v23 = vrot.slane %v3927_v49, 5  ;;  %v3938_v44 = vor.u32 %v3937_v63, %v3934_v38  ;;  %v8502_v51 = vld [vmem:[#allocation3_spill] sm:$0xff] }
 0x111   : > { %v8071_v42 = vsel %vm6966_vm7, %v4397_v31, %v4398_v30  ;;  %v8085_v59 = vsel %vm6966_vm7, %v5605_v37, %v4402_v47  ;;  %v4404_v30 = vrot.slane %v4402_v47, 4  ;;  %v3956_v2 = vshrl.u32 %v5544_v29, 16 }
 0x112   : > { %v5621_v33 = vcombine.low %v8049_v20, %v8071_v42  ;;  %v3959_v50 = vshll.u32 %v5544_v29, 16  ;;  %v3965_v61 = vshll.u32 %v8067_v55, 16  ;;  %v2264_v18 = vrot.slane %v2263_v17, 4  ;;  %v6577_v29 = vld [vmem:[%s6714_s26 + $0x30] sm:$0xff]  }
 0x113   : > { %v3969_v49 = vshrl.u32 %v8067_v55, 16  ;;  %v8096_v38 = vsel %vm6966_vm7, %v4404_v30, %v4405_v12  ;;  %v5606_v63 = vrot.slane %v5590_v8, 9  ;;  %v3948_v56 = vor.u32 %v3947_v22, %v8075_v62 }
 0x114   : > { %v3951_v31 = vshll.u32 %v8081_v52, 16  ;;  %v5622_v37 = vcombine.low %v8085_v59, %v8096_v38  ;;  %v5560_v46 = vcombine.low %v3896_v9, %v3906_v19  ;;  %v3915_v28 = vrot.slane %v3914_v11, 4  ;;  %v5591_v11 = vld [vmem:[%s6714_s26 + $0x9c] sm:$0xe] }
 0x115   : > { %6216 = vmatmul.mubr.msk.bf16.gmra.mrb[16].mxu0 %vm670_vm3, %v7928_v5  ;;  %v8500_v5 = vld [vmem:[#allocation15_spill] sm:$0xff]  ;;  %v3925_v47 = vrot.slane %v3924_v6, 4  ;;  %v3939_v12 = vrot.slane %v3938_v44, 4  ;;  %v4412_v8 = vrot.slane %v7828_v3, 5  ;;  %v3958_v30 = vrot.slane %v3956_v2, 4  ;;  %v6578_v19 = vld [vmem:[%s6714_s26 + $0x3c] sm:$0xff]  }
 0x116   : > { %6064 = vmatmul.mubr.msk.bf16.vlgmr.msra.gmra.mrb[0].mxu1 %vm670_vm3, %v6575_v1  ;;  %6219 = vmatprep.mubr.msk.bf16.mxu0 %vm670_vm3, %v7930_v7  ;;  %v4409_v43 = vrot.slane %v8500_v5, 5  ;;  %v2269_v7 = vsel %vm6740_vm4, %v2264_v18, %v8502_v51  ;;  %v3961_v18 = vrot.slane %v3959_v50, 5  ;;  %v8119_v5 = vrot.slane %v3965_v61, 5 }
 0x117   : > { %6266 = vmatpush3.bf16.msra.mxu1 %v8501_v16  ;;  %6067 = vmatprep.mubr.msk.bf16.mxu1 %vm670_vm3, %v6576_v21  ;;  %v8108_v1 = vcombine.low %v2269_v7, %v2279_v41  ;;  %v8112_v21 = vld [vmem:[%s6714_s26 + $0xd4] sm:$0x1]  ;;  %v3971_v9 = vrot.slane %v3969_v49, 4  ;;  %v3949_v41 = vrot.slane %v3948_v56, 4  ;;  %v3953_v6 = vrot.slane %v3951_v31, 5 }
 0x118   : > { %v8116_v22 = vsel %vm6966_vm7, %v5606_v63, %v4409_v43  ;;  %v4411_v17 = vrot.slane %v4409_v43, 4  ;;  %v3920_v63 = vsel %vm6740_vm4, %v3915_v28, %v8016_v4  ;;  %v3930_v2 = vsel %vm6740_vm4, %v3925_v47, %v3929_v23  ;;  %v6628_v16 = vld [vmem:[%s6714_s26 + $0x1c] sm:$0xf]  ;;  %v5592_v28 = vld [vmem:[%s6714_s26 + $0xa8] sm:$0xe] }
 0x119   : > { %v3975_v50 = vshll.u32 %v8112_v21, 16  ;;  %v5607_v61 = vrot.slane %v5591_v11, 9  ;;  %v4416_v49 = vrot.slane %v7816_v25, 5  ;;  %v3944_v4 = vsel %vm6740_vm4, %v3939_v12, %v8075_v62  ;;  %v5580_v62 = vld [vmem:[%s6714_s26 + $0x18] sm:$0xe]  ;;  %v6579_v47 = vld [vmem:[%s6714_s26 + $0x48] sm:$0xff]  }
 0x11a   : > { %v8125_v44 = vsel %vm6966_vm7, %v4411_v17, %v4412_v8  ;;  %v3972_v43 = vor.u32 %v3971_v9, %v8119_v5  ;;  %v4419_v23 = vrot.slane %v7861_v57, 5  ;;  %v3954_v25 = vsel %vm6740_vm4, %v3949_v41, %v3953_v6  ;;  %v6629_v11 = vld [vmem:[%s6714_s26 + $0x20] sm:$0x1] }
 0x11b   : > { %v5623_v3 = vcombine.low %v8116_v22, %v8125_v44  ;;  %v4339_v56 = vrot.slane %v6628_v16, 5  ;;  %v8151_v31 = vsel %vm6966_vm7, %v5607_v61, %v4416_v49  ;;  %v4418_v51 = vrot.slane %v4416_v49, 4  ;;  %v5593_v49 = vld [vmem:[%s6714_s26 + $0xb4] sm:$0xe] }
 0x11c   : > { %v5561_v7 = vcombine.low %v3920_v63, %v3930_v2  ;;  %v3973_v17 = vrot.slane %v3972_v43, 4  ;;  %v5608_v41 = vrot.slane %v5592_v28, 9  ;;  %v4423_v6 = vrot.slane %v7864_v34, 5  ;;  %v5581_v2 = vld [vmem:[%s6714_s26 + $0x24] sm:$0xe] }
 0x11d   : > { %6220 = vmatmul.mubr.msk.bf16.gmra.mrb[20].mxu0 %vm670_vm3, %v7963_v24  ;;  %v3962_v24 = vor.u32 %v3961_v18, %v3958_v30  ;;  %v8156_v57 = vsel %vm6966_vm7, %v4418_v51, %v4419_v23  ;;  %v6580_v30 = vld [vmem:[%s6714_s26 + $0x54] sm:$0xff]   ;;  %v5596_v18 = vrot.slane %v5580_v62, 9  ;;  %v4341_v9 = vrot.slane %v4339_v56, 4  ;;  %v6632_v28 = vld [vmem:[%s6714_s26 + $0x2c] sm:$0x1] }
 0x11e   : > { %6068 = vmatmul.mubr.msk.bf16.gmra.mrb[4].mxu1 %vm670_vm3, %v6577_v29  ;;  %6223 = vmatprep.mubr.msk.bf16.mxu0 %vm670_vm3, %v5560_v46  ;;  %v3977_v46 = vrot.slane %v3975_v50, 5  ;;  %v5562_v29 = vcombine.low %v3944_v4, %v3954_v25  ;;  %v5624_v8 = vcombine.low %v8151_v31, %v8156_v57  ;;  %v4426_v63 = vrot.slane %v7874_v48, 5  ;;  %v6630_v50 = vld [vmem:[%s6714_s26 + $0x28] sm:$0xf]  ;;  %v5582_v25 = vld [vmem:[%s6714_s26 + $0x30] sm:$0xe] }
 0x11f   : > { %6071 = vmatprep.mubr.msk.bf16.mxu1 %vm670_vm3, %v6578_v19  ;;  %v3963_v12 = vrot.slane %v3962_v24, 4  ;;  %v4342_v19 = vrot.slane %v6629_v11, 5  ;;  %v4346_v61 = vrot.slane %v6630_v50, 5  ;;  %v8179_v48 = vsel %vm6966_vm7, %v5608_v41, %v4423_v6  ;;  %v6582_v11 = vld [vmem:[%s6714_s26 + $0x6c] sm:$0xff]   ;;  %v8503_v41 = vld [vmem:[#allocation6_spill] sm:$0xff] }
 0x120   : > { %v3978_v34 = vsel %vm6740_vm4, %v3973_v17, %v3977_v46  ;;  %v4425_v24 = vrot.slane %v4423_v6, 4  ;;  %v4340_v43 = vsel %vm6966_vm7, %v5596_v18, %v4339_v56  ;;  %v5597_v51 = vrot.slane %v5581_v2, 9  ;;  %v5594_v50 = vld [vmem:[%s6714_s26 + $0xc0] sm:$0xe]  ;;  %v6646_v31 = vld [vmem:[%s6714_s26 + $0xc8] sm:$0x1] }
 0x121   : > { %v3968_v4 = vsel %vm6740_vm4, %v3963_v12, %v8119_v5  ;;  %v4343_v23 = vsel %vm6966_vm7, %v4341_v9, %v4342_v19  ;;  %v6631_v5 = vld [vmem:[%s6714_s26 + $0x34] sm:$0xf]  ;;  %v6581_v12 = vld [vmem:[%s6714_s26 + $0x60] sm:$0xff]   ;;  %v5598_v18 = vrot.slane %v5582_v25, 9  ;;  %v4433_v9 = vrot.slane %v7988_v35, 5 }
 0x122   : > { %v4353_v16 = vrot.slane %v6631_v5, 5  ;;  %v8190_v62 = vsel %vm6966_vm7, %v4425_v24, %v4426_v63  ;;  %v5563_v46 = vcombine.low %v3968_v4, %v3978_v34  ;;  %v5613_v17 = vcombine.low %v4340_v43, %v4343_v23  ;;  %v5583_v24 = vld [vmem:[%s6714_s26 + $0x3c] sm:$0xe] }
 0x123   : > { %v5625_v56 = vcombine.low %v8179_v48, %v8190_v62  ;;  %v4356_v6 = vrot.slane %v8503_v41, 5  ;;  %v4347_v35 = vsel %vm6966_vm7, %v5597_v51, %v4346_v61  ;;  %v5610_v5 = vrot.slane %v5594_v50, 9 }
 0x124   : > { %v4355_v19 = vrot.slane %v4353_v16, 4  ;;  %v4354_v23 = vsel %vm6966_vm7, %v5598_v18, %v4353_v16  ;;  %v4440_v51 = vrot.slane %v8081_v52, 5  ;;  %v2420_v57 = vshll.u32 %v6646_v31, 16 }
 0x125   : > { %6224 = vmatmul.mubr.msk.bf16.gmra.mrb[24].mxu0 %vm670_vm3, %v5561_v7  ;;  %v5609_v7 = vrot.slane %v5593_v49, 9 }
 0x126   : > { %6072 = vmatmul.mubr.msk.bf16.gmra.mrb[8].mxu1 %vm670_vm3, %v6579_v47  ;;  %6227 = vmatprep.mubr.msk.bf16.mxu0 %vm670_vm3, %v5562_v29  ;;  %v4349_v47 = vrot.slane %v6632_v28, 5  ;;  %v4430_v29 = vrot.slane %v7939_v39, 5  ;;  %v8504_v39 = vld [vmem:[#allocation7_spill] sm:$0xff]  ;;  %v4357_v25 = vsel %vm6966_vm7, %v4355_v19, %v4356_v6  ;;  %v5599_v28 = vrot.slane %v5583_v24, 9 }
 0x127   : > { %6075 = vmatprep.mubr.msk.bf16.mxu1 %vm670_vm3, %v6580_v30  ;;  %v4348_v30 = vrot.slane %v4346_v61, 4  ;;  %v4360_v49 = vrot.slane %v8504_v39, 5  ;;  %v4437_v61 = vrot.slane %v7991_v58, 5  ;;  %v6633_v39 = vld [vmem:[%s6714_s26 + $0x70] sm:$0xf]  ;;  %v4444_v24 = vrot.slane %v8067_v55, 5 }
 0x128   : > { %v8202_v63 = vsel %vm6966_vm7, %v5609_v7, %v4430_v29  ;;  %v4432_v2 = vrot.slane %v4430_v29, 4  ;;  %v5312_v7 = vld [vmem:[%s6714_s26 + $0x6c] sm:$0xf]  ;;  %v8505_v29 = vld [vmem:[#allocation8_spill] sm:$0xff] }
 0x129   : > { %v4350_v34 = vsel %vm6966_vm7, %v4348_v30, %v4349_v47  ;;  %v4362_v47 = vrot.slane %v4360_v49, 4  ;;  %v6583_v30 = vld [vmem:[%s6714_s26 + $0x78] sm:$0xff]   ;;  %v8233_v16 = vsel %vm6966_vm7, %v5610_v5, %v4437_v61  ;;  %v4439_v18 = vrot.slane %v4437_v61, 4 }
 0x12a   : > { %v8209_v4 = vsel %vm6966_vm7, %v4432_v2, %v4433_v9  ;;  %v5615_v9 = vcombine.low %v4354_v23, %v4357_v25  ;;  %v2233_v19 = vshrl.u32 %v5312_v7, 16  ;;  %v2236_v41 = vshll.u32 %v5312_v7, 16 }
 0x12b   : > { %v5626_v43 = vcombine.low %v8202_v63, %v8209_v4  ;;  %v8238_v58 = vsel %vm6966_vm7, %v4439_v18, %v4440_v51  ;;  %v4361_v6 = vsel %vm6966_vm7, %v5599_v28, %v4360_v49  ;;  %v4447_v49 = vrot.slane %v8112_v21, 5  ;;  %v6585_v51 = vld [vmem:[%s6714_s26 + $0x90] sm:$0xff]   ;;  %v6586_v21 = vld [vmem:[%s6714_s26 + $0x9c] sm:$0xff]  }
 0x12c   : > { %v5627_v50 = vcombine.low %v8233_v16, %v8238_v58  ;;  %v2235_v23 = vrot.slane %v2233_v19, 4  ;;  %v2238_v25 = vrot.slane %v2236_v41, 5  ;;  %v4446_v7 = vrot.slane %v4444_v24, 4 }
 0x12d   : > { %6228 = vmatmul.mubr.msk.bf16.gmra.mrb[28].mxu0 %vm670_vm3, %v5563_v46  ;;  %v5614_v46 = vcombine.low %v4347_v35, %v4350_v34  ;;  %v2242_v35 = vshll.u32 %v6633_v39, 16  ;;  %v2246_v34 = vshrl.u32 %v6633_v39, 16 }
 0x12e   : > { %6076 = vmatmul.mubr.msk.bf16.gmra.mrb[12].mxu1 %vm670_vm3, %v6581_v12  ;;  %6233 = vmatprep.mubr.msk.bf16.mxu0 %vm670_vm3, %v5613_v17  ;;  %v4363_v12 = vrot.slane %v8505_v29, 5  ;;  %v5595_v17 = vld [vmem:[%s6714_s26 + $0xcc] sm:$0xe]  ;;  %v8260_v55 = vsel %vm6966_vm7, %v4446_v7, %v4447_v49 }
 0x12f   : > { %6079 = vmatprep.mubr.msk.bf16.mxu1 %vm670_vm3, %v6582_v11  ;;  %v6584_v11 = vld [vmem:[%s6714_s26 + $0x84] sm:$0xff]   ;;  %v5611_v52 = vrot.slane %v5595_v17, 9  ;;  %v2248_v28 = vrot.slane %v2246_v34, 4  ;;  %v6634_v17 = vld [vmem:[%s6714_s26 + $0x74] sm:$0x1] }
 0x130   : > { %v4364_v2 = vsel %vm6966_vm7, %v4362_v47, %v4363_v12  ;;  %v5318_v47 = vld [vmem:[%s6714_s26 + $0x84] sm:$0xf]  ;;  %v2239_v12 = vor.u32 %v2238_v25, %v2235_v23  ;;  %v6588_v34 = vld [vmem:[%s6714_s26 + $0xb4] sm:$0xff]  }
 0x131   : > { %v8255_v5 = vsel %vm6966_vm7, %v5611_v52, %v4444_v24  ;;  %v5616_v61 = vcombine.low %v4361_v6, %v4364_v2  ;;  %v2284_v18 = vshll.u32 %v5318_v47, 16  ;;  %v5321_v6 = vld [vmem:[%s6714_s26 + $0x90] sm:$0xf]  ;;  %v6587_v2 = vld [vmem:[%s6714_s26 + $0xa8] sm:$0xff]  }
 0x132   : > { %v5628_v29 = vcombine.low %v8255_v5, %v8260_v55  ;;  %v2240_v52 = vrot.slane %v2239_v12, 4  ;;  %v2305_v23 = vshrl.u32 %v5321_v6, 16  ;;  %v2308_v25 = vshll.u32 %v5321_v6, 16 }
 0x133   : > { %v2338_v12 = vshll.u32 %v6637_v60, 16 }
 0x134   : > { %v2310_v14 = vrot.slane %v2308_v25, 5  ;;  %v6640_v25 = vld [vmem:[%s6714_s26 + $0xa4] sm:$0x1] }
 0x135   : > { %6234 = vmatmul.mubr.msk.bf16.vlgmr.msra.gmra.mrb[0].mxu0 %vm670_vm3, %v5614_v46  ;;  %v2244_v46 = vrot.slane %v2242_v35, 5  ;;  %v5324_v35 = vld [vmem:[%s6714_s26 + $0x9c] sm:$0xf]  ;;  %v8302_v6 = vrot.slane %v2338_v12, 5 }
 0x136   : > { %6080 = vmatmul.mubr.msk.bf16.gmra.mrb[16].mxu1 %vm670_vm3, %v6583_v30  ;;  %6237 = vmatprep.mubr.msk.bf16.mxu0 %vm670_vm3, %v5615_v9  ;;  %v2252_v30 = vshll.u32 %v6634_v17, 16  ;;  %v2281_v9 = vshrl.u32 %v5318_v47, 16  ;;  %v2332_v47 = vshll.u32 %v5324_v35, 16  ;;  %v6638_v17 = vld [vmem:[%s6714_s26 + $0x8c] sm:$0x1] }
 0x137   : > { %6083 = vmatprep.mubr.msk.bf16.mxu1 %vm670_vm3, %v6584_v11  ;;  %v2249_v13 = vor.u32 %v2248_v28, %v2244_v46  ;;  %v6635_v11 = vld [vmem:[%s6714_s26 + $0x88] sm:$0xf]  ;;  %v2245_v7 = vsel %vm6740_vm4, %v2240_v52, %v2244_v46 }
 0x138   : > { %v2290_v19 = vshll.u32 %v6635_v11, 16  ;;  %v2294_v41 = vshrl.u32 %v6635_v11, 16  ;;  %v2254_v0 = vrot.slane %v2252_v30, 5  ;;  %v2283_v36 = vrot.slane %v2281_v9, 4 }
 0x139   : > { %v2250_v39 = vrot.slane %v2249_v13, 4  ;;  %v2300_v30 = vshll.u32 %v6638_v17, 16  ;;  %v2307_v9 = vrot.slane %v2305_v23, 4  ;;  %v2334_v11 = vrot.slane %v2332_v47, 5 }
 0x13a   : > { %v8279_v24 = vrot.slane %v2290_v19, 5  ;;  %v2296_v49 = vrot.slane %v2294_v41, 4  ;;  %v6589_v19 = vld [vmem:[%s6714_s26 + $0xc0] sm:$0xff]  }
 0x13b   : > { %v2255_v46 = vsel %vm6740_vm4, %v2250_v39, %v2254_v0  ;;  %v5327_v39 = vld [vmem:[%s6714_s26 + $0xa8] sm:$0xf] }
 0x13c   : > { %v2297_v13 = vor.u32 %v2296_v49, %v8279_v24  ;;  %v5345_v41 = vcombine.low %v2245_v7, %v2255_v46  ;;  %v2348_v7 = vshll.u32 %v6640_v25, 16  ;;  %v2356_v45 = vshll.u32 %v5327_v39, 16 }
 0x13d   : > { %6238 = vmatmul.mubr.msk.bf16.gmra.mrb[4].mxu0 %vm670_vm3, %v5616_v61  ;;  %v6636_v61 = vld [vmem:[%s6714_s26 + $0x94] sm:$0xf] }
 0x13e   : > { %6084 = vmatmul.mubr.msk.bf16.gmra.mrb[20].mxu1 %vm670_vm3, %v6585_v51  ;;  %6241 = vmatprep.mubr.msk.bf16.mxu0 %vm670_vm3, %v5617_v10  ;;  %v2286_v10 = vrot.slane %v2284_v18, 5  ;;  %v2314_v51 = vshll.u32 %v6636_v61, 16  ;;  %v2318_v28 = vshrl.u32 %v6636_v61, 16  ;;  %v2298_v0 = vrot.slane %v2297_v13, 4 }
 0x13f   : > { %6087 = vmatprep.mubr.msk.bf16.mxu1 %vm670_vm3, %v6586_v21  ;;  %v2329_v21 = vshrl.u32 %v5324_v35, 16  ;;  %v6639_v35 = vld [vmem:[%s6714_s26 + $0x98] sm:$0x1]  ;;  %v2353_v61 = vshrl.u32 %v5327_v39, 16  ;;  %v5333_v39 = vld [vmem:[%s6714_s26 + $0xc0] sm:$0xf] }
 0x140   : > { %v2287_v15 = vor.u32 %v2286_v10, %v2283_v36  ;;  %v8299_v26 = vrot.slane %v2314_v51, 5  ;;  %v2302_v36 = vrot.slane %v2300_v30, 5  ;;  %v2311_v10 = vor.u32 %v2310_v14, %v2307_v9  ;;  %v5330_v51 = vld [vmem:[%s6714_s26 + $0xb4] sm:$0xf] }
 0x141   : > { %v2331_v18 = vrot.slane %v2329_v21, 4  ;;  %v2366_v21 = vshrl.u32 %v6641_v27, 16  ;;  %v2377_v20 = vshrl.u32 %v5330_v51, 16  ;;  %v2380_v42 = vshll.u32 %v5330_v51, 16 }
 0x142   : > { %v2288_v52 = vrot.slane %v2287_v15, 4  ;;  %v2303_v46 = vsel %vm6740_vm4, %v2298_v0, %v2302_v36  ;;  %v2312_v15 = vrot.slane %v2311_v10, 4  ;;  %v2350_v30 = vrot.slane %v2348_v7, 5 }
 0x143   : > { %v2335_v23 = vor.u32 %v2334_v11, %v2331_v18  ;;  %v2355_v9 = vrot.slane %v2353_v61, 4  ;;  %v2368_v11 = vrot.slane %v2366_v21, 4  ;;  %v6645_v61 = vld [vmem:[%s6714_s26 + $0xbc] sm:$0x1] }
 0x144   : > { %v2293_v47 = vsel %vm6740_vm4, %v2288_v52, %v8279_v24  ;;  %v2317_v0 = vsel %vm6740_vm4, %v2312_v15, %v8299_v26  ;;  %v2396_v22 = vshll.u32 %v6645_v61, 16 }
 0x145   : > { %6242 = vmatmul.mubr.msk.bf16.gmra.mrb[8].mxu0 %vm670_vm3, %v5618_v40  ;;  %v2342_v40 = vshrl.u32 %v6637_v60, 16  ;;  %v2336_v17 = vrot.slane %v2335_v23, 4  ;;  %v5347_v24 = vcombine.low %v2293_v47, %v2303_v46 }
 0x146   : > { %6088 = vmatmul.mubr.msk.bf16.gmra.mrb[24].mxu1 %vm670_vm3, %v6587_v2  ;;  %6245 = vmatprep.mubr.msk.bf16.mxu0 %vm670_vm3, %v5619_v54  ;;  %v2320_v54 = vrot.slane %v2318_v28, 4 }
 0x147   : > { %6091 = vmatprep.mubr.msk.bf16.mxu1 %vm670_vm3, %v6588_v34  ;;  %v2344_v2 = vrot.slane %v2342_v40, 4  ;;  %v2324_v34 = vshll.u32 %v6639_v35, 16  ;;  %v2341_v10 = vsel %vm6740_vm4, %v2336_v17, %v8302_v6  ;;  %v2422_v17 = vrot.slane %v2420_v57, 5 }
 0x148   : > { %v2321_v49 = vor.u32 %v2320_v54, %v8299_v26  ;;  %v2358_v54 = vrot.slane %v2356_v45, 5  ;;  %v6643_v26 = vld [vmem:[%s6714_s26 + $0xb0] sm:$0x1] }
 0x149   : > { %v2345_v28 = vor.u32 %v2344_v2, %v8302_v6  ;;  %v2326_v60 = vrot.slane %v2324_v34, 5  ;;  %v2372_v35 = vshll.u32 %v6643_v26, 16  ;;  %v2401_v34 = vshrl.u32 %v5333_v39, 16 }
 0x14a   : > { %v2322_v13 = vrot.slane %v2321_v49, 4  ;;  %v2359_v38 = vor.u32 %v2358_v54, %v2355_v9  ;;  %v2404_v6 = vshll.u32 %v5333_v39, 16  ;;  %v6644_v49 = vld [vmem:[%s6714_s26 + $0xc4] sm:$0xf] }
 0x14b   : > { %v2346_v14 = vrot.slane %v2345_v28, 4  ;;  %v2410_v23 = vshll.u32 %v6644_v49, 16  ;;  %v2414_v25 = vshrl.u32 %v6644_v49, 16  ;;  %v2374_v45 = vrot.slane %v2372_v35, 5 }
 0x14c   : > { %v2327_v36 = vsel %vm6740_vm4, %v2322_v13, %v2326_v60  ;;  %v2360_v51 = vrot.slane %v2359_v38, 4  ;;  %v2398_v60 = vrot.slane %v2396_v22, 5 }
 0x14d   : > { %6246 = vmatmul.mubr.msk.bf16.gmra.mrb[12].mxu0 %vm670_vm3, %v5620_v53  ;;  %v2362_v53 = vshll.u32 %v6641_v27, 16  ;;  %v2351_v59 = vsel %vm6740_vm4, %v2346_v14, %v2350_v30  ;;  %v5348_v44 = vcombine.low %v2317_v0, %v2327_v36  ;;  %v2403_v27 = vrot.slane %v2401_v34, 4 }
 0x14e   : > { %6092 = vmatmul.mubr.msk.bf16.gmra.mrb[28].mxu1 %vm670_vm3, %v6589_v19  ;;  %6249 = vmatprep.mubr.msk.bf16.mxu0 %vm670_vm3, %v5621_v33  ;;  %v6642_v33 = vld [vmem:[%s6714_s26 + $0xb8] sm:$0xf]  ;;  %v2379_v19 = vrot.slane %v2377_v20, 4  ;;  %v2412_v21 = vrot.slane %v2410_v23, 5  ;;  %v2416_v47 = vrot.slane %v2414_v25, 4 }
 0x14f   : > { %6113 = vmatprep.mubr.msk.bf16.mxu1 %vm670_vm3, %v5345_v41  ;;  %v2386_v12 = vshll.u32 %v6642_v33, 16  ;;  %v2390_v40 = vshrl.u32 %v6642_v33, 16  ;;  %v2364_v18 = vrot.slane %v2362_v53, 5  ;;  %v2382_v41 = vrot.slane %v2380_v42, 5 }
 0x150   : > { %v2406_v53 = vrot.slane %v2404_v6, 5 }
 0x151   : > { %v2388_v52 = vrot.slane %v2386_v12, 5  ;;  %v2392_v2 = vrot.slane %v2390_v40, 4  ;;  %v2365_v20 = vsel %vm6740_vm4, %v2360_v51, %v2364_v18  ;;  %v2417_v12 = vor.u32 %v2416_v47, %v2412_v21 }
 0x152   : > { %v2407_v33 = vor.u32 %v2406_v53, %v2403_v27 }
 0x153   : > { %v2393_v7 = vor.u32 %v2392_v2, %v2388_v52  ;;  %v2418_v13 = vrot.slane %v2417_v12, 4 }
 0x154   : > { %v2408_v40 = vrot.slane %v2407_v33, 4 }
 0x155   : > { %6250 = vmatmul.mubr.msk.bf16.gmra.mrb[16].mxu0 %vm670_vm3, %v5622_v37  ;;  %v2369_v37 = vor.u32 %v2368_v11, %v2364_v18  ;;  %v2394_v15 = vrot.slane %v2393_v7, 4  ;;  %v2423_v9 = vsel %vm6740_vm4, %v2418_v13, %v2422_v17 }
 0x156   : > { %6114 = vmatmul.mubr.msk.bf16.vlgmr.msra.gmra.mrb[16].mxu1 %vm670_vm3, %v8108_v1  ;;  %6253 = vmatprep.mubr.msk.bf16.mxu0 %vm670_vm3, %v5623_v3  ;;  %v2383_v1 = vor.u32 %v2382_v41, %v2379_v19  ;;  %v5349_v3 = vcombine.low %v2341_v10, %v2351_v59  ;;  %v2413_v30 = vsel %vm6740_vm4, %v2408_v40, %v2412_v21 }
 0x157   : > { %6117 = vmatprep.mubr.msk.bf16.mxu1 %vm670_vm3, %v5347_v24  ;;  %v2370_v28 = vrot.slane %v2369_v37, 4  ;;  %v2399_v48 = vsel %vm6740_vm4, %v2394_v15, %v2398_v60  ;;  %v5352_v14 = vcombine.low %v2413_v30, %v2423_v9 }
 0x158   : > { %v2384_v46 = vrot.slane %v2383_v1, 4 }
 0x159   : > { %v2375_v42 = vsel %vm6740_vm4, %v2370_v28, %v2374_v45 }
 0x15a   : > { %v5350_v62 = vcombine.low %v2365_v20, %v2375_v42 }
 0x15d   : > { %6254 = vmatmul.mubr.msk.bf16.gmra.mrb[20].mxu0 %vm670_vm3, %v5624_v8  ;;  %v2389_v8 = vsel %vm6740_vm4, %v2384_v46, %v2388_v52 }
 0x15e   : > { %6118 = vmatmul.mubr.msk.bf16.gmra.mrb[20].mxu1 %vm670_vm3, %v5348_v44  ;;  %6257 = vmatprep.mubr.msk.bf16.mxu0 %vm670_vm3, %v5625_v56  ;;  %v5351_v56 = vcombine.low %v2389_v8, %v2399_v48 }
 0x15f   : > { %6121 = vmatprep.mubr.msk.bf16.mxu1 %vm670_vm3, %v5349_v3 }
 0x165   : > { %6258 = vmatmul.mubr.msk.bf16.gmra.mrb[24].mxu0 %vm670_vm3, %v5626_v43 }
 0x166   : > { %6122 = vmatmul.mubr.msk.bf16.gmra.mrb[24].mxu1 %vm670_vm3, %v5350_v62  ;;  %6261 = vmatprep.mubr.msk.bf16.mxu0 %vm670_vm3, %v5627_v50 }
 0x167   : > { %6125 = vmatprep.mubr.msk.bf16.mxu1 %vm670_vm3, %v5351_v56 }
 0x16d   : > { %6262 = vmatmul.mubr.msk.bf16.gmra.mrb[28].mxu0 %vm670_vm3, %v5628_v29 }
 0x16e   : > { %6126 = vmatmul.mubr.msk.bf16.gmra.mrb[28].mxu1 %vm670_vm3, %v5352_v14 }
 0x1e9   : > { %v6065_v63 = vpop.f32.mrb[0].mxu1 }
 0x1ea   : > { %v1833_v4 = vpop.f32.mrb[1].mxu1 }
 0x1eb   : > { %v6066_v43 = vpop.f32.mrb[2].mxu1 }
 0x1ec   : > { %v1836_v16 = vpop.f32.mrb[3].mxu1 }
 0x1f1   : > { %v6069_v58 = vpop.f32.mrb[4].mxu1 }
 0x1f2   : > { %v1849_v50 = vpop.f32.mrb[5].mxu1 }
 0x1f3   : > { %v6070_v54 = vpop.f32.mrb[6].mxu1 }
 0x1f4   : > { %v1852_v18 = vpop.f32.mrb[7].mxu1 }
 0x1f9   : > { %v6073_v11 = vpop.f32.mrb[8].mxu1 }
 0x1fa   : > { %v1865_v32 = vpop.f32.mrb[9].mxu1 }
 0x1fb   : > { %v6074_v24 = vpop.f32.mrb[10].mxu1 }
 0x1fc   : > { %v8390_v19 = vpop.f32.mrb[11].mxu1 }
 0x201   : > { %v8393_v41 = vpop.f32.mrb[12].mxu1 }
 0x202   : > { %v8395_v5 = vpop.f32.mrb[13].mxu1 }
 0x203   : > { %v8397_v55 = vpop.f32.mrb[14].mxu1 }
 0x204   : > { %v8399_v29 = vpop.f32.mrb[15].mxu1 }
 0x208   : > { %v6235_v52 = vpop.f32.mrb[0].mxu0 }
 0x209   : > { %v6267_v2 = vadd.f32 %v6235_v52, %v6065_v63  ;;  %v4584_v39 = vpop.f32.mrb[1].mxu0 }
 0x20a   : > { %v6268_v0 = vadd.f32 %v4584_v39, %v1833_v4  ;;  %v6236_v36 = vpop.f32.mrb[2].mxu0 }
 0x20b   : > { %v6269_v10 = vadd.f32 %v6236_v36, %v6066_v43  ;;  %v4587_v59 = vpop.f32.mrb[3].mxu0  ;;  %v4942_v49 = vmul.f32 %v6267_v2, %v6267_v2 }
 0x20c   : > { %v6270_v38 = vadd.f32 %v4587_v59, %v1836_v16  ;;  %v4940_v26 = vmul.f32 %v6268_v0, %v6268_v0 }
 0x20d   : > { %v5719_v37 = vpack.c.bf16 %v6269_v10, %v6267_v2  ;;  %v4943_v22 = vmul.f32 %v6269_v10, %v6269_v10 }
 0x20e   : > { %v5714_v35 = vpack.c.bf16 %v6270_v38, %v6268_v0  ;;  %v4903_v34 = vadd.f32 %v6270_v38, %v6268_v0  ;;  %v4941_v6 = vmul.f32 %v6270_v38, %v6270_v38 }
 0x20f   : > { %5791 = vst [vmem:[%s8404_s20 + $0x8] sm:$0xff] %v5719_v37  }
 0x210   : > { %5715 = vst [vmem:[%s8404_s20] sm:$0xff] %v5714_v35   ;;  %v4904_v23 = vadd.f32 %v6267_v2, %v4903_v34  ;;  %v4972_v25 = vadd.f32 %v4941_v6, %v4940_v26  ;;  %v6239_v1 = vpop.f32.mrb[4].mxu0 }
 0x211   : > { %v6271_v7 = vadd.f32 %v6239_v1, %v6069_v58  ;;  %v4600_v61 = vpop.f32.mrb[5].mxu0 }
 0x212   : > { %v4973_v44 = vadd.f32 %v4972_v25, %v4942_v49  ;;  %v6272_v3 = vadd.f32 %v4600_v61, %v1849_v50  ;;  %v4905_v51 = vadd.f32 %v6269_v10, %v4904_v23  ;;  %v6240_v28 = vpop.f32.mrb[6].mxu0 }
 0x213   : > { %v6273_v45 = vadd.f32 %v6240_v28, %v6070_v54  ;;  %v4603_v27 = vpop.f32.mrb[7].mxu0  ;;  %v4946_v12 = vmul.f32 %v6271_v7, %v6271_v7 }
 0x214   : > { %v4906_v53 = vadd.f32 %v6272_v3, %v4905_v51  ;;  %v4944_v21 = vmul.f32 %v6272_v3, %v6272_v3  ;;  %v4974_v47 = vadd.f32 %v4973_v44, %v4943_v22  ;;  %v6274_v46 = vadd.f32 %v4603_v27, %v1852_v18 }
 0x215   : > { %v5729_v15 = vpack.c.bf16 %v6273_v45, %v6271_v7  ;;  %v4947_v56 = vmul.f32 %v6273_v45, %v6273_v45 }
 0x216   : > { %v4975_v60 = vadd.f32 %v4974_v47, %v4944_v21  ;;  %v5724_v20 = vpack.c.bf16 %v6274_v46, %v6272_v3  ;;  %v4907_v42 = vadd.f32 %v6274_v46, %v4906_v53  ;;  %v4945_v33 = vmul.f32 %v6274_v46, %v6274_v46 }
 0x217   : > { %5793 = vst [vmem:[%s8404_s20 + $0x18] sm:$0xff] %v5729_v15  }
 0x218   : > { %5792 = vst [vmem:[%s8404_s20 + $0x10] sm:$0xff] %v5724_v20   ;;  %v4908_v31 = vadd.f32 %v6271_v7, %v4907_v42  ;;  %v4976_v57 = vadd.f32 %v4975_v60, %v4945_v33  ;;  %v6243_v8 = vpop.f32.mrb[8].mxu0 }
 0x219   : > { %v6275_v48 = vadd.f32 %v6243_v8, %v6073_v11  ;;  %v4616_v62 = vpop.f32.mrb[9].mxu0 }
 0x21a   : > { %v4977_v40 = vadd.f32 %v4976_v57, %v4946_v12  ;;  %v6276_v13 = vadd.f32 %v4616_v62, %v1865_v32  ;;  %v4909_v17 = vadd.f32 %v6273_v45, %v4908_v31  ;;  %v6244_v30 = vpop.f32.mrb[10].mxu0 }
 0x21b   : > { %v6277_v9 = vadd.f32 %v6244_v30, %v6074_v24  ;;  %v4619_v14 = vpop.f32.mrb[11].mxu0  ;;  %v4950_v52 = vmul.f32 %v6275_v48, %v6275_v48 }
 0x21c   : > { %v4910_v63 = vadd.f32 %v6276_v13, %v4909_v17  ;;  %v4948_v4 = vmul.f32 %v6276_v13, %v6276_v13  ;;  %v4978_v43 = vadd.f32 %v4977_v40, %v4947_v56  ;;  %v6278_v16 = vadd.f32 %v4619_v14, %v8390_v19 }
 0x21d   : > { %v5739_v58 = vpack.c.bf16 %v6277_v9, %v6275_v48  ;;  %v4951_v36 = vmul.f32 %v6277_v9, %v6277_v9 }
 0x21e   : > { %v4979_v50 = vadd.f32 %v4978_v43, %v4948_v4  ;;  %v5734_v54 = vpack.c.bf16 %v6278_v16, %v6276_v13  ;;  %v4911_v18 = vadd.f32 %v6278_v16, %v4910_v63  ;;  %v4949_v11 = vmul.f32 %v6278_v16, %v6278_v16 }
 0x21f   : > { %5795 = vst [vmem:[%s8404_s20 + $0x28] sm:$0xff] %v5739_v58  }
 0x220   : > { %5794 = vst [vmem:[%s8404_s20 + $0x20] sm:$0xff] %v5734_v54   ;;  %v4912_v2 = vadd.f32 %v6275_v48, %v4911_v18  ;;  %v4980_v32 = vadd.f32 %v4979_v50, %v4949_v11  ;;  %v6247_v39 = vpop.f32.mrb[12].mxu0 }
 0x221   : > { %v6279_v0 = vadd.f32 %v6247_v39, %v8393_v41  ;;  %v4632_v24 = vpop.f32.mrb[13].mxu0 }
 0x222   : > { %v4981_v10 = vadd.f32 %v4980_v32, %v4950_v52  ;;  %v6280_v59 = vadd.f32 %v4632_v24, %v8395_v5  ;;  %v4913_v19 = vadd.f32 %v6277_v9, %v4912_v2  ;;  %v6248_v38 = vpop.f32.mrb[14].mxu0 }
 0x223   : > { %v6281_v37 = vadd.f32 %v6248_v38, %v8397_v55  ;;  %v4635_v26 = vpop.f32.mrb[15].mxu0  ;;  %v4954_v61 = vmul.f32 %v6279_v0, %v6279_v0 }
 0x224   : > { %v4914_v35 = vadd.f32 %v6280_v59, %v4913_v19  ;;  %v4952_v34 = vmul.f32 %v6280_v59, %v6280_v59  ;;  %v4982_v6 = vadd.f32 %v4981_v10, %v4951_v36  ;;  %v6282_v49 = vadd.f32 %v4635_v26, %v8399_v29 }
 0x225   : > { %v5749_v23 = vpack.c.bf16 %v6281_v37, %v6279_v0  ;;  %v4955_v55 = vmul.f32 %v6281_v37, %v6281_v37 }
 0x226   : > { %v4983_v25 = vadd.f32 %v4982_v6, %v4952_v34  ;;  %v5744_v41 = vpack.c.bf16 %v6282_v49, %v6280_v59  ;;  %v4915_v1 = vadd.f32 %v6282_v49, %v4914_v35  ;;  %v4953_v7 = vmul.f32 %v6282_v49, %v6282_v49 }
 0x227   : > { %5797 = vst [vmem:[%s8404_s20 + $0x38] sm:$0xff] %v5749_v23  }
 0x228   : > { %5796 = vst [vmem:[%s8404_s20 + $0x30] sm:$0xff] %v5744_v41   ;;  %v4916_v5 = vadd.f32 %v6279_v0, %v4915_v1  ;;  %v4984_v22 = vadd.f32 %v4983_v25, %v4953_v7  ;;  %v6251_v44 = vpop.f32.mrb[16].mxu0 }
 0x229   : > { %v6115_v3 = vpop.f32.mrb[16].mxu1  ;;  %v4648_v51 = vpop.f32.mrb[17].mxu0 }
 0x22a   : > { %v4985_v28 = vadd.f32 %v4984_v22, %v4954_v61  ;;  %v6283_v45 = vadd.f32 %v6251_v44, %v6115_v3  ;;  %v2623_v27 = vpop.f32.mrb[17].mxu1  ;;  %v4917_v53 = vadd.f32 %v6281_v37, %v4916_v5  ;;  %v6252_v29 = vpop.f32.mrb[18].mxu0 }
 0x22b   : > { %v6284_v21 = vadd.f32 %v4648_v51, %v2623_v27  ;;  %v6116_v47 = vpop.f32.mrb[18].mxu1  ;;  %v4651_v46 = vpop.f32.mrb[19].mxu0 }
 0x22c   : > { %v4986_v15 = vadd.f32 %v4985_v28, %v4955_v55  ;;  %v6285_v60 = vadd.f32 %v6252_v29, %v6116_v47  ;;  %v2626_v20 = vpop.f32.mrb[19].mxu1  ;;  %v4958_v40 = vmul.f32 %v6283_v45, %v6283_v45 }
 0x22d   : > { %v4918_v42 = vadd.f32 %v6284_v21, %v4917_v53  ;;  %v4956_v33 = vmul.f32 %v6284_v21, %v6284_v21  ;;  %v6286_v12 = vadd.f32 %v4651_v46, %v2626_v20 }
 0x22e   : > { %v5759_v31 = vpack.c.bf16 %v6285_v60, %v6283_v45  ;;  %v4959_v43 = vmul.f32 %v6285_v60, %v6285_v60 }
 0x22f   : > { %v4987_v57 = vadd.f32 %v4986_v15, %v4956_v33  ;;  %v5754_v8 = vpack.c.bf16 %v6286_v12, %v6284_v21  ;;  %v4919_v48 = vadd.f32 %v6286_v12, %v4918_v42  ;;  %v4957_v62 = vmul.f32 %v6286_v12, %v6286_v12 }
 0x230   : > { %5799 = vst [vmem:[%s8404_s20 + $0x48] sm:$0xff] %v5759_v31   ;;  %v6255_v56 = vpop.f32.mrb[20].mxu0 }
 0x231   : > { %5798 = vst [vmem:[%s8404_s20 + $0x40] sm:$0xff] %v5754_v8   ;;  %v4920_v13 = vadd.f32 %v6283_v45, %v4919_v48  ;;  %v4988_v17 = vadd.f32 %v4987_v57, %v4957_v62  ;;  %v6119_v30 = vpop.f32.mrb[20].mxu1  ;;  %v4664_v9 = vpop.f32.mrb[21].mxu0 }
 0x232   : > { %v6287_v14 = vadd.f32 %v6255_v56, %v6119_v30  ;;  %v2639_v63 = vpop.f32.mrb[21].mxu1  ;;  %v6256_v4 = vpop.f32.mrb[22].mxu0 }
 0x233   : > { %v4989_v16 = vadd.f32 %v4988_v17, %v4958_v40  ;;  %v6288_v58 = vadd.f32 %v4664_v9, %v2639_v63  ;;  %v4921_v50 = vadd.f32 %v6285_v60, %v4920_v13  ;;  %v6120_v54 = vpop.f32.mrb[22].mxu1  ;;  %v4667_v18 = vpop.f32.mrb[23].mxu0 }
 0x234   : > { %v6289_v11 = vadd.f32 %v6256_v4, %v6120_v54  ;;  %v2642_v52 = vpop.f32.mrb[23].mxu1  ;;  %v4962_v37 = vmul.f32 %v6287_v14, %v6287_v14 }
 0x235   : > { %v4922_v2 = vadd.f32 %v6288_v58, %v4921_v50  ;;  %v4960_v32 = vmul.f32 %v6288_v58, %v6288_v58  ;;  %v4990_v39 = vadd.f32 %v4989_v16, %v4959_v43  ;;  %v6290_v0 = vadd.f32 %v4667_v18, %v2642_v52 }
 0x236   : > { %v5769_v24 = vpack.c.bf16 %v6289_v11, %v6287_v14  ;;  %v4963_v41 = vmul.f32 %v6289_v11, %v6289_v11 }
 0x237   : > { %v4991_v36 = vadd.f32 %v4990_v39, %v4960_v32  ;;  %v5764_v10 = vpack.c.bf16 %v6290_v0, %v6288_v58  ;;  %v4923_v59 = vadd.f32 %v6290_v0, %v4922_v2  ;;  %v4961_v19 = vmul.f32 %v6290_v0, %v6290_v0 }
 0x238   : > { %5801 = vst [vmem:[%s8404_s20 + $0x58] sm:$0xff] %v5769_v24   ;;  %v6259_v38 = vpop.f32.mrb[24].mxu0 }
 0x239   : > { %5800 = vst [vmem:[%s8404_s20 + $0x50] sm:$0xff] %v5764_v10   ;;  %v4924_v26 = vadd.f32 %v6287_v14, %v4923_v59  ;;  %v4992_v35 = vadd.f32 %v4991_v36, %v4961_v19  ;;  %v6123_v34 = vpop.f32.mrb[24].mxu1  ;;  %v4680_v6 = vpop.f32.mrb[25].mxu0 }
 0x23a   : > { %v6291_v49 = vadd.f32 %v6259_v38, %v6123_v34  ;;  %v2655_v23 = vpop.f32.mrb[25].mxu1  ;;  %v6260_v25 = vpop.f32.mrb[26].mxu0 }
 0x23b   : > { %v4993_v1 = vadd.f32 %v4992_v35, %v4962_v37  ;;  %v6292_v7 = vadd.f32 %v4680_v6, %v2655_v23  ;;  %v4925_v61 = vadd.f32 %v6289_v11, %v4924_v26  ;;  %v6124_v5 = vpop.f32.mrb[26].mxu1  ;;  %v4683_v22 = vpop.f32.mrb[27].mxu0 }
 0x23c   : > { %v6293_v44 = vadd.f32 %v6260_v25, %v6124_v5  ;;  %v2658_v3 = vpop.f32.mrb[27].mxu1  ;;  %v4966_v15 = vmul.f32 %v6291_v49, %v6291_v49 }
 0x23d   : > { %v4926_v51 = vadd.f32 %v6292_v7, %v4925_v61  ;;  %v4964_v55 = vmul.f32 %v6292_v7, %v6292_v7  ;;  %v4994_v28 = vadd.f32 %v4993_v1, %v4963_v41  ;;  %v6294_v45 = vadd.f32 %v4683_v22, %v2658_v3 }
 0x23e   : > { %v5779_v27 = vpack.c.bf16 %v6293_v44, %v6291_v49  ;;  %v4967_v8 = vmul.f32 %v6293_v44, %v6293_v44 }
 0x23f   : > { %v4995_v53 = vadd.f32 %v4994_v28, %v4964_v55  ;;  %v5774_v29 = vpack.c.bf16 %v6294_v45, %v6292_v7  ;;  %v4927_v21 = vadd.f32 %v6294_v45, %v4926_v51  ;;  %v4965_v47 = vmul.f32 %v6294_v45, %v6294_v45 }
 0x240   : > { %5803 = vst [vmem:[%s8404_s20 + $0x68] sm:$0xff] %v5779_v27   ;;  %v6263_v46 = vpop.f32.mrb[28].mxu0 }
 0x241   : > { %5802 = vst [vmem:[%s8404_s20 + $0x60] sm:$0xff] %v5774_v29   ;;  %v4928_v60 = vadd.f32 %v6291_v49, %v4927_v21  ;;  %v4996_v20 = vadd.f32 %v4995_v53, %v4965_v47  ;;  %v6127_v42 = vpop.f32.mrb[28].mxu1  ;;  %v4696_v33 = vpop.f32.mrb[29].mxu0 }
 0x242   : > { %v6295_v12 = vadd.f32 %v6263_v46, %v6127_v42  ;;  %v2671_v31 = vpop.f32.mrb[29].mxu1  ;;  %v6264_v57 = vpop.f32.mrb[30].mxu0 }
 0x243   : > { %v4997_v48 = vadd.f32 %v4996_v20, %v4966_v15  ;;  %v6296_v62 = vadd.f32 %v4696_v33, %v2671_v31  ;;  %v4929_v56 = vadd.f32 %v6293_v44, %v4928_v60  ;;  %v6128_v40 = vpop.f32.mrb[30].mxu1  ;;  %v4699_v13 = vpop.f32.mrb[31].mxu0 }
 0x244   : > { %v6297_v17 = vadd.f32 %v6264_v57, %v6128_v40  ;;  %v2674_v30 = vpop.f32.mrb[31].mxu1  ;;  %v4970_v18 = vmul.f32 %v6295_v12, %v6295_v12 }
 0x245   : > { %v4930_v9 = vadd.f32 %v6296_v62, %v4929_v56  ;;  %v4968_v14 = vmul.f32 %v6296_v62, %v6296_v62  ;;  %v4998_v63 = vadd.f32 %v4997_v48, %v4967_v8  ;;  %v6298_v4 = vadd.f32 %v4699_v13, %v2674_v30 }
 0x246   : > { %v5789_v43 = vpack.c.bf16 %v6297_v17, %v6295_v12  ;;  %v4971_v2 = vmul.f32 %v6297_v17, %v6297_v17 }
 0x247   : > { %v4999_v16 = vadd.f32 %v4998_v63, %v4968_v14  ;;  %v5784_v58 = vpack.c.bf16 %v6298_v4, %v6296_v62  ;;  %v4931_v50 = vadd.f32 %v6298_v4, %v4930_v9  ;;  %v4969_v54 = vmul.f32 %v6298_v4, %v6298_v4 }
 0x248   : > { %5805 = vst [vmem:[%s8404_s20 + $0x78] sm:$0xff] %v5789_v43  }
 0x249   : > { %5804 = vst [vmem:[%s8404_s20 + $0x70] sm:$0xff] %v5784_v58   ;;  %v4932_v11 = vadd.f32 %v6295_v12, %v4931_v50  ;;  %v5000_v52 = vadd.f32 %v4999_v16, %v4969_v54 }
 0x24b   : > { %v4933_v32 = vadd.f32 %v6297_v17, %v4932_v11  ;;  %v5001_v39 = vadd.f32 %v5000_v52, %v4970_v18 }
 0x24d   : > { %v4934_v0 = vrot.slane %v4933_v32, 4  ;;  %v5002_v24 = vadd.f32 %v5001_v39, %v4971_v2 }
 0x24f   : > { %v4935_v36 = vadd.f32 %v4934_v0, %v4933_v32  ;;  %v5003_v10 = vrot.slane %v5002_v24, 4 }
 0x251   : > { %v4936_v59 = vrot.slane %v4935_v36, 2  ;;  %v5004_v19 = vadd.f32 %v5003_v10, %v5002_v24 }
 0x253   : > { %v4937_v38 = vadd.f32 %v4936_v59, %v4935_v36  ;;  %v5005_v37 = vrot.slane %v5004_v19, 2 }
 0x255   : > { %v4938_v26 = vrot.slane %v4937_v38, 1  ;;  %v5006_v35 = vadd.f32 %v5005_v37, %v5004_v19 }
 0x257   : > { %v5007_v34 = vrot.slane %v5006_v35, 1  ;;  %v4939_v6 = vadd.f32 %v4938_v26, %v4937_v38 }
 0x259   : > { %v5008_v49 = vadd.f32 %v5007_v34, %v5006_v35 }
 0x25b   : > { %v5010_v23 = vsel %vm5009_vm8, %v4939_v6, %v5008_v49 }
 0x25c   : > { %v5011_v25 = vsel %vm719_vm0, %v5010_v23, 0.0 }
 0x25d   : > { %5012 = vst [vmem:[%s182_s24] sm:$0xff] %v5011_v25 }
 0x25e PF: > { %s14_s12 = sadd.s32 1, %s6653_s12  }
 0x25f   : > { %p11_p5 = scmp.ge.s32.totalorder %s14_s12, 4  }
 0x261   :  { %13 = sbr.rel (!%p11_p5) target bundleno = 1 (0x1), region = 80 }

// kernel: basic_block_forward.5
= control target key start
LH: loop header
LB: loop body
LE: loop exit
PB: predicated region body
PF: predicated region fallthrough
CT: control target
= control target key end

     0   :  { %s7328_s18 = smov 0   ;;  %s9186_s0 = inlined_call_operand.vmem [shape: bf16[2,18,18,8], index: 0, kind: input, shape index: {}]   ;;  %s9187_s1 = inlined_call_operand.vmem [shape: f32[1,8], index: 1, kind: input, shape index: {}]   ;;  %s9188_s2 = inlined_call_operand.vmem [shape: f32[1,8], index: 2, kind: input, shape index: {}]   ;;  %s9189_s3 = inlined_call_operand.vmem [shape: bf16[9,8,128], index: 3, kind: input, shape index: {}]   ;;  %s9190_s4 = inlined_call_operand.vmem [shape: bf16[512,128], index: 4, kind: output, shape index: {0}]   ;;  %s9191_s5 = inlined_call_operand.vmem [shape: f32[2,8,128], index: 5, kind: output, shape index: {1}]  }
   0x1 LB: > { %s7334_s19 = sadd.s32 4294967295, %s7295_s18   ;;  %p5809_p0 = scmp.ge.s32.totalorder %s7295_s18, 1  ;;  %s7295_s18 = sphi %s7328_s18, %s16_s18  }
   0x2   : > { %p190_p1 = scmp.lt.s32.totalorder %s7295_s18, 3 }
   0x4   : > { %p191_p2 = pnand %p5809_p0, %p190_p1 }
   0x6   : > { %194 = sbr.rel (%p191_p2) target bundleno = 677 (0x2a5), region = 36 }
   0xd   : > { %v5870_v0 = vld [vmem:[%s9189_s3 + $0x4] sm:$0xf]  ;;  %vm1423_vm0 = vcmask 1043456   ;;  %v6017_v1 = vld [vmem:[%s9189_s3 + $0x10] sm:$0xf]  ;;  %v522_v2 = vlaneseq  ;;  %v7297_v5 = vmov 0.0|0.0  }
   0xe   : > { %7180 = vmatprep.subr.msk.bf16.mxu1 %vm1423_vm0, %v5870_v0  ;;  %7184 = vmatprep.subr.msk.bf16.mxu0 %vm1423_vm0, %v6017_v1  ;;  %v1425_v3 = vsel %vm1423_vm0, %v5870_v0, 0  ;;  %v7348_v4 = vsel %vm1423_vm0, %v6017_v1, 0  ;;  %v5816_v6 = vcombine.low %v7297_v5, %v7297_v5  ;;  %v5817_v7 = vcombine.high %v7297_v5, %v7297_v5  ;;  %p222_p3 = scmp.lt.s32.totalorder %s7334_s19, 1  ;;  %v7366_v9 = vld [vmem:[%s9189_s3] sm:$0xf]  ;;  %s5811_s8 = sshll.u32 %s7334_s19, 5 }
   0xf   : > { %9206 = vst [vmem:[#allocation3_spill] sm:$0xff] %v7348_v4  ;;  %6617 = vmatpush3.bf16.msra.mxu1 %v1425_v3  ;;  %6753 = vmatpush3.bf16.msra.mxu0 %v7348_v4  ;;  %vm832_vm1 = vcmask 60416   ;;  %vm835_vm2 = vcmask 57344   ;;  %v7361_v8 = vshrl.u32 %v522_v2, 7  ;;  %v7371_v10 = vld [vmem:[%s9189_s3 + $0x14] sm:$0xf] }
  0x10   : > { %833 = vst.msk [vmem:[#allocation2] sm:$0xf] %vm832_vm1, %v5816_v6  ;;  %834 = vst.msk [vmem:[#allocation2 + $0x4] sm:$0xf] %vm832_vm1, %v5817_v7  ;;  %s7359_s24 = scalar_select %p222_p3, %s7334_s19, 1  ;;  %7181 = vmatprep.subr.msk.bf16.mxu1 %vm1423_vm0, %v7366_v9  ;;  %7186 = vmatprep.subr.msk.bf16.mxu0 %vm1423_vm0, %v7371_v10  ;;  %vm1374_vm7 = vcmask 64512  }
  0x11   : > { %836 = vst.msk [vmem:[#allocation2 + $0x8] sm:$0x1] %vm835_vm2, %v5816_v6  ;;  %887 = vst.msk [vmem:[#allocation2 + $0xd4] sm:$0x1] %vm835_vm2, %v5816_v6  ;;  %v7375_v11 = vadd.s32 16, %v7361_v8  ;;  %vm526_vm5 = vcmp.ge.s32.totalorder %v7361_v8, 1 }
  0x12   : > { %885 = vst.msk [vmem:[#allocation2 + $0xcc] sm:$0xf] %vm832_vm1, %v5816_v6  ;;  %886 = vst.msk [vmem:[#allocation2 + $0xd0] sm:$0xf] %vm832_vm1, %v5817_v7  ;;  %s7190_s29 = smul.u32 216, %s7359_s24  ;;  %vm1928_vm9 = vcmask 1042432  }
  0x13   : > { %vm937_vm3 = vsmask.f32 3328  ;;  %vm938_vm4 = vsmask.f32 7440  ;;  %v7393_v18 = vld [vmem:[%s9187_s1] ss:$0 sm:$0xff] }
  0x14   : > { %s7384_s7 = scalar_lea.vmem %s9186_s0, %s7190_s29  ;;  %vm537_vm6 = vcmp.le.s32.totalorder %v7375_v11, 16  ;;  %v7404_v32 = vld [vmem:[%s9188_s2] ss:$0 sm:$0xff]  ;;  %vm7416_vm8 = vmor %vm937_vm3, %vm938_vm4  ;;  %vm1929_vm10 = vcmask 1046532   ;;  %p228_p4 = scmp.lt.s32.totalorder %s5811_s8, 63  ;;  %vm5713_vm12 = vcmask 1040384  }
  0x15   : > { %v241_v12 = vld [vmem:[%s7384_s7 + $0xc] sm:$0xff]   ;;  %v243_v13 = vld [vmem:[%s7384_s7 + $0x14] sm:$0x1]  ;;  %v6440_v14 = vld [vmem:[%s7384_s7 + $0x18] sm:$0xff]   ;;  %s5813_s12 = sshll.u32 %s7359_s24, 3  ;;  %vm5715_vm13 = vcmask 1041408  }
  0x16   : > { %v295_v15 = vunpack.c.l.bf16 %v241_v12  ;;  %v296_v16 = vunpack.c.h.bf16 %v241_v12  ;;  %v297_v17 = vunpack.c.l.bf16 %v243_v13  ;;  %v246_v19 = vld [vmem:[%s7384_s7 + $0x20] sm:$0x1]  ;;  %v7398_v20 = vld [vmem:[%s7384_s7 + $0x24] sm:$0xff]   ;;  %v6330_v24 = vunpack.c.l.bf16 %v6440_v14  ;;  %v249_v62 = vld [vmem:[%s7384_s7 + $0x2c] sm:$0x1]  ;;  %s9263_s8 = smov (!%p228_p4, %s5811_s8), 63  ;;  %s236_s15 = scalar_lea.vmem %s9191_s5, %s5813_s12 }
  0x17   : > { %v888_v21 = vld [vmem:[#allocation2] sm:$0xf]  ;;  %v889_v22 = vld [vmem:[#allocation2 + $0x4] sm:$0xf]  ;;  %v6331_v25 = vunpack.c.h.bf16 %v6440_v14  ;;  %v300_v26 = vunpack.c.l.bf16 %v246_v19  ;;  %v301_v27 = vunpack.c.l.bf16 %v7398_v20  ;;  %v302_v36 = vunpack.c.h.bf16 %v7398_v20  ;;  %v6441_v12 = vld [vmem:[%s7384_s7 + $0x30] sm:$0xff]   ;;  %s5812_s9 = sshll.u32 %s9263_s8, 2 }
  0x18   : > { %v921_v23 = vld [vmem:[#allocation2 + $0x8] sm:$0x1]  ;;  %v941_v28 = vshrl.u32 %v888_v21, 16  ;;  %v944_v29 = vshll.u32 %v888_v21, 16  ;;  %v950_v30 = vshll.u32 %v889_v22, 16  ;;  %v954_v31 = vshrl.u32 %v889_v22, 16  ;;  %vm7770_vm11 = vmor %vm1928_vm9, %vm1929_vm10  ;;  %s9156_s11 = scalar_lea.vmem %s9190_s4, %s5812_s9 }
  0x19   : > { %v960_v33 = vshll.u32 %v921_v23, 16  ;;  %v356_v34 = vmul.f32 %v7393_v18, %v295_v15  ;;  %v357_v35 = vmul.f32 %v7393_v18, %v296_v16  ;;  %v358_v42 = vmul.f32 %v7393_v18, %v297_v17  ;;  %v252_v17 = vld [vmem:[%s7384_s7 + $0x38] sm:$0x1] }
  0x1a   : > { %v943_v37 = vrot.slane %v941_v28, 4  ;;  %v946_v38 = vrot.slane %v944_v29, 5  ;;  %v952_v39 = vrot.slane %v950_v30, 5  ;;  %v956_v40 = vrot.slane %v954_v31, 4 }
  0x1b   : > { %v962_v41 = vrot.slane %v960_v33, 5  ;;  %v417_v43 = vadd.f32 %v7404_v32, %v356_v34  ;;  %v418_v44 = vadd.f32 %v7404_v32, %v357_v35  ;;  %v359_v47 = vmul.f32 %v6330_v24, %v7393_v18  ;;  %v7463_v35 = vld [vmem:[%s7384_s7 + $0x44] sm:$0x1] }
  0x1c   : > { %v947_v45 = vor.u32 %v946_v38, %v943_v37  ;;  %v957_v46 = vor.u32 %v956_v40, %v952_v39  ;;  %v360_v48 = vmul.f32 %v6331_v25, %v7393_v18  ;;  %v419_v50 = vadd.f32 %v7404_v32, %v358_v42 }
  0x1d   : > { %v471_v51 = vmax.f32 %v417_v43, 0.0  ;;  %v472_v52 = vmax.f32 %v418_v44, 0.0  ;;  %v361_v53 = vmul.f32 %v7393_v18, %v300_v26  ;;  %v420_v56 = vadd.f32 %v7404_v32, %v359_v47 }
  0x1e   : > { %v948_v54 = vrot.slane %v947_v45, 4  ;;  %v958_v55 = vrot.slane %v957_v46, 4  ;;  %v421_v57 = vadd.f32 %v7404_v32, %v360_v48  ;;  %v473_v58 = vmax.f32 %v419_v50, 0.0 }
  0x1f   : > { %v547_v59 = vsel %vm526_vm5, %v471_v51, 0.0  ;;  %v6249_v60 = vpack.c.bf16 %v472_v52, %v472_v52  ;;  %v422_v61 = vadd.f32 %v7404_v32, %v361_v53  ;;  %v474_v2 = vmax.f32 %v420_v56, 0.0 }
  0x20   : > { %v953_v63 = vsel %vm7416_vm8, %v948_v54, %v952_v39  ;;  %v963_v0 = vsel %vm7416_vm8, %v958_v55, %v962_v41  ;;  %v6248_v1 = vpack.c.bf16 %v547_v59, %v547_v59  ;;  %v549_v5 = vsel %vm537_vm6, %v473_v58, 0.0 }
  0x21   : > { %v5871_v3 = vcombine.low %v953_v63, %v963_v0  ;;  %838 = vst.msk [vmem:[#allocation2 + $0x10] sm:$0xf] %vm832_vm1, %v6249_v60  ;;  %v475_v6 = vmax.f32 %v421_v57, 0.0  ;;  %v476_v7 = vmax.f32 %v422_v61, 0.0  ;;  %v6250_v13 = vpack.c.bf16 %v549_v5, %v549_v5 }
  0x22   : > { %837 = vst.msk [vmem:[#allocation2 + $0xc] sm:$0xf] %vm832_vm1, %v6248_v1  ;;  %v550_v14 = vsel %vm526_vm5, %v474_v2, 0.0  ;;  %v303_v15 = vunpack.c.l.bf16 %v249_v62  ;;  %v362_v16 = vmul.f32 %v7393_v18, %v301_v27  ;;  %v363_v22 = vmul.f32 %v7393_v18, %v302_v36  ;;  %v7449_v27 = vld [vmem:[%s7384_s7 + $0x3c] sm:$0xff]  }
  0x23   : > { %6618 = vmatprep.mubr.msk.bf16.mxu1 %vm1374_vm7, %v5871_v3  ;;  %v552_v19 = vsel %vm537_vm6, %v476_v7, 0.0  ;;  %v6251_v20 = vpack.c.bf16 %v550_v14, %v550_v14  ;;  %v6252_v21 = vpack.c.bf16 %v475_v6, %v475_v6  ;;  %839 = vst.msk [vmem:[#allocation2 + $0x14] sm:$0x1] %vm835_vm2, %v6250_v13  ;;  %v6334_v26 = vunpack.c.l.bf16 %v6441_v12 }
  0x24   : > { %v6253_v23 = vpack.c.bf16 %v552_v19, %v552_v19  ;;  %v364_v24 = vmul.f32 %v7393_v18, %v303_v15  ;;  %v423_v25 = vadd.f32 %v7404_v32, %v362_v16  ;;  %v424_v28 = vadd.f32 %v7404_v32, %v363_v22 }
  0x25   : > { %840 = vst.msk [vmem:[#allocation2 + $0x18] sm:$0xf] %vm832_vm1, %v6251_v20  ;;  %841 = vst.msk [vmem:[#allocation2 + $0x1c] sm:$0xf] %vm832_vm1, %v6252_v21  ;;  %v6335_v29 = vunpack.c.h.bf16 %v6441_v12  ;;  %v306_v30 = vunpack.c.l.bf16 %v252_v17  ;;  %v7456_v31 = vsel %vm1423_vm0, %v7366_v9, 0  ;;  %v7467_v36 = vsel %vm1423_vm0, %v7371_v10, 0 }
  0x26   : > { %842 = vst.msk [vmem:[#allocation2 + $0x20] sm:$0x1] %vm835_vm2, %v6253_v23  ;;  %v7460_v33 = vadd.f32 %v7404_v32, %v364_v24  ;;  %v477_v34 = vmax.f32 %v423_v25, 0.0  ;;  %v478_v37 = vmax.f32 %v424_v28, 0.0  ;;  %v365_v38 = vmul.f32 %v6334_v26, %v7393_v18 }
  0x27   : > { %v307_v39 = vunpack.c.l.bf16 %v7449_v27  ;;  %v7476_v42 = vmul.f32 %v6335_v29, %v7393_v18  ;;  %v7479_v43 = vmul.f32 %v7393_v18, %v306_v30  ;;  %v308_v10 = vunpack.c.h.bf16 %v7449_v27 }
  0x28   : > { %v891_v40 = vld [vmem:[#allocation2 + $0x10] sm:$0xf]  ;;  %v553_v41 = vsel %vm526_vm5, %v477_v34, 0.0  ;;  %v309_v48 = vunpack.c.l.bf16 %v7463_v35  ;;  %v479_v54 = vmax.f32 %v7460_v33, 0.0  ;;  %v6255_v60 = vpack.c.bf16 %v478_v37, %v478_v37  ;;  %v7531_v33 = vld [vmem:[%s9189_s3 + $0x18] sm:$0xf] }
  0x29   : > { %v7471_v9 = vld [vmem:[#allocation2 + $0x10] sm:$0xf]  ;;  %v890_v44 = vld [vmem:[#allocation2 + $0xc] sm:$0xf]  ;;  %v974_v45 = vshll.u32 %v891_v40, 16  ;;  %v978_v46 = vshrl.u32 %v891_v40, 16  ;;  %v6254_v59 = vpack.c.bf16 %v553_v41, %v553_v41  ;;  %v7489_v0 = vadd.f32 %v7404_v32, %v365_v38 }
  0x2a   : > { %v2754_v47 = vshll.u32 %v7471_v9, 16  ;;  %v965_v50 = vshrl.u32 %v890_v44, 16  ;;  %v968_v51 = vshll.u32 %v890_v44, 16  ;;  %v2696_v52 = vld [vmem:[#allocation2 + $0xc] sm:$0xf]  ;;  %v2758_v53 = vshrl.u32 %v7471_v9, 16 }
  0x2b   : > { %v922_v55 = vld [vmem:[#allocation2 + $0x14] sm:$0x1]  ;;  %v976_v56 = vrot.slane %v974_v45, 5  ;;  %v980_v57 = vrot.slane %v978_v46, 4  ;;  %v2745_v2 = vshrl.u32 %v2696_v52, 16  ;;  %v2748_v3 = vshll.u32 %v2696_v52, 16 }
  0x2c   : > { %v7486_v58 = vld [vmem:[#allocation2 + $0x14] sm:$0x1]  ;;  %v967_v61 = vrot.slane %v965_v50, 4  ;;  %v970_v62 = vrot.slane %v968_v51, 5  ;;  %v984_v63 = vshll.u32 %v922_v55, 16  ;;  %v2756_v5 = vrot.slane %v2754_v47, 5 }
  0x2d   : > { %v981_v1 = vor.u32 %v980_v57, %v976_v56  ;;  %v2699_v6 = vld [vmem:[#allocation2 + $0x18] sm:$0xf]  ;;  %843 = vst.msk [vmem:[#allocation2 + $0x24] sm:$0xf] %vm832_vm1, %v6254_v59  ;;  %844 = vst.msk [vmem:[#allocation2 + $0x28] sm:$0xf] %vm832_vm1, %v6255_v60  ;;  %v7497_v20 = vmul.f32 %v7393_v18, %v307_v39 }
  0x2e   : > { %v971_v7 = vor.u32 %v970_v62, %v967_v61  ;;  %v986_v12 = vrot.slane %v984_v63, 5  ;;  %v2760_v13 = vrot.slane %v2758_v53, 4  ;;  %v2764_v14 = vshll.u32 %v7486_v58, 16  ;;  %v7494_v15 = vld [vmem:[#allocation2 + $0x1c] sm:$0xf] }
  0x2f   : > { %v982_v16 = vrot.slane %v981_v1, 4  ;;  %v2747_v17 = vrot.slane %v2745_v2, 4  ;;  %v2750_v19 = vrot.slane %v2748_v3, 5  ;;  %v2769_v24 = vshrl.u32 %v2699_v6, 16  ;;  %v7501_v28 = vld [vmem:[#allocation2 + $0x20] sm:$0x1] }
  0x30   : > { %v972_v21 = vrot.slane %v971_v7, 4  ;;  %v2761_v22 = vor.u32 %v2760_v13, %v2756_v5  ;;  %v2766_v23 = vrot.slane %v2764_v14, 5  ;;  %v2772_v29 = vshll.u32 %v2699_v6, 16  ;;  %v892_v40 = vld [vmem:[#allocation2 + $0x18] sm:$0xf] }
  0x31   : > { %v987_v25 = vsel %vm7416_vm8, %v982_v16, %v986_v12  ;;  %v2751_v26 = vor.u32 %v2750_v19, %v2747_v17  ;;  %v2778_v30 = vshll.u32 %v7494_v15, 16  ;;  %v2771_v38 = vrot.slane %v2769_v24, 4  ;;  %v893_v53 = vld [vmem:[#allocation2 + $0x1c] sm:$0xf]  ;;  %v923_v59 = vld [vmem:[#allocation2 + $0x20] sm:$0x1] }
  0x32   : > { %v977_v34 = vsel %vm7416_vm8, %v972_v21, %v976_v56  ;;  %v2762_v37 = vrot.slane %v2761_v22, 4  ;;  %v2782_v39 = vshrl.u32 %v7494_v15, 16  ;;  %v2774_v45 = vrot.slane %v2772_v29, 5 }
  0x33   : > { %v5872_v41 = vcombine.low %v977_v34, %v987_v25  ;;  %v2752_v44 = vrot.slane %v2751_v26, 4  ;;  %v2780_v46 = vrot.slane %v2778_v30, 5  ;;  %v3488_v50 = vrot.slane %v7471_v9, 5  ;;  %v271_v9 = vld [vmem:[%s7384_s7 + $0x84] sm:$0xff]  }
  0x34   : > { %v2767_v47 = vsel %vm7416_vm8, %v2762_v37, %v2766_v23  ;;  %v2784_v51 = vrot.slane %v2782_v39, 4  ;;  %v2788_v52 = vshll.u32 %v7501_v28, 16  ;;  %v3491_v56 = vrot.slane %v7486_v58, 5  ;;  %v894_v2 = vld [vmem:[#allocation2 + $0x24] sm:$0xf] }
  0x35   : > { %6619 = vmatmul.mubr.msk.bf16.vlgmr.msra.gmra.mrb[0].mxu1 %vm1374_vm7, %v5872_v41  ;;  %v2757_v55 = vsel %vm7416_vm8, %v2752_v44, %v2756_v5  ;;  %v2775_v57 = vor.u32 %v2774_v45, %v2771_v38  ;;  %v989_v60 = vshrl.u32 %v892_v40, 16  ;;  %v3495_v1 = vrot.slane %v7494_v15, 5  ;;  %v895_v3 = vld [vmem:[#allocation2 + $0x28] sm:$0xf]  ;;  %v2702_v14 = vld [vmem:[#allocation2 + $0x24] sm:$0xf] }
  0x36   : > { %v6018_v61 = vcombine.low %v2757_v55, %v2767_v47  ;;  %6651 = vmatpush3.bf16.msra.mxu1 %v7456_v31  ;;  %v2785_v62 = vor.u32 %v2784_v51, %v2780_v46  ;;  %v2790_v63 = vrot.slane %v2788_v52, 5  ;;  %v992_v12 = vshll.u32 %v892_v40, 16  ;;  %v7524_v24 = vld [vmem:[#allocation2 + $0x28] sm:$0xf]  ;;  %v7823_v15 = vld [vmem:[%s9187_s1] ss:$0 sm:$0xff] }
  0x37   : > { %v2776_v6 = vrot.slane %v2775_v57, 4  ;;  %v991_v7 = vrot.slane %v989_v60, 4  ;;  %v998_v13 = vshll.u32 %v893_v53, 16  ;;  %v1002_v16 = vshrl.u32 %v893_v53, 16 }
  0x38   : > { %6754 = vmatprep.mubr.msk.bf16.mxu0 %vm1374_vm7, %v6018_v61  ;;  %v2786_v5 = vrot.slane %v2785_v62, 4  ;;  %v1008_v17 = vshll.u32 %v923_v59, 16  ;;  %v555_v31 = vsel %vm537_vm6, %v479_v54, 0.0  ;;  %v994_v21 = vrot.slane %v992_v12, 5 }
  0x39   : > { %v2781_v19 = vsel %vm7416_vm8, %v2776_v6, %v2780_v46  ;;  %v1000_v22 = vrot.slane %v998_v13, 5  ;;  %v6256_v23 = vpack.c.bf16 %v555_v31, %v555_v31  ;;  %v1004_v26 = vrot.slane %v1002_v16, 4 }
  0x3a   : > { %v2791_v25 = vsel %vm7416_vm8, %v2786_v5, %v2790_v63  ;;  %v1010_v29 = vrot.slane %v1008_v17, 5  ;;  %v1013_v30 = vshrl.u32 %v894_v2, 16  ;;  %v995_v34 = vor.u32 %v994_v21, %v991_v7 }
  0x3b   : > { %v6019_v54 = vcombine.low %v2781_v19, %v2791_v25  ;;  %845 = vst.msk [vmem:[#allocation2 + $0x2c] sm:$0x1] %vm835_vm2, %v6256_v23  ;;  %v1016_v37 = vshll.u32 %v894_v2, 16  ;;  %v1022_v38 = vshll.u32 %v895_v3, 16  ;;  %v1005_v39 = vor.u32 %v1004_v26, %v1000_v22 }
  0x3c   : > { %v1015_v40 = vrot.slane %v1013_v30, 4  ;;  %v1026_v41 = vshrl.u32 %v895_v3, 16  ;;  %v2793_v44 = vshrl.u32 %v2702_v14, 16  ;;  %v996_v45 = vrot.slane %v995_v34, 4 }
  0x3d   : > { %6755 = vmatmul.mubr.msk.bf16.vlgmr.msra.gmra.mrb[0].mxu0 %vm1374_vm7, %v6019_v54  ;;  %v1018_v46 = vrot.slane %v1016_v37, 5  ;;  %v1024_v47 = vrot.slane %v1022_v38, 5  ;;  %v2796_v51 = vshll.u32 %v2702_v14, 16  ;;  %v1006_v52 = vrot.slane %v1005_v39, 4  ;;  %v6442_v54 = vld [vmem:[%s7384_s7 + $0x48] sm:$0xff]  }
  0x3e   : > { %6787 = vmatpush3.bf16.msra.mxu0 %v7467_v36  ;;  %v1028_v53 = vrot.slane %v1026_v41, 4  ;;  %v2795_v55 = vrot.slane %v2793_v44, 4  ;;  %v2802_v57 = vshll.u32 %v7524_v24, 16  ;;  %v1001_v59 = vsel %vm7416_vm8, %v996_v45, %v1000_v22 }
  0x3f   : > { %v1019_v60 = vor.u32 %v1018_v46, %v1015_v40  ;;  %v2798_v61 = vrot.slane %v2796_v51, 5  ;;  %v2806_v62 = vshrl.u32 %v7524_v24, 16  ;;  %7187 = vmatprep.subr.msk.bf16.mxu0 %vm1423_vm0, %v7531_v33  ;;  %v1011_v63 = vsel %vm7416_vm8, %v1006_v52, %v1010_v29  ;;  %v258_v46 = vld [vmem:[%s7384_s7 + $0x50] sm:$0x1] }
  0x40   : > { %v1029_v2 = vor.u32 %v1028_v53, %v1024_v47  ;;  %v2804_v36 = vrot.slane %v2802_v57, 5  ;;  %v427_v3 = vadd.f32 %v7404_v32, %v7476_v42  ;;  %v5873_v6 = vcombine.low %v1001_v59, %v1011_v63 }
  0x41   : > { %v1020_v7 = vrot.slane %v1019_v60, 4  ;;  %v2799_v12 = vor.u32 %v2798_v61, %v2795_v55  ;;  %v2808_v13 = vrot.slane %v2806_v62, 4  ;;  %v428_v17 = vadd.f32 %v7404_v32, %v7479_v43  ;;  %v261_v62 = vld [vmem:[%s7384_s7 + $0x5c] sm:$0x1] }
  0x42   : > { %v924_v14 = vld [vmem:[#allocation2 + $0x2c] sm:$0x1]  ;;  %v1030_v5 = vrot.slane %v1029_v2, 4  ;;  %v480_v31 = vmax.f32 %v7489_v0, 0.0  ;;  %v369_v19 = vmul.f32 %v7393_v18, %v308_v10  ;;  %6622 = vmatprep.mubr.msk.bf16.mxu1 %vm1374_vm7, %v5873_v6  ;;  %v481_v26 = vmax.f32 %v427_v3, 0.0 }
  0x43   : > { %v7546_v16 = vld [vmem:[#allocation2 + $0x2c] sm:$0x1]  ;;  %v1025_v42 = vsel %vm7416_vm8, %v1020_v7, %v1024_v47  ;;  %v1032_v21 = vshll.u32 %v924_v14, 16  ;;  %v2800_v22 = vrot.slane %v2799_v12, 4  ;;  %v2809_v23 = vor.u32 %v2808_v13, %v2804_v36  ;;  %v259_v47 = vld [vmem:[%s7384_s7 + $0x54] sm:$0xff]   ;;  %v7589_v7 = vld [vmem:[%s7384_s7 + $0x60] sm:$0xff]  }
  0x44   : > { %v2812_v25 = vshll.u32 %v7546_v16, 16  ;;  %v482_v29 = vmax.f32 %v428_v17, 0.0  ;;  %v556_v43 = vsel %vm526_vm5, %v480_v31, 0.0  ;;  %v6258_v38 = vpack.c.bf16 %v481_v26, %v481_v26 }
  0x45   : > { %v1034_v27 = vrot.slane %v1032_v21, 5  ;;  %v2805_v10 = vsel %vm7416_vm8, %v2800_v22, %v2804_v36  ;;  %v2810_v0 = vrot.slane %v2809_v23, 4  ;;  %v6257_v30 = vpack.c.bf16 %v556_v43, %v556_v43 }
  0x46   : > { %v2814_v34 = vrot.slane %v2812_v25, 5  ;;  %v558_v37 = vsel %vm537_vm6, %v482_v29, 0.0  ;;  %v370_v39 = vmul.f32 %v7393_v18, %v309_v48  ;;  %v429_v44 = vadd.f32 %v7404_v32, %v7497_v20  ;;  %847 = vst.msk [vmem:[#allocation2 + $0x34] sm:$0xf] %vm832_vm1, %v6258_v38 }
  0x47   : > { %v1035_v40 = vsel %vm7416_vm8, %v1030_v5, %v1034_v27  ;;  %v6259_v41 = vpack.c.bf16 %v558_v37, %v558_v37  ;;  %846 = vst.msk [vmem:[#allocation2 + $0x30] sm:$0xf] %vm832_vm1, %v6257_v30  ;;  %v430_v45 = vadd.f32 %v7404_v32, %v369_v19  ;;  %v6338_v52 = vunpack.c.l.bf16 %v6442_v54 }
  0x48   : > { %v5874_v51 = vcombine.low %v1025_v42, %v1035_v40  ;;  %v2815_v35 = vsel %vm7416_vm8, %v2810_v0, %v2814_v34  ;;  %v431_v48 = vadd.f32 %v7404_v32, %v370_v39  ;;  %v483_v55 = vmax.f32 %v429_v44, 0.0 }
  0x49   : > { %v6020_v53 = vcombine.low %v2805_v10, %v2815_v35  ;;  %848 = vst.msk [vmem:[#allocation2 + $0x38] sm:$0x1] %vm835_vm2, %v6259_v41  ;;  %v484_v20 = vmax.f32 %v430_v45, 0.0  ;;  %v6339_v57 = vunpack.c.h.bf16 %v6442_v54  ;;  %v312_v60 = vunpack.c.l.bf16 %v258_v46 }
  0x4a   : > { %6623 = vmatmul.mubr.msk.bf16.gmra.mrb[4].mxu1 %vm1374_vm7, %v5874_v51  ;;  %v485_v59 = vmax.f32 %v431_v48, 0.0  ;;  %v371_v61 = vmul.f32 %v6338_v52, %v7393_v18  ;;  %v313_v63 = vunpack.c.l.bf16 %v259_v47  ;;  %v559_v2 = vsel %vm526_vm5, %v483_v55, 0.0 }
  0x4b   : > { %6758 = vmatprep.mubr.msk.bf16.mxu0 %vm1374_vm7, %v6020_v53  ;;  %v6261_v36 = vpack.c.bf16 %v484_v20, %v484_v20  ;;  %v372_v3 = vmul.f32 %v6339_v57, %v7393_v18  ;;  %v314_v6 = vunpack.c.h.bf16 %v259_v47  ;;  %v6260_v13 = vpack.c.bf16 %v559_v2, %v559_v2 }
  0x4c   : > { %v561_v12 = vsel %vm537_vm6, %v485_v59, 0.0  ;;  %v373_v14 = vmul.f32 %v7393_v18, %v312_v60  ;;  %v7595_v5 = vadd.f32 %v7404_v32, %v371_v61  ;;  %v315_v19 = vunpack.c.l.bf16 %v261_v62 }
  0x4d   : > { %v6262_v17 = vpack.c.bf16 %v561_v12, %v561_v12  ;;  %850 = vst.msk [vmem:[#allocation2 + $0x40] sm:$0xf] %vm832_vm1, %v6261_v36  ;;  %v7599_v31 = vadd.f32 %v7404_v32, %v372_v3  ;;  %v374_v42 = vmul.f32 %v7393_v18, %v313_v63  ;;  %849 = vst.msk [vmem:[#allocation2 + $0x3c] sm:$0xf] %vm832_vm1, %v6260_v13  ;;  %v6342_v29 = vunpack.c.l.bf16 %v7589_v7  ;;  %v7609_v43 = vld [vmem:[#allocation2 + $0x34] sm:$0xf] }
  0x4e   : > { %v2705_v21 = vld [vmem:[#allocation2 + $0x30] sm:$0xf]  ;;  %v7604_v23 = vadd.f32 %v7404_v32, %v373_v14  ;;  %v486_v25 = vmax.f32 %v7595_v5, 0.0  ;;  %v375_v26 = vmul.f32 %v7393_v18, %v314_v6  ;;  %v897_v0 = vld [vmem:[#allocation2 + $0x34] sm:$0xf]  ;;  %v7613_v30 = vmul.f32 %v7393_v18, %v315_v19 }
  0x4f   : > { %v896_v22 = vld [vmem:[#allocation2 + $0x30] sm:$0xf]  ;;  %v2817_v27 = vshrl.u32 %v2705_v21, 16  ;;  %v2820_v10 = vshll.u32 %v2705_v21, 16  ;;  %851 = vst.msk [vmem:[#allocation2 + $0x44] sm:$0x1] %vm835_vm2, %v6262_v17  ;;  %v7616_v54 = vadd.f32 %v7404_v32, %v374_v42  ;;  %v6343_v40 = vunpack.c.h.bf16 %v7589_v7 }
  0x50   : > { %v7618_v34 = vld [vmem:[#allocation2 + $0x38] sm:$0x1]  ;;  %v2826_v37 = vshll.u32 %v7609_v43, 16  ;;  %v2830_v38 = vshrl.u32 %v7609_v43, 16  ;;  %v7623_v39 = vadd.f32 %v7404_v32, %v375_v26  ;;  %v1037_v47 = vshrl.u32 %v896_v22, 16 }
  0x51   : > { %v2819_v41 = vrot.slane %v2817_v27, 4  ;;  %v2822_v44 = vrot.slane %v2820_v10, 5  ;;  %v2836_v45 = vshll.u32 %v7618_v34, 16  ;;  %v925_v46 = vld [vmem:[#allocation2 + $0x38] sm:$0x1]  ;;  %v1040_v48 = vshll.u32 %v896_v22, 16 }
  0x52   : > { %v2828_v51 = vrot.slane %v2826_v37, 5  ;;  %v2832_v35 = vrot.slane %v2830_v38, 4  ;;  %v1046_v52 = vshll.u32 %v897_v0, 16  ;;  %v1039_v20 = vrot.slane %v1037_v47, 4 }
  0x53   : > { %v2823_v53 = vor.u32 %v2822_v44, %v2819_v41  ;;  %v2838_v55 = vrot.slane %v2836_v45, 5  ;;  %v1050_v57 = vshrl.u32 %v897_v0, 16  ;;  %v1042_v60 = vrot.slane %v1040_v48, 5 }
  0x54   : > { %v2833_v59 = vor.u32 %v2832_v35, %v2828_v51  ;;  %v1048_v61 = vrot.slane %v1046_v52, 5  ;;  %v1056_v62 = vshll.u32 %v925_v46, 16  ;;  %v899_v63 = vld [vmem:[#allocation2 + $0x40] sm:$0xf]  ;;  %v898_v3 = vld [vmem:[#allocation2 + $0x3c] sm:$0xf]  ;;  %v326_v58 = vunpack.c.h.bf16 %v271_v9 }
  0x55   : > { %v2824_v2 = vrot.slane %v2823_v53, 4  ;;  %v1052_v36 = vrot.slane %v1050_v57, 4  ;;  %v1070_v6 = vshll.u32 %v899_v63, 16  ;;  %v1074_v12 = vshrl.u32 %v899_v63, 16  ;;  %v2708_v10 = vld [vmem:[#allocation2 + $0x3c] sm:$0xf] }
  0x56   : > { %v2834_v13 = vrot.slane %v2833_v59, 4  ;;  %v1043_v14 = vor.u32 %v1042_v60, %v1039_v20  ;;  %v1058_v17 = vrot.slane %v1056_v62, 5  ;;  %v926_v19 = vld [vmem:[#allocation2 + $0x44] sm:$0x1]  ;;  %v1061_v42 = vshrl.u32 %v898_v3, 16 }
  0x57   : > { %v2829_v21 = vsel %vm7416_vm8, %v2824_v2, %v2828_v51  ;;  %v1053_v22 = vor.u32 %v1052_v36, %v1048_v61  ;;  %v1064_v26 = vshll.u32 %v898_v3, 16  ;;  %v1072_v27 = vrot.slane %v1070_v6, 5  ;;  %v7631_v44 = vld [vmem:[#allocation2 + $0x40] sm:$0xf]  ;;  %v7633_v48 = vld [vmem:[#allocation2 + $0x44] sm:$0x1] }
  0x58   : > { %v2839_v0 = vsel %vm7416_vm8, %v2834_v13, %v2838_v55  ;;  %v1044_v37 = vrot.slane %v1043_v14, 4  ;;  %v1063_v38 = vrot.slane %v1061_v42, 4  ;;  %v1076_v41 = vrot.slane %v1074_v12, 4  ;;  %v5951_v13 = vld [vmem:[%s9189_s3 + $0x8] sm:$0xf] }
  0x59   : > { %v6021_v45 = vcombine.low %v2829_v21, %v2839_v0  ;;  %v1054_v46 = vrot.slane %v1053_v22, 4  ;;  %v1066_v47 = vrot.slane %v1064_v26, 5  ;;  %v1080_v35 = vshll.u32 %v926_v19, 16  ;;  %7182 = vmatprep.subr.msk.bf16.mxu1 %vm1423_vm0, %v5951_v13  ;;  %v264_v0 = vld [vmem:[%s7384_s7 + $0x68] sm:$0x1] }
  0x5a   : > { %v1049_v51 = vsel %vm7416_vm8, %v1044_v37, %v1048_v61  ;;  %v1077_v52 = vor.u32 %v1076_v41, %v1072_v27  ;;  %v2841_v53 = vshrl.u32 %v2708_v10, 16  ;;  %v2844_v20 = vshll.u32 %v2708_v10, 16  ;;  %v8155_v8 = vld [vmem:[#allocation2 + $0x40] sm:$0xf]  ;;  %v7246_v11 = vld [vmem:[#allocation2 + $0x3c] sm:$0xf] }
  0x5b   : > { %6759 = vmatmul.mubr.msk.bf16.gmra.mrb[4].mxu0 %vm1374_vm7, %v6021_v45  ;;  %v1059_v55 = vsel %vm7416_vm8, %v1054_v46, %v1058_v17  ;;  %v1067_v57 = vor.u32 %v1066_v47, %v1063_v38  ;;  %v1082_v59 = vrot.slane %v1080_v35, 5  ;;  %v2850_v60 = vshll.u32 %v7631_v44, 16  ;;  %v265_v47 = vld [vmem:[%s7384_s7 + $0x6c] sm:$0xff]  }
  0x5c   : > { %v5875_v62 = vcombine.low %v1049_v51, %v1059_v55  ;;  %v1078_v63 = vrot.slane %v1077_v52, 4  ;;  %v2843_v2 = vrot.slane %v2841_v53, 4  ;;  %v2846_v36 = vrot.slane %v2844_v20, 5 }
  0x5d   : > { %v1068_v3 = vrot.slane %v1067_v57, 4  ;;  %v2852_v6 = vrot.slane %v2850_v60, 5  ;;  %v2854_v61 = vshrl.u32 %v7631_v44, 16  ;;  %v2860_v12 = vshll.u32 %v7633_v48, 16  ;;  %v267_v57 = vld [vmem:[%s7384_s7 + $0x74] sm:$0x1] }
  0x5e   : > { %6626 = vmatprep.mubr.msk.bf16.mxu1 %vm1374_vm7, %v5875_v62  ;;  %v1083_v14 = vsel %vm7416_vm8, %v1078_v63, %v1082_v59  ;;  %v2847_v17 = vor.u32 %v2846_v36, %v2843_v2  ;;  %v487_v19 = vmax.f32 %v7599_v31, 0.0  ;;  %v488_v42 = vmax.f32 %v7604_v23, 0.0 }
  0x5f   : > { %v1073_v21 = vsel %vm7416_vm8, %v1068_v3, %v1072_v27  ;;  %v2856_v22 = vrot.slane %v2854_v61, 4  ;;  %v2862_v26 = vrot.slane %v2860_v12, 5  ;;  %v562_v10 = vsel %vm526_vm5, %v486_v25, 0.0 }
  0x60   : > { %v5876_v37 = vcombine.low %v1073_v21, %v1083_v14  ;;  %v2848_v38 = vrot.slane %v2847_v17, 4  ;;  %v564_v31 = vsel %vm537_vm6, %v488_v42, 0.0  ;;  %v6263_v41 = vpack.c.bf16 %v562_v10, %v562_v10 }
  0x61   : > { %v2857_v23 = vor.u32 %v2856_v22, %v2852_v6  ;;  %v6264_v45 = vpack.c.bf16 %v487_v19, %v487_v19  ;;  %v6265_v46 = vpack.c.bf16 %v564_v31, %v564_v31  ;;  %v437_v27 = vadd.f32 %v7404_v32, %v7613_v30 }
  0x62   : > { %6627 = vmatmul.mubr.msk.bf16.gmra.mrb[8].mxu1 %vm1374_vm7, %v5876_v37  ;;  %v2853_v5 = vsel %vm7416_vm8, %v2848_v38, %v2852_v6  ;;  %852 = vst.msk [vmem:[#allocation2 + $0x48] sm:$0xf] %vm832_vm1, %v6263_v41  ;;  %v489_v25 = vmax.f32 %v7616_v54, 0.0  ;;  %v490_v35 = vmax.f32 %v7623_v39, 0.0  ;;  %v318_v51 = vunpack.c.l.bf16 %v264_v0 }
  0x63   : > { %v2858_v52 = vrot.slane %v2857_v23, 4  ;;  %853 = vst.msk [vmem:[#allocation2 + $0x4c] sm:$0xf] %vm832_vm1, %v6264_v45  ;;  %v491_v30 = vmax.f32 %v437_v27, 0.0  ;;  %v377_v53 = vmul.f32 %v6342_v29, %v7393_v18  ;;  %v378_v20 = vmul.f32 %v6343_v40, %v7393_v18 }
  0x64   : > { %854 = vst.msk [vmem:[#allocation2 + $0x50] sm:$0x1] %vm835_vm2, %v6265_v46  ;;  %v565_v54 = vsel %vm526_vm5, %v489_v25, 0.0  ;;  %v6267_v55 = vpack.c.bf16 %v490_v35, %v490_v35  ;;  %v379_v39 = vmul.f32 %v7393_v18, %v318_v51  ;;  %v319_v59 = vunpack.c.l.bf16 %v265_v47 }
  0x65   : > { %v2863_v60 = vsel %vm7416_vm8, %v2858_v52, %v2862_v26  ;;  %v567_v62 = vsel %vm537_vm6, %v491_v30, 0.0  ;;  %v6266_v63 = vpack.c.bf16 %v565_v54, %v565_v54  ;;  %v438_v29 = vadd.f32 %v7404_v32, %v377_v53 }
  0x66   : > { %v6022_v2 = vcombine.low %v2853_v5, %v2863_v60  ;;  %v6268_v7 = vpack.c.bf16 %v567_v62, %v567_v62  ;;  %856 = vst.msk [vmem:[#allocation2 + $0x58] sm:$0xf] %vm832_vm1, %v6267_v55  ;;  %v439_v40 = vadd.f32 %v7404_v32, %v378_v20  ;;  %v7690_v36 = vadd.f32 %v7404_v32, %v379_v39 }
  0x67   : > { %855 = vst.msk [vmem:[#allocation2 + $0x54] sm:$0xf] %vm832_vm1, %v6266_v63  ;;  %v492_v3 = vmax.f32 %v438_v29, 0.0  ;;  %v320_v6 = vunpack.c.h.bf16 %v265_v47  ;;  %v321_v61 = vunpack.c.l.bf16 %v267_v57  ;;  %v380_v12 = vmul.f32 %v7393_v18, %v319_v59 }
  0x68   : > { %v7696_v13 = vrot.slane %v3495_v1, 4  ;;  %v3498_v14 = vrot.slane %v7501_v28, 5  ;;  %6762 = vmatprep.mubr.msk.bf16.mxu0 %vm1374_vm7, %v6022_v2  ;;  %857 = vst.msk [vmem:[#allocation2 + $0x5c] sm:$0x1] %vm835_vm2, %v6268_v7  ;;  %v493_v17 = vmax.f32 %v439_v40, 0.0  ;;  %v494_v19 = vmax.f32 %v7690_v36, 0.0 }
  0x69   : > { %v2711_v42 = vld [vmem:[#allocation2 + $0x48] sm:$0xf]  ;;  %v568_v22 = vsel %vm526_vm5, %v492_v3, 0.0  ;;  %v7705_v26 = vmul.f32 %v7393_v18, %v320_v6  ;;  %v7708_v10 = vmul.f32 %v7393_v18, %v321_v61  ;;  %v7711_v0 = vadd.f32 %v7404_v32, %v380_v12 }
  0x6a   : > { %v900_v21 = vld [vmem:[#allocation2 + $0x48] sm:$0xf]  ;;  %v7713_v37 = vld [vmem:[#allocation2 + $0x4c] sm:$0xf]  ;;  %v2865_v31 = vshrl.u32 %v2711_v42, 16  ;;  %v2868_v41 = vshll.u32 %v2711_v42, 16  ;;  %v6269_v23 = vpack.c.bf16 %v568_v22, %v568_v22  ;;  %v6270_v45 = vpack.c.bf16 %v493_v17, %v493_v17 }
  0x6b   : > { %v7715_v38 = vld [vmem:[#allocation2 + $0x50] sm:$0x1]  ;;  %v2874_v46 = vshll.u32 %v7713_v37, 16  ;;  %v2878_v27 = vshrl.u32 %v7713_v37, 16  ;;  %v901_v5 = vld [vmem:[#allocation2 + $0x4c] sm:$0xf] }
  0x6c   : > { %v2884_v47 = vshll.u32 %v7715_v38, 16  ;;  %v1085_v18 = vshrl.u32 %v900_v21, 16  ;;  %v2867_v25 = vrot.slane %v2865_v31, 4  ;;  %v2870_v35 = vrot.slane %v2868_v41, 5  ;;  %v927_v32 = vld [vmem:[#allocation2 + $0x50] sm:$0x1] }
  0x6d   : > { %v1088_v51 = vshll.u32 %v900_v21, 16  ;;  %v1094_v52 = vshll.u32 %v901_v5, 16  ;;  %858 = vst.msk [vmem:[#allocation2 + $0x60] sm:$0xf] %vm832_vm1, %v6269_v23  ;;  %859 = vst.msk [vmem:[#allocation2 + $0x64] sm:$0xf] %vm832_vm1, %v6270_v45 }
  0x6e   : > { %v2876_v30 = vrot.slane %v2874_v46, 5  ;;  %v2880_v53 = vrot.slane %v2878_v27, 4  ;;  %v2886_v20 = vrot.slane %v2884_v47, 5  ;;  %v1087_v54 = vrot.slane %v1085_v18, 4  ;;  %v903_v55 = vld [vmem:[#allocation2 + $0x58] sm:$0xf] }
  0x6f   : > { %v2871_v39 = vor.u32 %v2870_v35, %v2867_v25  ;;  %v1090_v57 = vrot.slane %v1088_v51, 5  ;;  %v1096_v59 = vrot.slane %v1094_v52, 5  ;;  %v1098_v60 = vshrl.u32 %v901_v5, 16  ;;  %v902_v62 = vld [vmem:[#allocation2 + $0x54] sm:$0xf] }
  0x70   : > { %v2881_v63 = vor.u32 %v2880_v53, %v2876_v30  ;;  %v1104_v29 = vshll.u32 %v927_v32, 16  ;;  %v1109_v2 = vshrl.u32 %v902_v62, 16  ;;  %v1112_v7 = vshll.u32 %v902_v62, 16  ;;  %v928_v61 = vld [vmem:[#allocation2 + $0x5c] sm:$0x1] }
  0x71   : > { %v2872_v40 = vrot.slane %v2871_v39, 4  ;;  %v1091_v3 = vor.u32 %v1090_v57, %v1087_v54  ;;  %v1100_v6 = vrot.slane %v1098_v60, 4  ;;  %v1118_v12 = vshll.u32 %v903_v55, 16  ;;  %v2714_v31 = vld [vmem:[#allocation2 + $0x54] sm:$0xf] }
  0x72   : > { %v2882_v17 = vrot.slane %v2881_v63, 4  ;;  %v1106_v42 = vrot.slane %v1104_v29, 5  ;;  %v1111_v21 = vrot.slane %v1109_v2, 4  ;;  %v1114_v22 = vrot.slane %v1112_v7, 5  ;;  %v7726_v25 = vld [vmem:[#allocation2 + $0x58] sm:$0xf] }
  0x73   : > { %v2877_v41 = vsel %vm7416_vm8, %v2872_v40, %v2876_v30  ;;  %v1092_v23 = vrot.slane %v1091_v3, 4  ;;  %v1101_v45 = vor.u32 %v1100_v6, %v1096_v59  ;;  %v1120_v46 = vrot.slane %v1118_v12, 5  ;;  %v7730_v52 = vld [vmem:[#allocation2 + $0x5c] sm:$0x1] }
  0x74   : > { %v2887_v27 = vsel %vm7416_vm8, %v2882_v17, %v2886_v20  ;;  %v1115_v47 = vor.u32 %v1114_v22, %v1111_v21  ;;  %v1122_v5 = vshrl.u32 %v903_v55, 16  ;;  %v1128_v18 = vshll.u32 %v928_v61, 16  ;;  %v2717_v60 = vld [vmem:[#allocation2 + $0x60] sm:$0xf] }
  0x75   : > { %v6023_v35 = vcombine.low %v2877_v41, %v2887_v27  ;;  %v1097_v32 = vsel %vm7416_vm8, %v1092_v23, %v1096_v59  ;;  %v1102_v51 = vrot.slane %v1101_v45, 4  ;;  %v2889_v53 = vshrl.u32 %v2714_v31, 16  ;;  %v7737_v59 = vld [vmem:[#allocation2 + $0x64] sm:$0xf]  ;;  %v904_v17 = vld [vmem:[#allocation2 + $0x60] sm:$0xf] }
  0x76   : > { %v1116_v30 = vrot.slane %v1115_v47, 4  ;;  %v1124_v54 = vrot.slane %v1122_v5, 4  ;;  %v1130_v39 = vrot.slane %v1128_v18, 5  ;;  %v2892_v57 = vshll.u32 %v2714_v31, 16  ;;  %v905_v41 = vld [vmem:[#allocation2 + $0x64] sm:$0xf] }
  0x77   : > { %6763 = vmatmul.mubr.msk.bf16.gmra.mrb[8].mxu0 %vm1374_vm7, %v6023_v35  ;;  %v1107_v20 = vsel %vm7416_vm8, %v1102_v51, %v1106_v42  ;;  %v2891_v55 = vrot.slane %v2889_v53, 4  ;;  %v2898_v62 = vshll.u32 %v7726_v25, 16  ;;  %v2902_v63 = vshrl.u32 %v7726_v25, 16 }
  0x78   : > { %v5877_v29 = vcombine.low %v1097_v32, %v1107_v20  ;;  %v1121_v2 = vsel %vm7416_vm8, %v1116_v30, %v1120_v46  ;;  %v1125_v7 = vor.u32 %v1124_v54, %v1120_v46  ;;  %v2894_v40 = vrot.slane %v2892_v57, 5 }
  0x79   : > { %v2900_v3 = vrot.slane %v2898_v62, 5  ;;  %v2904_v6 = vrot.slane %v2902_v63, 4  ;;  %v2908_v61 = vshll.u32 %v7730_v52, 16  ;;  %v570_v12 = vsel %vm537_vm6, %v494_v19, 0.0 }
  0x7a   : > { %6630 = vmatprep.mubr.msk.bf16.mxu1 %vm1374_vm7, %v5877_v29  ;;  %v1126_v42 = vrot.slane %v1125_v7, 4  ;;  %v2895_v21 = vor.u32 %v2894_v40, %v2891_v55  ;;  %v6271_v22 = vpack.c.bf16 %v570_v12, %v570_v12  ;;  %v2913_v31 = vshrl.u32 %v2717_v60, 16 }
  0x7b   : > { %v2905_v23 = vor.u32 %v2904_v6, %v2900_v3  ;;  %v2910_v45 = vrot.slane %v2908_v61, 5  ;;  %v2916_v46 = vshll.u32 %v2717_v60, 16  ;;  %v2922_v27 = vshll.u32 %v7737_v59, 16  ;;  %v3422_v60 = vld [vmem:[#allocation2 + $0xc] sm:$0xe] }
  0x7c   : > { %v1131_v47 = vsel %vm7416_vm8, %v1126_v42, %v1130_v39  ;;  %v2896_v36 = vrot.slane %v2895_v21, 4  ;;  %860 = vst.msk [vmem:[#allocation2 + $0x68] sm:$0x1] %vm835_vm2, %v6271_v22  ;;  %v2915_v19 = vrot.slane %v2913_v31, 4  ;;  %v2926_v5 = vshrl.u32 %v7737_v59, 16 }
  0x7d   : > { %v5878_v18 = vcombine.low %v1121_v2, %v1131_v47  ;;  %v2906_v35 = vrot.slane %v2905_v23, 4  ;;  %v2918_v32 = vrot.slane %v2916_v46, 5  ;;  %v2924_v51 = vrot.slane %v2922_v27, 5 }
  0x7e   : > { %v2901_v53 = vsel %vm7416_vm8, %v2896_v36, %v2900_v3  ;;  %v2928_v30 = vrot.slane %v2926_v5, 4  ;;  %v1133_v54 = vshrl.u32 %v904_v17, 16  ;;  %v1136_v57 = vshll.u32 %v904_v17, 16  ;;  %v7760_v3 = vld [vmem:[%s9188_s2] ss:$0 sm:$0xff] }
  0x7f   : > { %6631 = vmatmul.mubr.msk.bf16.gmra.mrb[12].mxu1 %vm1374_vm7, %v5878_v18  ;;  %v2911_v39 = vsel %vm7416_vm8, %v2906_v35, %v2910_v45  ;;  %v2919_v20 = vor.u32 %v2918_v32, %v2915_v19  ;;  %v1142_v55 = vshll.u32 %v905_v41, 16  ;;  %v1146_v62 = vshrl.u32 %v905_v41, 16  ;;  %v3423_v19 = vld [vmem:[#allocation2 + $0x18] sm:$0xe] }
  0x80   : > { %v6024_v63 = vcombine.low %v2901_v53, %v2911_v39  ;;  %v2929_v29 = vor.u32 %v2928_v30, %v2924_v51  ;;  %v1135_v2 = vrot.slane %v1133_v54, 4  ;;  %v1138_v7 = vrot.slane %v1136_v57, 5 }
  0x81   : > { %v2920_v40 = vrot.slane %v2919_v20, 4  ;;  %v1144_v6 = vrot.slane %v1142_v55, 5  ;;  %v1148_v61 = vrot.slane %v1146_v62, 4  ;;  %v442_v12 = vadd.f32 %v7760_v3, %v7705_v26  ;;  %v6444_v55 = vld [vmem:[%s7384_s7 + $0x78] sm:$0xff]  }
  0x82   : > { %6766 = vmatprep.mubr.msk.bf16.mxu0 %vm1374_vm7, %v6024_v63  ;;  %v2930_v17 = vrot.slane %v2929_v29, 4  ;;  %v1139_v42 = vor.u32 %v1138_v7, %v1135_v2  ;;  %v443_v21 = vadd.f32 %v7760_v3, %v7708_v10  ;;  %v495_v22 = vmax.f32 %v7711_v0, 0.0  ;;  %v270_v7 = vld [vmem:[%s7384_s7 + $0x80] sm:$0x1] }
  0x83   : > { %v7774_v41 = vld [vmem:[#allocation2 + $0x68] sm:$0x1]  ;;  %v2925_v26 = vsel %vm7416_vm8, %v2920_v40, %v2924_v51  ;;  %v1149_v45 = vor.u32 %v1148_v61, %v1144_v6  ;;  %v496_v46 = vmax.f32 %v442_v12, 0.0  ;;  %v6050_v27 = vrot.slane %v3422_v60, 9 }
  0x84   : > { %v929_v23 = vld [vmem:[#allocation2 + $0x68] sm:$0x1]  ;;  %v2932_v47 = vshll.u32 %v7774_v41, 16  ;;  %v1140_v10 = vrot.slane %v1139_v42, 4  ;;  %v497_v0 = vmax.f32 %v443_v21, 0.0  ;;  %v571_v18 = vsel %vm526_vm5, %v495_v22, 0.0 }
  0x85   : > { %v1152_v36 = vshll.u32 %v929_v23, 16  ;;  %v1150_v5 = vrot.slane %v1149_v45, 4  ;;  %v6273_v35 = vpack.c.bf16 %v496_v46, %v496_v46  ;;  %v3489_v32 = vsel %vm7770_vm11, %v6050_v27, %v3488_v50 }
  0x86   : > { %v2934_v51 = vrot.slane %v2932_v47, 5  ;;  %v1145_v53 = vsel %vm7416_vm8, %v1140_v10, %v1144_v6  ;;  %v573_v54 = vsel %vm537_vm6, %v497_v0, 0.0  ;;  %v6272_v57 = vpack.c.bf16 %v571_v18, %v571_v18 }
  0x87   : > { %v1154_v30 = vrot.slane %v1152_v36, 5  ;;  %v6274_v60 = vpack.c.bf16 %v573_v54, %v573_v54  ;;  %862 = vst.msk [vmem:[#allocation2 + $0x70] sm:$0xf] %vm832_vm1, %v6273_v35  ;;  %v3490_v39 = vrot.slane %v3488_v50, 4  ;;  %v6051_v20 = vrot.slane %v3423_v19, 9 }
  0x88   : > { %v2935_v62 = vsel %vm7416_vm8, %v2930_v17, %v2934_v51  ;;  %v3499_v29 = vsel %vm7770_vm11, %v7696_v13, %v3498_v14  ;;  %v4056_v2 = vsel %vm1423_vm0, %v7531_v33, 0  ;;  %v273_v50 = vld [vmem:[%s7384_s7 + $0x8c] sm:$0x1]  ;;  %861 = vst.msk [vmem:[#allocation2 + $0x6c] sm:$0xf] %vm832_vm1, %v6272_v57  ;;  %v6346_v12 = vunpack.c.l.bf16 %v6444_v55 }
  0x89   : > { %v1155_v63 = vsel %vm7416_vm8, %v1150_v5, %v1154_v30  ;;  %v6025_v40 = vcombine.low %v2925_v26, %v2935_v62  ;;  %863 = vst.msk [vmem:[#allocation2 + $0x74] sm:$0x1] %vm835_vm2, %v6274_v60  ;;  %v3492_v28 = vsel %vm7770_vm11, %v3490_v39, %v3491_v56  ;;  %v3496_v13 = vsel %vm7770_vm11, %v6051_v20, %v3495_v1  ;;  %v3424_v33 = vld [vmem:[#allocation2 + $0x24] sm:$0xe] }
  0x8a   : > { %v5879_v6 = vcombine.low %v1145_v53, %v1155_v63  ;;  %v6067_v14 = vcombine.low %v3489_v32, %v3492_v28  ;;  %v6068_v61 = vcombine.low %v3496_v13, %v3499_v29  ;;  %v6347_v17 = vunpack.c.h.bf16 %v6444_v55  ;;  %v3425_v63 = vld [vmem:[#allocation2 + $0x30] sm:$0xe] }
  0x8b   : > { %6767 = vmatmul.mubr.msk.bf16.gmra.mrb[12].mxu0 %vm1374_vm7, %v6025_v40  ;;  %v324_v42 = vunpack.c.l.bf16 %v270_v7  ;;  %v325_v21 = vunpack.c.l.bf16 %v271_v9  ;;  %v327_v22 = vunpack.c.l.bf16 %v273_v50  ;;  %v383_v56 = vmul.f32 %v7823_v15, %v6346_v12  ;;  %v7855_v40 = vld [vmem:[%s9189_s3 + $0x1c] sm:$0xf] }
  0x8c   : > { %6634 = vmatprep.mubr.msk.bf16.mxu1 %vm1374_vm7, %v5879_v6  ;;  %6788 = vmatprep.mubr.msk.bf16.mxu0 %vm1374_vm7, %v6067_v14  ;;  %v384_v1 = vmul.f32 %v7823_v15, %v6347_v17  ;;  %v6052_v26 = vrot.slane %v3424_v33, 9  ;;  %v3502_v23 = vrot.slane %v7524_v24, 5  ;;  %v387_v27 = vmul.f32 %v7823_v15, %v326_v58 }
  0x8d   : > { %v385_v45 = vmul.f32 %v7823_v15, %v324_v42  ;;  %v386_v46 = vmul.f32 %v7823_v15, %v325_v21  ;;  %v388_v47 = vmul.f32 %v7823_v15, %v327_v22  ;;  %v444_v36 = vadd.f32 %v7760_v3, %v383_v56 }
  0x8e   : > { %v7832_v10 = vld [vmem:[#allocation2 + $0x70] sm:$0xf]  ;;  %v445_v0 = vadd.f32 %v7760_v3, %v384_v1  ;;  %v7838_v19 = vsel %vm7770_vm11, %v6052_v26, %v3502_v23  ;;  %v3504_v5 = vrot.slane %v3502_v23, 4  ;;  %v448_v57 = vadd.f32 %v7760_v3, %v387_v27 }
  0x8f   : > { %v1166_v24 = vshll.u32 %v7832_v10, 16  ;;  %v1170_v18 = vshrl.u32 %v7832_v10, 16  ;;  %v446_v35 = vadd.f32 %v7760_v3, %v385_v45  ;;  %v447_v32 = vadd.f32 %v7760_v3, %v386_v46  ;;  %v7844_v51 = vld [vmem:[#allocation2 + $0x6c] sm:$0xf]  ;;  %v6445_v23 = vld [vmem:[%s7384_s7 + $0x90] sm:$0xff]  }
  0x90   : > { %v930_v53 = vld [vmem:[#allocation2 + $0x74] sm:$0x1]  ;;  %v498_v30 = vmax.f32 %v444_v36, 0.0  ;;  %v499_v54 = vmax.f32 %v445_v0, 0.0  ;;  %v449_v60 = vadd.f32 %v7760_v3, %v388_v47  ;;  %v1157_v39 = vshrl.u32 %v7844_v51, 16 }
  0x91   : > { %v1160_v20 = vshll.u32 %v7844_v51, 16  ;;  %v1168_v55 = vrot.slane %v1166_v24, 5  ;;  %v1172_v62 = vrot.slane %v1170_v18, 4  ;;  %v1176_v29 = vshll.u32 %v930_v53, 16  ;;  %v276_v36 = vld [vmem:[%s7384_s7 + $0x98] sm:$0x1] }
  0x92   : > { %v500_v7 = vmax.f32 %v446_v35, 0.0  ;;  %v574_v9 = vsel %vm526_vm5, %v498_v30, 0.0  ;;  %v6276_v50 = vpack.c.bf16 %v499_v54, %v499_v54  ;;  %v1159_v6 = vrot.slane %v1157_v39, 4  ;;  %v7880_v35 = vld [vmem:[%s7384_s7 + $0x9c] sm:$0xff]  }
  0x93   : > { %v1162_v28 = vrot.slane %v1160_v20, 5  ;;  %v1173_v13 = vor.u32 %v1172_v62, %v1168_v55  ;;  %6789 = vmatmul.mubr.msk.bf16.vlgmr.msra.gmra.mrb[0].mxu0 %vm1374_vm7, %v6068_v61  ;;  %v6275_v33 = vpack.c.bf16 %v574_v9, %v574_v9  ;;  %v1178_v14 = vrot.slane %v1176_v29, 5 }
  0x94   : > { %6821 = vmatpush3.bf16.msra.mxu0 %v4056_v2  ;;  %v576_v12 = vsel %vm537_vm6, %v500_v7, 0.0  ;;  %865 = vst.msk [vmem:[#allocation2 + $0x7c] sm:$0xf] %vm832_vm1, %v6276_v50  ;;  %v501_v17 = vmax.f32 %v447_v32, 0.0  ;;  %v502_v42 = vmax.f32 %v448_v57, 0.0  ;;  %v503_v56 = vmax.f32 %v449_v60, 0.0 }
  0x95   : > { %v1163_v21 = vor.u32 %v1162_v28, %v1159_v6  ;;  %v1174_v58 = vrot.slane %v1173_v13, 4  ;;  %v6277_v22 = vpack.c.bf16 %v576_v12, %v576_v12  ;;  %864 = vst.msk [vmem:[#allocation2 + $0x78] sm:$0xf] %vm832_vm1, %v6275_v33  ;;  %7188 = vmatprep.subr.msk.bf16.mxu0 %vm1423_vm0, %v7855_v40  ;;  %v3505_v1 = vrot.slane %v7546_v16, 5 }
  0x96   : > { %v577_v2 = vsel %vm526_vm5, %v501_v17, 0.0  ;;  %v6279_v61 = vpack.c.bf16 %v502_v42, %v502_v42  ;;  %v6053_v26 = vrot.slane %v3425_v63, 9  ;;  %v579_v27 = vsel %vm537_vm6, %v503_v56, 0.0 }
  0x97   : > { %v1164_v45 = vrot.slane %v1163_v21, 4  ;;  %v1179_v46 = vsel %vm7416_vm8, %v1174_v58, %v1178_v14  ;;  %866 = vst.msk [vmem:[#allocation2 + $0x80] sm:$0x1] %vm835_vm2, %v6277_v22  ;;  %v6278_v47 = vpack.c.bf16 %v577_v2, %v577_v2  ;;  %v6280_v0 = vpack.c.bf16 %v579_v27, %v579_v27 }
  0x98   : > { %868 = vst.msk [vmem:[#allocation2 + $0x88] sm:$0xf] %vm832_vm1, %v6279_v61  ;;  %v3506_v24 = vsel %vm7770_vm11, %v3504_v5, %v3505_v1  ;;  %v3509_v16 = vrot.slane %v7609_v43, 5  ;;  %v3512_v18 = vrot.slane %v7618_v34, 5  ;;  %v6350_v30 = vunpack.c.l.bf16 %v6445_v23 }
  0x99   : > { %v1169_v32 = vsel %vm7416_vm8, %v1164_v45, %v1168_v55  ;;  %867 = vst.msk [vmem:[#allocation2 + $0x84] sm:$0xf] %vm832_vm1, %v6278_v47  ;;  %v6069_v53 = vcombine.low %v7838_v19, %v3506_v24  ;;  %v6351_v54 = vunpack.c.h.bf16 %v6445_v23  ;;  %v330_v60 = vunpack.c.l.bf16 %v276_v36 }
  0x9a   : > { %v5880_v57 = vcombine.low %v1169_v32, %v1179_v46  ;;  %869 = vst.msk [vmem:[#allocation2 + $0x8c] sm:$0x1] %vm835_vm2, %v6280_v0  ;;  %v3510_v5 = vsel %vm7770_vm11, %v6053_v26, %v3509_v16  ;;  %v3511_v43 = vrot.slane %v3509_v16, 4  ;;  %v389_v39 = vmul.f32 %v7823_v15, %v6350_v30 }
  0x9b   : > { %v7889_v34 = vld [vmem:[#allocation2 + $0x7c] sm:$0xf]  ;;  %6792 = vmatprep.mubr.msk.bf16.mxu0 %vm1374_vm7, %v6069_v53  ;;  %v390_v20 = vmul.f32 %v7823_v15, %v6351_v54  ;;  %v331_v19 = vunpack.c.l.bf16 %v7880_v35  ;;  %v332_v55 = vunpack.c.h.bf16 %v7880_v35  ;;  %v391_v9 = vmul.f32 %v7823_v15, %v330_v60 }
  0x9c   : > { %6635 = vmatmul.mubr.msk.bf16.gmra.mrb[16].mxu1 %vm1374_vm7, %v5880_v57  ;;  %v7897_v62 = vld [vmem:[#allocation2 + $0x78] sm:$0xf]  ;;  %v1190_v63 = vshll.u32 %v7889_v34, 16  ;;  %v1194_v29 = vshrl.u32 %v7889_v34, 16  ;;  %v3513_v7 = vsel %vm7770_vm11, %v3511_v43, %v3512_v18  ;;  %v450_v13 = vadd.f32 %v7760_v3, %v389_v39  ;;  %v279_v39 = vld [vmem:[%s7384_s7 + $0xa4] sm:$0x1] }
  0x9d   : > { %v1181_v50 = vshrl.u32 %v7897_v62, 16  ;;  %v1184_v6 = vshll.u32 %v7897_v62, 16  ;;  %v6070_v28 = vcombine.low %v3510_v5, %v3513_v7  ;;  %v451_v17 = vadd.f32 %v7760_v3, %v390_v20  ;;  %v3426_v20 = vld [vmem:[#allocation2 + $0x3c] sm:$0xe] }
  0x9e   : > { %v931_v33 = vld [vmem:[#allocation2 + $0x80] sm:$0x1]  ;;  %v1192_v14 = vrot.slane %v1190_v63, 5  ;;  %v1196_v12 = vrot.slane %v1194_v29, 4  ;;  %v452_v42 = vadd.f32 %v7760_v3, %v391_v9  ;;  %v504_v2 = vmax.f32 %v450_v13, 0.0 }
  0x9f   : > { %v1183_v21 = vrot.slane %v1181_v50, 4  ;;  %v1186_v58 = vrot.slane %v1184_v6, 5  ;;  %v1200_v22 = vshll.u32 %v931_v33, 16  ;;  %v7909_v56 = vld [vmem:[#allocation2 + $0x88] sm:$0xf]  ;;  %6793 = vmatmul.mubr.msk.bf16.gmra.mrb[4].mxu0 %vm1374_vm7, %v6070_v28  ;;  %v505_v45 = vmax.f32 %v451_v17, 0.0 }
  0xa0   : > { %v1197_v61 = vor.u32 %v1196_v12, %v1192_v14  ;;  %v7912_v1 = vld [vmem:[#allocation2 + $0x84] sm:$0xf]  ;;  %v1214_v26 = vshll.u32 %v7909_v56, 16  ;;  %v1218_v23 = vshrl.u32 %v7909_v56, 16  ;;  %v506_v54 = vmax.f32 %v452_v42, 0.0 }
  0xa1   : > { %v1187_v46 = vor.u32 %v1186_v58, %v1183_v21  ;;  %v1202_v27 = vrot.slane %v1200_v22, 5  ;;  %v932_v47 = vld [vmem:[#allocation2 + $0x8c] sm:$0x1]  ;;  %v1205_v36 = vshrl.u32 %v7912_v1, 16  ;;  %v1208_v0 = vshll.u32 %v7912_v1, 16 }
  0xa2   : > { %v1198_v24 = vrot.slane %v1197_v61, 4  ;;  %v1216_v16 = vrot.slane %v1214_v26, 5  ;;  %v1220_v18 = vrot.slane %v1218_v23, 4  ;;  %v1224_v35 = vshll.u32 %v932_v47, 16  ;;  %v3427_v21 = vld [vmem:[#allocation2 + $0x48] sm:$0xe] }
  0xa3   : > { %v1188_v32 = vrot.slane %v1187_v46, 4  ;;  %v1207_v53 = vrot.slane %v1205_v36, 4  ;;  %v1210_v30 = vrot.slane %v1208_v0, 5  ;;  %v580_v60 = vsel %vm526_vm5, %v504_v2, 0.0  ;;  %v6446_v61 = vld [vmem:[%s7384_s7 + $0xa8] sm:$0xff]  }
  0xa4   : > { %v1203_v57 = vsel %vm7416_vm8, %v1198_v24, %v1202_v27  ;;  %v1221_v5 = vor.u32 %v1220_v18, %v1216_v16  ;;  %v1226_v43 = vrot.slane %v1224_v35, 5  ;;  %v582_v7 = vsel %vm537_vm6, %v506_v54, 0.0  ;;  %v282_v24 = vld [vmem:[%s7384_s7 + $0xb0] sm:$0x1] }
  0xa5   : > { %v1193_v63 = vsel %vm7416_vm8, %v1188_v32, %v1192_v14  ;;  %v1211_v29 = vor.u32 %v1210_v30, %v1207_v53  ;;  %v6281_v9 = vpack.c.bf16 %v580_v60, %v580_v60  ;;  %v6282_v28 = vpack.c.bf16 %v505_v45, %v505_v45 }
  0xa6   : > { %v5881_v50 = vcombine.low %v1193_v63, %v1203_v57  ;;  %v1222_v6 = vrot.slane %v1221_v5, 4  ;;  %v6283_v13 = vpack.c.bf16 %v582_v7, %v582_v7  ;;  %v333_v12 = vunpack.c.l.bf16 %v279_v39 }
  0xa7   : > { %v1212_v33 = vrot.slane %v1211_v29, 4  ;;  %870 = vst.msk [vmem:[#allocation2 + $0x90] sm:$0xf] %vm832_vm1, %v6281_v9  ;;  %v392_v17 = vmul.f32 %v7823_v15, %v331_v19  ;;  %v393_v42 = vmul.f32 %v7823_v15, %v332_v55  ;;  %871 = vst.msk [vmem:[#allocation2 + $0x94] sm:$0xf] %vm832_vm1, %v6282_v28  ;;  %v6054_v58 = vrot.slane %v3426_v20, 9 }
  0xa8   : > { %6638 = vmatprep.mubr.msk.bf16.mxu1 %vm1374_vm7, %v5881_v50  ;;  %v1227_v14 = vsel %vm7416_vm8, %v1222_v6, %v1226_v43  ;;  %872 = vst.msk [vmem:[#allocation2 + $0x98] sm:$0x1] %vm835_vm2, %v6283_v13  ;;  %v3516_v22 = vrot.slane %v7631_v44, 5  ;;  %v3519_v2 = vrot.slane %v7633_v48, 5  ;;  %v394_v55 = vmul.f32 %v7823_v15, %v333_v12 }
  0xa9   : > { %v1217_v19 = vsel %vm7416_vm8, %v1212_v33, %v1216_v16  ;;  %v453_v26 = vadd.f32 %v7760_v3, %v392_v17  ;;  %v454_v23 = vadd.f32 %v7760_v3, %v393_v42  ;;  %v6055_v47 = vrot.slane %v3427_v21, 9  ;;  %v283_v33 = vld [vmem:[%s7384_s7 + $0xb4] sm:$0xff]  }
  0xaa   : > { %v5882_v45 = vcombine.low %v1217_v19, %v1227_v14  ;;  %v3517_v46 = vsel %vm7770_vm11, %v6054_v58, %v3516_v22  ;;  %v3518_v27 = vrot.slane %v3516_v22, 4  ;;  %v455_v44 = vadd.f32 %v7760_v3, %v394_v55  ;;  %v285_v14 = vld [vmem:[%s7384_s7 + $0xbc] sm:$0x1] }
  0xab   : > { %v507_v36 = vmax.f32 %v453_v26, 0.0  ;;  %v508_v48 = vmax.f32 %v454_v23, 0.0  ;;  %v3523_v0 = vrot.slane %v7713_v37, 5  ;;  %v3526_v18 = vrot.slane %v7715_v38, 5 }
  0xac   : > { %6639 = vmatmul.mubr.msk.bf16.gmra.mrb[20].mxu1 %vm1374_vm7, %v5882_v45  ;;  %v3520_v16 = vsel %vm7770_vm11, %v3518_v27, %v3519_v2  ;;  %v6354_v35 = vunpack.c.l.bf16 %v6446_v61  ;;  %v6355_v32 = vunpack.c.h.bf16 %v6446_v61  ;;  %v509_v53 = vmax.f32 %v455_v44, 0.0 }
  0xad   : > { %v583_v30 = vsel %vm526_vm5, %v507_v36, 0.0  ;;  %v6285_v54 = vpack.c.bf16 %v508_v48, %v508_v48  ;;  %v6071_v57 = vcombine.low %v3517_v46, %v3520_v16  ;;  %v3524_v37 = vsel %vm7770_vm11, %v6055_v47, %v3523_v0 }
  0xae   : > { %v7954_v5 = vld [vmem:[#allocation2 + $0x90] sm:$0xf]  ;;  %v6284_v43 = vpack.c.bf16 %v583_v30, %v583_v30  ;;  %v3525_v60 = vrot.slane %v3523_v0, 4  ;;  %v336_v39 = vunpack.c.l.bf16 %v282_v24  ;;  %v7958_v20 = vld [vmem:[#allocation2 + $0x94] sm:$0xf]  ;;  %v395_v7 = vmul.f32 %v7823_v15, %v6354_v35 }
  0xaf   : > { %v933_v38 = vld [vmem:[#allocation2 + $0x98] sm:$0x1]  ;;  %v1229_v63 = vshrl.u32 %v7954_v5, 16  ;;  %v1232_v29 = vshll.u32 %v7954_v5, 16  ;;  %874 = vst.msk [vmem:[#allocation2 + $0xa0] sm:$0xf] %vm832_vm1, %v6285_v54  ;;  %6796 = vmatprep.mubr.msk.bf16.mxu0 %vm1374_vm7, %v6071_v57  ;;  %v396_v9 = vmul.f32 %v7823_v15, %v6355_v32  ;;  %v337_v46 = vunpack.c.l.bf16 %v283_v33 }
  0xb0   : > { %v1238_v50 = vshll.u32 %v7958_v20, 16  ;;  %v1242_v6 = vshrl.u32 %v7958_v20, 16  ;;  %v1248_v28 = vshll.u32 %v933_v38, 16  ;;  %v585_v13 = vsel %vm537_vm6, %v509_v53, 0.0  ;;  %873 = vst.msk [vmem:[#allocation2 + $0x9c] sm:$0xf] %vm832_vm1, %v6284_v43 }
  0xb1   : > { %v1231_v12 = vrot.slane %v1229_v63, 4  ;;  %v1234_v17 = vrot.slane %v1232_v29, 5  ;;  %v6286_v42 = vpack.c.bf16 %v585_v13, %v585_v13  ;;  %v3527_v21 = vsel %vm7770_vm11, %v3525_v60, %v3526_v18  ;;  %v3428_v63 = vld [vmem:[#allocation2 + $0x54] sm:$0xe] }
  0xb2   : > { %v1240_v58 = vrot.slane %v1238_v50, 5  ;;  %v1244_v22 = vrot.slane %v1242_v6, 4  ;;  %v1250_v2 = vrot.slane %v1248_v28, 5  ;;  %v6072_v61 = vcombine.low %v3524_v37, %v3527_v21 }
  0xb3   : > { %v1235_v19 = vor.u32 %v1234_v17, %v1231_v12  ;;  %875 = vst.msk [vmem:[#allocation2 + $0xa4] sm:$0x1] %vm835_vm2, %v6286_v42  ;;  %v397_v55 = vmul.f32 %v7823_v15, %v336_v39  ;;  %v456_v26 = vadd.f32 %v7760_v3, %v395_v7  ;;  %v457_v23 = vadd.f32 %v7760_v3, %v396_v9 }
  0xb4   : > { %v1245_v45 = vor.u32 %v1244_v22, %v1240_v58  ;;  %6797 = vmatmul.mubr.msk.bf16.gmra.mrb[8].mxu0 %vm1374_vm7, %v6072_v61  ;;  %v338_v27 = vunpack.c.h.bf16 %v283_v33  ;;  %v339_v47 = vunpack.c.l.bf16 %v285_v14  ;;  %v398_v18 = vmul.f32 %v7823_v15, %v337_v46 }
  0xb5   : > { %v1236_v44 = vrot.slane %v1235_v19, 4  ;;  %v458_v36 = vadd.f32 %v7760_v3, %v397_v55  ;;  %v510_v48 = vmax.f32 %v456_v26, 0.0  ;;  %v511_v0 = vmax.f32 %v457_v23, 0.0 }
  0xb6   : > { %v1246_v24 = vrot.slane %v1245_v45, 4  ;;  %v7981_v16 = vld [vmem:[#allocation2 + $0xa0] sm:$0xf]  ;;  %v399_v35 = vmul.f32 %v7823_v15, %v338_v27  ;;  %v400_v32 = vmul.f32 %v7823_v15, %v339_v47  ;;  %v459_v14 = vadd.f32 %v7760_v3, %v398_v18 }
  0xb7   : > { %v1241_v53 = vsel %vm7416_vm8, %v1236_v44, %v1240_v58  ;;  %v7988_v30 = vld [vmem:[#allocation2 + $0x9c] sm:$0xf]  ;;  %v1262_v54 = vshll.u32 %v7981_v16, 16  ;;  %v1266_v57 = vshrl.u32 %v7981_v16, 16  ;;  %v512_v43 = vmax.f32 %v458_v36, 0.0 }
  0xb8   : > { %v1251_v37 = vsel %vm7416_vm8, %v1246_v24, %v1250_v2  ;;  %v1253_v60 = vshrl.u32 %v7988_v30, 16  ;;  %v1256_v39 = vshll.u32 %v7988_v30, 16  ;;  %v586_v38 = vsel %vm526_vm5, %v510_v48, 0.0  ;;  %v3429_v44 = vld [vmem:[#allocation2 + $0x60] sm:$0xe] }
  0xb9   : > { %v5883_v29 = vcombine.low %v1241_v53, %v1251_v37  ;;  %v1264_v7 = vrot.slane %v1262_v54, 5  ;;  %v1268_v9 = vrot.slane %v1266_v57, 4  ;;  %v588_v50 = vsel %vm537_vm6, %v512_v43, 0.0  ;;  %v3430_v53 = vld [vmem:[#allocation2 + $0x6c] sm:$0xe] }
  0xba   : > { %v8000_v6 = vld [vmem:[#allocation2 + $0xa4] sm:$0x1]  ;;  %v1255_v28 = vrot.slane %v1253_v60, 4  ;;  %v1258_v13 = vrot.slane %v1256_v39, 5  ;;  %v6287_v33 = vpack.c.bf16 %v586_v38, %v586_v38  ;;  %v6288_v12 = vpack.c.bf16 %v511_v0, %v511_v0 }
  0xbb   : > { %6642 = vmatprep.mubr.msk.bf16.mxu1 %vm1374_vm7, %v5883_v29  ;;  %v1269_v17 = vor.u32 %v1268_v9, %v1264_v7  ;;  %v1272_v42 = vshll.u32 %v8000_v6, 16  ;;  %v6289_v21 = vpack.c.bf16 %v588_v50, %v588_v50  ;;  %v460_v22 = vadd.f32 %v7760_v3, %v399_v35 }
  0xbc   : > { %v1259_v58 = vor.u32 %v1258_v13, %v1255_v28  ;;  %876 = vst.msk [vmem:[#allocation2 + $0xa8] sm:$0xf] %vm832_vm1, %v6287_v33  ;;  %877 = vst.msk [vmem:[#allocation2 + $0xac] sm:$0xf] %vm832_vm1, %v6288_v12  ;;  %v461_v2 = vadd.f32 %v7760_v3, %v400_v32  ;;  %v6056_v61 = vrot.slane %v3428_v63, 9  ;;  %v513_v26 = vmax.f32 %v459_v14, 0.0 }
  0xbd   : > { %v1270_v19 = vrot.slane %v1269_v17, 4  ;;  %v1274_v55 = vrot.slane %v1272_v42, 5  ;;  %878 = vst.msk [vmem:[#allocation2 + $0xb0] sm:$0x1] %vm835_vm2, %v6289_v21  ;;  %v3530_v23 = vrot.slane %v7726_v25, 5  ;;  %v514_v46 = vmax.f32 %v460_v22, 0.0 }
  0xbe   : > { %v1260_v45 = vrot.slane %v1259_v58, 4  ;;  %v515_v27 = vmax.f32 %v461_v2, 0.0  ;;  %v3533_v47 = vrot.slane %v7730_v52, 5  ;;  %v589_v48 = vsel %vm526_vm5, %v513_v26, 0.0  ;;  %v2721_v52 = vld [vmem:[#allocation2 + $0x70] sm:$0xf] }
  0xbf   : > { %v1275_v36 = vsel %vm7416_vm8, %v1270_v19, %v1274_v55  ;;  %v3531_v0 = vsel %vm7770_vm11, %v6056_v61, %v3530_v23  ;;  %v3532_v24 = vrot.slane %v3530_v23, 4  ;;  %v6290_v35 = vpack.c.bf16 %v589_v48, %v589_v48  ;;  %v2722_v63 = vld [vmem:[#allocation2 + $0x74] sm:$0x1] }
  0xc0   : > { %v1265_v18 = vsel %vm7416_vm8, %v1260_v45, %v1264_v7  ;;  %v591_v25 = vsel %vm537_vm6, %v515_v27, 0.0  ;;  %v6291_v32 = vpack.c.bf16 %v514_v46, %v514_v46  ;;  %v6057_v37 = vrot.slane %v3429_v44, 9 }
  0xc1   : > { %v5884_v54 = vcombine.low %v1265_v18, %v1275_v36  ;;  %v6292_v57 = vpack.c.bf16 %v591_v25, %v591_v25  ;;  %v3534_v43 = vsel %vm7770_vm11, %v3532_v24, %v3533_v47  ;;  %879 = vst.msk [vmem:[#allocation2 + $0xb4] sm:$0xf] %vm832_vm1, %v6290_v35  ;;  %v3537_v39 = vrot.slane %v7737_v59, 5  ;;  %v8059_v25 = vld [vmem:[#allocation2 + $0x7c] sm:$0xf] }
  0xc2   : > { %880 = vst.msk [vmem:[#allocation2 + $0xb8] sm:$0xf] %vm832_vm1, %v6291_v32  ;;  %v6073_v60 = vcombine.low %v3531_v0, %v3534_v43  ;;  %v3540_v38 = vrot.slane %v7774_v41, 5  ;;  %v6058_v9 = vrot.slane %v3430_v53, 9  ;;  %v3544_v50 = vrot.slane %v2721_v52, 5 }
  0xc3   : > { %6643 = vmatmul.mubr.msk.bf16.gmra.mrb[24].mxu1 %vm1374_vm7, %v5884_v54  ;;  %v8029_v29 = vld [vmem:[#allocation2 + $0xa8] sm:$0xf]  ;;  %v8031_v7 = vld [vmem:[#allocation2 + $0xac] sm:$0xf]  ;;  %881 = vst.msk [vmem:[#allocation2 + $0xbc] sm:$0x1] %vm835_vm2, %v6292_v57  ;;  %v3538_v17 = vsel %vm7770_vm11, %v6057_v37, %v3537_v39 }
  0xc4   : > { %v8034_v28 = vld [vmem:[#allocation2 + $0xb0] sm:$0x1]  ;;  %v1277_v13 = vshrl.u32 %v8029_v29, 16  ;;  %v1280_v33 = vshll.u32 %v8029_v29, 16  ;;  %v1286_v59 = vshll.u32 %v8031_v7, 16  ;;  %v1290_v41 = vshrl.u32 %v8031_v7, 16  ;;  %6800 = vmatprep.mubr.msk.bf16.mxu0 %vm1374_vm7, %v6073_v60 }
  0xc5   : > { %v1296_v12 = vshll.u32 %v8034_v28, 16  ;;  %v3539_v42 = vrot.slane %v3537_v39, 4  ;;  %v3545_v61 = vsel %vm7770_vm11, %v6058_v9, %v3544_v50  ;;  %v3546_v19 = vrot.slane %v3544_v50, 4  ;;  %v3431_v54 = vld [vmem:[#allocation2 + $0x78] sm:$0xe] }
  0xc6   : > { %v1279_v21 = vrot.slane %v1277_v13, 4  ;;  %v1282_v14 = vrot.slane %v1280_v33, 5  ;;  %v1288_v58 = vrot.slane %v1286_v59, 5  ;;  %v1292_v22 = vrot.slane %v1290_v41, 4  ;;  %v8068_v39 = vld [vmem:[#allocation2 + $0x80] sm:$0x1] }
  0xc7   : > { %v3541_v2 = vsel %vm7770_vm11, %v3539_v42, %v3540_v38  ;;  %v3547_v55 = vrot.slane %v2722_v63, 5  ;;  %v1298_v45 = vrot.slane %v1296_v12, 5  ;;  %v2727_v38 = vld [vmem:[#allocation2 + $0x88] sm:$0xf]  ;;  %v3432_v13 = vld [vmem:[#allocation2 + $0x84] sm:$0xe] }
  0xc8   : > { %v1283_v26 = vor.u32 %v1282_v14, %v1279_v21  ;;  %v1293_v23 = vor.u32 %v1292_v22, %v1288_v58  ;;  %v6074_v46 = vcombine.low %v3538_v17, %v3541_v2  ;;  %v8048_v27 = vld [vmem:[#allocation2 + $0xb4] sm:$0xf]  ;;  %v2728_v41 = vld [vmem:[#allocation2 + $0x8c] sm:$0x1]  ;;  %v6059_v17 = vrot.slane %v3431_v54, 9 }
  0xc9   : > { %v8050_v47 = vld [vmem:[#allocation2 + $0xb8] sm:$0xf]  ;;  %v3548_v44 = vsel %vm7770_vm11, %v3546_v19, %v3547_v55  ;;  %v1301_v24 = vshrl.u32 %v8048_v27, 16  ;;  %v1304_v18 = vshll.u32 %v8048_v27, 16  ;;  %v3551_v42 = vrot.slane %v8059_v25, 5 }
  0xca   : > { %v1284_v36 = vrot.slane %v1283_v26, 4  ;;  %v1294_v48 = vrot.slane %v1293_v23, 4  ;;  %v8054_v0 = vld [vmem:[#allocation2 + $0xbc] sm:$0x1]  ;;  %6801 = vmatmul.mubr.msk.bf16.gmra.mrb[12].mxu0 %vm1374_vm7, %v6074_v46  ;;  %v1310_v35 = vshll.u32 %v8050_v47, 16  ;;  %v1314_v32 = vshrl.u32 %v8050_v47, 16 }
  0xcb   : > { %v1320_v52 = vshll.u32 %v8054_v0, 16  ;;  %v6075_v53 = vcombine.low %v3545_v61, %v3548_v44  ;;  %v1303_v37 = vrot.slane %v1301_v24, 4  ;;  %v1306_v60 = vrot.slane %v1304_v18, 5  ;;  %v3433_v14 = vld [vmem:[#allocation2 + $0x90] sm:$0xe] }
  0xcc   : > { %v1289_v57 = vsel %vm7416_vm8, %v1284_v36, %v1288_v58  ;;  %v1299_v43 = vsel %vm7416_vm8, %v1294_v48, %v1298_v45  ;;  %v1312_v9 = vrot.slane %v1310_v35, 5  ;;  %v1316_v50 = vrot.slane %v1314_v32, 4  ;;  %v2730_v2 = vld [vmem:[#allocation2 + $0x94] sm:$0xf]  ;;  %v2731_v23 = vld [vmem:[#allocation2 + $0x98] sm:$0x1] }
  0xcd   : > { %v5885_v63 = vcombine.low %v1289_v57, %v1299_v43  ;;  %6804 = vmatprep.mubr.msk.bf16.mxu0 %vm1374_vm7, %v6075_v53  ;;  %v1307_v33 = vor.u32 %v1306_v60, %v1303_v37  ;;  %v1322_v59 = vrot.slane %v1320_v52, 5  ;;  %v3554_v21 = vrot.slane %v8068_v39, 5  ;;  %v7234_v46 = vld [vmem:[#allocation2] sm:$0xf]  ;;  %v8078_v44 = vld [vmem:[#allocation2 + $0x4] sm:$0xf] }
  0xce   : > { %v1317_v12 = vor.u32 %v1316_v50, %v1312_v9  ;;  %v6060_v22 = vrot.slane %v3432_v13, 9  ;;  %v3552_v19 = vsel %vm7770_vm11, %v6059_v17, %v3551_v42  ;;  %v3553_v55 = vrot.slane %v3551_v42, 4  ;;  %v3434_v18 = vld [vmem:[#allocation2 + $0x9c] sm:$0xe]  ;;  %v2733_v54 = vld [vmem:[#allocation2 + $0xa0] sm:$0xf] }
  0xcf   : > { %6646 = vmatprep.mubr.msk.bf16.mxu1 %vm1374_vm7, %v5885_v63  ;;  %v1308_v58 = vrot.slane %v1307_v33, 4  ;;  %v3558_v26 = vrot.slane %v2727_v38, 5  ;;  %v5903_v36 = vcombine.low %v7234_v46, %v8078_v44  ;;  %v3561_v48 = vrot.slane %v2728_v41, 5  ;;  %v2734_v38 = vld [vmem:[#allocation2 + $0xa4] sm:$0x1] }
  0xd0   : > { %v1318_v61 = vrot.slane %v1317_v12, 4  ;;  %v6061_v24 = vrot.slane %v3433_v14, 9  ;;  %v3555_v32 = vsel %vm7770_vm11, %v3553_v55, %v3554_v21  ;;  %v3565_v37 = vrot.slane %v2730_v2, 5  ;;  %v2736_v63 = vld [vmem:[#allocation2 + $0xac] sm:$0xf] }
  0xd1   : > { %v1313_v45 = vsel %vm7416_vm8, %v1308_v58, %v1312_v9  ;;  %v3559_v52 = vsel %vm7770_vm11, %v6060_v22, %v3558_v26  ;;  %v3560_v53 = vrot.slane %v3558_v26, 4  ;;  %v6076_v43 = vcombine.low %v3552_v19, %v3555_v32  ;;  %v3435_v41 = vld [vmem:[#allocation2 + $0xa8] sm:$0xe]  ;;  %v2737_v42 = vld [vmem:[#allocation2 + $0xb0] sm:$0x1]  ;;  %v6447_v26 = vld [vmem:[%s7384_s7 + $0xc0] sm:$0xff]  }
  0xd2   : > { %v1323_v35 = vsel %vm7416_vm8, %v1318_v61, %v1322_v59  ;;  %v3568_v60 = vrot.slane %v2731_v23, 5  ;;  %v6062_v50 = vrot.slane %v3434_v18, 9  ;;  %v3567_v33 = vrot.slane %v3565_v37, 4  ;;  %v2739_v14 = vld [vmem:[#allocation2 + $0xb8] sm:$0xf] }
  0xd3   : > { %v5886_v57 = vcombine.low %v1313_v45, %v1323_v35  ;;  %v3562_v9 = vsel %vm7770_vm11, %v3560_v53, %v3561_v48  ;;  %6805 = vmatmul.mubr.msk.bf16.gmra.mrb[16].mxu0 %vm1374_vm7, %v6076_v43  ;;  %v3572_v59 = vrot.slane %v2733_v54, 5  ;;  %v3566_v12 = vsel %vm7770_vm11, %v6061_v24, %v3565_v37  ;;  %v8094_v58 = vld [vmem:[#allocation2 + $0x10] sm:$0xf]  ;;  %v7237_v22 = vld [vmem:[#allocation2 + $0xc] sm:$0xf] }
  0xd4   : > { %v6077_v13 = vcombine.low %v3559_v52, %v3562_v9  ;;  %v3575_v17 = vrot.slane %v2734_v38, 5  ;;  %v3579_v21 = vrot.slane %v2736_v63, 5  ;;  %v5904_v2 = vcombine.low %v7237_v22, %v8094_v58  ;;  %v3436_v55 = vld [vmem:[#allocation2 + $0xb4] sm:$0xe]  ;;  %v7238_v23 = vld [vmem:[%s9189_s3 + $0x8] sm:$0xf] }
  0xd5   : > { %6647 = vmatmul.mubr.msk.bf16.gmra.mrb[28].mxu1 %vm1374_vm7, %v5886_v57  ;;  %v3569_v61 = vsel %vm7770_vm11, %v3567_v33, %v3568_v60  ;;  %v3574_v19 = vrot.slane %v3572_v59, 4  ;;  %v2142_v45 = vsel %vm1423_vm0, %v7238_v23, 0  ;;  %v7239_v46 = vld [vmem:[#allocation2 + $0x18] sm:$0xf]  ;;  %v3573_v24 = vsel %vm7770_vm11, %v6062_v50, %v3572_v59  ;;  %v2740_v35 = vld [vmem:[#allocation2 + $0xbc] sm:$0x1] }
  0xd6   : > { %6652 = vmatprep.mubr.msk.bf16.mxu1 %vm1374_vm7, %v5903_v36  ;;  %6808 = vmatprep.mubr.msk.bf16.mxu0 %vm1374_vm7, %v6077_v13  ;;  %v8105_v36 = vld [vmem:[#allocation2 + $0x1c] sm:$0xf]  ;;  %v6063_v18 = vrot.slane %v3435_v41, 9  ;;  %v288_v32 = vld [vmem:[%s7384_s7 + $0xc8] sm:$0x1]  ;;  %v6078_v52 = vcombine.low %v3566_v12, %v3569_v61  ;;  %v3582_v54 = vrot.slane %v2737_v42, 5  ;;  %v6358_v60 = vunpack.c.l.bf16 %v6447_v26 }
  0xd7   : > { %v5905_v48 = vcombine.low %v7239_v46, %v8105_v36  ;;  %v3576_v53 = vsel %vm7770_vm11, %v3574_v19, %v3575_v17  ;;  %v3586_v57 = vrot.slane %v2739_v14, 5  ;;  %v3581_v43 = vrot.slane %v3579_v21, 4  ;;  %v8123_v12 = vld [vmem:[%s9189_s3 + $0xc] sm:$0xf] }
  0xd8   : > { %v6064_v37 = vrot.slane %v3436_v55, 9  ;;  %v6359_v38 = vunpack.c.h.bf16 %v6447_v26  ;;  %v6079_v63 = vcombine.low %v3573_v24, %v3576_v53  ;;  %v3589_v13 = vrot.slane %v2740_v35, 5  ;;  %v7241_v55 = vld [vmem:[#allocation2 + $0x24] sm:$0xf]  ;;  %v8138_v26 = vld [vmem:[#allocation2 + $0x28] sm:$0xf] }
  0xd9   : > { %v3588_v9 = vrot.slane %v3586_v57, 4  ;;  %v342_v33 = vunpack.c.l.bf16 %v288_v32  ;;  %v401_v22 = vmul.f32 %v7823_v15, %v6358_v60  ;;  %v3580_v59 = vsel %vm7770_vm11, %v6063_v18, %v3579_v21  ;;  %v8141_v24 = vld [vmem:[#allocation2 + $0x34] sm:$0xf] }
  0xda   : > { %v402_v50 = vmul.f32 %v7823_v15, %v6359_v38  ;;  %v3583_v17 = vsel %vm7770_vm11, %v3581_v43, %v3582_v54  ;;  %v5906_v23 = vcombine.low %v7241_v55, %v8138_v26  ;;  %v7247_v43 = vld [vmem:[#allocation2 + $0x48] sm:$0xf]  ;;  %v2980_v55 = vshll.u32 %v8068_v39, 16  ;;  %v7254_v39 = vld [vmem:[#allocation2 + $0x14] sm:$0x1] }
  0xdb   : > { %6809 = vmatmul.mubr.msk.bf16.gmra.mrb[20].mxu0 %vm1374_vm7, %v6078_v52  ;;  %v403_v41 = vmul.f32 %v7823_v15, %v342_v33  ;;  %v462_v42 = vadd.f32 %v7760_v3, %v401_v22  ;;  %v3587_v15 = vsel %vm7770_vm11, %v6064_v37, %v3586_v57  ;;  %v3590_v21 = vsel %vm7770_vm11, %v3588_v9, %v3589_v13  ;;  %v8158_v37 = vld [vmem:[#allocation2 + $0x4c] sm:$0xf] }
  0xdc   : > { %v463_v14 = vadd.f32 %v7760_v3, %v402_v50  ;;  %6812 = vmatprep.mubr.msk.bf16.mxu0 %vm1374_vm7, %v6079_v63  ;;  %v6081_v35 = vcombine.low %v3587_v15, %v3590_v21  ;;  %v5908_v57 = vcombine.low %v7246_v11, %v8155_v8  ;;  %v5909_v60 = vcombine.low %v7247_v43, %v8158_v37 }
  0xdd   : > { %6653 = vmatmul.mubr.msk.bf16.vlgmr.msra.gmra.mrb[0].mxu1 %vm1374_vm7, %v5904_v2  ;;  %v464_v2 = vadd.f32 %v7760_v3, %v403_v41  ;;  %v516_v61 = vmax.f32 %v462_v42, 0.0  ;;  %v2970_v13 = vshll.u32 %v8059_v25, 16  ;;  %v2974_v33 = vshrl.u32 %v8059_v25, 16  ;;  %v7250_v25 = vld [vmem:[#allocation2 + $0x54] sm:$0xf] }
  0xde   : > { %6685 = vmatpush3.bf16.msra.mxu1 %v2142_v45  ;;  %6656 = vmatprep.mubr.msk.bf16.mxu1 %vm1374_vm7, %v5905_v48  ;;  %v517_v19 = vmax.f32 %v463_v14, 0.0  ;;  %v6080_v45 = vcombine.low %v3580_v59, %v3583_v17  ;;  %v7243_v48 = vld [vmem:[#allocation2 + $0x30] sm:$0xf]  ;;  %v7200_v14 = vld [vmem:[#allocation2 + $0x18] sm:$0xff]   ;;  %v8186_v43 = vrot.slane %v2980_v55, 5 }
  0xdf   : > { %7183 = vmatprep.subr.msk.bf16.mxu1 %vm1423_vm0, %v8123_v12  ;;  %v518_v46 = vmax.f32 %v464_v2, 0.0  ;;  %v5907_v18 = vcombine.low %v7243_v48, %v8141_v24  ;;  %v592_v3 = vsel %vm526_vm5, %v516_v61, 0.0  ;;  %v8169_v15 = vrot.slane %v2970_v13, 5  ;;  %v8171_v2 = vld [vmem:[#allocation2 + $0x58] sm:$0xf] }
  0xe0   : > { %v6294_v32 = vpack.c.bf16 %v517_v19, %v517_v19  ;;  %v6293_v53 = vpack.c.bf16 %v592_v3, %v592_v3  ;;  %v2976_v21 = vrot.slane %v2974_v33, 4  ;;  %v5910_v61 = vcombine.low %v7250_v25, %v8171_v2  ;;  %v1881_v3 = vld [vmem:[#allocation2 + $0xc] sm:$0xe]  ;;  %9212 = vst [vmem:[#allocation5_spill] sm:$0xff] %v8186_v43  ;;  %v1885_v25 = vld [vmem:[#allocation2 + $0x3c] sm:$0xe] }
  0xe1   : > { %v594_v52 = vsel %vm537_vm6, %v518_v46, 0.0  ;;  %9211 = vst [vmem:[#allocation4_spill] sm:$0xff] %v8169_v15  ;;  %v1940_v48 = vrot.slane %v8094_v58, 5  ;;  %v1954_v58 = vrot.slane %v8138_v26, 5  ;;  %v5936_v33 = vrot.slane %v1881_v3, 9 }
  0xe2   : > { %v6295_v54 = vpack.c.bf16 %v594_v52, %v594_v52  ;;  %883 = vst.msk [vmem:[#allocation2 + $0xc4] sm:$0xf] %vm832_vm1, %v6294_v32  ;;  %882 = vst.msk [vmem:[#allocation2 + $0xc0] sm:$0xf] %vm832_vm1, %v6293_v53  ;;  %v1947_v32 = vrot.slane %v8105_v36, 5  ;;  %v2977_v11 = vor.u32 %v2976_v21, %v8169_v15  ;;  %v4782_v36 = vsel %vm1423_vm0, %v7855_v40, 0 }
  0xe3   : > { %6813 = vmatmul.mubr.msk.bf16.gmra.mrb[24].mxu0 %vm1374_vm7, %v6080_v45  ;;  %v8175_v45 = vld [vmem:[#allocation2 + $0x64] sm:$0xf]  ;;  %v7253_v52 = vld [vmem:[#allocation2 + $0x8] sm:$0x1]  ;;  %v1942_v26 = vrot.slane %v1940_v48, 4  ;;  %v8214_v3 = vsel %vm7770_vm11, %v5936_v33, %v1940_v48 }
  0xe4   : > { %6816 = vmatprep.mubr.msk.bf16.mxu0 %vm1374_vm7, %v6081_v35  ;;  %884 = vst.msk [vmem:[#allocation2 + $0xc8] sm:$0x1] %vm835_vm2, %v6295_v54  ;;  %v1933_v35 = vrot.slane %v8078_v44, 5  ;;  %v1936_v53 = vrot.slane %v7253_v52, 5  ;;  %v1943_v54 = vrot.slane %v7254_v39, 5  ;;  %v5912_v44 = vcombine.low %v7844_v51, %v7832_v10 }
  0xe5   : > { %6657 = vmatmul.mubr.msk.bf16.gmra.mrb[4].mxu1 %vm1374_vm7, %v5906_v23  ;;  %v7251_v23 = vld [vmem:[#allocation2 + $0x60] sm:$0xf]  ;;  %v5914_v51 = vcombine.low %v7912_v1, %v7909_v56  ;;  %v8220_v39 = vrot.slane %v2977_v11, 4 }
  0xe6   : > { %6660 = vmatprep.mubr.msk.bf16.mxu1 %vm1374_vm7, %v5907_v18  ;;  %v5911_v46 = vcombine.low %v7251_v23, %v8175_v45  ;;  %v1880_v18 = vld [vmem:[#allocation2] sm:$0xe]  ;;  %v8218_v52 = vsel %vm7770_vm11, %v1942_v26, %v1943_v54 }
  0xe7   : > { %v5935_v13 = vrot.slane %v1880_v18, 9  ;;  %v8203_v23 = vld [vmem:[%s9189_s3 + $0x20] sm:$0xf]  ;;  %9213 = vst [vmem:[#allocation6_spill] sm:$0xff] %v8220_v39 }
  0xe9   : > { %v2742_v38 = vld [vmem:[#allocation2 + $0xc4] sm:$0xf]  ;;  %v3437_v63 = vld [vmem:[#allocation2 + $0xc0] sm:$0xe]  ;;  %v8210_v18 = vsel %vm7770_vm11, %v5935_v13, %v1933_v35 }
  0xea   : > { %v3593_v9 = vrot.slane %v2742_v38, 5  ;;  %v6065_v50 = vrot.slane %v3437_v63, 9  ;;  %v1961_v38 = vrot.slane %v8141_v24, 5  ;;  %v7201_v63 = vld [vmem:[#allocation2 + $0x24] sm:$0xff]   ;;  %v7256_v24 = vld [vmem:[#allocation2 + $0x2c] sm:$0x1] }
  0xeb   : > { %v2743_v22 = vld [vmem:[#allocation2 + $0xc8] sm:$0x1]  ;;  %v1957_v21 = vrot.slane %v7256_v24, 5  ;;  %v7203_v13 = vld [vmem:[#allocation2 + $0x3c] sm:$0xff]   ;;  %v1982_v24 = vrot.slane %v8171_v2, 5 }
  0xec   : > { %v3595_v59 = vrot.slane %v3593_v9, 4  ;;  %v3596_v41 = vrot.slane %v2743_v22, 5  ;;  %v3594_v17 = vsel %vm7770_vm11, %v6065_v50, %v3593_v9  ;;  %v5913_v9 = vcombine.low %v7897_v62, %v7889_v34  ;;  %v1884_v22 = vld [vmem:[#allocation2 + $0x30] sm:$0xe] }
  0xed   : > { %6661 = vmatmul.mubr.msk.bf16.gmra.mrb[8].mxu1 %vm1374_vm7, %v5908_v57  ;;  %v1882_v57 = vld [vmem:[#allocation2 + $0x18] sm:$0xe]  ;;  %v7202_v50 = vld [vmem:[#allocation2 + $0x30] sm:$0xff]   ;;  %v5915_v34 = vcombine.low %v7954_v5, %v7958_v20  ;;  %v5939_v62 = vrot.slane %v1884_v22, 9  ;;  %v1975_v22 = vrot.slane %v8158_v37, 5 }
  0xee   : > { %6664 = vmatprep.mubr.msk.bf16.mxu1 %vm1374_vm7, %v5909_v60  ;;  %v3597_v42 = vsel %vm7770_vm11, %v3595_v59, %v3596_v41  ;;  %v1883_v60 = vld [vmem:[#allocation2 + $0x24] sm:$0xe]  ;;  %v1935_v59 = vrot.slane %v1933_v35, 4  ;;  %v5937_v41 = vrot.slane %v1882_v57, 9  ;;  %v7261_v5 = vld [vmem:[#allocation2 + $0x68] sm:$0x1] }
  0xef   : > { %v6082_v19 = vcombine.low %v3594_v17, %v3597_v42  ;;  %v1949_v17 = vrot.slane %v1947_v32, 4  ;;  %v7255_v42 = vld [vmem:[#allocation2 + $0x20] sm:$0x1]  ;;  %v5938_v40 = vrot.slane %v1883_v60, 9  ;;  %v1886_v60 = vld [vmem:[#allocation2 + $0x48] sm:$0xe] }
  0xf0   : > { %v1950_v10 = vrot.slane %v7255_v42, 5  ;;  %v8225_v57 = vsel %vm7770_vm11, %v1935_v59, %v1936_v53  ;;  %v8229_v35 = vsel %vm7770_vm11, %v5937_v41, %v1947_v32  ;;  %v5940_v53 = vrot.slane %v1885_v25, 9  ;;  %v7204_v59 = vld [vmem:[#allocation2 + $0x48] sm:$0xff]   ;;  %v7258_v42 = vld [vmem:[#allocation2 + $0x44] sm:$0x1] }
  0xf1   : > { %6817 = vmatmul.mubr.msk.bf16.gmra.mrb[28].mxu0 %vm1374_vm7, %v6082_v19  ;;  %v7257_v19 = vld [vmem:[#allocation2 + $0x38] sm:$0x1]  ;;  %v8238_v54 = vsel %vm7770_vm11, %v5938_v40, %v1954_v58  ;;  %v5941_v26 = vrot.slane %v1886_v60, 9  ;;  %v1887_v40 = vld [vmem:[#allocation2 + $0x54] sm:$0xe]  ;;  %v1992_v20 = vrot.slane %v7261_v5, 5 }
  0xf2   : > { %6822 = vmatprep.mubr.msk.bf16.mxu0 %vm1374_vm7, %v7200_v14  ;;  %v1956_v14 = vrot.slane %v1954_v58, 4  ;;  %v1964_v55 = vrot.slane %v7257_v19, 5  ;;  %v8233_v48 = vsel %vm7770_vm11, %v1949_v17, %v1950_v10  ;;  %v8254_v58 = vsel %vm7770_vm11, %v5939_v62, %v1961_v38  ;;  %v4255_v25 = vld [vmem:[#allocation2 + $0x28] sm:$0xf] }
  0xf3   : > { %v1971_v10 = vrot.slane %v7258_v42, 5  ;;  %v8283_v60 = vsel %vm7770_vm11, %v5941_v26, %v1975_v22  ;;  %v1977_v42 = vrot.slane %v1975_v22, 4  ;;  %v4333_v33 = vshll.u32 %v4255_v25, 16  ;;  %v7260_v26 = vld [vmem:[#allocation2 + $0x5c] sm:$0x1] }
  0xf4   : > { %v8242_v11 = vsel %vm7770_vm11, %v1956_v14, %v1957_v21  ;;  %v4254_v21 = vld [vmem:[#allocation2 + $0x24] sm:$0xf]  ;;  %v1985_v22 = vrot.slane %v7260_v26, 5 }
  0xf5   : > { %6665 = vmatmul.mubr.msk.bf16.gmra.mrb[12].mxu1 %vm1374_vm7, %v5910_v61  ;;  %v1963_v61 = vrot.slane %v1961_v38, 4  ;;  %v4324_v2 = vshrl.u32 %v4254_v21, 16  ;;  %v4327_v41 = vshll.u32 %v4254_v21, 16  ;;  %v4337_v38 = vshrl.u32 %v4255_v25, 16  ;;  %v7206_v21 = vld [vmem:[#allocation2 + $0x60] sm:$0xff]  }
  0xf6   : > { %6668 = vmatprep.mubr.msk.bf16.mxu1 %vm1374_vm7, %v5911_v46  ;;  %v5916_v46 = vcombine.low %v7988_v30, %v7981_v16  ;;  %v4256_v25 = vld [vmem:[#allocation2 + $0x2c] sm:$0x1] }
  0xf9   : > { %6823 = vmatmul.mubr.msk.bf16.vlgmr.msra.gmra.mrb[0].mxu0 %vm1374_vm7, %v7201_v63  ;;  %v8258_v63 = vsel %vm7770_vm11, %v1963_v61, %v1964_v55 }
  0xfa   : > { %6855 = vmatpush3.bf16.msra.mxu0 %v4782_v36  ;;  %6826 = vmatprep.mubr.msk.bf16.mxu0 %vm1374_vm7, %v7202_v50  ;;  %v1968_v36 = vrot.slane %v8155_v8, 5  ;;  %v4251_v8 = vld [vmem:[#allocation2 + $0x18] sm:$0xf]  ;;  %v4252_v50 = vld [vmem:[#allocation2 + $0x1c] sm:$0xf] }
  0xfb   : > { %7189 = vmatprep.subr.msk.bf16.mxu0 %vm1423_vm0, %v8203_v23  ;;  %v4300_v62 = vshrl.u32 %v4251_v8, 16  ;;  %v4303_v61 = vshll.u32 %v4251_v8, 16  ;;  %v4309_v19 = vshll.u32 %v4252_v50, 16  ;;  %v4313_v55 = vshrl.u32 %v4252_v50, 16 }
  0xfc   : > { %v8277_v37 = vsel %vm7770_vm11, %v5940_v53, %v1968_v36  ;;  %v1970_v14 = vrot.slane %v1968_v36, 4  ;;  %v5942_v53 = vrot.slane %v1887_v40, 9  ;;  %v1888_v36 = vld [vmem:[#allocation2 + $0x60] sm:$0xe]  ;;  %v1989_v50 = vrot.slane %v8175_v45, 5 }
  0xfd   : > { %6669 = vmatmul.mubr.msk.bf16.gmra.mrb[16].mxu1 %vm1374_vm7, %v5912_v44  ;;  %v4302_v40 = vrot.slane %v4300_v62, 4  ;;  %v8299_v56 = vrot.slane %v4309_v19, 5  ;;  %v4315_v1 = vrot.slane %v4313_v55, 4  ;;  %v4326_v62 = vrot.slane %v4324_v2, 4  ;;  %v7262_v44 = vld [vmem:[#allocation2 + $0x70] sm:$0xf] }
  0xfe   : > { %6672 = vmatprep.mubr.msk.bf16.mxu1 %vm1374_vm7, %v5913_v9  ;;  %v8264_v9 = vsel %vm1423_vm0, %v8123_v12, 0  ;;  %v7259_v12 = vld [vmem:[#allocation2 + $0x50] sm:$0x1]  ;;  %v8292_v8 = vsel %vm7770_vm11, %v1970_v14, %v1971_v10  ;;  %v8307_v45 = vsel %vm7770_vm11, %v5942_v53, %v1982_v24  ;;  %v5943_v14 = vrot.slane %v1888_v36, 9 }
  0xff   : > { %v1978_v17 = vrot.slane %v7259_v12, 5  ;;  %v4305_v12 = vrot.slane %v4303_v61, 5  ;;  %v4329_v61 = vrot.slane %v4327_v41, 5  ;;  %v8311_v19 = vrot.slane %v4333_v33, 5  ;;  %v7266_v33 = vld [vmem:[#allocation2 + $0x80] sm:$0x1] }
 0x100   : > { %v4339_v55 = vrot.slane %v4337_v38, 4  ;;  %v4316_v5 = vor.u32 %v4315_v1, %v8299_v56  ;;  %v7263_v38 = vld [vmem:[#allocation2 + $0x74] sm:$0x1] }
 0x101   : > { %6827 = vmatmul.mubr.msk.bf16.gmra.mrb[4].mxu0 %vm1374_vm7, %v7203_v13  ;;  %v1984_v13 = vrot.slane %v1982_v24, 4  ;;  %v8303_v10 = vsel %vm7770_vm11, %v1977_v42, %v1978_v17  ;;  %v1991_v17 = vrot.slane %v1989_v50, 4  ;;  %v1996_v24 = vrot.slane %v7262_v44, 5 }
 0x102   : > { %6830 = vmatprep.mubr.msk.bf16.mxu0 %vm1374_vm7, %v7204_v59  ;;  %v1889_v59 = vld [vmem:[#allocation2 + $0x6c] sm:$0xe]  ;;  %v4306_v36 = vor.u32 %v4305_v12, %v4302_v40  ;;  %v1999_v41 = vrot.slane %v7263_v38, 5  ;;  %v8329_v40 = vsel %vm7770_vm11, %v5943_v14, %v1989_v50  ;;  %v4330_v12 = vor.u32 %v4329_v61, %v4326_v62  ;;  %v7265_v50 = vld [vmem:[#allocation2 + $0x88] sm:$0xf] }
 0x103   : > { %v8315_v26 = vsel %vm7770_vm11, %v1984_v13, %v1985_v22  ;;  %v5944_v42 = vrot.slane %v1889_v59, 9  ;;  %v4343_v13 = vshll.u32 %v4256_v25, 16  ;;  %v1890_v22 = vld [vmem:[#allocation2 + $0x78] sm:$0xe]  ;;  %v7264_v59 = vld [vmem:[#allocation2 + $0x7c] sm:$0xf]  ;;  %v4340_v1 = vor.u32 %v4339_v55, %v8311_v19 }
 0x104   : > { %v2003_v32 = vrot.slane %v7264_v59, 5  ;;  %v8338_v25 = vsel %vm7770_vm11, %v1991_v17, %v1992_v20  ;;  %v1998_v38 = vrot.slane %v1996_v24, 4  ;;  %v2010_v14 = vrot.slane %v7265_v50, 5  ;;  %v4257_v62 = vld [vmem:[#allocation2 + $0x30] sm:$0xf]  ;;  %v7208_v17 = vld [vmem:[#allocation2 + $0x78] sm:$0xff]  }
 0x105   : > { %6673 = vmatmul.mubr.msk.bf16.gmra.mrb[20].mxu1 %vm1374_vm7, %v5914_v51  ;;  %v7205_v51 = vld [vmem:[#allocation2 + $0x54] sm:$0xff]   ;;  %v9215_v61 = vcombine.low %v8029_v29, %v8031_v7  ;;  %v4307_v16 = vrot.slane %v4306_v36, 4  ;;  %v4317_v30 = vrot.slane %v4316_v5, 4  ;;  %v5945_v55 = vrot.slane %v1890_v22, 9  ;;  %v7207_v20 = vld [vmem:[#allocation2 + $0x6c] sm:$0xff]  }
 0x106   : > { %6676 = vmatprep.mubr.msk.bf16.mxu1 %vm1374_vm7, %v5915_v34  ;;  %v8309_v34 = vld [vmem:[#allocation2 + $0x20] sm:$0x1]  ;;  %v8348_v59 = vld [vmem:[#allocation2 + $0x34] sm:$0xf]  ;;  %v4345_v44 = vrot.slane %v4343_v13, 5  ;;  %v4331_v50 = vrot.slane %v4330_v12, 4  ;;  %v8354_v22 = vsel %vm7770_vm11, %v1998_v38, %v1999_v41 }
 0x107   : > { %9214 = vst [vmem:[#allocation7_spill] sm:$0xff] %v8309_v34  ;;  %v4319_v2 = vshll.u32 %v8309_v34, 16  ;;  %9216 = vst [vmem:[#allocation8_spill] sm:$0xff] %v8348_v59  ;;  %v4341_v34 = vrot.slane %v4340_v1, 4  ;;  %v4348_v4 = vshrl.u32 %v4257_v62, 16  ;;  %v4351_v15 = vshll.u32 %v4257_v62, 16 }
 0x108   : > { %v4260_v29 = vld [vmem:[#allocation2 + $0x3c] sm:$0xf]  ;;  %v2012_v39 = vrot.slane %v2010_v14, 4  ;;  %v4357_v5 = vshll.u32 %v8348_v59, 16  ;;  %v8363_v12 = vsel %vm7770_vm11, %v5945_v55, %v2003_v32  ;;  %v8365_v1 = vld [vmem:[#allocation2 + $0x38] sm:$0x1]  ;;  %v9219_v55 = vcombine.low %v8048_v27, %v8050_v47 }
 0x109   : > { %6831 = vmatmul.mubr.msk.bf16.gmra.mrb[8].mxu0 %vm1374_vm7, %v7205_v51  ;;  %v1891_v51 = vld [vmem:[#allocation2 + $0x84] sm:$0xe]  ;;  %9217 = vst [vmem:[#allocation9_spill] sm:$0xff] %v8365_v1  ;;  %v4375_v38 = vshll.u32 %v4260_v29, 16  ;;  %v4346_v62 = vsel %vm7416_vm8, %v4341_v34, %v4345_v44  ;;  %v1892_v34 = vld [vmem:[#allocation2 + $0x90] sm:$0xe] }
 0x10a   : > { %6834 = vmatprep.mubr.msk.bf16.mxu0 %vm1374_vm7, %v7206_v21  ;;  %v8342_v21 = vsel %vm7770_vm11, %v5944_v42, %v1996_v24  ;;  %v2005_v42 = vrot.slane %v2003_v32, 4  ;;  %v2006_v24 = vrot.slane %v7266_v33, 5  ;;  %v5946_v53 = vrot.slane %v1891_v51, 9 }
 0x10b   : > { %v4312_v33 = vsel %vm7416_vm8, %v4307_v16, %v8299_v56  ;;  %v4372_v56 = vshrl.u32 %v4260_v29, 16  ;;  %v4336_v32 = vsel %vm7416_vm8, %v4331_v50, %v8311_v19  ;;  %v4350_v16 = vrot.slane %v4348_v4, 4  ;;  %v4266_v29 = vld [vmem:[#allocation2 + $0x54] sm:$0xf] }
 0x10c   : > { %v8370_v51 = vsel %vm7770_vm11, %v2005_v42, %v2006_v24  ;;  %v8374_v41 = vsel %vm7770_vm11, %v5946_v53, %v2010_v14  ;;  %v8392_v14 = vrot.slane %v4357_v5, 5  ;;  %v4367_v19 = vshll.u32 %v8365_v1, 16  ;;  %v8409_v42 = vld [vmem:[#allocation2 + $0x4c] sm:$0xf] }
 0x10d   : > { %6677 = vmatmul.mubr.msk.bf16.gmra.mrb[24].mxu1 %vm1374_vm7, %v5916_v46  ;;  %v4321_v46 = vrot.slane %v4319_v2, 5  ;;  %v4361_v2 = vshrl.u32 %v8348_v59, 16  ;;  %v9220_v4 = vcombine.low %v8210_v18, %v8225_v57  ;;  %v4374_v24 = vrot.slane %v4372_v56, 4 }
 0x10e   : > { %6680 = vmatprep.mubr.msk.bf16.mxu1 %vm1374_vm7, %v9215_v61  ;;  %v7267_v61 = vld [vmem:[#allocation2 + $0x8c] sm:$0x1]  ;;  %v4377_v18 = vrot.slane %v4375_v38, 5  ;;  %v8422_v56 = vrot.slane %v4367_v19, 5  ;;  %v4420_v5 = vshrl.u32 %v4266_v29, 16  ;;  %v4423_v27 = vshll.u32 %v4266_v29, 16 }
 0x10f   : > { %v2013_v36 = vrot.slane %v7267_v61, 5  ;;  %v4322_v13 = vsel %vm7416_vm8, %v4317_v30, %v4321_v46  ;;  %v4353_v30 = vrot.slane %v4351_v15, 5  ;;  %v8382_v46 = vld [vmem:[#allocation2 + $0x40] sm:$0xf]  ;;  %v7209_v15 = vld [vmem:[#allocation2 + $0x84] sm:$0xff]   ;;  %v7210_v61 = vld [vmem:[#allocation2 + $0x90] sm:$0xff]   ;;  %v9223_v29 = vcombine.low %v8214_v3, %v8218_v52 }
 0x110   : > { %9218 = vst [vmem:[#allocation10_spill] sm:$0xff] %v8382_v46  ;;  %v8403_v44 = vcombine.low %v4312_v33, %v4322_v13  ;;  %v4381_v57 = vshll.u32 %v8382_v46, 16  ;;  %v4385_v50 = vshrl.u32 %v8382_v46, 16  ;;  %v8419_v33 = vld [vmem:[#allocation2 + $0x44] sm:$0x1]  ;;  %v4425_v3 = vrot.slane %v4423_v27, 5 }
 0x111   : > { %6835 = vmatmul.mubr.msk.bf16.gmra.mrb[12].mxu0 %vm1374_vm7, %v7207_v20  ;;  %v8390_v53 = vsel %vm7770_vm11, %v2012_v39, %v2013_v36  ;;  %v4363_v20 = vrot.slane %v4361_v2, 4  ;;  %v8407_v39 = vsel %vm1423_vm0, %v8203_v23, 0  ;;  %v8413_v36 = vcombine.low %v4336_v32, %v4346_v62  ;;  %9221 = vst [vmem:[#allocation11_spill] sm:$0xff] %v8419_v33  ;;  %v7211_v52 = vld [vmem:[#allocation2 + $0x9c] sm:$0xff]  }
 0x112   : > { %6838 = vmatprep.mubr.msk.bf16.mxu0 %vm1374_vm7, %v7208_v17  ;;  %v4263_v17 = vld [vmem:[#allocation2 + $0x48] sm:$0xf]  ;;  %v4354_v2 = vor.u32 %v4353_v30, %v4350_v16  ;;  %v4405_v32 = vshll.u32 %v8409_v42, 16  ;;  %v4409_v62 = vshrl.u32 %v8409_v42, 16  ;;  %v4378_v16 = vor.u32 %v4377_v18, %v4374_v24  ;;  %v1893_v18 = vld [vmem:[#allocation2 + $0x9c] sm:$0xe] }
 0x113   : > { %v4364_v13 = vor.u32 %v4363_v20, %v8392_v14  ;;  %v4396_v38 = vshrl.u32 %v4263_v17, 16  ;;  %v8429_v30 = vrot.slane %v4381_v57, 5  ;;  %v4387_v23 = vrot.slane %v4385_v50, 4 }
 0x114   : > { %v4391_v20 = vshll.u32 %v8419_v33, 16  ;;  %v8433_v19 = vrot.slane %v4354_v2, 4  ;;  %v5947_v24 = vrot.slane %v1892_v34, 9  ;;  %v8448_v2 = vrot.slane %v4405_v32, 5 }
 0x115   : > { %6681 = vmatmul.mubr.msk.bf16.gmra.mrb[28].mxu1 %vm1374_vm7, %v9219_v55  ;;  %v4399_v55 = vshll.u32 %v4263_v17, 16  ;;  %v7268_v17 = vld [vmem:[#allocation2 + $0x94] sm:$0xf]  ;;  %v4398_v57 = vrot.slane %v4396_v38, 4  ;;  %v4422_v33 = vrot.slane %v4420_v5, 4  ;;  %v4388_v34 = vor.u32 %v4387_v23, %v8429_v30 }
 0x116   : > { %6686 = vmatprep.mubr.msk.bf16.mxu1 %vm1374_vm7, %v9220_v4  ;;  %v8424_v4 = vld [vmem:[#allocation2 + $0x58] sm:$0xf]  ;;  %v2017_v46 = vrot.slane %v7268_v17, 5  ;;  %v4411_v17 = vrot.slane %v4409_v62, 4  ;;  %v5948_v27 = vrot.slane %v1893_v18, 9 }
 0x117   : > { %9222 = vst [vmem:[#allocation12_spill] sm:$0xff] %v8424_v4  ;;  %v4429_v1 = vshll.u32 %v8424_v4, 16  ;;  %v4433_v59 = vshrl.u32 %v8424_v4, 16  ;;  %v4401_v50 = vrot.slane %v4399_v55, 5  ;;  %v7269_v38 = vld [vmem:[#allocation2 + $0x98] sm:$0x1]  ;;  %v4426_v43 = vor.u32 %v4425_v3, %v4422_v33 }
 0x118   : > { %v2020_v55 = vrot.slane %v7269_v38, 5  ;;  %v2019_v5 = vrot.slane %v2017_v46, 4  ;;  %v8475_v18 = vld [vmem:[#allocation2 + $0x5c] sm:$0x1]  ;;  %v1894_v23 = vld [vmem:[#allocation2 + $0xa8] sm:$0xe] }
 0x119   : > { %6839 = vmatmul.mubr.msk.bf16.gmra.mrb[16].mxu0 %vm1374_vm7, %v7209_v15  ;;  %v8441_v15 = vrot.slane %v4364_v13, 4  ;;  %v8453_v13 = vrot.slane %v4391_v20, 5  ;;  %v8461_v32 = vrot.slane %v4429_v1, 5  ;;  %v4435_v62 = vrot.slane %v4433_v59, 4  ;;  %9225 = vst [vmem:[#allocation13_spill] sm:$0xff] %v8475_v18 }
 0x11a   : > { %6842 = vmatprep.mubr.msk.bf16.mxu0 %vm1374_vm7, %v7210_v61  ;;  %v9224_v61 = vcombine.low %v8229_v35, %v8233_v48  ;;  %v7270_v35 = vld [vmem:[%s9189_s3 + $0x10] sm:$0xf]  ;;  %v7212_v48 = vld [vmem:[#allocation2 + $0xa8] sm:$0xff]   ;;  %v8473_v20 = vsel %vm7770_vm11, %v5947_v24, %v2017_v46  ;;  %v4402_v1 = vor.u32 %v4401_v50, %v4398_v57  ;;  %v4412_v59 = vor.u32 %v4411_v17, %v8448_v2  ;;  %v4269_v4 = vld [vmem:[#allocation2 + $0x60] sm:$0xf] }
 0x11b   : > { %v4389_v24 = vrot.slane %v4388_v34, 4  ;;  %v8489_v57 = vsel %vm7770_vm11, %v2019_v5, %v2020_v55  ;;  %v4436_v50 = vor.u32 %v4435_v62, %v8461_v32  ;;  %v4439_v17 = vshll.u32 %v8475_v18, 16  ;;  %v8501_v3 = vld [vmem:[#allocation2 + $0x64] sm:$0xf]  ;;  %v1895_v62 = vld [vmem:[#allocation2 + $0xb4] sm:$0xe] }
 0x11c   : > { %v9227_v34 = vcombine.low %v8254_v58, %v8258_v63  ;;  %v4403_v55 = vrot.slane %v4402_v1, 4  ;;  %v7213_v18 = vld [vmem:[#allocation2 + $0xb4] sm:$0xff]   ;;  %v7214_v58 = vld [vmem:[#allocation2 + $0xc0] sm:$0xff]   ;;  %v4453_v1 = vshll.u32 %v8501_v3, 16 }
 0x11d   : > { %6687 = vmatmul.mubr.msk.bf16.vlgmr.msra.gmra.mrb[0].mxu1 %vm1374_vm7, %v9223_v29  ;;  %v8450_v29 = vrot.slane %v4378_v16, 4  ;;  %v2031_v16 = vrot.slane %v8031_v7, 5  ;;  %v5949_v7 = vrot.slane %v1894_v23, 9  ;;  %v2034_v23 = vrot.slane %v8034_v28, 5 }
 0x11e   : > { %6719 = vmatpush3.bf16.msra.mxu1 %v8264_v9  ;;  %6690 = vmatprep.mubr.msk.bf16.mxu1 %vm1374_vm7, %v9224_v61  ;;  %v8455_v9 = vld [vmem:[#allocation2 + $0x50] sm:$0x1]  ;;  %v7271_v61 = vld [vmem:[#allocation2 + $0xa0] sm:$0xf]  ;;  %v4437_v63 = vrot.slane %v4436_v50, 4 }
 0x11f   : > { %7185 = vmatprep.subr.msk.bf16.mxu1 %vm1423_vm0, %v7270_v35  ;;  %v2024_v38 = vrot.slane %v7271_v61, 5  ;;  %v4415_v35 = vshll.u32 %v8455_v9, 16  ;;  %v4384_v46 = vsel %vm7416_vm8, %v8450_v29, %v8429_v30  ;;  %v2027_v61 = vrot.slane %v8000_v6, 5 }
 0x120   : > { %v9226_v30 = vcombine.low %v8238_v54, %v8242_v11  ;;  %v4447_v29 = vshll.u32 %v4269_v4, 16  ;;  %v4394_v54 = vsel %vm7416_vm8, %v4389_v24, %v8453_v13  ;;  %v2033_v11 = vrot.slane %v2031_v16, 4 }
 0x121   : > { %6843 = vmatmul.mubr.msk.bf16.gmra.mrb[20].mxu0 %vm1374_vm7, %v7211_v52  ;;  %v8493_v33 = vsel %vm7770_vm11, %v5948_v27, %v2024_v38  ;;  %v2026_v6 = vrot.slane %v2024_v38, 4  ;;  %v4444_v52 = vshrl.u32 %v4269_v4, 16  ;;  %v4417_v5 = vrot.slane %v4415_v35, 5  ;;  %v8512_v38 = vld [vmem:[#allocation2 + $0x68] sm:$0x1] }
 0x122   : > { %6846 = vmatprep.mubr.msk.bf16.mxu0 %vm1374_vm7, %v7212_v48  ;;  %v4413_v48 = vrot.slane %v4412_v59, 4  ;;  %v4427_v27 = vrot.slane %v4426_v43, 4  ;;  %v2038_v4 = vrot.slane %v8050_v47, 5  ;;  %v4457_v43 = vshrl.u32 %v8501_v3, 16  ;;  %v4272_v47 = vld [vmem:[#allocation2 + $0x6c] sm:$0xf] }
 0x123   : > { %v8518_v59 = vsel %vm7770_vm11, %v2026_v6, %v2027_v61  ;;  %v8522_v13 = vsel %vm7770_vm11, %v5949_v7, %v2031_v16  ;;  %v4446_v28 = vrot.slane %v4444_v52, 4  ;;  %v4449_v35 = vrot.slane %v4447_v29, 5 }
 0x124   : > { %v4408_v24 = vsel %vm7416_vm8, %v4403_v55, %v8448_v2  ;;  %v4418_v50 = vsel %vm7416_vm8, %v4413_v48, %v4417_v5  ;;  %v5950_v61 = vrot.slane %v1895_v62, 9  ;;  %v8535_v16 = vsel %vm7770_vm11, %v2033_v11, %v2034_v23  ;;  %v7215_v55 = vld [vmem:[#allocation2 + $0xcc] sm:$0xff]   ;;  %v8582_v23 = vld [vmem:[#allocation2 + $0x7c] sm:$0xf] }
 0x125   : > { %6691 = vmatmul.mubr.msk.bf16.gmra.mrb[4].mxu1 %vm1374_vm7, %v9226_v30  ;;  %v4441_v30 = vrot.slane %v4439_v17, 5  ;;  %v4432_v17 = vsel %vm7416_vm8, %v4427_v27, %v8461_v32  ;;  %v2040_v6 = vrot.slane %v2038_v4, 4  ;;  %v2041_v7 = vrot.slane %v8054_v0, 5  ;;  %v8564_v62 = vld [vmem:[#allocation2 + $0x70] sm:$0xf]  ;;  %9232 = vst [vmem:[#allocation14_spill] sm:$0xff] %v8582_v23 }
 0x126   : > { %6694 = vmatprep.mubr.msk.bf16.mxu1 %vm1374_vm7, %v9227_v34  ;;  %v4463_v52 = vshll.u32 %v8512_v38, 16  ;;  %v8542_v29 = vrot.slane %v4453_v1, 5  ;;  %v4459_v32 = vrot.slane %v4457_v43, 4  ;;  %v4468_v34 = vshrl.u32 %v4272_v47, 16  ;;  %v8592_v1 = vld [vmem:[#allocation2 + $0x88] sm:$0xf] }
 0x127   : > { %v4442_v2 = vsel %vm7416_vm8, %v4437_v63, %v4441_v30  ;;  %v9229_v0 = vsel %vm7416_vm8, %v8441_v15, %v8422_v56  ;;  %v9230_v48 = vsel %vm7416_vm8, %v8433_v19, %v8392_v14  ;;  %v8560_v27 = vcombine.low %v4384_v46, %v4394_v54  ;;  %v8580_v46 = vld [vmem:[#allocation2 + $0x74] sm:$0x1]  ;;  %v4275_v54 = vld [vmem:[#allocation2 + $0x78] sm:$0xf]  ;;  %v4278_v30 = vld [vmem:[#allocation2 + $0x84] sm:$0xf] }
 0x128   : > { %v8558_v5 = vcombine.low %v9230_v48, %v9229_v0  ;;  %v9231_v11 = vcombine.low %v8283_v60, %v8303_v10  ;;  %v8572_v15 = vcombine.low %v4408_v24, %v4418_v50  ;;  %v8578_v19 = vsel %vm7770_vm11, %v5950_v61, %v2038_v4  ;;  %9233 = vst [vmem:[#allocation15_spill] sm:$0xff] %v8592_v1  ;;  %v4281_v24 = vld [vmem:[#allocation2 + $0x90] sm:$0xf] }
 0x129   : > { %6847 = vmatmul.mubr.msk.bf16.gmra.mrb[24].mxu0 %vm1374_vm7, %v7213_v18  ;;  %v9228_v18 = vcombine.low %v8277_v37, %v8292_v8  ;;  %v4450_v8 = vor.u32 %v4449_v35, %v4446_v28  ;;  %v8584_v60 = vcombine.low %v4432_v17, %v4442_v2  ;;  %v8588_v10 = vsel %vm7770_vm11, %v2040_v6, %v2041_v7 }
 0x12a   : > { %6850 = vmatprep.mubr.msk.bf16.mxu0 %vm1374_vm7, %v7214_v58  ;;  %v8590_v58 = vrot.slane %v4463_v52, 5  ;;  %v4471_v63 = vshll.u32 %v4272_v47, 16  ;;  %v4460_v4 = vor.u32 %v4459_v32, %v8542_v29  ;;  %v8595_v43 = vrot.slane %v4468_v34, 4  ;;  %v8604_v32 = vld [vmem:[#allocation2 + $0x94] sm:$0xf] }
 0x12b   : > { %v4477_v28 = vshll.u32 %v8564_v62, 16  ;;  %v4481_v35 = vshrl.u32 %v8564_v62, 16  ;;  %v8599_v50 = vrot.slane %v4450_v8, 4  ;;  %v4487_v17 = vshll.u32 %v8580_v46, 16  ;;  %9234 = vst [vmem:[#allocation16_spill] sm:$0xff] %v8604_v32 }
 0x12c   : > { %v4492_v61 = vshrl.u32 %v4275_v54, 16  ;;  %v4495_v6 = vshll.u32 %v4275_v54, 16  ;;  %v4501_v47 = vshll.u32 %v8582_v23, 16  ;;  %v4505_v7 = vshrl.u32 %v8582_v23, 16 }
 0x12d   : > { %6695 = vmatmul.mubr.msk.bf16.gmra.mrb[8].mxu1 %vm1374_vm7, %v9228_v18  ;;  %v4516_v52 = vshrl.u32 %v4278_v30, 16  ;;  %v4519_v2 = vshll.u32 %v4278_v30, 16  ;;  %v4525_v34 = vshll.u32 %v8592_v1, 16  ;;  %v4529_v18 = vshrl.u32 %v8592_v1, 16  ;;  %v4284_v1 = vld [vmem:[#allocation2 + $0x9c] sm:$0xf] }
 0x12e   : > { %6698 = vmatprep.mubr.msk.bf16.mxu1 %vm1374_vm7, %v9231_v11  ;;  %v4540_v0 = vshrl.u32 %v4281_v24, 16  ;;  %v4543_v48 = vshll.u32 %v4281_v24, 16  ;;  %v8611_v8 = vrot.slane %v4460_v4, 4  ;;  %v4473_v11 = vrot.slane %v4471_v63, 5  ;;  %v8625_v63 = vld [vmem:[#allocation2 + $0x80] sm:$0x1] }
 0x12f   : > { %v8613_v54 = vrot.slane %v4477_v28, 5  ;;  %v4483_v14 = vrot.slane %v4481_v35, 4  ;;  %v9235_v30 = vcombine.low %v8307_v45, %v8315_v26  ;;  %v4497_v56 = vrot.slane %v4495_v6, 5  ;;  %v8629_v35 = vld [vmem:[#allocation2 + $0x8c] sm:$0x1] }
 0x130   : > { %v4549_v37 = vshll.u32 %v8604_v32, 16  ;;  %v4553_v24 = vshrl.u32 %v8604_v32, 16  ;;  %v8627_v4 = vrot.slane %v4501_v47, 5  ;;  %v4507_v28 = vrot.slane %v4505_v7, 4 }
 0x131   : > { %6851 = vmatmul.mubr.msk.bf16.gmra.mrb[28].mxu0 %vm1374_vm7, %v7215_v55  ;;  %v4494_v55 = vrot.slane %v4492_v61, 4  ;;  %v4518_v45 = vrot.slane %v4516_v52, 4  ;;  %v4521_v26 = vrot.slane %v4519_v2, 5  ;;  %v8631_v61 = vrot.slane %v4525_v34, 5 }
 0x132   : > { %6856 = vmatprep.mubr.msk.bf16.mxu0 %vm1374_vm7, %v8403_v44  ;;  %v9236_v44 = vcombine.low %v8329_v40, %v8338_v25  ;;  %v4531_v6 = vrot.slane %v4529_v18, 4  ;;  %v4545_v32 = vrot.slane %v4543_v48, 5  ;;  %v8637_v25 = vrot.slane %v4487_v17, 5  ;;  %v8648_v17 = vld [vmem:[#allocation2 + $0x98] sm:$0x1] }
 0x133   : > { %v4564_v47 = vshrl.u32 %v4284_v1, 16  ;;  %v4567_v7 = vshll.u32 %v4284_v1, 16  ;;  %v4474_v52 = vor.u32 %v4473_v11, %v8595_v43  ;;  %v4484_v2 = vor.u32 %v4483_v14, %v8613_v54  ;;  %9238 = vst [vmem:[#allocation18_spill] sm:$0xff] %v8648_v17 }
 0x134   : > { %v8643_v34 = vrot.slane %v4549_v37, 5  ;;  %v4555_v18 = vrot.slane %v4553_v24, 4  ;;  %v4508_v48 = vor.u32 %v4507_v28, %v8627_v4  ;;  %v4511_v23 = vshll.u32 %v8625_v63, 16 }
 0x135   : > { %6699 = vmatmul.mubr.msk.bf16.gmra.mrb[12].mxu1 %vm1374_vm7, %v9235_v30  ;;  %v4542_v30 = vrot.slane %v4540_v0, 4  ;;  %v4498_v0 = vor.u32 %v4497_v56, %v4494_v55  ;;  %v4535_v40 = vshll.u32 %v8629_v35, 16  ;;  %v4522_v1 = vor.u32 %v4521_v26, %v4518_v45  ;;  %v4287_v45 = vld [vmem:[#allocation2 + $0xa8] sm:$0xf] }
 0x136   : > { %6702 = vmatprep.mubr.msk.bf16.mxu1 %vm1374_vm7, %v9236_v44  ;;  %v8639_v44 = vld [vmem:[#allocation2 + $0xa0] sm:$0xf]  ;;  %v4532_v43 = vor.u32 %v4531_v6, %v8631_v61  ;;  %v4466_v56 = vsel %vm7416_vm8, %v8611_v8, %v8590_v58  ;;  %v4566_v14 = vrot.slane %v4564_v47, 4  ;;  %v4569_v55 = vrot.slane %v4567_v7, 5  ;;  %v8672_v47 = vld [vmem:[#allocation2 + $0xac] sm:$0xf] }
 0x137   : > { %9237 = vst [vmem:[#allocation17_spill] sm:$0xff] %v8639_v44  ;;  %v4546_v11 = vor.u32 %v4545_v32, %v4542_v30  ;;  %v4573_v37 = vshll.u32 %v8639_v44, 16  ;;  %v9239_v24 = vcombine.low %v8342_v21, %v8354_v22  ;;  %v4475_v32 = vrot.slane %v4474_v52, 4 }
 0x138   : > { %v4485_v28 = vrot.slane %v4484_v2, 4  ;;  %v9240_v26 = vcombine.low %v8363_v12, %v8370_v51  ;;  %v4499_v58 = vrot.slane %v4498_v0, 4  ;;  %v4509_v8 = vrot.slane %v4508_v48, 4  ;;  %v8676_v2 = vld [vmem:[#allocation2 + $0xa4] sm:$0x1] }
 0x139   : > { %6857 = vmatmul.mubr.msk.bf16.vlgmr.msra.gmra.mrb[0].mxu0 %vm1374_vm7, %v8413_v36  ;;  %v4577_v36 = vshrl.u32 %v8639_v44, 16  ;;  %v4513_v6 = vrot.slane %v4511_v23, 5  ;;  %v4537_v30 = vrot.slane %v4535_v40, 5  ;;  %v4523_v21 = vrot.slane %v4522_v1, 4 }
 0x13a   : > { %6889 = vmatpush3.bf16.msra.mxu0 %v8407_v39  ;;  %6860 = vmatprep.mubr.msk.bf16.mxu0 %vm1374_vm7, %v8558_v5  ;;  %v4556_v39 = vor.u32 %v4555_v18, %v8643_v34  ;;  %v4559_v5 = vshll.u32 %v8648_v17, 16  ;;  %v4533_v22 = vrot.slane %v4532_v43, 4  ;;  %v4547_v7 = vrot.slane %v4546_v11, 4  ;;  %v8691_v11 = vld [vmem:[#allocation2 + $0xb0] sm:$0x1] }
 0x13b   : > { %v8674_v52 = vrot.slane %v4573_v37, 5  ;;  %v4570_v18 = vor.u32 %v4569_v55, %v4566_v14  ;;  %v4588_v44 = vshrl.u32 %v4287_v45, 16  ;;  %v4591_v17 = vshll.u32 %v4287_v45, 16  ;;  %v4290_v14 = vld [vmem:[#allocation2 + $0xb4] sm:$0xf] }
 0x13c   : > { %v4557_v12 = vrot.slane %v4556_v39, 4  ;;  %v4561_v51 = vrot.slane %v4559_v5, 5  ;;  %v4597_v0 = vshll.u32 %v8672_v47, 16  ;;  %v4601_v23 = vshrl.u32 %v8672_v47, 16 }
 0x13d   : > { %6703 = vmatmul.mubr.msk.bf16.gmra.mrb[16].mxu1 %vm1374_vm7, %v9239_v24  ;;  %v4579_v24 = vrot.slane %v4577_v36, 4  ;;  %v4480_v40 = vsel %vm7416_vm8, %v4475_v32, %v8613_v54  ;;  %v4490_v48 = vsel %vm7416_vm8, %v4485_v28, %v8637_v25  ;;  %v4504_v1 = vsel %vm7416_vm8, %v4499_v58, %v8627_v4 }
 0x13e   : > { %6706 = vmatprep.mubr.msk.bf16.mxu1 %vm1374_vm7, %v9240_v26  ;;  %v4514_v43 = vsel %vm7416_vm8, %v4509_v8, %v4513_v6  ;;  %v4528_v54 = vsel %vm7416_vm8, %v4523_v21, %v8631_v61  ;;  %v4538_v37 = vsel %vm7416_vm8, %v4533_v22, %v4537_v30  ;;  %v4552_v25 = vsel %vm7416_vm8, %v4547_v7, %v8643_v34  ;;  %v4981_v26 = vld [vmem:[#allocation2 + $0x48] sm:$0xe]  ;;  %v4982_v21 = vld [vmem:[#allocation2 + $0x54] sm:$0xe] }
 0x13f   : > { %v4583_v4 = vshll.u32 %v8676_v2, 16  ;;  %v8706_v55 = vrot.slane %v4570_v18, 4  ;;  %v4590_v36 = vrot.slane %v4588_v44, 4  ;;  %v4593_v32 = vrot.slane %v4591_v17, 5 }
 0x140   : > { %v9241_v61 = vcombine.low %v8374_v41, %v8390_v53  ;;  %v4562_v34 = vsel %vm7416_vm8, %v4557_v12, %v4561_v51  ;;  %v8715_v28 = vrot.slane %v4597_v0, 5  ;;  %v4603_v39 = vrot.slane %v4601_v23, 4  ;;  %v4983_v12 = vld [vmem:[#allocation2 + $0x60] sm:$0xe] }
 0x141   : > { %6861 = vmatmul.mubr.msk.bf16.gmra.mrb[4].mxu0 %vm1374_vm7, %v8560_v27  ;;  %v4580_v27 = vor.u32 %v4579_v24, %v8674_v52  ;;  %v4607_v5 = vshll.u32 %v8691_v11, 16  ;;  %v5967_v44 = vcombine.low %v8578_v19, %v8588_v10  ;;  %v9243_v41 = vsel %vm7416_vm8, %v8599_v50, %v8542_v29  ;;  %v9250_v19 = vld [vmem:[#allocation14_spill] sm:$0xff] }
 0x142   : > { %6864 = vmatprep.mubr.msk.bf16.mxu0 %vm1374_vm7, %v8572_v15  ;;  %v9242_v15 = vcombine.low %v8473_v20, %v8489_v57  ;;  %v6139_v53 = vcombine.low %v9243_v41, %v4466_v56  ;;  %v4612_v17 = vshrl.u32 %v4290_v14, 16  ;;  %v4615_v45 = vshll.u32 %v4290_v14, 16  ;;  %v8735_v57 = vld [vmem:[#allocation2 + $0xb8] sm:$0xf]  ;;  %v4293_v41 = vld [vmem:[#allocation2 + $0xc0] sm:$0xf] }
 0x143   : > { %v6140_v58 = vcombine.low %v4480_v40, %v4490_v48  ;;  %v8729_v8 = vcombine.low %v4504_v1, %v4514_v43  ;;  %v8731_v6 = vcombine.low %v4528_v54, %v4538_v37  ;;  %v8733_v20 = vrot.slane %v4583_v4, 5  ;;  %v9244_v54 = vld [vmem:[#allocation12_spill] sm:$0xff] }
 0x144   : > { %v8737_v30 = vcombine.low %v4552_v25, %v4562_v34  ;;  %v4576_v29 = vsel %vm7416_vm8, %v8706_v55, %v8674_v52  ;;  %v8743_v50 = vrot.slane %v4580_v27, 4  ;;  %v4594_v56 = vor.u32 %v4593_v32, %v4590_v36  ;;  %v9245_v25 = vld [vmem:[#allocation13_spill] sm:$0xff] }
 0x145   : > { %6707 = vmatmul.mubr.msk.bf16.gmra.mrb[20].mxu1 %vm1374_vm7, %v9241_v61  ;;  %v4604_v22 = vor.u32 %v4603_v39, %v8715_v28  ;;  %v8746_v7 = vrot.slane %v4607_v5, 5  ;;  %v6169_v18 = vrot.slane %v4981_v26, 9  ;;  %v5071_v24 = vrot.slane %v8409_v42, 5  ;;  %v4984_v27 = vld [vmem:[#allocation2 + $0x6c] sm:$0xe] }
 0x146   : > { %6710 = vmatprep.mubr.msk.bf16.mxu1 %vm1374_vm7, %v9242_v15  ;;  %v8749_v51 = vrot.slane %v4612_v17, 4  ;;  %v8751_v0 = vrot.slane %v4615_v45, 5  ;;  %v4621_v23 = vshll.u32 %v8735_v57, 16  ;;  %v5074_v40 = vrot.slane %v8455_v9, 5  ;;  %v8784_v39 = vld [vmem:[#allocation2 + $0xbc] sm:$0x1] }
 0x147   : > { %v8759_v48 = vsel %vm7770_vm11, %v6169_v18, %v5071_v24  ;;  %v5073_v1 = vrot.slane %v5071_v24, 4  ;;  %v6170_v43 = vrot.slane %v4982_v21, 9  ;;  %v5078_v42 = vrot.slane %v9244_v54, 5  ;;  %v2723_v21 = vld [vmem:[#allocation2 + $0x78] sm:$0xf] }
 0x148   : > { %v4625_v37 = vshrl.u32 %v8735_v57, 16  ;;  %v5081_v4 = vrot.slane %v9245_v25, 5  ;;  %v6171_v14 = vrot.slane %v4983_v12, 9  ;;  %v5085_v9 = vrot.slane %v8501_v3, 5  ;;  %v7216_v12 = vld [vmem:[#allocation2 + $0xc] sm:$0xff]  }
 0x149   : > { %6865 = vmatmul.mubr.msk.bf16.gmra.mrb[8].mxu0 %vm1374_vm7, %v8584_v60  ;;  %v9246_v60 = vcombine.low %v8493_v33, %v8518_v59  ;;  %v8770_v36 = vrot.slane %v4594_v56, 4  ;;  %v8774_v32 = vsel %vm7770_vm11, %v5073_v1, %v5074_v40  ;;  %v8778_v61 = vsel %vm7770_vm11, %v6170_v43, %v5078_v42 }
 0x14a   : > { %6868 = vmatprep.mubr.msk.bf16.mxu0 %vm1374_vm7, %v6139_v53  ;;  %v5080_v34 = vrot.slane %v5078_v42, 4  ;;  %v9247_v3 = vcombine.low %v8522_v13, %v8535_v16  ;;  %v6186_v33 = vcombine.low %v8759_v48, %v8774_v32  ;;  %v8790_v59 = vsel %vm7770_vm11, %v6171_v14, %v5085_v9  ;;  %v7230_v48 = vld [vmem:[#allocation2 + $0xb4] sm:$0xff]  }
 0x14b   : > { %v5087_v5 = vrot.slane %v5085_v9, 4  ;;  %v5088_v15 = vrot.slane %v8512_v38, 5  ;;  %v6172_v13 = vrot.slane %v4984_v27, 9  ;;  %v5092_v16 = vrot.slane %v8564_v62, 5  ;;  %v8813_v62 = vld [vmem:[#allocation2 + $0xc4] sm:$0xf] }
 0x14c   : > { %v8795_v53 = vsel %vm7770_vm11, %v5080_v34, %v5081_v4  ;;  %v5095_v17 = vrot.slane %v8580_v46, 5  ;;  %v4586_v45 = vsel %vm7416_vm8, %v8743_v50, %v8733_v20  ;;  %v8803_v26 = vrot.slane %v4604_v22, 4  ;;  %v4986_v9 = vld [vmem:[#allocation2 + $0x84] sm:$0xe] }
 0x14d   : > { %6711 = vmatmul.mubr.msk.bf16.gmra.mrb[24].mxu1 %vm1374_vm7, %v9246_v60  ;;  %v6187_v38 = vcombine.low %v8778_v61, %v8795_v53  ;;  %v8809_v56 = vsel %vm7770_vm11, %v5087_v5, %v5088_v15  ;;  %v8811_v18 = vrot.slane %v4621_v23, 5  ;;  %v8819_v24 = vsel %vm7770_vm11, %v6172_v13, %v5092_v16  ;;  %v4985_v23 = vld [vmem:[#allocation2 + $0x78] sm:$0xe]  ;;  %v9248_v60 = vld [vmem:[#allocation5_spill] sm:$0xff]  ;;  %v9254_v50 = vld [vmem:[#allocation16_spill] sm:$0xff] }
 0x14e   : > { %6714 = vmatprep.mubr.msk.bf16.mxu1 %vm1374_vm7, %v9247_v3  ;;  %v6188_v46 = vcombine.low %v8790_v59, %v8809_v56  ;;  %v5094_v22 = vrot.slane %v5092_v16, 4  ;;  %v4618_v40 = vor.u32 %v8751_v0, %v8749_v51  ;;  %v4627_v1 = vrot.slane %v4625_v37, 4  ;;  %v4296_v15 = vld [vmem:[#allocation2 + $0xcc] sm:$0xf] }
 0x14f   : > { %v4631_v43 = vshll.u32 %v8784_v39, 16  ;;  %v4636_v54 = vshrl.u32 %v4293_v41, 16  ;;  %v4600_v42 = vsel %vm7416_vm8, %v8770_v36, %v8715_v28  ;;  %v2961_v4 = vshrl.u32 %v2723_v21, 16  ;;  %v9249_v36 = vld [vmem:[#allocation6_spill] sm:$0xff] }
 0x150   : > { %v8831_v25 = vsel %vm7770_vm11, %v5094_v22, %v5095_v17  ;;  %v2964_v14 = vshll.u32 %v2723_v21, 16  ;;  %v4639_v51 = vshll.u32 %v4293_v41, 16  ;;  %v4645_v0 = vshll.u32 %v8813_v62, 16  ;;  %v8854_v41 = vld [vmem:[#allocation2 + $0xc8] sm:$0x1]  ;;  %v9251_v17 = vld [vmem:[#allocation15_spill] sm:$0xff] }
 0x151   : > { %6869 = vmatmul.mubr.msk.bf16.gmra.mrb[12].mxu0 %vm1374_vm7, %v6140_v58  ;;  %v4649_v37 = vshrl.u32 %v8813_v62, 16  ;;  %v6189_v58 = vcombine.low %v8819_v24, %v8831_v25  ;;  %v2963_v28 = vrot.slane %v2961_v4, 4  ;;  %v6173_v34 = vrot.slane %v4985_v23, 9  ;;  %v7283_v24 = vld [vmem:[#allocation2 + $0xac] sm:$0xf] }
 0x152   : > { %6872 = vmatprep.mubr.msk.bf16.mxu0 %vm1374_vm7, %v8729_v8  ;;  %v2966_v27 = vrot.slane %v2964_v14, 5  ;;  %v2983_v8 = vsel %vm7416_vm8, %v9249_v36, %v9248_v60  ;;  %v4610_v3 = vsel %vm7416_vm8, %v8803_v26, %v8746_v7  ;;  %v4638_v5 = vrot.slane %v4636_v54, 4  ;;  %v7217_v54 = vld [vmem:[#allocation2 + $0x18] sm:$0xff]   ;;  %v8864_v14 = vld [vmem:[#allocation2 + $0xd0] sm:$0xf]  ;;  %v9252_v36 = vld [vmem:[#allocation4_spill] sm:$0xff] }
 0x153   : > { %v5099_v10 = vrot.slane %v9250_v19, 5  ;;  %v6174_v16 = vrot.slane %v4986_v9, 9  ;;  %v5106_v21 = vrot.slane %v9251_v17, 5  ;;  %v5109_v22 = vrot.slane %v8629_v35, 5  ;;  %v9253_v17 = vld [vmem:[#allocation3_spill] sm:$0xff] }
 0x154   : > { %v2967_v13 = vor.u32 %v2966_v27, %v2963_v28  ;;  %v8858_v23 = vrot.slane %v4645_v0, 5  ;;  %v4651_v4 = vrot.slane %v4649_v37, 4  ;;  %v7218_v27 = vld [vmem:[#allocation2 + $0x24] sm:$0xff]   ;;  %v4628_v35 = vor.u32 %v4627_v1, %v8811_v18 }
 0x155   : > { %6715 = vmatmul.mubr.msk.bf16.gmra.mrb[28].mxu1 %vm1374_vm7, %v5967_v44  ;;  %v5102_v44 = vrot.slane %v8625_v63, 5  ;;  %v8862_v7 = vsel %vm7770_vm11, %v6173_v34, %v5099_v10  ;;  %v5101_v26 = vrot.slane %v5099_v10, 4  ;;  %v8868_v9 = vsel %vm7770_vm11, %v6174_v16, %v5106_v21 }
 0x156   : > { %6720 = vmatprep.mubr.msk.bf16.mxu1 %vm1374_vm7, %v7216_v12  ;;  %v4641_v12 = vrot.slane %v4639_v51, 5  ;;  %v2968_v63 = vrot.slane %v2967_v13, 4  ;;  %v5108_v28 = vrot.slane %v5106_v21, 4  ;;  %v4655_v51 = vshll.u32 %v8854_v41, 16 }
 0x157   : > { %v4660_v0 = vshrl.u32 %v4296_v15, 16  ;;  %v8874_v60 = vsel %vm7770_vm11, %v5101_v26, %v5102_v44  ;;  %v4663_v37 = vshll.u32 %v4296_v15, 16  ;;  %v4669_v10 = vshll.u32 %v8864_v14, 16  ;;  %v4987_v26 = vld [vmem:[#allocation2 + $0x90] sm:$0xe] }
 0x158   : > { %v2973_v34 = vsel %vm7416_vm8, %v2968_v63, %v9252_v36  ;;  %v6190_v19 = vcombine.low %v8862_v7, %v8874_v60  ;;  %v8885_v1 = vsel %vm7770_vm11, %v5108_v28, %v5109_v22  ;;  %v4673_v44 = vshrl.u32 %v8864_v14, 16  ;;  %v4988_v28 = vld [vmem:[#allocation2 + $0x9c] sm:$0xe] }
 0x159   : > { %6873 = vmatmul.mubr.msk.bf16.gmra.mrb[16].mxu0 %vm1374_vm7, %v8731_v6  ;;  %v8891_v6 = vcombine.low %v2973_v34, %v2983_v8  ;;  %v6191_v15 = vcombine.low %v8868_v9, %v8885_v1  ;;  %v4642_v13 = vor.u32 %v4641_v12, %v4638_v5  ;;  %v4652_v16 = vor.u32 %v4651_v4, %v8858_v23  ;;  %v7285_v9 = vld [vmem:[#allocation2 + $0xb0] sm:$0x1] }
 0x15a   : > { %6876 = vmatprep.mubr.msk.bf16.mxu0 %vm1374_vm7, %v8737_v30  ;;  %v4619_v21 = vrot.slane %v4618_v40, 4  ;;  %v4629_v30 = vrot.slane %v4628_v35, 4  ;;  %v4633_v22 = vrot.slane %v4631_v43, 5  ;;  %v6144_v8 = vcombine.low %v4576_v29, %v4586_v45  ;;  %v9255_v29 = vld [vmem:[#allocation18_spill] sm:$0xff] }
 0x15b   : > { %v6145_v5 = vcombine.low %v4600_v42, %v4610_v3  ;;  %v4657_v12 = vrot.slane %v4655_v51, 5  ;;  %v4662_v4 = vrot.slane %v4660_v0, 4  ;;  %v4665_v40 = vrot.slane %v4663_v37, 5  ;;  %v4977_v3 = vld [vmem:[#allocation2 + $0x18] sm:$0xe] }
 0x15c   : > { %v8911_v63 = vrot.slane %v4669_v10, 5  ;;  %v4675_v43 = vrot.slane %v4673_v44, 4  ;;  %v4643_v35 = vrot.slane %v4642_v13, 4  ;;  %v4653_v36 = vrot.slane %v4652_v16, 4  ;;  %v7272_v44 = vld [vmem:[#allocation2 + $0x1c] sm:$0xf] }
 0x15d   : > { %6721 = vmatmul.mubr.msk.bf16.vlgmr.msra.gmra.mrb[0].mxu1 %vm1374_vm7, %v7217_v54  ;;  %v8909_v54 = vld [vmem:[#allocation2 + $0xd4] sm:$0x1]  ;;  %v6175_v20 = vrot.slane %v4987_v26, 9  ;;  %v5113_v34 = vrot.slane %v9254_v50, 5  ;;  %v4624_v52 = vsel %vm7416_vm8, %v4619_v21, %v8811_v18  ;;  %v4634_v55 = vsel %vm7416_vm8, %v4629_v30, %v4633_v22  ;;  %v9256_v16 = vld [vmem:[#allocation17_spill] sm:$0xff] }
 0x15e   : > { %6923 = vmatpush3.bf16.msra.mxu1 %v9253_v17  ;;  %6724 = vmatprep.mubr.msk.bf16.mxu1 %vm1374_vm7, %v7218_v27  ;;  %v7219_v27 = vld [vmem:[#allocation2 + $0x30] sm:$0xff]   ;;  %v7220_v17 = vld [vmem:[#allocation2 + $0x3c] sm:$0xff]   ;;  %v5116_v45 = vrot.slane %v9255_v29, 5  ;;  %v4679_v42 = vshll.u32 %v8909_v54, 16  ;;  %v6176_v37 = vrot.slane %v4988_v28, 9  ;;  %v4666_v10 = vor.u32 %v4665_v40, %v4662_v4 }
 0x15f   : > { %v8924_v51 = vsel %vm7770_vm11, %v6175_v20, %v5113_v34  ;;  %v5115_v0 = vrot.slane %v5113_v34, 4  ;;  %v4676_v18 = vor.u32 %v4675_v43, %v8911_v63  ;;  %v5043_v13 = vrot.slane %v7272_v44, 5  ;;  %v9257_v28 = vld [vmem:[#allocation7_spill] sm:$0xff]  ;;  %v9258_v44 = vld [vmem:[#allocation8_spill] sm:$0xff] }
 0x160   : > { %v5120_v21 = vrot.slane %v9256_v16, 5  ;;  %v4648_v30 = vsel %vm7416_vm8, %v4643_v35, %v8858_v23  ;;  %v4658_v22 = vsel %vm7416_vm8, %v4653_v36, %v4657_v12  ;;  %v6165_v4 = vrot.slane %v4977_v3, 9 }
 0x161   : > { %6877 = vmatmul.mubr.msk.bf16.gmra.mrb[20].mxu0 %vm1374_vm7, %v6144_v8  ;;  %v8937_v26 = vsel %vm7770_vm11, %v5115_v0, %v5116_v45  ;;  %v5123_v8 = vrot.slane %v8676_v2, 5  ;;  %v4681_v43 = vrot.slane %v4679_v42, 5  ;;  %v6147_v35 = vcombine.low %v4648_v30, %v4658_v22  ;;  %v7221_v2 = vld [vmem:[#allocation2 + $0x48] sm:$0xff]   ;;  %v4978_v45 = vld [vmem:[#allocation2 + $0x24] sm:$0xe] }
 0x162   : > { %6880 = vmatprep.mubr.msk.bf16.mxu0 %vm1374_vm7, %v6145_v5  ;;  %v6146_v5 = vcombine.low %v4624_v52, %v4634_v55  ;;  %v6192_v40 = vcombine.low %v8924_v51, %v8937_v26  ;;  %v8946_v23 = vsel %vm7770_vm11, %v6176_v37, %v5120_v21  ;;  %v5122_v12 = vrot.slane %v5120_v21, 4  ;;  %v4989_v55 = vld [vmem:[#allocation2 + $0xa8] sm:$0xe]  ;;  %v7274_v22 = vld [vmem:[#allocation2 + $0x2c] sm:$0x1] }
 0x163   : > { %v4667_v36 = vrot.slane %v4666_v10, 4  ;;  %v4677_v20 = vrot.slane %v4676_v18, 4  ;;  %v5045_v50 = vrot.slane %v5043_v13, 4  ;;  %v5044_v29 = vsel %vm7770_vm11, %v6165_v4, %v5043_v13  ;;  %v7273_v37 = vld [vmem:[#allocation2 + $0x28] sm:$0xf] }
 0x164   : > { %v8950_v34 = vsel %vm7770_vm11, %v5122_v12, %v5123_v8  ;;  %v5050_v10 = vrot.slane %v7273_v37, 5  ;;  %v4990_v18 = vld [vmem:[#allocation2 + $0xb4] sm:$0xe]  ;;  %v5057_v13 = vrot.slane %v9258_v44, 5  ;;  %v6177_v16 = vrot.slane %v4989_v55, 9 }
 0x165   : > { %6725 = vmatmul.mubr.msk.bf16.gmra.mrb[4].mxu1 %vm1374_vm7, %v7219_v27  ;;  %v5046_v27 = vrot.slane %v9257_v28, 5  ;;  %v6193_v52 = vcombine.low %v8946_v23, %v8950_v34  ;;  %v4672_v42 = vsel %vm7416_vm8, %v4667_v36, %v8911_v63  ;;  %v4682_v3 = vsel %vm7416_vm8, %v4677_v20, %v4681_v43  ;;  %v7286_v26 = vld [vmem:[#allocation2 + $0xc4] sm:$0xf] }
 0x166   : > { %6728 = vmatprep.mubr.msk.bf16.mxu1 %vm1374_vm7, %v7220_v17  ;;  %v7222_v17 = vld [vmem:[#allocation2 + $0x54] sm:$0xff]   ;;  %v5127_v21 = vrot.slane %v8672_v47, 5  ;;  %v5130_v30 = vrot.slane %v8691_v11, 5  ;;  %v6166_v63 = vrot.slane %v4978_v45, 9  ;;  %v5053_v8 = vrot.slane %v7274_v22, 5  ;;  %v7223_v11 = vld [vmem:[#allocation2 + $0x60] sm:$0xff]  }
 0x167   : > { %v5047_v0 = vsel %vm7770_vm11, %v5045_v50, %v5046_v27  ;;  %v6148_v4 = vcombine.low %v4672_v42, %v4682_v3  ;;  %v6178_v27 = vrot.slane %v4990_v18, 9  ;;  %v5134_v36 = vrot.slane %v8735_v57, 5  ;;  %v7224_v45 = vld [vmem:[#allocation2 + $0x6c] sm:$0xff]   ;;  %v4991_v22 = vld [vmem:[#allocation2 + $0xc0] sm:$0xe] }
 0x168   : > { %v8972_v43 = vsel %vm7770_vm11, %v6177_v16, %v5127_v21  ;;  %v5129_v28 = vrot.slane %v5127_v21, 4  ;;  %v6182_v12 = vcombine.low %v5044_v29, %v5047_v0  ;;  %v5137_v47 = vrot.slane %v8784_v39, 5  ;;  %v9260_v42 = vld [vmem:[#allocation10_spill] sm:$0xff]  ;;  %v4980_v0 = vld [vmem:[#allocation2 + $0x3c] sm:$0xe] }
 0x169   : > { %6881 = vmatmul.mubr.msk.bf16.gmra.mrb[24].mxu0 %vm1374_vm7, %v6146_v5  ;;  %v4979_v5 = vld [vmem:[#allocation2 + $0x30] sm:$0xe]  ;;  %v5059_v50 = vrot.slane %v5057_v13, 4  ;;  %v5064_v3 = vrot.slane %v9260_v42, 5  ;;  %v8986_v57 = vsel %vm7770_vm11, %v6178_v27, %v5134_v36  ;;  %v5136_v39 = vrot.slane %v5134_v36, 4  ;;  %v7225_v36 = vld [vmem:[#allocation2 + $0x78] sm:$0xff]  }
 0x16a   : > { %6884 = vmatprep.mubr.msk.bf16.mxu0 %vm1374_vm7, %v6147_v35  ;;  %v5052_v35 = vrot.slane %v5050_v10, 4  ;;  %v6167_v20 = vrot.slane %v4979_v5, 9  ;;  %v8979_v55 = vsel %vm7770_vm11, %v5129_v28, %v5130_v30  ;;  %v5051_v37 = vsel %vm7770_vm11, %v6166_v63, %v5050_v10  ;;  %v2720_v28 = vld [vmem:[#allocation2 + $0x6c] sm:$0xf] }
 0x16b   : > { %v6194_v29 = vcombine.low %v8972_v43, %v8979_v55  ;;  %v8996_v44 = vsel %vm7770_vm11, %v5136_v39, %v5137_v47  ;;  %v6168_v10 = vrot.slane %v4980_v0, 9  ;;  %v5066_v63 = vrot.slane %v5064_v3, 4  ;;  %v7226_v47 = vld [vmem:[#allocation2 + $0x84] sm:$0xff]   ;;  %v7275_v39 = vld [vmem:[#allocation2 + $0x70] sm:$0xf] }
 0x16c   : > { %v5054_v18 = vsel %vm7770_vm11, %v5052_v35, %v5053_v8  ;;  %v5058_v16 = vsel %vm7770_vm11, %v6167_v20, %v5057_v13  ;;  %v6195_v30 = vcombine.low %v8986_v57, %v8996_v44  ;;  %v9261_v8 = vld [vmem:[#allocation11_spill] sm:$0xff]  ;;  %v5141_v35 = vrot.slane %v8813_v62, 5  ;;  %v4992_v13 = vld [vmem:[#allocation2 + $0xcc] sm:$0xe] }
 0x16d   : > { %6729 = vmatmul.mubr.msk.bf16.gmra.mrb[8].mxu1 %vm1374_vm7, %v7221_v2  ;;  %v9259_v2 = vld [vmem:[#allocation9_spill] sm:$0xff]  ;;  %v5067_v5 = vrot.slane %v9261_v8, 5  ;;  %v5144_v62 = vrot.slane %v8854_v41, 5  ;;  %v6180_v42 = vrot.slane %v4992_v13, 9  ;;  %v2946_v0 = vshll.u32 %v7275_v39, 16 }
 0x16e   : > { %6732 = vmatprep.mubr.msk.bf16.mxu1 %vm1374_vm7, %v7222_v17  ;;  %v5060_v17 = vrot.slane %v9259_v2, 5  ;;  %v5143_v2 = vrot.slane %v5141_v35, 4  ;;  %v3066_v25 = vshll.u32 %v7283_v24, 16  ;;  %v3076_v1 = vshll.u32 %v7285_v9, 16 }
 0x16f   : > { %v5068_v20 = vsel %vm7770_vm11, %v5066_v63, %v5067_v5 }
 0x170   : > { %v5061_v21 = vsel %vm7770_vm11, %v5059_v50, %v5060_v17  ;;  %v2937_v50 = vshrl.u32 %v2720_v28, 16  ;;  %v2940_v17 = vshll.u32 %v2720_v28, 16 }
 0x171   : > { %6885 = vmatmul.mubr.msk.bf16.gmra.mrb[28].mxu0 %vm1374_vm7, %v6148_v4  ;;  %v6183_v4 = vcombine.low %v5051_v37, %v5054_v18  ;;  %v6184_v27 = vcombine.low %v5058_v16, %v5061_v21  ;;  %v5148_v37 = vrot.slane %v8864_v14, 5  ;;  %v5151_v18 = vrot.slane %v8909_v54, 5 }
 0x172   : > { %6890 = vmatprep.mubr.msk.bf16.mxu0 %vm1374_vm7, %v6182_v12  ;;  %v6179_v12 = vrot.slane %v4991_v22, 9  ;;  %v9024_v16 = vsel %vm7770_vm11, %v5143_v2, %v5144_v62  ;;  %v2939_v14 = vrot.slane %v2937_v50, 4  ;;  %v2942_v63 = vrot.slane %v2940_v17, 5  ;;  %v2729_v62 = vld [vmem:[#allocation2 + $0x90] sm:$0xf] }
 0x173   : > { %v9031_v21 = vsel %vm7770_vm11, %v6180_v42, %v5148_v37  ;;  %v5150_v22 = vrot.slane %v5148_v37, 4  ;;  %v2948_v54 = vrot.slane %v2946_v0, 5  ;;  %v7229_v0 = vld [vmem:[#allocation2 + $0xa8] sm:$0xff]  }
 0x175   : > { %6733 = vmatmul.mubr.msk.bf16.gmra.mrb[12].mxu1 %vm1374_vm7, %v7223_v11  ;;  %v5065_v11 = vsel %vm7770_vm11, %v6168_v10, %v5064_v3  ;;  %v2950_v3 = vshrl.u32 %v7275_v39, 16  ;;  %v9035_v5 = vsel %vm7770_vm11, %v5150_v22, %v5151_v18  ;;  %v3009_v18 = vshrl.u32 %v2729_v62, 16 }
 0x176   : > { %6736 = vmatprep.mubr.msk.bf16.mxu1 %vm1374_vm7, %v7224_v45  ;;  %v9015_v45 = vsel %vm7770_vm11, %v6179_v12, %v5141_v35  ;;  %v6185_v10 = vcombine.low %v5065_v11, %v5068_v20  ;;  %v6197_v28 = vcombine.low %v9031_v21, %v9035_v5  ;;  %v2726_v12 = vld [vmem:[#allocation2 + $0x84] sm:$0xf]  ;;  %v2943_v35 = vor.u32 %v2942_v63, %v2939_v14  ;;  %v7277_v20 = vld [vmem:[#allocation2 + $0x88] sm:$0xf] }
 0x177   : > { %v6196_v41 = vcombine.low %v9015_v45, %v9024_v16  ;;  %v2952_v8 = vrot.slane %v2950_v3, 4  ;;  %v2985_v31 = vshrl.u32 %v2726_v12, 16  ;;  %v2988_v11 = vshll.u32 %v2726_v12, 16 }
 0x178   : > { %v2994_v50 = vshll.u32 %v7277_v20, 16  ;;  %v2998_v2 = vshrl.u32 %v7277_v20, 16  ;;  %v2944_v17 = vrot.slane %v2943_v35, 4  ;;  %v3012_v22 = vshll.u32 %v2729_v62, 16 }
 0x179   : > { %6891 = vmatmul.mubr.msk.bf16.vlgmr.msra.gmra.mrb[0].mxu0 %vm1374_vm7, %v6183_v4  ;;  %v7227_v4 = vld [vmem:[#allocation2 + $0x90] sm:$0xff]   ;;  %v2953_v13 = vor.u32 %v2952_v8, %v2948_v54  ;;  %v2987_v32 = vrot.slane %v2985_v31, 4  ;;  %v7278_v8 = vld [vmem:[#allocation2 + $0x8c] sm:$0x1] }
 0x17a   : > { %6894 = vmatprep.mubr.msk.bf16.mxu0 %vm1374_vm7, %v6184_v27  ;;  %v7228_v27 = vld [vmem:[#allocation2 + $0x9c] sm:$0xff]   ;;  %v9046_v3 = vrot.slane %v2994_v50, 5  ;;  %v3000_v37 = vrot.slane %v2998_v2, 4  ;;  %v2949_v14 = vsel %vm7416_vm8, %v2944_v17, %v2948_v54 }
 0x17b   : > { %v2954_v42 = vrot.slane %v2953_v13, 4 }
 0x17c   : > { %v3001_v56 = vor.u32 %v3000_v37, %v9046_v3 }
 0x17d   : > { %6737 = vmatmul.mubr.msk.bf16.gmra.mrb[16].mxu1 %vm1374_vm7, %v7225_v36  ;;  %v7276_v36 = vld [vmem:[#allocation2 + $0x74] sm:$0x1] }
 0x17e   : > { %6740 = vmatprep.mubr.msk.bf16.mxu1 %vm1374_vm7, %v7226_v47  ;;  %v2956_v47 = vshll.u32 %v7276_v36, 16  ;;  %v3014_v36 = vrot.slane %v3012_v22, 5 }
 0x180   : > { %v2958_v39 = vrot.slane %v2956_v47, 5  ;;  %v7231_v47 = vld [vmem:[#allocation2 + $0xc0] sm:$0xff]  }
 0x181   : > { %6895 = vmatmul.mubr.msk.bf16.gmra.mrb[4].mxu0 %vm1374_vm7, %v6185_v10  ;;  %v2732_v10 = vld [vmem:[#allocation2 + $0x9c] sm:$0xf] }
 0x182   : > { %6898 = vmatprep.mubr.msk.bf16.mxu0 %vm1374_vm7, %v6186_v33  ;;  %v2990_v33 = vrot.slane %v2988_v11, 5  ;;  %v2959_v63 = vsel %vm7416_vm8, %v2954_v42, %v2958_v39  ;;  %v3033_v61 = vshrl.u32 %v2732_v10, 16  ;;  %v3036_v53 = vshll.u32 %v2732_v10, 16  ;;  %v2735_v39 = vld [vmem:[#allocation2 + $0xa8] sm:$0xf] }
 0x183   : > { %v6026_v31 = vcombine.low %v2949_v14, %v2959_v63  ;;  %v3002_v10 = vrot.slane %v3001_v56, 4  ;;  %v3057_v14 = vshrl.u32 %v2735_v39, 16  ;;  %v3060_v63 = vshll.u32 %v2735_v39, 16  ;;  %v2741_v39 = vld [vmem:[#allocation2 + $0xc0] sm:$0xf] }
 0x184   : > { %v2991_v59 = vor.u32 %v2990_v33, %v2987_v32  ;;  %v3035_v2 = vrot.slane %v3033_v61, 4  ;;  %v3038_v17 = vrot.slane %v3036_v53, 5  ;;  %v7281_v32 = vld [vmem:[#allocation2 + $0x98] sm:$0x1]  ;;  %v3108_v51 = vshll.u32 %v2741_v39, 16 }
 0x185   : > { %6741 = vmatmul.mubr.msk.bf16.gmra.mrb[20].mxu1 %vm1374_vm7, %v7227_v4  ;;  %v3004_v4 = vshll.u32 %v7278_v8, 16  ;;  %v3028_v33 = vshll.u32 %v7281_v32, 16  ;;  %v2738_v8 = vld [vmem:[#allocation2 + $0xb4] sm:$0xf]  ;;  %v7284_v53 = vld [vmem:[#allocation2 + $0xb8] sm:$0xf] }
 0x186   : > { %6744 = vmatprep.mubr.msk.bf16.mxu1 %vm1374_vm7, %v7228_v27  ;;  %v7279_v27 = vld [vmem:[#allocation2 + $0x94] sm:$0xf]  ;;  %v3084_v61 = vshll.u32 %v2738_v8, 16  ;;  %v3059_v56 = vrot.slane %v3057_v14, 4  ;;  %v7287_v14 = vld [vmem:[#allocation2 + $0xbc] sm:$0x1] }
 0x187   : > { %v3018_v12 = vshll.u32 %v7279_v27, 16  ;;  %v3022_v35 = vshrl.u32 %v7279_v27, 16  ;;  %v3006_v11 = vrot.slane %v3004_v4, 5  ;;  %v3039_v4 = vor.u32 %v3038_v17, %v3035_v2 }
 0x189   : > { %6899 = vmatmul.mubr.msk.bf16.gmra.mrb[8].mxu0 %vm1374_vm7, %v6187_v38  ;;  %v7280_v38 = vld [vmem:[#allocation2 + $0xa0] sm:$0xf]  ;;  %v9063_v20 = vrot.slane %v3018_v12, 5  ;;  %v3024_v50 = vrot.slane %v3022_v35, 4  ;;  %v3007_v60 = vsel %vm7416_vm8, %v3002_v10, %v3006_v11  ;;  %v3030_v12 = vrot.slane %v3028_v33, 5 }
 0x18a   : > { %6902 = vmatprep.mubr.msk.bf16.mxu0 %vm1374_vm7, %v6188_v46  ;;  %v3042_v13 = vshll.u32 %v7280_v38, 16  ;;  %v3046_v54 = vshrl.u32 %v7280_v38, 16  ;;  %v3011_v46 = vrot.slane %v3009_v18, 4  ;;  %v7282_v18 = vld [vmem:[#allocation2 + $0xa4] sm:$0x1]  ;;  %v3081_v35 = vshrl.u32 %v2738_v8, 16 }
 0x18b   : > { %v3025_v37 = vor.u32 %v3024_v50, %v9063_v20  ;;  %v3052_v22 = vshll.u32 %v7282_v18, 16  ;;  %v3090_v38 = vshll.u32 %v7284_v53, 16  ;;  %v3086_v11 = vrot.slane %v3084_v61, 5  ;;  %v7288_v61 = vld [vmem:[#allocation2 + $0xc8] sm:$0x1] }
 0x18c   : > { %v9065_v62 = vrot.slane %v3042_v13, 5  ;;  %v3048_v42 = vrot.slane %v3046_v54, 4  ;;  %v3094_v13 = vshrl.u32 %v7284_v53, 16  ;;  %v3105_v33 = vshrl.u32 %v2741_v39, 16 }
 0x18d   : > { %6745 = vmatmul.mubr.msk.bf16.gmra.mrb[24].mxu1 %vm1374_vm7, %v7229_v0  ;;  %v2992_v0 = vrot.slane %v2991_v59, 4  ;;  %v3026_v54 = vrot.slane %v3025_v37, 4  ;;  %v3054_v59 = vrot.slane %v3052_v22, 5  ;;  %v3092_v17 = vrot.slane %v3090_v38, 5 }
 0x18e   : > { %6748 = vmatprep.mubr.msk.bf16.mxu1 %vm1374_vm7, %v7230_v48  ;;  %v3015_v48 = vor.u32 %v3014_v36, %v3011_v46  ;;  %v3049_v27 = vor.u32 %v3048_v42, %v9065_v62  ;;  %v3062_v46 = vrot.slane %v3060_v63, 5  ;;  %v3040_v36 = vrot.slane %v3039_v4, 4 }
 0x18f   : > { %v2997_v7 = vsel %vm7416_vm8, %v2992_v0, %v9046_v3  ;;  %v3083_v3 = vrot.slane %v3081_v35, 4  ;;  %v3096_v42 = vrot.slane %v3094_v13, 4  ;;  %v3031_v10 = vsel %vm7416_vm8, %v3026_v54, %v3030_v12 }
 0x190   : > { %v6028_v2 = vcombine.low %v2997_v7, %v3007_v60  ;;  %v3118_v37 = vshrl.u32 %v7286_v26, 16  ;;  %v3124_v53 = vshll.u32 %v7288_v61, 16 }
 0x191   : > { %6903 = vmatmul.mubr.msk.bf16.gmra.mrb[12].mxu0 %vm1374_vm7, %v6189_v58  ;;  %v3070_v58 = vshrl.u32 %v7283_v24, 16  ;;  %v3087_v18 = vor.u32 %v3086_v11, %v3083_v3  ;;  %v3097_v22 = vor.u32 %v3096_v42, %v3092_v17  ;;  %v3107_v24 = vrot.slane %v3105_v33, 4 }
 0x192   : > { %6906 = vmatprep.mubr.msk.bf16.mxu0 %vm1374_vm7, %v6190_v19  ;;  %v3016_v19 = vrot.slane %v3015_v48, 4  ;;  %v3063_v48 = vor.u32 %v3062_v46, %v3059_v56  ;;  %v3120_v7 = vrot.slane %v3118_v37, 4 }
 0x193   : > { %v3072_v50 = vrot.slane %v3070_v58, 4  ;;  %v3088_v60 = vrot.slane %v3087_v18, 4 }
 0x194   : > { %v3021_v0 = vsel %vm7416_vm8, %v3016_v19, %v9063_v20  ;;  %v3064_v4 = vrot.slane %v3063_v48, 4  ;;  %v3098_v19 = vrot.slane %v3097_v22, 4 }
 0x195   : > { %6749 = vmatmul.mubr.msk.bf16.gmra.mrb[28].mxu1 %vm1374_vm7, %v7231_v47  ;;  %v3050_v47 = vrot.slane %v3049_v27, 4  ;;  %v6029_v63 = vcombine.low %v3021_v0, %v3031_v10  ;;  %v3078_v27 = vrot.slane %v3076_v1, 5  ;;  %v3093_v38 = vsel %vm7416_vm8, %v3088_v60, %v3092_v17 }
 0x196   : > { %6770 = vmatprep.mubr.msk.bf16.mxu1 %vm1374_vm7, %v6026_v31  ;;  %v3068_v31 = vrot.slane %v3066_v25, 5  ;;  %v3110_v25 = vrot.slane %v3108_v51, 5 }
 0x197   : > { %v3055_v20 = vsel %vm7416_vm8, %v3050_v47, %v3054_v59  ;;  %v3126_v59 = vrot.slane %v3124_v53, 5 }
 0x198   : > { %v3073_v32 = vor.u32 %v3072_v50, %v3068_v31  ;;  %v3069_v35 = vsel %vm7416_vm8, %v3064_v4, %v3068_v31  ;;  %v3111_v34 = vor.u32 %v3110_v25, %v3107_v24 }
 0x199   : > { %6907 = vmatmul.mubr.msk.bf16.gmra.mrb[16].mxu0 %vm1374_vm7, %v6191_v15  ;;  %v3045_v15 = vsel %vm7416_vm8, %v3040_v36, %v9065_v62 }
 0x19a   : > { %6910 = vmatprep.mubr.msk.bf16.mxu0 %vm1374_vm7, %v6192_v40  ;;  %v3114_v40 = vshll.u32 %v7286_v26, 16  ;;  %v6030_v8 = vcombine.low %v3045_v15, %v3055_v20  ;;  %v3074_v62 = vrot.slane %v3073_v32, 4  ;;  %v3112_v13 = vrot.slane %v3111_v34, 4 }
 0x19c   : > { %v3116_v58 = vrot.slane %v3114_v40, 5  ;;  %v3079_v23 = vsel %vm7416_vm8, %v3074_v62, %v3078_v27 }
 0x19d   : > { %6771 = vmatmul.mubr.msk.bf16.vlgmr.msra.gmra.mrb[16].mxu1 %vm1374_vm7, %v8891_v6  ;;  %v3100_v6 = vshll.u32 %v7287_v14, 16  ;;  %v6031_v55 = vcombine.low %v3069_v35, %v3079_v23 }
 0x19e   : > { %6774 = vmatprep.mubr.msk.bf16.mxu1 %vm1374_vm7, %v6028_v2  ;;  %v3117_v56 = vsel %vm7416_vm8, %v3112_v13, %v3116_v58 }
 0x19f   : > { %v3102_v12 = vrot.slane %v3100_v6, 5 }
 0x1a1   : > { %6911 = vmatmul.mubr.msk.bf16.gmra.mrb[20].mxu0 %vm1374_vm7, %v6193_v52  ;;  %v3121_v52 = vor.u32 %v3120_v7, %v3116_v58  ;;  %v3103_v43 = vsel %vm7416_vm8, %v3098_v19, %v3102_v12 }
 0x1a2   : > { %6914 = vmatprep.mubr.msk.bf16.mxu0 %vm1374_vm7, %v6194_v29  ;;  %v6032_v29 = vcombine.low %v3093_v38, %v3103_v43 }
 0x1a3   : > { %v3122_v54 = vrot.slane %v3121_v52, 4 }
 0x1a5   : > { %6775 = vmatmul.mubr.msk.bf16.gmra.mrb[20].mxu1 %vm1374_vm7, %v6029_v63  ;;  %v3127_v46 = vsel %vm7416_vm8, %v3122_v54, %v3126_v59 }
 0x1a6   : > { %6778 = vmatprep.mubr.msk.bf16.mxu1 %vm1374_vm7, %v6030_v8  ;;  %v6033_v36 = vcombine.low %v3117_v56, %v3127_v46 }
 0x1a9   : > { %6915 = vmatmul.mubr.msk.bf16.gmra.mrb[24].mxu0 %vm1374_vm7, %v6195_v30 }
 0x1aa   : > { %6918 = vmatprep.mubr.msk.bf16.mxu0 %vm1374_vm7, %v6196_v41 }
 0x1ad   : > { %6779 = vmatmul.mubr.msk.bf16.gmra.mrb[24].mxu1 %vm1374_vm7, %v6031_v55 }
 0x1ae   : > { %6782 = vmatprep.mubr.msk.bf16.mxu1 %vm1374_vm7, %v6032_v29 }
 0x1b1   : > { %6919 = vmatmul.mubr.msk.bf16.gmra.mrb[28].mxu0 %vm1374_vm7, %v6197_v28 }
 0x1b5   : > { %6783 = vmatmul.mubr.msk.bf16.gmra.mrb[28].mxu1 %vm1374_vm7, %v6033_v36 }
 0x230   : > { %v6722_v57 = vpop.f32.mrb[0].mxu1 }
 0x231   : > { %v2537_v44 = vpop.f32.mrb[1].mxu1 }
 0x232   : > { %v6723_v30 = vpop.f32.mrb[2].mxu1 }
 0x233   : > { %v2540_v45 = vpop.f32.mrb[3].mxu1 }
 0x238   : > { %v6726_v16 = vpop.f32.mrb[4].mxu1 }
 0x239   : > { %v2553_v41 = vpop.f32.mrb[5].mxu1 }
 0x23a   : > { %v6727_v47 = vpop.f32.mrb[6].mxu1 }
 0x23b   : > { %v2556_v31 = vpop.f32.mrb[7].mxu1 }
 0x240   : > { %v6730_v50 = vpop.f32.mrb[8].mxu1 }
 0x241   : > { %v2569_v49 = vpop.f32.mrb[9].mxu1 }
 0x242   : > { %v6731_v2 = vpop.f32.mrb[10].mxu1 }
 0x243   : > { %v9142_v3 = vpop.f32.mrb[11].mxu1 }
 0x248   : > { %v9145_v21 = vpop.f32.mrb[12].mxu1 }
 0x249   : > { %v9147_v5 = vpop.f32.mrb[13].mxu1 }
 0x24a   : > { %v9149_v28 = vpop.f32.mrb[14].mxu1 }
 0x24b   : > { %v9151_v11 = vpop.f32.mrb[15].mxu1 }
 0x24c   : > { %v6892_v17 = vpop.f32.mrb[0].mxu0 }
 0x24d   : > { %v6924_v42 = vadd.f32 %v6892_v17, %v6722_v57  ;;  %v5288_v39 = vpop.f32.mrb[1].mxu0 }
 0x24e   : > { %v6925_v0 = vadd.f32 %v5288_v39, %v2537_v44  ;;  %v6893_v10 = vpop.f32.mrb[2].mxu0 }
 0x24f   : > { %v6926_v9 = vadd.f32 %v6893_v10, %v6723_v30  ;;  %v5291_v1 = vpop.f32.mrb[3].mxu0  ;;  %v5646_v26 = vmul.f32 %v6924_v42, %v6924_v42 }
 0x250   : > { %v6927_v15 = vadd.f32 %v5291_v1, %v2540_v45  ;;  %v5644_v48 = vmul.f32 %v6925_v0, %v6925_v0 }
 0x251   : > { %v6368_v20 = vpack.c.bf16 %v6926_v9, %v6924_v42  ;;  %v5647_v6 = vmul.f32 %v6926_v9, %v6926_v9 }
 0x252   : > { %v6363_v32 = vpack.c.bf16 %v6927_v15, %v6925_v0  ;;  %v5607_v33 = vadd.f32 %v6927_v15, %v6925_v0  ;;  %v5645_v51 = vmul.f32 %v6927_v15, %v6927_v15 }
 0x253   : > { %6448 = vst [vmem:[%s9156_s11 + $0x8] sm:$0xff] %v6368_v20  }
 0x254   : > { %6364 = vst [vmem:[%s9156_s11] sm:$0xff] %v6363_v32   ;;  %v5608_v40 = vadd.f32 %v6924_v42, %v5607_v33  ;;  %v5676_v37 = vadd.f32 %v5645_v51, %v5644_v48  ;;  %v6896_v18 = vpop.f32.mrb[4].mxu0 }
 0x255   : > { %v6928_v22 = vadd.f32 %v6896_v18, %v6726_v16  ;;  %v5304_v14 = vpop.f32.mrb[5].mxu0 }
 0x256   : > { %v5677_v63 = vadd.f32 %v5676_v37, %v5646_v26  ;;  %v6929_v8 = vadd.f32 %v5304_v14, %v2553_v41  ;;  %v5609_v4 = vadd.f32 %v6926_v9, %v5608_v40  ;;  %v6897_v62 = vpop.f32.mrb[6].mxu0 }
 0x257   : > { %v6930_v27 = vadd.f32 %v6897_v62, %v6727_v47  ;;  %v5307_v24 = vpop.f32.mrb[7].mxu0  ;;  %v5650_v52 = vmul.f32 %v6928_v22, %v6928_v22 }
 0x258   : > { %v5610_v25 = vadd.f32 %v6929_v8, %v5609_v4  ;;  %v5648_v58 = vmul.f32 %v6929_v8, %v6929_v8  ;;  %v5678_v7 = vadd.f32 %v5677_v63, %v5647_v6  ;;  %v6931_v60 = vadd.f32 %v5307_v24, %v2556_v31 }
 0x259   : > { %v6378_v19 = vpack.c.bf16 %v6930_v27, %v6928_v22  ;;  %v5651_v29 = vmul.f32 %v6930_v27, %v6930_v27 }
 0x25a   : > { %v5679_v12 = vadd.f32 %v5678_v7, %v5648_v58  ;;  %v6373_v35 = vpack.c.bf16 %v6931_v60, %v6929_v8  ;;  %v5611_v23 = vadd.f32 %v6931_v60, %v5610_v25  ;;  %v5649_v34 = vmul.f32 %v6931_v60, %v6931_v60 }
 0x25b   : > { %6450 = vst [vmem:[%s9156_s11 + $0x18] sm:$0xff] %v6378_v19  }
 0x25c   : > { %6449 = vst [vmem:[%s9156_s11 + $0x10] sm:$0xff] %v6373_v35   ;;  %v5612_v61 = vadd.f32 %v6928_v22, %v5611_v23  ;;  %v5680_v53 = vadd.f32 %v5679_v12, %v5649_v34  ;;  %v6900_v38 = vpop.f32.mrb[8].mxu0 }
 0x25d   : > { %v6932_v43 = vadd.f32 %v6900_v38, %v6730_v50  ;;  %v5320_v55 = vpop.f32.mrb[9].mxu0 }
 0x25e   : > { %v5681_v13 = vadd.f32 %v5680_v53, %v5650_v52  ;;  %v6933_v54 = vadd.f32 %v5320_v55, %v2569_v49  ;;  %v5613_v59 = vadd.f32 %v6930_v27, %v5612_v61  ;;  %v6901_v56 = vpop.f32.mrb[10].mxu0 }
 0x25f   : > { %v6934_v46 = vadd.f32 %v6901_v56, %v6731_v2  ;;  %v5323_v36 = vpop.f32.mrb[11].mxu0  ;;  %v5654_v17 = vmul.f32 %v6932_v43, %v6932_v43 }
 0x260   : > { %v5614_v57 = vadd.f32 %v6933_v54, %v5613_v59  ;;  %v5652_v44 = vmul.f32 %v6933_v54, %v6933_v54  ;;  %v5682_v30 = vadd.f32 %v5681_v13, %v5651_v29  ;;  %v6935_v45 = vadd.f32 %v5323_v36, %v9142_v3 }
 0x261   : > { %v6388_v16 = vpack.c.bf16 %v6934_v46, %v6932_v43  ;;  %v5655_v10 = vmul.f32 %v6934_v46, %v6934_v46 }
 0x262   : > { %v5683_v41 = vadd.f32 %v5682_v30, %v5652_v44  ;;  %v6383_v47 = vpack.c.bf16 %v6935_v45, %v6933_v54  ;;  %v5615_v31 = vadd.f32 %v6935_v45, %v5614_v57  ;;  %v5653_v50 = vmul.f32 %v6935_v45, %v6935_v45 }
 0x263   : > { %6452 = vst [vmem:[%s9156_s11 + $0x28] sm:$0xff] %v6388_v16  }
 0x264   : > { %6451 = vst [vmem:[%s9156_s11 + $0x20] sm:$0xff] %v6383_v47   ;;  %v5616_v42 = vadd.f32 %v6932_v43, %v5615_v31  ;;  %v5684_v49 = vadd.f32 %v5683_v41, %v5653_v50  ;;  %v6904_v39 = vpop.f32.mrb[12].mxu0 }
 0x265   : > { %v6936_v0 = vadd.f32 %v6904_v39, %v9145_v21  ;;  %v5336_v2 = vpop.f32.mrb[13].mxu0 }
 0x266   : > { %v5685_v9 = vadd.f32 %v5684_v49, %v5654_v17  ;;  %v6937_v1 = vadd.f32 %v5336_v2, %v9147_v5  ;;  %v5617_v3 = vadd.f32 %v6934_v46, %v5616_v42  ;;  %v6905_v15 = vpop.f32.mrb[14].mxu0 }
 0x267   : > { %v6938_v20 = vadd.f32 %v6905_v15, %v9149_v28  ;;  %v5339_v48 = vpop.f32.mrb[15].mxu0  ;;  %v5658_v14 = vmul.f32 %v6936_v0, %v6936_v0 }
 0x268   : > { %v5618_v32 = vadd.f32 %v6937_v1, %v5617_v3  ;;  %v5656_v33 = vmul.f32 %v6937_v1, %v6937_v1  ;;  %v5686_v51 = vadd.f32 %v5685_v9, %v5655_v10  ;;  %v6939_v26 = vadd.f32 %v5339_v48, %v9151_v11 }
 0x269   : > { %v6398_v40 = vpack.c.bf16 %v6938_v20, %v6936_v0  ;;  %v5659_v4 = vmul.f32 %v6938_v20, %v6938_v20 }
 0x26a   : > { %v5687_v37 = vadd.f32 %v5686_v51, %v5656_v33  ;;  %v6393_v21 = vpack.c.bf16 %v6939_v26, %v6937_v1  ;;  %v5619_v18 = vadd.f32 %v6939_v26, %v5618_v32  ;;  %v5657_v22 = vmul.f32 %v6939_v26, %v6939_v26 }
 0x26b   : > { %6454 = vst [vmem:[%s9156_s11 + $0x38] sm:$0xff] %v6398_v40  }
 0x26c   : > { %6453 = vst [vmem:[%s9156_s11 + $0x30] sm:$0xff] %v6393_v21   ;;  %v5620_v5 = vadd.f32 %v6936_v0, %v5619_v18  ;;  %v5688_v6 = vadd.f32 %v5687_v37, %v5657_v22  ;;  %v6908_v63 = vpop.f32.mrb[16].mxu0 }
 0x26d   : > { %v5352_v8 = vpop.f32.mrb[17].mxu0 }
 0x26e   : > { %v5689_v28 = vadd.f32 %v5688_v6, %v5658_v14  ;;  %v5621_v27 = vadd.f32 %v6938_v20, %v5620_v5  ;;  %v6909_v24 = vpop.f32.mrb[18].mxu0 }
 0x26f   : > { %v5355_v11 = vpop.f32.mrb[19].mxu0 }
 0x270   : > { %v6772_v62 = vpop.f32.mrb[16].mxu1  ;;  %v5690_v19 = vadd.f32 %v5689_v28, %v5659_v4 }
 0x271   : > { %v3327_v25 = vpop.f32.mrb[17].mxu1  ;;  %v6940_v58 = vadd.f32 %v6908_v63, %v6772_v62 }
 0x272   : > { %v6773_v7 = vpop.f32.mrb[18].mxu1  ;;  %v6941_v60 = vadd.f32 %v5352_v8, %v3327_v25 }
 0x273   : > { %v3330_v12 = vpop.f32.mrb[19].mxu1  ;;  %v6942_v35 = vadd.f32 %v6909_v24, %v6773_v7  ;;  %v5662_v54 = vmul.f32 %v6940_v58, %v6940_v58 }
 0x274   : > { %v5622_v23 = vadd.f32 %v6941_v60, %v5621_v27  ;;  %v5660_v34 = vmul.f32 %v6941_v60, %v6941_v60  ;;  %v6943_v52 = vadd.f32 %v5355_v11, %v3330_v12  ;;  %v6912_v29 = vpop.f32.mrb[20].mxu0 }
 0x275   : > { %v6408_v61 = vpack.c.bf16 %v6942_v35, %v6940_v58  ;;  %v5368_v13 = vpop.f32.mrb[21].mxu0  ;;  %v5663_v45 = vmul.f32 %v6942_v35, %v6942_v35 }
 0x276   : > { %v5691_v53 = vadd.f32 %v5690_v19, %v5660_v34  ;;  %v6403_v38 = vpack.c.bf16 %v6943_v52, %v6941_v60  ;;  %v5623_v43 = vadd.f32 %v6943_v52, %v5622_v23  ;;  %v5661_v55 = vmul.f32 %v6943_v52, %v6943_v52  ;;  %v6913_v36 = vpop.f32.mrb[22].mxu0 }
 0x277   : > { %6456 = vst [vmem:[%s9156_s11 + $0x48] sm:$0xff] %v6408_v61   ;;  %v5371_v30 = vpop.f32.mrb[23].mxu0 }
 0x278   : > { %6455 = vst [vmem:[%s9156_s11 + $0x40] sm:$0xff] %v6403_v38   ;;  %v5624_v59 = vadd.f32 %v6940_v58, %v5623_v43  ;;  %v5692_v56 = vadd.f32 %v5691_v53, %v5661_v55  ;;  %v6776_v46 = vpop.f32.mrb[20].mxu1 }
 0x279   : > { %v3343_v57 = vpop.f32.mrb[21].mxu1  ;;  %v6944_v44 = vadd.f32 %v6912_v29, %v6776_v46 }
 0x27a   : > { %v5693_v16 = vadd.f32 %v5692_v56, %v5662_v54  ;;  %v6777_v41 = vpop.f32.mrb[22].mxu1  ;;  %v6945_v47 = vadd.f32 %v5368_v13, %v3343_v57  ;;  %v5625_v31 = vadd.f32 %v6942_v35, %v5624_v59 }
 0x27b   : > { %v3346_v50 = vpop.f32.mrb[23].mxu1  ;;  %v6946_v17 = vadd.f32 %v6913_v36, %v6777_v41  ;;  %v5666_v48 = vmul.f32 %v6944_v44, %v6944_v44 }
 0x27c   : > { %v5626_v42 = vadd.f32 %v6945_v47, %v5625_v31  ;;  %v5664_v49 = vmul.f32 %v6945_v47, %v6945_v47  ;;  %v5694_v39 = vadd.f32 %v5693_v16, %v5663_v45  ;;  %v6947_v0 = vadd.f32 %v5371_v30, %v3346_v50  ;;  %v6916_v15 = vpop.f32.mrb[24].mxu0 }
 0x27d   : > { %v6418_v2 = vpack.c.bf16 %v6946_v17, %v6944_v44  ;;  %v5384_v20 = vpop.f32.mrb[25].mxu0  ;;  %v5667_v18 = vmul.f32 %v6946_v17, %v6946_v17 }
 0x27e   : > { %v5695_v10 = vadd.f32 %v5694_v39, %v5664_v49  ;;  %v6413_v9 = vpack.c.bf16 %v6947_v0, %v6945_v47  ;;  %v5627_v1 = vadd.f32 %v6947_v0, %v5626_v42  ;;  %v5665_v3 = vmul.f32 %v6947_v0, %v6947_v0  ;;  %v6917_v26 = vpop.f32.mrb[26].mxu0 }
 0x27f   : > { %6458 = vst [vmem:[%s9156_s11 + $0x58] sm:$0xff] %v6418_v2   ;;  %v5387_v21 = vpop.f32.mrb[27].mxu0 }
 0x280   : > { %6457 = vst [vmem:[%s9156_s11 + $0x50] sm:$0xff] %v6413_v9   ;;  %v5628_v32 = vadd.f32 %v6944_v44, %v5627_v1  ;;  %v5696_v33 = vadd.f32 %v5695_v10, %v5665_v3  ;;  %v6780_v51 = vpop.f32.mrb[24].mxu1 }
 0x281   : > { %v3359_v40 = vpop.f32.mrb[25].mxu1  ;;  %v6948_v37 = vadd.f32 %v6916_v15, %v6780_v51 }
 0x282   : > { %v5697_v22 = vadd.f32 %v5696_v33, %v5666_v48  ;;  %v6781_v14 = vpop.f32.mrb[26].mxu1  ;;  %v6949_v5 = vadd.f32 %v5384_v20, %v3359_v40  ;;  %v5629_v6 = vadd.f32 %v6946_v17, %v5628_v32 }
 0x283   : > { %v3362_v63 = vpop.f32.mrb[27].mxu1  ;;  %v6950_v8 = vadd.f32 %v6917_v26, %v6781_v14  ;;  %v5670_v12 = vmul.f32 %v6948_v37, %v6948_v37 }
 0x284   : > { %v5630_v4 = vadd.f32 %v6949_v5, %v5629_v6  ;;  %v5668_v28 = vmul.f32 %v6949_v5, %v6949_v5  ;;  %v5698_v62 = vadd.f32 %v5697_v22, %v5667_v18  ;;  %v6951_v27 = vadd.f32 %v5387_v21, %v3362_v63  ;;  %v6920_v60 = vpop.f32.mrb[28].mxu0 }
 0x285   : > { %v6428_v24 = vpack.c.bf16 %v6950_v8, %v6948_v37  ;;  %v5400_v19 = vpop.f32.mrb[29].mxu0  ;;  %v5671_v43 = vmul.f32 %v6950_v8, %v6950_v8 }
 0x286   : > { %v5699_v25 = vadd.f32 %v5698_v62, %v5668_v28  ;;  %v6423_v58 = vpack.c.bf16 %v6951_v27, %v6949_v5  ;;  %v5631_v11 = vadd.f32 %v6951_v27, %v5630_v4  ;;  %v5669_v7 = vmul.f32 %v6951_v27, %v6951_v27  ;;  %v6921_v52 = vpop.f32.mrb[30].mxu0 }
 0x287   : > { %6460 = vst [vmem:[%s9156_s11 + $0x68] sm:$0xff] %v6428_v24   ;;  %v5403_v38 = vpop.f32.mrb[31].mxu0 }
 0x288   : > { %6459 = vst [vmem:[%s9156_s11 + $0x60] sm:$0xff] %v6423_v58   ;;  %v5632_v35 = vadd.f32 %v6948_v37, %v5631_v11  ;;  %v5700_v23 = vadd.f32 %v5699_v25, %v5669_v7  ;;  %v6784_v34 = vpop.f32.mrb[28].mxu1 }
 0x289   : > { %v3375_v61 = vpop.f32.mrb[29].mxu1  ;;  %v6952_v53 = vadd.f32 %v6920_v60, %v6784_v34 }
 0x28a   : > { %v5701_v55 = vadd.f32 %v5700_v23, %v5670_v12  ;;  %v6785_v29 = vpop.f32.mrb[30].mxu1  ;;  %v6953_v13 = vadd.f32 %v5400_v19, %v3375_v61  ;;  %v5633_v54 = vadd.f32 %v6950_v8, %v5632_v35 }
 0x28b   : > { %v3378_v59 = vpop.f32.mrb[31].mxu1  ;;  %v6954_v56 = vadd.f32 %v6921_v52, %v6785_v29  ;;  %v5674_v31 = vmul.f32 %v6952_v53, %v6952_v53 }
 0x28c   : > { %v5634_v46 = vadd.f32 %v6953_v13, %v5633_v54  ;;  %v5672_v36 = vmul.f32 %v6953_v13, %v6953_v13  ;;  %v5702_v57 = vadd.f32 %v5701_v55, %v5671_v43  ;;  %v6955_v44 = vadd.f32 %v5403_v38, %v3378_v59 }
 0x28d   : > { %v6438_v30 = vpack.c.bf16 %v6954_v56, %v6952_v53  ;;  %v5675_v42 = vmul.f32 %v6954_v56, %v6954_v56 }
 0x28e   : > { %v5703_v45 = vadd.f32 %v5702_v57, %v5672_v36  ;;  %v6433_v16 = vpack.c.bf16 %v6955_v44, %v6953_v13  ;;  %v5635_v41 = vadd.f32 %v6955_v44, %v5634_v46  ;;  %v5673_v47 = vmul.f32 %v6955_v44, %v6955_v44 }
 0x28f   : > { %6462 = vst [vmem:[%s9156_s11 + $0x78] sm:$0xff] %v6438_v30  }
 0x290   : > { %6461 = vst [vmem:[%s9156_s11 + $0x70] sm:$0xff] %v6433_v16   ;;  %v5636_v50 = vadd.f32 %v6952_v53, %v5635_v41  ;;  %v5704_v17 = vadd.f32 %v5703_v45, %v5673_v47 }
 0x292   : > { %v5637_v49 = vadd.f32 %v6954_v56, %v5636_v50  ;;  %v5705_v39 = vadd.f32 %v5704_v17, %v5674_v31 }
 0x294   : > { %v5638_v0 = vrot.slane %v5637_v49, 4  ;;  %v5706_v2 = vadd.f32 %v5705_v39, %v5675_v42 }
 0x296   : > { %v5639_v10 = vadd.f32 %v5638_v0, %v5637_v49  ;;  %v5707_v9 = vrot.slane %v5706_v2, 4 }
 0x298   : > { %v5640_v1 = vrot.slane %v5639_v10, 2  ;;  %v5708_v3 = vadd.f32 %v5707_v9, %v5706_v2 }
 0x29a   : > { %v5641_v15 = vadd.f32 %v5640_v1, %v5639_v10  ;;  %v5709_v20 = vrot.slane %v5708_v3, 2 }
 0x29c   : > { %v5642_v48 = vrot.slane %v5641_v15, 1  ;;  %v5710_v32 = vadd.f32 %v5709_v20, %v5708_v3 }
 0x29e   : > { %v5711_v33 = vrot.slane %v5710_v32, 1  ;;  %v5643_v51 = vadd.f32 %v5642_v48, %v5641_v15 }
 0x2a0   : > { %v5712_v26 = vadd.f32 %v5711_v33, %v5710_v32 }
 0x2a2   : > { %v5714_v40 = vsel %vm5713_vm12, %v5643_v51, %v5712_v26 }
 0x2a3   : > { %v5716_v37 = vsel %vm5715_vm13, %v5714_v40, 0.0 }
 0x2a4   : > { %5717 = vst [vmem:[%s236_s15] sm:$0xff] %v5716_v37 }
 0x2a5 PF: > { %s16_s18 = sadd.s32 1, %s7295_s18  }
 0x2a6   : > { %p13_p5 = scmp.ge.s32.totalorder %s16_s18, 4  }
 0x2a8   :  { %15 = sbr.rel (!%p13_p5) target bundleno = 1 (0x1), region = 88 }

</bundles_post_ra>
